<compile_context>
chip_gen: v7x
topology: tpu7x:2x2x1
jax: 0.10.0
libtpu: 0.0.40
codegen_flags: <defaults>
</compile_context>

<pallas_src>
import jax
import jax.numpy as jnp
from jax.experimental import pallas as pl
from jax.experimental.pallas import tpu as pltpu

EPS = 1e-5
LANES = 128
_SLAB_MAX_K = 256          # use the fused-K im2col slab when 9*Cin <= this


def _round_up(x, m):
    return (x + m - 1) // m * m


def _vmem_limit_bytes():
    # Budget scoped VMEM per generation: ~3/4 of physical, capped at 100 MiB
    # (v5e/v6e: 128 MiB physical -> 96 MiB; v7x: 64 MiB -> 48 MiB).
    try:
        cap = pltpu.get_tpu_info().vmem_capacity_bytes
    except Exception:
        cap = 64 * 1024 * 1024
    return int(min(cap * 3 // 4, 100 * 1024 * 1024))


def _pick_row_tile(r):
    for t in (1024, 512, 256, 128, 64, 32, 16, 8):
        if r % t == 0:
            return t
    return r


# --------------------------- in-kernel helpers --------------------------------

def _zero_pad_hw1(x):
    """(H, W, C) -> (H+2, W+2, C) with a zero border (pure VMEM data movement)."""
    H, W, C = x.shape
    zr = jnp.zeros((1, W, C), x.dtype)
    x = jnp.concatenate([zr, x, zr], axis=0)
    zc = jnp.zeros((H + 2, 1, C), x.dtype)
    return jnp.concatenate([zc, x, zc], axis=1)


def _conv3x3_taps(xp, w_ref, H, W, acc):
    """3x3 / stride-1 conv as 9 accumulating tap matmuls (no im2col slab).

    xp    : (H+2, W+2, C) zero-padded input (bf16 data movement only)
    w_ref : (9*C, Cout_p)  bf16 weights, rows ordered tap-major / channel-minor
    acc   : (H*W, Cout_p)  f32 accumulator (returned updated)
    """
    C = xp.shape[-1]
    t = 0
    for dh in range(3):
        for dw in range(3):
            win = xp[dh:dh + H, dw:dw + W, :].reshape(H * W, C)
            acc = acc + jnp.dot(win.astype(jnp.bfloat16),
                                w_ref[pl.ds(t * C, C), :],
                                preferred_element_type=jnp.float32)
            t += 1
    return acc


def _conv3x3_slab(xp, w_ref, H, W):
    """Fused-K im2col matmul (small-channel path: fills the MXU K dim)."""
    C = xp.shape[-1]
    cols = []
    for dh in range(3):
        for dw in range(3):
            cols.append(xp[dh:dh + H, dw:dw + W, :].reshape(H * W, C))
    patches = jnp.concatenate(cols, axis=-1).astype(jnp.bfloat16)
    return jnp.dot(patches, w_ref[...], preferred_element_type=jnp.float32)


# --------------------------- Pallas kernels -----------------------------------

def _conv1_stats_kernel(x_ref, w_ref, y_ref, sum_ref, sq_ref):
    # x_ref : (1, H, W, Cin)    bf16  upsampled activation
    # w_ref : (9*Cin, Cp)       bf16  im2col conv1 weights (Cout padded to Cp)
    # y_ref : (1, H, W, Cp)     bf16  pre-BN conv1 output
    # sum_ref, sq_ref: (1,1,Cp) f32   per-grid-step BN stats (summed in glue)
    H, W, cp = y_ref.shape[1], y_ref.shape[2], y_ref.shape[3]
    cin = x_ref.shape[3]
    if 9 * cin <= _SLAB_MAX_K:
        # Small-channel path: one fused-K contraction fills the MXU K dim far
        # better than per-tap K=cin matmuls.  The slab is small by
        # construction (<= H*W x 256) so f32 shuffles + one bf16 cast are cheap.
        acc = _conv3x3_slab(_zero_pad_hw1(x_ref[0].astype(jnp.float32)),
                            w_ref, H, W)
    else:
        # Large-channel path: 9-tap accumulating matmuls, window data movement
        # stays in bf16, no materialized im2col slab.
        acc = _conv3x3_taps(_zero_pad_hw1(x_ref[0]), w_ref, H, W,
                            jnp.zeros((H * W, cp), jnp.float32))
    sum_ref[...] = jnp.sum(acc, axis=0)[None, None, :]
    sq_ref[...] = jnp.sum(acc * acc, axis=0)[None, None, :]
    y_ref[0] = acc.reshape(H, W, cp).astype(y_ref.dtype)


def _conv2_stats_kernel(y1_ref, d_ref, s1_ref, t1_ref, wu_ref, wd_ref,
                        y2_ref, sum_ref, sq_ref):
    # y1_ref: (1, H, W, Cp)   bf16  pre-BN conv1 output (lane-dense)
    # d_ref : (1, H, W, Cdp)  bf16  cropped bypass (lane-padded)
    # s1_ref, t1_ref: (1, Cp) f32   BN1 scale / shift (padded lanes are 0)
    # wu_ref: (9*Cp, Cp)      bf16  conv2 weights, "up" (conv1) channel half
    # wd_ref: (9*Cdp, Cp)     bf16  conv2 weights, bypass channel half
    # y2_ref: (1, H, W, Cp)   bf16  pre-BN conv2 output
    H, W, cp = y2_ref.shape[1], y2_ref.shape[2], y2_ref.shape[3]
    # BN1 + ReLU on the fly, f32 fma on the full lane-dense tile (padded lanes
    # have scale=shift=0 so they stay exactly 0), then cast ONCE to bf16 for
    # all the window data movement.
    a = (y1_ref[0].astype(jnp.float32) * s1_ref[0][None, None, :]
         + t1_ref[0][None, None, :])
    a = jnp.maximum(a, 0.0).astype(jnp.bfloat16)
    # Crop-concat folded away: two accumulating tap contractions instead of a
    # concatenated patch slab (half the peak VMEM, no relayout).
    acc = jnp.zeros((H * W, cp), jnp.float32)
    acc = _conv3x3_taps(_zero_pad_hw1(a), wu_ref, H, W, acc)
    acc = _conv3x3_taps(_zero_pad_hw1(d_ref[0]), wd_ref, H, W, acc)
    sum_ref[...] = jnp.sum(acc, axis=0)[None, None, :]
    sq_ref[...] = jnp.sum(acc * acc, axis=0)[None, None, :]
    y2_ref[0] = acc.reshape(H, W, cp).astype(y2_ref.dtype)


def _bn_relu_kernel(y_ref, s_ref, t_ref, o_ref):
    # o = relu(y * scale + shift); lane-dense (rows, Cp) tiles, f32 arithmetic.
    y = y_ref[...].astype(jnp.float32)
    o_ref[...] = jnp.maximum(y * s_ref[0][None, :] + t_ref[0][None, :],
                             0.0).astype(o_ref.dtype)


# --------------------------- pallas_call wrappers ------------------------------

def _conv1_call(x_up, w_im2col, cp):
    N, H, W, cin = x_up.shape
    return pl.pallas_call(
        _conv1_stats_kernel,
        out_shape=(
            jax.ShapeDtypeStruct((N, H, W, cp), jnp.bfloat16),
            jax.ShapeDtypeStruct((N, 1, cp), jnp.float32),
            jax.ShapeDtypeStruct((N, 1, cp), jnp.float32),
        ),
        grid=(N,),
        in_specs=[
            pl.BlockSpec((1, H, W, cin), lambda n: (n, 0, 0, 0)),
            pl.BlockSpec((9 * cin, cp), lambda n: (0, 0)),
        ],
        out_specs=(
            pl.BlockSpec((1, H, W, cp), lambda n: (n, 0, 0, 0)),
            pl.BlockSpec((1, 1, cp), lambda n: (n, 0, 0)),
            pl.BlockSpec((1, 1, cp), lambda n: (n, 0, 0)),
        ),
        compiler_params=pltpu.CompilerParams(
            dimension_semantics=("parallel",),
            vmem_limit_bytes=_vmem_limit_bytes()),
    )(x_up, w_im2col)


def _conv2_call(y1, d, scale1, shift1, wu, wd, cp):
    N, H, W, _ = y1.shape
    cdp = d.shape[-1]
    return pl.pallas_call(
        _conv2_stats_kernel,
        out_shape=(
            jax.ShapeDtypeStruct((N, H, W, cp), jnp.bfloat16),
            jax.ShapeDtypeStruct((N, 1, cp), jnp.float32),
            jax.ShapeDtypeStruct((N, 1, cp), jnp.float32),
        ),
        grid=(N,),
        in_specs=[
            pl.BlockSpec((1, H, W, cp), lambda n: (n, 0, 0, 0)),
            pl.BlockSpec((1, H, W, cdp), lambda n: (n, 0, 0, 0)),
            pl.BlockSpec((1, cp), lambda n: (0, 0)),
            pl.BlockSpec((1, cp), lambda n: (0, 0)),
            pl.BlockSpec((9 * cp, cp), lambda n: (0, 0)),
            pl.BlockSpec((9 * cdp, cp), lambda n: (0, 0)),
        ],
        out_specs=(
            pl.BlockSpec((1, H, W, cp), lambda n: (n, 0, 0, 0)),
            pl.BlockSpec((1, 1, cp), lambda n: (n, 0, 0)),
            pl.BlockSpec((1, 1, cp), lambda n: (n, 0, 0)),
        ),
        compiler_params=pltpu.CompilerParams(
            dimension_semantics=("parallel",),
            vmem_limit_bytes=_vmem_limit_bytes()),
    )(y1, d,
      scale1.reshape(1, cp).astype(jnp.float32),
      shift1.reshape(1, cp).astype(jnp.float32),
      wu, wd)


def _bn_relu_call(y_flat, scale, shift):
    R, cp = y_flat.shape
    tile = _pick_row_tile(R)
    return pl.pallas_call(
        _bn_relu_kernel,
        out_shape=jax.ShapeDtypeStruct((R, cp), jnp.float32),
        grid=(R // tile,),
        in_specs=[
            pl.BlockSpec((tile, cp), lambda i: (i, 0)),
            pl.BlockSpec((1, cp), lambda i: (0, 0)),
            pl.BlockSpec((1, cp), lambda i: (0, 0)),
        ],
        out_specs=pl.BlockSpec((tile, cp), lambda i: (i, 0)),
        compiler_params=pltpu.CompilerParams(
            dimension_semantics=("parallel",),
            vmem_limit_bytes=_vmem_limit_bytes()),
    )(y_flat, scale.reshape(1, cp).astype(jnp.float32),
      shift.reshape(1, cp).astype(jnp.float32))


# --------------------------- JAX glue ------------------------------------------

def bilinear_upsample2x(x):
    # PyTorch nn.Upsample(scale_factor=2, mode='bilinear', align_corners=False).
    # For scale 2 the interpolation weights are the constants 0.25 / 0.75 with
    # edge clamping, so the gather collapses into static shifted slices.
    N, H, W, C = x.shape
    prev_h = jnp.concatenate([x[:, :1], x[:, :-1]], axis=1)
    next_h = jnp.concatenate([x[:, 1:], x[:, -1:]], axis=1)
    even_h = 0.25 * prev_h + 0.75 * x
    odd_h = 0.75 * x + 0.25 * next_h
    xh = jnp.stack([even_h, odd_h], axis=2).reshape(N, 2 * H, W, C)
    prev_w = jnp.concatenate([xh[:, :, :1], xh[:, :, :-1]], axis=2)
    next_w = jnp.concatenate([xh[:, :, 1:], xh[:, :, -1:]], axis=2)
    even_w = 0.25 * prev_w + 0.75 * xh
    odd_w = 0.75 * xh + 0.25 * next_w
    return jnp.stack([even_w, odd_w], axis=3).reshape(N, 2 * H, 2 * W, C)


def crop_bypass(up_hw, bypass):
    # Same crop convention as the PyTorch _crop_concat (margin taken from H).
    Hb, Wb = bypass.shape[1], bypass.shape[2]
    margin = Hb - up_hw
    c = margin // 2
    if margin % 2 == 1:
        return bypass[:, c:Hb - c - 1, c:Wb - c - 1, :]
    return bypass[:, c:Hb - c, c:Wb - c, :]


def _prep_w1_im2col(w_hwio, cin_p, cp):
    kh, kw, cin, cout = w_hwio.shape
    w = jnp.pad(w_hwio, ((0, 0), (0, 0), (0, cin_p - cin), (0, cp - cout)))
    return w.reshape(kh * kw * cin_p, cp).astype(jnp.bfloat16)   # tap-major rows


def _prep_w2_im2col(w_hwio, c1, cp, cdp):
    # Split the conv2 weight into its "up" (conv1-output) and "down" (bypass)
    # channel halves; each half is lane-padded per tap so the kernel stays
    # lane-dense (no sub-128 slices) and never builds a concatenated slab.
    kh, kw, cin2, cout = w_hwio.shape
    wu = jnp.pad(w_hwio[:, :, :c1, :],
                 ((0, 0), (0, 0), (0, cp - c1), (0, cp - cout)))
    wd = jnp.pad(w_hwio[:, :, c1:, :],
                 ((0, 0), (0, 0), (0, cdp - (cin2 - c1)), (0, cp - cout)))
    return (wu.reshape(kh * kw * cp, cp).astype(jnp.bfloat16),
            wd.reshape(kh * kw * cdp, cp).astype(jnp.bfloat16))


def _bn_scale_shift(sums, sqs, count, gamma_p, beta_p):
    # Training-mode BatchNorm batch statistics (biased variance), all in f32.
    # TODO(synk): switch to a shifted/centered accumulation if E[x^2]-E[x]^2
    # cancellation ever matters for very large N*H*W.
    s = jnp.sum(sums, axis=(0, 1))
    q = jnp.sum(sqs, axis=(0, 1))
    mean = s / count
    var = jnp.maximum(q / count - mean * mean, 0.0)
    scale = gamma_p * jax.lax.rsqrt(var + EPS)
    shift = beta_p - mean * scale
    return scale, shift


def stack_decoder_forward(x_nchw, down_nchw, params):
    # NCHW (PyTorch) -> NHWC (kernel layout); bf16 before the upsample so the
    # 4x-larger x_up HBM intermediate (XLA write + kernel-1 read) is halved.
    x = jnp.transpose(x_nchw, (0, 2, 3, 1)).astype(jnp.bfloat16)
    down = jnp.transpose(down_nchw, (0, 2, 3, 1))

    cin = params["w1"].shape[-2]
    cout = params["w1"].shape[-1]
    c1 = cout                               # conv1 output channels (concat half)
    cp = _round_up(cout, LANES)             # lane-dense conv-output channels

    gamma1 = jnp.pad(params["g1"], (0, cp - cout)).astype(jnp.float32)
    beta1 = jnp.pad(params["be1"], (0, cp - cout)).astype(jnp.float32)
    gamma2 = jnp.pad(params["g2"], (0, cp - cout)).astype(jnp.float32)
    beta2 = jnp.pad(params["be2"], (0, cp - cout)).astype(jnp.float32)

    # Bilinear 2x upsample (JAX glue, static slices, bf16).
    x_up = bilinear_upsample2x(x)
    N, H, W, _ = x_up.shape
    count = float(N * H * W)

    # Small Cin -> fused-K slab (unpadded); large Cin -> lane-padded tap loop.
    cin_p = cin if 9 * cin <= _SLAB_MAX_K else _round_up(cin, LANES)
    if cin_p != cin:
        x_up = jnp.pad(x_up, ((0, 0), (0, 0), (0, 0), (0, cin_p - cin)))

    # kernel 1: conv1 + fused BN1 batch statistics (per-grid-step, parallel).
    w1 = _prep_w1_im2col(params["w1"], cin_p, cp)
    y1, s1, q1 = _conv1_call(x_up, w1, cp)
    scale1, shift1 = _bn_scale_shift(s1, q1, count, gamma1, beta1)

    # kernel 2: BN1+ReLU + crop-concat folded into conv2, + BN2 statistics.
    d = crop_bypass(H, down)
    cd = d.shape[-1]
    cdp = _round_up(cd, LANES)
    d = jnp.pad(d, ((0, 0), (0, 0), (0, 0), (0, cdp - cd))).astype(jnp.bfloat16)
    wu, wd = _prep_w2_im2col(params["w2"], c1, cp, cdp)
    y2, s2, q2 = _conv2_call(y1, d, scale1, shift1, wu, wd, cp)
    scale2, shift2 = _bn_scale_shift(s2, q2, count, gamma2, beta2)

    # kernel 3: BN2 + ReLU epilogue on a flattened lane-dense (rows, Cp) view.
    out = _bn_relu_call(y2.reshape(N * H * W, cp), scale2, shift2)
    out = out.reshape(N, H, W, cp)[:, :, :, :cout]     # drop lane padding
    return jnp.transpose(out, (0, 3, 1, 2))            # back to NCHW


# --------------------------- main ----------------------------------------------

if __name__ == "__main__":
    key = jax.random.PRNGKey(0)
    keys = jax.random.split(key, 8)

    # StackDecoder(in_channels=8, out_channels=4)
    Cin, Cout = 8, 4
    N, H, W = 2, 8, 8               # x:    (2, 8, 8, 8)   NCHW
    Hd, Wd = 18, 18                 # down: (2, 4, 18, 18) NCHW (even-margin crop)

    x = jax.random.normal(keys[0], (N, Cin, H, W), jnp.float32)
    down = jax.random.normal(keys[1], (N, Cout, Hd, Wd), jnp.float32)

    # Deterministic synthetic parameters (HWIO conv weights).  Conv biases are
    # omitted: they are cancelled exactly by the training-mode BatchNorm that
    # immediately follows each convolution.
    params = {
        "w1": 0.1 * jax.random.normal(keys[2], (3, 3, Cin, Cout), jnp.float32),
        "g1": 1.0 + 0.1 * jax.random.normal(keys[3], (Cout,), jnp.float32),
        "be1": 0.1 * jax.random.normal(keys[4], (Cout,), jnp.float32),
        "w2": 0.1 * jax.random.normal(keys[5], (3, 3, Cin, Cout), jnp.float32),
        "g2": 1.0 + 0.1 * jax.random.normal(keys[6], (Cout,), jnp.float32),
        "be2": 0.1 * jax.random.normal(keys[7], (Cout,), jnp.float32),
    }

    out = jax.jit(stack_decoder_forward)(x, down, params)
    out = jax.block_until_ready(out)
    assert out.shape == (N, Cout, 2 * H, 2 * W), out.shape
    assert bool(jnp.all(jnp.isfinite(out)))
    print("KERNEL_OK")
</pallas_src>

<mosaic_0001>
module attributes {stable_mosaic.version = 11 : i64} {
  func.func @_conv1_stats_kernel(%arg0: i32, %arg1: memref<1x16x16x8xbf16, #tpu.memory_space<vmem>>, %arg2: memref<72x128xbf16, #tpu.memory_space<vmem>>, %arg3: memref<1x16x16x128xbf16, #tpu.memory_space<vmem>>, %arg4: memref<1x1x128xf32, #tpu.memory_space<vmem>>, %arg5: memref<1x1x128xf32, #tpu.memory_space<vmem>>) attributes {dimension_semantics = [#tpu.dimension_semantics<parallel>], iteration_bounds = array<i64: 2>, scalar_prefetch = 0 : i64, scratch_operands = 0 : i64, tpu.core_type = #tpu.core_type<tc>, window_params = [{transform_indices = @transform_0, window_bounds = array<i64: 1, 16, 16, 8>}, {pipeline_mode = #tpu.pipeline_mode<synchronous>, transform_indices = @transform_1, window_bounds = array<i64: 72, 128>}, {transform_indices = @transform_2, window_bounds = array<i64: 1, 16, 16, 128>}, {transform_indices = @transform_3, window_bounds = array<i64: 1, 1, 128>}, {transform_indices = @transform_4, window_bounds = array<i64: 1, 1, 128>}]} {
    %c0 = arith.constant 0 : index
    %c0_0 = arith.constant 0 : index
    %c0_1 = arith.constant 0 : index
    %c0_2 = arith.constant 0 : index
    %0 = vector.load %arg1[%c0, %c0_0, %c0_1, %c0_2] : memref<1x16x16x8xbf16, #tpu.memory_space<vmem>>, vector<1x16x16x8xbf16>
    %1 = vector.shape_cast %0 : vector<1x16x16x8xbf16> to vector<16x16x8xbf16>
    %2 = arith.extf %1 : vector<16x16x8xbf16> to vector<16x16x8xf32>
    %cst = arith.constant 0.000000e+00 : f32
    %3 = vector.broadcast %cst : f32 to vector<1x16x8xf32>
    %4 = tpu.concatenate %3, %2, %3 in 0 : vector<1x16x8xf32>, vector<16x16x8xf32>, vector<1x16x8xf32> -> vector<18x16x8xf32>
    %cst_3 = arith.constant 0.000000e+00 : f32
    %5 = vector.broadcast %cst_3 : f32 to vector<18x1x8xf32>
    %6 = tpu.concatenate %5, %4, %5 in 1 : vector<18x1x8xf32>, vector<18x16x8xf32>, vector<18x1x8xf32> -> vector<18x18x8xf32>
    %7 = vector.extract_strided_slice %6 {offsets = [0, 0, 0], sizes = [16, 16, 8], strides = [1, 1, 1]} : vector<18x18x8xf32> to vector<16x16x8xf32>
    %8 = vector.shape_cast %7 : vector<16x16x8xf32> to vector<256x8xf32>
    %9 = vector.extract_strided_slice %6 {offsets = [0, 1, 0], sizes = [16, 16, 8], strides = [1, 1, 1]} : vector<18x18x8xf32> to vector<16x16x8xf32>
    %10 = vector.shape_cast %9 : vector<16x16x8xf32> to vector<256x8xf32>
    %11 = vector.extract_strided_slice %6 {offsets = [0, 2, 0], sizes = [16, 16, 8], strides = [1, 1, 1]} : vector<18x18x8xf32> to vector<16x16x8xf32>
    %12 = vector.shape_cast %11 : vector<16x16x8xf32> to vector<256x8xf32>
    %13 = vector.extract_strided_slice %6 {offsets = [1, 0, 0], sizes = [16, 16, 8], strides = [1, 1, 1]} : vector<18x18x8xf32> to vector<16x16x8xf32>
    %14 = vector.shape_cast %13 : vector<16x16x8xf32> to vector<256x8xf32>
    %15 = vector.extract_strided_slice %6 {offsets = [1, 1, 0], sizes = [16, 16, 8], strides = [1, 1, 1]} : vector<18x18x8xf32> to vector<16x16x8xf32>
    %16 = vector.shape_cast %15 : vector<16x16x8xf32> to vector<256x8xf32>
    %17 = vector.extract_strided_slice %6 {offsets = [1, 2, 0], sizes = [16, 16, 8], strides = [1, 1, 1]} : vector<18x18x8xf32> to vector<16x16x8xf32>
    %18 = vector.shape_cast %17 : vector<16x16x8xf32> to vector<256x8xf32>
    %19 = vector.extract_strided_slice %6 {offsets = [2, 0, 0], sizes = [16, 16, 8], strides = [1, 1, 1]} : vector<18x18x8xf32> to vector<16x16x8xf32>
    %20 = vector.shape_cast %19 : vector<16x16x8xf32> to vector<256x8xf32>
    %21 = vector.extract_strided_slice %6 {offsets = [2, 1, 0], sizes = [16, 16, 8], strides = [1, 1, 1]} : vector<18x18x8xf32> to vector<16x16x8xf32>
    %22 = vector.shape_cast %21 : vector<16x16x8xf32> to vector<256x8xf32>
    %23 = vector.extract_strided_slice %6 {offsets = [2, 2, 0], sizes = [16, 16, 8], strides = [1, 1, 1]} : vector<18x18x8xf32> to vector<16x16x8xf32>
    %24 = vector.shape_cast %23 : vector<16x16x8xf32> to vector<256x8xf32>
    %25 = tpu.concatenate %8, %10, %12, %14, %16, %18, %20, %22, %24 in 1 : vector<256x8xf32>, vector<256x8xf32>, vector<256x8xf32>, vector<256x8xf32>, vector<256x8xf32>, vector<256x8xf32>, vector<256x8xf32>, vector<256x8xf32>, vector<256x8xf32> -> vector<256x72xf32>
    %26 = arith.truncf %25 : vector<256x72xf32> to vector<256x72xbf16>
    %c0_4 = arith.constant 0 : index
    %c0_5 = arith.constant 0 : index
    %27 = vector.load %arg2[%c0_4, %c0_5] : memref<72x128xbf16, #tpu.memory_space<vmem>>, vector<72x128xbf16>
    %cst_6 = arith.constant dense<0.000000e+00> : vector<256x128xf32>
    %28 = tpu.matmul %26, %27, %cst_6 {dimension_numbers = #tpu.dot_dimension_numbers<[1], [0], [0], [1], [0, 0, 1, 1], [], []>} : vector<256x72xbf16>, vector<72x128xbf16>, vector<256x128xf32> -> vector<256x128xf32>
    %cst_7 = arith.constant dense<0.000000e+00> : vector<128xf32>
    %29 = vector.multi_reduction <add>, %28, %cst_7 [0] : vector<256x128xf32> to vector<128xf32>
    %30 = vector.shape_cast %29 : vector<128xf32> to vector<1x1x128xf32>
    %c0_8 = arith.constant 0 : index
    %c0_9 = arith.constant 0 : index
    %c0_10 = arith.constant 0 : index
    %31 = vector.load %arg4[%c0_8, %c0_9, %c0_10] : memref<1x1x128xf32, #tpu.memory_space<vmem>>, vector<1x1x128xf32>
    tpu.vector_store %arg4[%c0_8, %c0_9, %c0_10], %30 {strides = array<i32>} : memref<1x1x128xf32, #tpu.memory_space<vmem>>, vector<1x1x128xf32>,
    %32 = arith.mulf %28, %28 : vector<256x128xf32>
    %cst_11 = arith.constant dense<0.000000e+00> : vector<128xf32>
    %33 = vector.multi_reduction <add>, %32, %cst_11 [0] : vector<256x128xf32> to vector<128xf32>
    %34 = vector.shape_cast %33 : vector<128xf32> to vector<1x1x128xf32>
    %c0_12 = arith.constant 0 : index
    %c0_13 = arith.constant 0 : index
    %c0_14 = arith.constant 0 : index
    %35 = vector.load %arg5[%c0_12, %c0_13, %c0_14] : memref<1x1x128xf32, #tpu.memory_space<vmem>>, vector<1x1x128xf32>
    tpu.vector_store %arg5[%c0_12, %c0_13, %c0_14], %34 {strides = array<i32>} : memref<1x1x128xf32, #tpu.memory_space<vmem>>, vector<1x1x128xf32>,
    %36 = vector.shape_cast %28 : vector<256x128xf32> to vector<16x16x128xf32>
    %37 = arith.truncf %36 : vector<16x16x128xf32> to vector<16x16x128xbf16>
    %c0_15 = arith.constant 0 : index
    %c0_16 = arith.constant 0 : index
    %c0_17 = arith.constant 0 : index
    %c0_18 = arith.constant 0 : index
    %38 = vector.load %arg3[%c0_15, %c0_16, %c0_17, %c0_18] : memref<1x16x16x128xbf16, #tpu.memory_space<vmem>>, vector<1x16x16x128xbf16>
    %39 = vector.shape_cast %38 : vector<1x16x16x128xbf16> to vector<16x16x128xbf16>
    %40 = vector.shape_cast %37 : vector<16x16x128xbf16> to vector<1x16x16x128xbf16>
    tpu.vector_store %arg3[%c0_15, %c0_16, %c0_17, %c0_18], %40 {strides = array<i32>} : memref<1x16x16x128xbf16, #tpu.memory_space<vmem>>, vector<1x16x16x128xbf16>,
    return
  }
  func.func @transform_0(%arg0: i32) -> (i32, i32, i32, i32) {
    %c0_i32 = arith.constant 0 : i32
    %c0_i32_0 = arith.constant 0 : i32
    %c0_i32_1 = arith.constant 0 : i32
    %c0_i32_2 = arith.constant 0 : i32
    return %arg0, %c0_i32, %c0_i32_0, %c0_i32_1 : i32, i32, i32, i32
  }
  func.func @transform_1(%arg0: i32) -> (i32, i32) {
    %c0_i32 = arith.constant 0 : i32
    %c0_i32_0 = arith.constant 0 : i32
    %c0_i32_1 = arith.constant 0 : i32
    return %c0_i32, %c0_i32_0 : i32, i32
  }
  func.func @transform_2(%arg0: i32) -> (i32, i32, i32, i32) {
    %c0_i32 = arith.constant 0 : i32
    %c0_i32_0 = arith.constant 0 : i32
    %c0_i32_1 = arith.constant 0 : i32
    %c0_i32_2 = arith.constant 0 : i32
    return %arg0, %c0_i32, %c0_i32_0, %c0_i32_1 : i32, i32, i32, i32
  }
  func.func @transform_3(%arg0: i32) -> (i32, i32, i32) {
    %c0_i32 = arith.constant 0 : i32
    %c0_i32_0 = arith.constant 0 : i32
    %c0_i32_1 = arith.constant 0 : i32
    return %arg0, %c0_i32, %c0_i32_0 : i32, i32, i32
  }
  func.func @transform_4(%arg0: i32) -> (i32, i32, i32) {
    %c0_i32 = arith.constant 0 : i32
    %c0_i32_0 = arith.constant 0 : i32
    %c0_i32_1 = arith.constant 0 : i32
    return %arg0, %c0_i32, %c0_i32_0 : i32, i32, i32
  }
}

module attributes {stable_mosaic.version = 11 : i64} {
  func.func @_conv2_stats_kernel(%arg0: i32, %arg1: memref<1x16x16x128xbf16, #tpu.memory_space<vmem>>, %arg2: memref<1x16x16x128xbf16, #tpu.memory_space<vmem>>, %arg3: memref<1x128xf32, #tpu.memory_space<vmem>>, %arg4: memref<1x128xf32, #tpu.memory_space<vmem>>, %arg5: memref<1152x128xbf16, #tpu.memory_space<vmem>>, %arg6: memref<1152x128xbf16, #tpu.memory_space<vmem>>, %arg7: memref<1x16x16x128xbf16, #tpu.memory_space<vmem>>, %arg8: memref<1x1x128xf32, #tpu.memory_space<vmem>>, %arg9: memref<1x1x128xf32, #tpu.memory_space<vmem>>) attributes {dimension_semantics = [#tpu.dimension_semantics<parallel>], iteration_bounds = array<i64: 2>, scalar_prefetch = 0 : i64, scratch_operands = 0 : i64, tpu.core_type = #tpu.core_type<tc>, window_params = [{transform_indices = @transform_0, window_bounds = array<i64: 1, 16, 16, 128>}, {transform_indices = @transform_1, window_bounds = array<i64: 1, 16, 16, 128>}, {pipeline_mode = #tpu.pipeline_mode<synchronous>, transform_indices = @transform_2, window_bounds = array<i64: 1, 128>}, {pipeline_mode = #tpu.pipeline_mode<synchronous>, transform_indices = @transform_3, window_bounds = array<i64: 1, 128>}, {pipeline_mode = #tpu.pipeline_mode<synchronous>, transform_indices = @transform_4, window_bounds = array<i64: 1152, 128>}, {pipeline_mode = #tpu.pipeline_mode<synchronous>, transform_indices = @transform_5, window_bounds = array<i64: 1152, 128>}, {transform_indices = @transform_6, window_bounds = array<i64: 1, 16, 16, 128>}, {transform_indices = @transform_7, window_bounds = array<i64: 1, 1, 128>}, {transform_indices = @transform_8, window_bounds = array<i64: 1, 1, 128>}]} {
    %c0 = arith.constant 0 : index
    %c0_0 = arith.constant 0 : index
    %c0_1 = arith.constant 0 : index
    %c0_2 = arith.constant 0 : index
    %0 = vector.load %arg1[%c0, %c0_0, %c0_1, %c0_2] : memref<1x16x16x128xbf16, #tpu.memory_space<vmem>>, vector<1x16x16x128xbf16>
    %1 = vector.shape_cast %0 : vector<1x16x16x128xbf16> to vector<16x16x128xbf16>
    %2 = arith.extf %1 : vector<16x16x128xbf16> to vector<16x16x128xf32>
    %c0_3 = arith.constant 0 : index
    %c0_4 = arith.constant 0 : index
    %3 = vector.load %arg3[%c0_3, %c0_4] : memref<1x128xf32, #tpu.memory_space<vmem>>, vector<1x128xf32>
    %4 = vector.shape_cast %3 : vector<1x128xf32> to vector<128xf32>
    %5 = vector.shape_cast %4 : vector<128xf32> to vector<1x1x128xf32>
    %6 = vector.broadcast %5 : vector<1x1x128xf32> to vector<16x16x128xf32>
    %7 = arith.mulf %2, %6 : vector<16x16x128xf32>
    %c0_5 = arith.constant 0 : index
    %c0_6 = arith.constant 0 : index
    %8 = vector.load %arg4[%c0_5, %c0_6] : memref<1x128xf32, #tpu.memory_space<vmem>>, vector<1x128xf32>
    %9 = vector.shape_cast %8 : vector<1x128xf32> to vector<128xf32>
    %10 = vector.shape_cast %9 : vector<128xf32> to vector<1x1x128xf32>
    %11 = vector.broadcast %10 : vector<1x1x128xf32> to vector<16x16x128xf32>
    %12 = arith.addf %7, %11 : vector<16x16x128xf32>
    %cst = arith.constant 0.000000e+00 : f32
    %13 = vector.broadcast %cst : f32 to vector<16x16x128xf32>
    %14 = arith.maximumf %12, %13 : vector<16x16x128xf32>
    %15 = arith.truncf %14 : vector<16x16x128xf32> to vector<16x16x128xbf16>
    %cst_7 = arith.constant 0.000000e+00 : f32
    %16 = vector.broadcast %cst_7 : f32 to vector<256x128xf32>
    %cst_8 = arith.constant 0.000000e+00 : bf16
    %17 = vector.broadcast %cst_8 : bf16 to vector<1x16x128xbf16>
    %18 = tpu.concatenate %17, %15, %17 in 0 : vector<1x16x128xbf16>, vector<16x16x128xbf16>, vector<1x16x128xbf16> -> vector<18x16x128xbf16>
    %cst_9 = arith.constant 0.000000e+00 : bf16
    %19 = vector.broadcast %cst_9 : bf16 to vector<18x1x128xbf16>
    %20 = tpu.concatenate %19, %18, %19 in 1 : vector<18x1x128xbf16>, vector<18x16x128xbf16>, vector<18x1x128xbf16> -> vector<18x18x128xbf16>
    %21 = vector.extract_strided_slice %20 {offsets = [0, 0, 0], sizes = [16, 16, 128], strides = [1, 1, 1]} : vector<18x18x128xbf16> to vector<16x16x128xbf16>
    %22 = vector.shape_cast %21 : vector<16x16x128xbf16> to vector<256x128xbf16>
    %c0_10 = arith.constant 0 : index
    %c0_11 = arith.constant 0 : index
    %23 = vector.load %arg5[%c0_10, %c0_11] : memref<1152x128xbf16, #tpu.memory_space<vmem>>, vector<128x128xbf16>
    %cst_12 = arith.constant dense<0.000000e+00> : vector<256x128xf32>
    %24 = tpu.matmul %22, %23, %cst_12 {dimension_numbers = #tpu.dot_dimension_numbers<[1], [0], [0], [1], [0, 0, 1, 1], [], []>} : vector<256x128xbf16>, vector<128x128xbf16>, vector<256x128xf32> -> vector<256x128xf32>
    %25 = arith.addf %16, %24 : vector<256x128xf32>
    %26 = vector.extract_strided_slice %20 {offsets = [0, 1, 0], sizes = [16, 16, 128], strides = [1, 1, 1]} : vector<18x18x128xbf16> to vector<16x16x128xbf16>
    %27 = vector.shape_cast %26 : vector<16x16x128xbf16> to vector<256x128xbf16>
    %c128 = arith.constant 128 : index
    %c0_13 = arith.constant 0 : index
    %28 = vector.load %arg5[%c128, %c0_13] : memref<1152x128xbf16, #tpu.memory_space<vmem>>, vector<128x128xbf16>
    %cst_14 = arith.constant dense<0.000000e+00> : vector<256x128xf32>
    %29 = tpu.matmul %27, %28, %cst_14 {dimension_numbers = #tpu.dot_dimension_numbers<[1], [0], [0], [1], [0, 0, 1, 1], [], []>} : vector<256x128xbf16>, vector<128x128xbf16>, vector<256x128xf32> -> vector<256x128xf32>
    %30 = arith.addf %25, %29 : vector<256x128xf32>
    %31 = vector.extract_strided_slice %20 {offsets = [0, 2, 0], sizes = [16, 16, 128], strides = [1, 1, 1]} : vector<18x18x128xbf16> to vector<16x16x128xbf16>
    %32 = vector.shape_cast %31 : vector<16x16x128xbf16> to vector<256x128xbf16>
    %c256 = arith.constant 256 : index
    %c0_15 = arith.constant 0 : index
    %33 = vector.load %arg5[%c256, %c0_15] : memref<1152x128xbf16, #tpu.memory_space<vmem>>, vector<128x128xbf16>
    %cst_16 = arith.constant dense<0.000000e+00> : vector<256x128xf32>
    %34 = tpu.matmul %32, %33, %cst_16 {dimension_numbers = #tpu.dot_dimension_numbers<[1], [0], [0], [1], [0, 0, 1, 1], [], []>} : vector<256x128xbf16>, vector<128x128xbf16>, vector<256x128xf32> -> vector<256x128xf32>
    %35 = arith.addf %30, %34 : vector<256x128xf32>
    %36 = vector.extract_strided_slice %20 {offsets = [1, 0, 0], sizes = [16, 16, 128], strides = [1, 1, 1]} : vector<18x18x128xbf16> to vector<16x16x128xbf16>
    %37 = vector.shape_cast %36 : vector<16x16x128xbf16> to vector<256x128xbf16>
    %c384 = arith.constant 384 : index
    %c0_17 = arith.constant 0 : index
    %38 = vector.load %arg5[%c384, %c0_17] : memref<1152x128xbf16, #tpu.memory_space<vmem>>, vector<128x128xbf16>
    %cst_18 = arith.constant dense<0.000000e+00> : vector<256x128xf32>
    %39 = tpu.matmul %37, %38, %cst_18 {dimension_numbers = #tpu.dot_dimension_numbers<[1], [0], [0], [1], [0, 0, 1, 1], [], []>} : vector<256x128xbf16>, vector<128x128xbf16>, vector<256x128xf32> -> vector<256x128xf32>
    %40 = arith.addf %35, %39 : vector<256x128xf32>
    %41 = vector.extract_strided_slice %20 {offsets = [1, 1, 0], sizes = [16, 16, 128], strides = [1, 1, 1]} : vector<18x18x128xbf16> to vector<16x16x128xbf16>
    %42 = vector.shape_cast %41 : vector<16x16x128xbf16> to vector<256x128xbf16>
    %c512 = arith.constant 512 : index
    %c0_19 = arith.constant 0 : index
    %43 = vector.load %arg5[%c512, %c0_19] : memref<1152x128xbf16, #tpu.memory_space<vmem>>, vector<128x128xbf16>
    %cst_20 = arith.constant dense<0.000000e+00> : vector<256x128xf32>
    %44 = tpu.matmul %42, %43, %cst_20 {dimension_numbers = #tpu.dot_dimension_numbers<[1], [0], [0], [1], [0, 0, 1, 1], [], []>} : vector<256x128xbf16>, vector<128x128xbf16>, vector<256x128xf32> -> vector<256x128xf32>
    %45 = arith.addf %40, %44 : vector<256x128xf32>
    %46 = vector.extract_strided_slice %20 {offsets = [1, 2, 0], sizes = [16, 16, 128], strides = [1, 1, 1]} : vector<18x18x128xbf16> to vector<16x16x128xbf16>
    %47 = vector.shape_cast %46 : vector<16x16x128xbf16> to vector<256x128xbf16>
    %c640 = arith.constant 640 : index
    %c0_21 = arith.constant 0 : index
    %48 = vector.load %arg5[%c640, %c0_21] : memref<1152x128xbf16, #tpu.memory_space<vmem>>, vector<128x128xbf16>
    %cst_22 = arith.constant dense<0.000000e+00> : vector<256x128xf32>
    %49 = tpu.matmul %47, %48, %cst_22 {dimension_numbers = #tpu.dot_dimension_numbers<[1], [0], [0], [1], [0, 0, 1, 1], [], []>} : vector<256x128xbf16>, vector<128x128xbf16>, vector<256x128xf32> -> vector<256x128xf32>
    %50 = arith.addf %45, %49 : vector<256x128xf32>
    %51 = vector.extract_strided_slice %20 {offsets = [2, 0, 0], sizes = [16, 16, 128], strides = [1, 1, 1]} : vector<18x18x128xbf16> to vector<16x16x128xbf16>
    %52 = vector.shape_cast %51 : vector<16x16x128xbf16> to vector<256x128xbf16>
    %c768 = arith.constant 768 : index
    %c0_23 = arith.constant 0 : index
    %53 = vector.load %arg5[%c768, %c0_23] : memref<1152x128xbf16, #tpu.memory_space<vmem>>, vector<128x128xbf16>
    %cst_24 = arith.constant dense<0.000000e+00> : vector<256x128xf32>
    %54 = tpu.matmul %52, %53, %cst_24 {dimension_numbers = #tpu.dot_dimension_numbers<[1], [0], [0], [1], [0, 0, 1, 1], [], []>} : vector<256x128xbf16>, vector<128x128xbf16>, vector<256x128xf32> -> vector<256x128xf32>
    %55 = arith.addf %50, %54 : vector<256x128xf32>
    %56 = vector.extract_strided_slice %20 {offsets = [2, 1, 0], sizes = [16, 16, 128], strides = [1, 1, 1]} : vector<18x18x128xbf16> to vector<16x16x128xbf16>
    %57 = vector.shape_cast %56 : vector<16x16x128xbf16> to vector<256x128xbf16>
    %c896 = arith.constant 896 : index
    %c0_25 = arith.constant 0 : index
    %58 = vector.load %arg5[%c896, %c0_25] : memref<1152x128xbf16, #tpu.memory_space<vmem>>, vector<128x128xbf16>
    %cst_26 = arith.constant dense<0.000000e+00> : vector<256x128xf32>
    %59 = tpu.matmul %57, %58, %cst_26 {dimension_numbers = #tpu.dot_dimension_numbers<[1], [0], [0], [1], [0, 0, 1, 1], [], []>} : vector<256x128xbf16>, vector<128x128xbf16>, vector<256x128xf32> -> vector<256x128xf32>
    %60 = arith.addf %55, %59 : vector<256x128xf32>
    %61 = vector.extract_strided_slice %20 {offsets = [2, 2, 0], sizes = [16, 16, 128], strides = [1, 1, 1]} : vector<18x18x128xbf16> to vector<16x16x128xbf16>
    %62 = vector.shape_cast %61 : vector<16x16x128xbf16> to vector<256x128xbf16>
    %c1024 = arith.constant 1024 : index
    %c0_27 = arith.constant 0 : index
    %63 = vector.load %arg5[%c1024, %c0_27] : memref<1152x128xbf16, #tpu.memory_space<vmem>>, vector<128x128xbf16>
    %cst_28 = arith.constant dense<0.000000e+00> : vector<256x128xf32>
    %64 = tpu.matmul %62, %63, %cst_28 {dimension_numbers = #tpu.dot_dimension_numbers<[1], [0], [0], [1], [0, 0, 1, 1], [], []>} : vector<256x128xbf16>, vector<128x128xbf16>, vector<256x128xf32> -> vector<256x128xf32>
    %65 = arith.addf %60, %64 : vector<256x128xf32>
    %c0_29 = arith.constant 0 : index
    %c0_30 = arith.constant 0 : index
    %c0_31 = arith.constant 0 : index
    %c0_32 = arith.constant 0 : index
    %66 = vector.load %arg2[%c0_29, %c0_30, %c0_31, %c0_32] : memref<1x16x16x128xbf16, #tpu.memory_space<vmem>>, vector<1x16x16x128xbf16>
    %67 = vector.shape_cast %66 : vector<1x16x16x128xbf16> to vector<16x16x128xbf16>
    %cst_33 = arith.constant 0.000000e+00 : bf16
    %68 = vector.broadcast %cst_33 : bf16 to vector<1x16x128xbf16>
    %69 = tpu.concatenate %68, %67, %68 in 0 : vector<1x16x128xbf16>, vector<16x16x128xbf16>, vector<1x16x128xbf16> -> vector<18x16x128xbf16>
    %cst_34 = arith.constant 0.000000e+00 : bf16
    %70 = vector.broadcast %cst_34 : bf16 to vector<18x1x128xbf16>
    %71 = tpu.concatenate %70, %69, %70 in 1 : vector<18x1x128xbf16>, vector<18x16x128xbf16>, vector<18x1x128xbf16> -> vector<18x18x128xbf16>
    %72 = vector.extract_strided_slice %71 {offsets = [0, 0, 0], sizes = [16, 16, 128], strides = [1, 1, 1]} : vector<18x18x128xbf16> to vector<16x16x128xbf16>
    %73 = vector.shape_cast %72 : vector<16x16x128xbf16> to vector<256x128xbf16>
    %c0_35 = arith.constant 0 : index
    %c0_36 = arith.constant 0 : index
    %74 = vector.load %arg6[%c0_35, %c0_36] : memref<1152x128xbf16, #tpu.memory_space<vmem>>, vector<128x128xbf16>
    %cst_37 = arith.constant dense<0.000000e+00> : vector<256x128xf32>
    %75 = tpu.matmul %73, %74, %cst_37 {dimension_numbers = #tpu.dot_dimension_numbers<[1], [0], [0], [1], [0, 0, 1, 1], [], []>} : vector<256x128xbf16>, vector<128x128xbf16>, vector<256x128xf32> -> vector<256x128xf32>
    %76 = arith.addf %65, %75 : vector<256x128xf32>
    %77 = vector.extract_strided_slice %71 {offsets = [0, 1, 0], sizes = [16, 16, 128], strides = [1, 1, 1]} : vector<18x18x128xbf16> to vector<16x16x128xbf16>
    %78 = vector.shape_cast %77 : vector<16x16x128xbf16> to vector<256x128xbf16>
    %c128_38 = arith.constant 128 : index
    %c0_39 = arith.constant 0 : index
    %79 = vector.load %arg6[%c128_38, %c0_39] : memref<1152x128xbf16, #tpu.memory_space<vmem>>, vector<128x128xbf16>
    %cst_40 = arith.constant dense<0.000000e+00> : vector<256x128xf32>
    %80 = tpu.matmul %78, %79, %cst_40 {dimension_numbers = #tpu.dot_dimension_numbers<[1], [0], [0], [1], [0, 0, 1, 1], [], []>} : vector<256x128xbf16>, vector<128x128xbf16>, vector<256x128xf32> -> vector<256x128xf32>
    %81 = arith.addf %76, %80 : vector<256x128xf32>
    %82 = vector.extract_strided_slice %71 {offsets = [0, 2, 0], sizes = [16, 16, 128], strides = [1, 1, 1]} : vector<18x18x128xbf16> to vector<16x16x128xbf16>
    %83 = vector.shape_cast %82 : vector<16x16x128xbf16> to vector<256x128xbf16>
    %c256_41 = arith.constant 256 : index
    %c0_42 = arith.constant 0 : index
    %84 = vector.load %arg6[%c256_41, %c0_42] : memref<1152x128xbf16, #tpu.memory_space<vmem>>, vector<128x128xbf16>
    %cst_43 = arith.constant dense<0.000000e+00> : vector<256x128xf32>
    %85 = tpu.matmul %83, %84, %cst_43 {dimension_numbers = #tpu.dot_dimension_numbers<[1], [0], [0], [1], [0, 0, 1, 1], [], []>} : vector<256x128xbf16>, vector<128x128xbf16>, vector<256x128xf32> -> vector<256x128xf32>
    %86 = arith.addf %81, %85 : vector<256x128xf32>
    %87 = vector.extract_strided_slice %71 {offsets = [1, 0, 0], sizes = [16, 16, 128], strides = [1, 1, 1]} : vector<18x18x128xbf16> to vector<16x16x128xbf16>
    %88 = vector.shape_cast %87 : vector<16x16x128xbf16> to vector<256x128xbf16>
    %c384_44 = arith.constant 384 : index
    %c0_45 = arith.constant 0 : index
    %89 = vector.load %arg6[%c384_44, %c0_45] : memref<1152x128xbf16, #tpu.memory_space<vmem>>, vector<128x128xbf16>
    %cst_46 = arith.constant dense<0.000000e+00> : vector<256x128xf32>
    %90 = tpu.matmul %88, %89, %cst_46 {dimension_numbers = #tpu.dot_dimension_numbers<[1], [0], [0], [1], [0, 0, 1, 1], [], []>} : vector<256x128xbf16>, vector<128x128xbf16>, vector<256x128xf32> -> vector<256x128xf32>
    %91 = arith.addf %86, %90 : vector<256x128xf32>
    %92 = vector.extract_strided_slice %71 {offsets = [1, 1, 0], sizes = [16, 16, 128], strides = [1, 1, 1]} : vector<18x18x128xbf16> to vector<16x16x128xbf16>
    %93 = vector.shape_cast %92 : vector<16x16x128xbf16> to vector<256x128xbf16>
    %c512_47 = arith.constant 512 : index
    %c0_48 = arith.constant 0 : index
    %94 = vector.load %arg6[%c512_47, %c0_48] : memref<1152x128xbf16, #tpu.memory_space<vmem>>, vector<128x128xbf16>
    %cst_49 = arith.constant dense<0.000000e+00> : vector<256x128xf32>
    %95 = tpu.matmul %93, %94, %cst_49 {dimension_numbers = #tpu.dot_dimension_numbers<[1], [0], [0], [1], [0, 0, 1, 1], [], []>} : vector<256x128xbf16>, vector<128x128xbf16>, vector<256x128xf32> -> vector<256x128xf32>
    %96 = arith.addf %91, %95 : vector<256x128xf32>
    %97 = vector.extract_strided_slice %71 {offsets = [1, 2, 0], sizes = [16, 16, 128], strides = [1, 1, 1]} : vector<18x18x128xbf16> to vector<16x16x128xbf16>
    %98 = vector.shape_cast %97 : vector<16x16x128xbf16> to vector<256x128xbf16>
    %c640_50 = arith.constant 640 : index
    %c0_51 = arith.constant 0 : index
    %99 = vector.load %arg6[%c640_50, %c0_51] : memref<1152x128xbf16, #tpu.memory_space<vmem>>, vector<128x128xbf16>
    %cst_52 = arith.constant dense<0.000000e+00> : vector<256x128xf32>
    %100 = tpu.matmul %98, %99, %cst_52 {dimension_numbers = #tpu.dot_dimension_numbers<[1], [0], [0], [1], [0, 0, 1, 1], [], []>} : vector<256x128xbf16>, vector<128x128xbf16>, vector<256x128xf32> -> vector<256x128xf32>
    %101 = arith.addf %96, %100 : vector<256x128xf32>
    %102 = vector.extract_strided_slice %71 {offsets = [2, 0, 0], sizes = [16, 16, 128], strides = [1, 1, 1]} : vector<18x18x128xbf16> to vector<16x16x128xbf16>
    %103 = vector.shape_cast %102 : vector<16x16x128xbf16> to vector<256x128xbf16>
    %c768_53 = arith.constant 768 : index
    %c0_54 = arith.constant 0 : index
    %104 = vector.load %arg6[%c768_53, %c0_54] : memref<1152x128xbf16, #tpu.memory_space<vmem>>, vector<128x128xbf16>
    %cst_55 = arith.constant dense<0.000000e+00> : vector<256x128xf32>
    %105 = tpu.matmul %103, %104, %cst_55 {dimension_numbers = #tpu.dot_dimension_numbers<[1], [0], [0], [1], [0, 0, 1, 1], [], []>} : vector<256x128xbf16>, vector<128x128xbf16>, vector<256x128xf32> -> vector<256x128xf32>
    %106 = arith.addf %101, %105 : vector<256x128xf32>
    %107 = vector.extract_strided_slice %71 {offsets = [2, 1, 0], sizes = [16, 16, 128], strides = [1, 1, 1]} : vector<18x18x128xbf16> to vector<16x16x128xbf16>
    %108 = vector.shape_cast %107 : vector<16x16x128xbf16> to vector<256x128xbf16>
    %c896_56 = arith.constant 896 : index
    %c0_57 = arith.constant 0 : index
    %109 = vector.load %arg6[%c896_56, %c0_57] : memref<1152x128xbf16, #tpu.memory_space<vmem>>, vector<128x128xbf16>
    %cst_58 = arith.constant dense<0.000000e+00> : vector<256x128xf32>
    %110 = tpu.matmul %108, %109, %cst_58 {dimension_numbers = #tpu.dot_dimension_numbers<[1], [0], [0], [1], [0, 0, 1, 1], [], []>} : vector<256x128xbf16>, vector<128x128xbf16>, vector<256x128xf32> -> vector<256x128xf32>
    %111 = arith.addf %106, %110 : vector<256x128xf32>
    %112 = vector.extract_strided_slice %71 {offsets = [2, 2, 0], sizes = [16, 16, 128], strides = [1, 1, 1]} : vector<18x18x128xbf16> to vector<16x16x128xbf16>
    %113 = vector.shape_cast %112 : vector<16x16x128xbf16> to vector<256x128xbf16>
    %c1024_59 = arith.constant 1024 : index
    %c0_60 = arith.constant 0 : index
    %114 = vector.load %arg6[%c1024_59, %c0_60] : memref<1152x128xbf16, #tpu.memory_space<vmem>>, vector<128x128xbf16>
    %cst_61 = arith.constant dense<0.000000e+00> : vector<256x128xf32>
    %115 = tpu.matmul %113, %114, %cst_61 {dimension_numbers = #tpu.dot_dimension_numbers<[1], [0], [0], [1], [0, 0, 1, 1], [], []>} : vector<256x128xbf16>, vector<128x128xbf16>, vector<256x128xf32> -> vector<256x128xf32>
    %116 = arith.addf %111, %115 : vector<256x128xf32>
    %cst_62 = arith.constant dense<0.000000e+00> : vector<128xf32>
    %117 = vector.multi_reduction <add>, %116, %cst_62 [0] : vector<256x128xf32> to vector<128xf32>
    %118 = vector.shape_cast %117 : vector<128xf32> to vector<1x1x128xf32>
    %c0_63 = arith.constant 0 : index
    %c0_64 = arith.constant 0 : index
    %c0_65 = arith.constant 0 : index
    %119 = vector.load %arg8[%c0_63, %c0_64, %c0_65] : memref<1x1x128xf32, #tpu.memory_space<vmem>>, vector<1x1x128xf32>
    tpu.vector_store %arg8[%c0_63, %c0_64, %c0_65], %118 {strides = array<i32>} : memref<1x1x128xf32, #tpu.memory_space<vmem>>, vector<1x1x128xf32>,
    %120 = arith.mulf %116, %116 : vector<256x128xf32>
    %cst_66 = arith.constant dense<0.000000e+00> : vector<128xf32>
    %121 = vector.multi_reduction <add>, %120, %cst_66 [0] : vector<256x128xf32> to vector<128xf32>
    %122 = vector.shape_cast %121 : vector<128xf32> to vector<1x1x128xf32>
    %c0_67 = arith.constant 0 : index
    %c0_68 = arith.constant 0 : index
    %c0_69 = arith.constant 0 : index
    %123 = vector.load %arg9[%c0_67, %c0_68, %c0_69] : memref<1x1x128xf32, #tpu.memory_space<vmem>>, vector<1x1x128xf32>
    tpu.vector_store %arg9[%c0_67, %c0_68, %c0_69], %122 {strides = array<i32>} : memref<1x1x128xf32, #tpu.memory_space<vmem>>, vector<1x1x128xf32>,
    %124 = vector.shape_cast %116 : vector<256x128xf32> to vector<16x16x128xf32>
    %125 = arith.truncf %124 : vector<16x16x128xf32> to vector<16x16x128xbf16>
    %c0_70 = arith.constant 0 : index
    %c0_71 = arith.constant 0 : index
    %c0_72 = arith.constant 0 : index
    %c0_73 = arith.constant 0 : index
    %126 = vector.load %arg7[%c0_70, %c0_71, %c0_72, %c0_73] : memref<1x16x16x128xbf16, #tpu.memory_space<vmem>>, vector<1x16x16x128xbf16>
    %127 = vector.shape_cast %126 : vector<1x16x16x128xbf16> to vector<16x16x128xbf16>
    %128 = vector.shape_cast %125 : vector<16x16x128xbf16> to vector<1x16x16x128xbf16>
    tpu.vector_store %arg7[%c0_70, %c0_71, %c0_72, %c0_73], %128 {strides = array<i32>} : memref<1x16x16x128xbf16, #tpu.memory_space<vmem>>, vector<1x16x16x128xbf16>,
    return
  }
  func.func @transform_0(%arg0: i32) -> (i32, i32, i32, i32) {
    %c0_i32 = arith.constant 0 : i32
    %c0_i32_0 = arith.constant 0 : i32
    %c0_i32_1 = arith.constant 0 : i32
    %c0_i32_2 = arith.constant 0 : i32
    return %arg0, %c0_i32, %c0_i32_0, %c0_i32_1 : i32, i32, i32, i32
  }
  func.func @transform_1(%arg0: i32) -> (i32, i32, i32, i32) {
    %c0_i32 = arith.constant 0 : i32
    %c0_i32_0 = arith.constant 0 : i32
    %c0_i32_1 = arith.constant 0 : i32
    %c0_i32_2 = arith.constant 0 : i32
    return %arg0, %c0_i32, %c0_i32_0, %c0_i32_1 : i32, i32, i32, i32
  }
  func.func @transform_2(%arg0: i32) -> (i32, i32) {
    %c0_i32 = arith.constant 0 : i32
    %c0_i32_0 = arith.constant 0 : i32
    %c0_i32_1 = arith.constant 0 : i32
    return %c0_i32, %c0_i32_0 : i32, i32
  }
  func.func @transform_3(%arg0: i32) -> (i32, i32) {
    %c0_i32 = arith.constant 0 : i32
    %c0_i32_0 = arith.constant 0 : i32
    %c0_i32_1 = arith.constant 0 : i32
    return %c0_i32, %c0_i32_0 : i32, i32
  }
  func.func @transform_4(%arg0: i32) -> (i32, i32) {
    %c0_i32 = arith.constant 0 : i32
    %c0_i32_0 = arith.constant 0 : i32
    %c0_i32_1 = arith.constant 0 : i32
    return %c0_i32, %c0_i32_0 : i32, i32
  }
  func.func @transform_5(%arg0: i32) -> (i32, i32) {
    %c0_i32 = arith.constant 0 : i32
    %c0_i32_0 = arith.constant 0 : i32
    %c0_i32_1 = arith.constant 0 : i32
    return %c0_i32, %c0_i32_0 : i32, i32
  }
  func.func @transform_6(%arg0: i32) -> (i32, i32, i32, i32) {
    %c0_i32 = arith.constant 0 : i32
    %c0_i32_0 = arith.constant 0 : i32
    %c0_i32_1 = arith.constant 0 : i32
    %c0_i32_2 = arith.constant 0 : i32
    return %arg0, %c0_i32, %c0_i32_0, %c0_i32_1 : i32, i32, i32, i32
  }
  func.func @transform_7(%arg0: i32) -> (i32, i32, i32) {
    %c0_i32 = arith.constant 0 : i32
    %c0_i32_0 = arith.constant 0 : i32
    %c0_i32_1 = arith.constant 0 : i32
    return %arg0, %c0_i32, %c0_i32_0 : i32, i32, i32
  }
  func.func @transform_8(%arg0: i32) -> (i32, i32, i32) {
    %c0_i32 = arith.constant 0 : i32
    %c0_i32_0 = arith.constant 0 : i32
    %c0_i32_1 = arith.constant 0 : i32
    return %arg0, %c0_i32, %c0_i32_0 : i32, i32, i32
  }
}

module attributes {stable_mosaic.version = 11 : i64} {
  func.func @_bn_relu_kernel(%arg0: i32, %arg1: memref<512x128xbf16, #tpu.memory_space<vmem>>, %arg2: memref<1x128xf32, #tpu.memory_space<vmem>>, %arg3: memref<1x128xf32, #tpu.memory_space<vmem>>, %arg4: memref<512x128xf32, #tpu.memory_space<vmem>>) attributes {dimension_semantics = [#tpu.dimension_semantics<parallel>], iteration_bounds = array<i64: 1>, scalar_prefetch = 0 : i64, scratch_operands = 0 : i64, tpu.core_type = #tpu.core_type<tc>, window_params = [{transform_indices = @transform_0, window_bounds = array<i64: 512, 128>}, {pipeline_mode = #tpu.pipeline_mode<synchronous>, transform_indices = @transform_1, window_bounds = array<i64: 1, 128>}, {pipeline_mode = #tpu.pipeline_mode<synchronous>, transform_indices = @transform_2, window_bounds = array<i64: 1, 128>}, {transform_indices = @transform_3, window_bounds = array<i64: 512, 128>}]} {
    %c0 = arith.constant 0 : index
    %c0_0 = arith.constant 0 : index
    %0 = vector.load %arg1[%c0, %c0_0] : memref<512x128xbf16, #tpu.memory_space<vmem>>, vector<512x128xbf16>
    %1 = arith.extf %0 : vector<512x128xbf16> to vector<512x128xf32>
    %c0_1 = arith.constant 0 : index
    %c0_2 = arith.constant 0 : index
    %2 = vector.load %arg2[%c0_1, %c0_2] : memref<1x128xf32, #tpu.memory_space<vmem>>, vector<1x128xf32>
    %3 = vector.shape_cast %2 : vector<1x128xf32> to vector<128xf32>
    %4 = vector.shape_cast %3 : vector<128xf32> to vector<1x128xf32>
    %5 = vector.broadcast %4 : vector<1x128xf32> to vector<512x128xf32>
    %6 = arith.mulf %1, %5 : vector<512x128xf32>
    %c0_3 = arith.constant 0 : index
    %c0_4 = arith.constant 0 : index
    %7 = vector.load %arg3[%c0_3, %c0_4] : memref<1x128xf32, #tpu.memory_space<vmem>>, vector<1x128xf32>
    %8 = vector.shape_cast %7 : vector<1x128xf32> to vector<128xf32>
    %9 = vector.shape_cast %8 : vector<128xf32> to vector<1x128xf32>
    %10 = vector.broadcast %9 : vector<1x128xf32> to vector<512x128xf32>
    %11 = arith.addf %6, %10 : vector<512x128xf32>
    %cst = arith.constant 0.000000e+00 : f32
    %12 = vector.broadcast %cst : f32 to vector<512x128xf32>
    %13 = arith.maximumf %11, %12 : vector<512x128xf32>
    %c0_5 = arith.constant 0 : index
    %c0_6 = arith.constant 0 : index
    %14 = vector.load %arg4[%c0_5, %c0_6] : memref<512x128xf32, #tpu.memory_space<vmem>>, vector<512x128xf32>
    tpu.vector_store %arg4[%c0_5, %c0_6], %13 {strides = array<i32>} : memref<512x128xf32, #tpu.memory_space<vmem>>, vector<512x128xf32>,
    return
  }
  func.func @transform_0(%arg0: i32) -> (i32, i32) {
    %c0_i32 = arith.constant 0 : i32
    %c0_i32_0 = arith.constant 0 : i32
    return %arg0, %c0_i32 : i32, i32
  }
  func.func @transform_1(%arg0: i32) -> (i32, i32) {
    %c0_i32 = arith.constant 0 : i32
    %c0_i32_0 = arith.constant 0 : i32
    %c0_i32_1 = arith.constant 0 : i32
    return %c0_i32, %c0_i32_0 : i32, i32
  }
  func.func @transform_2(%arg0: i32) -> (i32, i32) {
    %c0_i32 = arith.constant 0 : i32
    %c0_i32_0 = arith.constant 0 : i32
    %c0_i32_1 = arith.constant 0 : i32
    return %c0_i32, %c0_i32_0 : i32, i32
  }
  func.func @transform_3(%arg0: i32) -> (i32, i32) {
    %c0_i32 = arith.constant 0 : i32
    %c0_i32_0 = arith.constant 0 : i32
    return %arg0, %c0_i32 : i32, i32
  }
}

</mosaic_0001>

<bundles_post_ra>
// kernel: stack_decoder_forward.5
= control target key start
LH: loop header
LB: loop body
LE: loop exit
PB: predicated region body
PF: predicated region fallthrough
CT: control target
= control target key end

     0   :  { %s1023_s0 = inlined_call_operand.vmem [shape: bf16[512,128], index: 0, kind: input, shape index: {}]   ;;  %s1024_s1 = inlined_call_operand.vmem [shape: f32[1,128], index: 1, kind: input, shape index: {}]   ;;  %s1025_s2 = inlined_call_operand.vmem [shape: f32[1,128], index: 2, kind: input, shape index: {}]   ;;  %s1026_s3 = inlined_call_operand.vmem [shape: f32[512,128], index: 3, kind: output, shape index: {}]  }
   0x1   :  { %v419_v0 = vld [vmem:[%s1023_s0] sm:$0xff]   ;;  %v546_v4 = vld [vmem:[%s1023_s0 + $0x8] sm:$0xff]   ;;  %v547_v5 = vld [vmem:[%s1023_s0 + $0x10] sm:$0xff]  }
   0x2   :  { %v603_v1 = vld [vmem:[%s1024_s1] ss:$0 sm:$0xff]  ;;  %v420_v2 = vunpack.c.l.bf16 %v419_v0  ;;  %v421_v3 = vunpack.c.h.bf16 %v419_v0  ;;  %v548_v6 = vld [vmem:[%s1023_s0 + $0x18] sm:$0xff]   ;;  %v424_v8 = vunpack.c.l.bf16 %v546_v4  ;;  %v425_v9 = vunpack.c.h.bf16 %v546_v4  ;;  %v550_v33 = vld [vmem:[%s1023_s0 + $0x28] sm:$0xff]  }
   0x3   :  { %v617_v7 = vld [vmem:[%s1025_s2] ss:$0 sm:$0xff]  ;;  %v428_v10 = vunpack.c.l.bf16 %v547_v5  ;;  %v429_v11 = vunpack.c.h.bf16 %v547_v5  ;;  %v432_v14 = vunpack.c.l.bf16 %v548_v6  ;;  %v433_v15 = vunpack.c.h.bf16 %v548_v6  ;;  %v551_v34 = vld [vmem:[%s1023_s0 + $0x30] sm:$0xff]   ;;  %v552_v39 = vld [vmem:[%s1023_s0 + $0x38] sm:$0xff]  }
   0x4   :  { %v149_v12 = vmul.f32 %v420_v2, %v603_v1  ;;  %v150_v13 = vmul.f32 %v421_v3, %v603_v1  ;;  %v151_v16 = vmul.f32 %v424_v8, %v603_v1  ;;  %v152_v17 = vmul.f32 %v425_v9, %v603_v1  ;;  %v549_v28 = vld [vmem:[%s1023_s0 + $0x20] sm:$0xff]   ;;  %v554_v6 = vld [vmem:[%s1023_s0 + $0x48] sm:$0xff]   ;;  %v555_v8 = vld [vmem:[%s1023_s0 + $0x50] sm:$0xff]  }
   0x5   :  { %v153_v18 = vmul.f32 %v428_v10, %v603_v1  ;;  %v154_v19 = vmul.f32 %v429_v11, %v603_v1  ;;  %v155_v22 = vmul.f32 %v432_v14, %v603_v1  ;;  %v156_v23 = vmul.f32 %v433_v15, %v603_v1  ;;  %v553_v0 = vld [vmem:[%s1023_s0 + $0x40] sm:$0xff]  }
   0x6   :  { %v220_v20 = vadd.f32 %v617_v7, %v149_v12  ;;  %v221_v21 = vadd.f32 %v617_v7, %v150_v13  ;;  %v222_v24 = vadd.f32 %v617_v7, %v151_v16  ;;  %v223_v25 = vadd.f32 %v617_v7, %v152_v17  ;;  %v556_v13 = vld [vmem:[%s1023_s0 + $0x58] sm:$0xff]  }
   0x7   :  { %v224_v26 = vadd.f32 %v617_v7, %v153_v18  ;;  %v225_v27 = vadd.f32 %v617_v7, %v154_v19  ;;  %v226_v31 = vadd.f32 %v617_v7, %v155_v22  ;;  %v227_v32 = vadd.f32 %v617_v7, %v156_v23 }
   0x8   :  { %v284_v29 = vmax.f32 %v220_v20, 0.0  ;;  %v285_v30 = vmax.f32 %v221_v21, 0.0  ;;  %v286_v35 = vmax.f32 %v222_v24, 0.0  ;;  %v287_v36 = vmax.f32 %v223_v25, 0.0 }
   0x9   :  { %v288_v37 = vmax.f32 %v224_v26, 0.0  ;;  %v289_v38 = vmax.f32 %v225_v27, 0.0  ;;  %v290_v40 = vmax.f32 %v226_v31, 0.0  ;;  %v291_v41 = vmax.f32 %v227_v32, 0.0 }
   0xa   :  { %348 = vst [vmem:[%s1026_s3] sm:$0xff] %v284_v29  ;;  %349 = vst [vmem:[%s1026_s3 + $0x8] sm:$0xff] %v285_v30  ;;  %v436_v42 = vunpack.c.l.bf16 %v549_v28  ;;  %v437_v43 = vunpack.c.h.bf16 %v549_v28  ;;  %v440_v44 = vunpack.c.l.bf16 %v550_v33  ;;  %v441_v45 = vunpack.c.h.bf16 %v550_v33 }
   0xb   :  { %350 = vst [vmem:[%s1026_s3 + $0x10] sm:$0xff] %v286_v35  ;;  %351 = vst [vmem:[%s1026_s3 + $0x18] sm:$0xff] %v287_v36  ;;  %v444_v46 = vunpack.c.l.bf16 %v551_v34  ;;  %v445_v47 = vunpack.c.h.bf16 %v551_v34  ;;  %v448_v50 = vunpack.c.l.bf16 %v552_v39  ;;  %v449_v51 = vunpack.c.h.bf16 %v552_v39 }
   0xc   :  { %352 = vst [vmem:[%s1026_s3 + $0x20] sm:$0xff] %v288_v37  ;;  %353 = vst [vmem:[%s1026_s3 + $0x28] sm:$0xff] %v289_v38  ;;  %v157_v48 = vmul.f32 %v436_v42, %v603_v1  ;;  %v158_v49 = vmul.f32 %v437_v43, %v603_v1  ;;  %v159_v52 = vmul.f32 %v440_v44, %v603_v1  ;;  %v452_v16 = vunpack.c.l.bf16 %v553_v0  ;;  %v557_v38 = vld [vmem:[%s1023_s0 + $0x60] sm:$0xff]   ;;  %v558_v43 = vld [vmem:[%s1023_s0 + $0x68] sm:$0xff]  }
   0xd   :  { %354 = vst [vmem:[%s1026_s3 + $0x30] sm:$0xff] %v290_v40  ;;  %355 = vst [vmem:[%s1026_s3 + $0x38] sm:$0xff] %v291_v41  ;;  %v160_v53 = vmul.f32 %v441_v45, %v603_v1  ;;  %v161_v54 = vmul.f32 %v444_v46, %v603_v1  ;;  %v162_v55 = vmul.f32 %v445_v47, %v603_v1  ;;  %v453_v17 = vunpack.c.h.bf16 %v553_v0  ;;  %v559_v44 = vld [vmem:[%s1023_s0 + $0x70] sm:$0xff]  }
   0xe   :  { %v228_v56 = vadd.f32 %v617_v7, %v157_v48  ;;  %v229_v57 = vadd.f32 %v617_v7, %v158_v49  ;;  %v163_v58 = vmul.f32 %v448_v50, %v603_v1  ;;  %v164_v59 = vmul.f32 %v449_v51, %v603_v1  ;;  %v560_v49 = vld [vmem:[%s1023_s0 + $0x78] sm:$0xff]  }
   0xf   :  { %v230_v60 = vadd.f32 %v617_v7, %v159_v52  ;;  %v231_v61 = vadd.f32 %v617_v7, %v160_v53  ;;  %v232_v62 = vadd.f32 %v617_v7, %v161_v54  ;;  %v233_v63 = vadd.f32 %v617_v7, %v162_v55 }
  0x10   :  { %v292_v2 = vmax.f32 %v228_v56, 0.0  ;;  %v293_v3 = vmax.f32 %v229_v57, 0.0  ;;  %v234_v4 = vadd.f32 %v617_v7, %v163_v58  ;;  %v235_v5 = vadd.f32 %v617_v7, %v164_v59 }
  0x11   :  { %v294_v9 = vmax.f32 %v230_v60, 0.0  ;;  %v295_v10 = vmax.f32 %v231_v61, 0.0  ;;  %v296_v11 = vmax.f32 %v232_v62, 0.0  ;;  %v297_v12 = vmax.f32 %v233_v63, 0.0 }
  0x12   :  { %356 = vst [vmem:[%s1026_s3 + $0x40] sm:$0xff] %v292_v2  ;;  %357 = vst [vmem:[%s1026_s3 + $0x48] sm:$0xff] %v293_v3  ;;  %v298_v14 = vmax.f32 %v234_v4, 0.0  ;;  %v299_v15 = vmax.f32 %v235_v5, 0.0  ;;  %v456_v18 = vunpack.c.l.bf16 %v554_v6  ;;  %v457_v19 = vunpack.c.h.bf16 %v554_v6 }
  0x13   :  { %358 = vst [vmem:[%s1026_s3 + $0x50] sm:$0xff] %v294_v9  ;;  %359 = vst [vmem:[%s1026_s3 + $0x58] sm:$0xff] %v295_v10  ;;  %v460_v20 = vunpack.c.l.bf16 %v555_v8  ;;  %v461_v21 = vunpack.c.h.bf16 %v555_v8  ;;  %v165_v22 = vmul.f32 %v452_v16, %v603_v1  ;;  %v166_v23 = vmul.f32 %v453_v17, %v603_v1  ;;  %v562_v17 = vld [vmem:[%s1023_s0 + $0x88] sm:$0xff]  }
  0x14   :  { %360 = vst [vmem:[%s1026_s3 + $0x60] sm:$0xff] %v296_v11  ;;  %361 = vst [vmem:[%s1026_s3 + $0x68] sm:$0xff] %v297_v12  ;;  %v464_v24 = vunpack.c.l.bf16 %v556_v13  ;;  %v465_v25 = vunpack.c.h.bf16 %v556_v13  ;;  %v167_v26 = vmul.f32 %v456_v18, %v603_v1  ;;  %v168_v27 = vmul.f32 %v457_v19, %v603_v1  ;;  %v561_v12 = vld [vmem:[%s1023_s0 + $0x80] sm:$0xff]   ;;  %v563_v18 = vld [vmem:[%s1023_s0 + $0x90] sm:$0xff]  }
  0x15   :  { %362 = vst [vmem:[%s1026_s3 + $0x70] sm:$0xff] %v298_v14  ;;  %363 = vst [vmem:[%s1026_s3 + $0x78] sm:$0xff] %v299_v15  ;;  %v169_v28 = vmul.f32 %v460_v20, %v603_v1  ;;  %v170_v29 = vmul.f32 %v461_v21, %v603_v1  ;;  %v236_v30 = vadd.f32 %v617_v7, %v165_v22  ;;  %v468_v52 = vunpack.c.l.bf16 %v557_v38 }
  0x16   :  { %v237_v31 = vadd.f32 %v617_v7, %v166_v23  ;;  %v171_v32 = vmul.f32 %v464_v24, %v603_v1  ;;  %v172_v33 = vmul.f32 %v465_v25, %v603_v1  ;;  %v238_v34 = vadd.f32 %v617_v7, %v167_v26  ;;  %v564_v23 = vld [vmem:[%s1023_s0 + $0x98] sm:$0xff]  }
  0x17   :  { %v239_v35 = vadd.f32 %v617_v7, %v168_v27  ;;  %v240_v36 = vadd.f32 %v617_v7, %v169_v28  ;;  %v241_v37 = vadd.f32 %v617_v7, %v170_v29  ;;  %v300_v39 = vmax.f32 %v236_v30, 0.0 }
  0x18   :  { %v301_v40 = vmax.f32 %v237_v31, 0.0  ;;  %v242_v41 = vadd.f32 %v617_v7, %v171_v32  ;;  %v243_v42 = vadd.f32 %v617_v7, %v172_v33  ;;  %v302_v45 = vmax.f32 %v238_v34, 0.0 }
  0x19   :  { %v303_v46 = vmax.f32 %v239_v35, 0.0  ;;  %v304_v47 = vmax.f32 %v240_v36, 0.0  ;;  %v305_v48 = vmax.f32 %v241_v37, 0.0  ;;  %364 = vst [vmem:[%s1026_s3 + $0x80] sm:$0xff] %v300_v39  ;;  %v469_v53 = vunpack.c.h.bf16 %v557_v38 }
  0x1a   :  { %365 = vst [vmem:[%s1026_s3 + $0x88] sm:$0xff] %v301_v40  ;;  %v306_v50 = vmax.f32 %v242_v41, 0.0  ;;  %v307_v51 = vmax.f32 %v243_v42, 0.0  ;;  %366 = vst [vmem:[%s1026_s3 + $0x90] sm:$0xff] %v302_v45  ;;  %v472_v54 = vunpack.c.l.bf16 %v558_v43  ;;  %v473_v55 = vunpack.c.h.bf16 %v558_v43 }
  0x1b   :  { %367 = vst [vmem:[%s1026_s3 + $0x98] sm:$0xff] %v303_v46  ;;  %368 = vst [vmem:[%s1026_s3 + $0xa0] sm:$0xff] %v304_v47  ;;  %v476_v56 = vunpack.c.l.bf16 %v559_v44  ;;  %v477_v57 = vunpack.c.h.bf16 %v559_v44  ;;  %v173_v58 = vmul.f32 %v468_v52, %v603_v1  ;;  %v174_v59 = vmul.f32 %v469_v53, %v603_v1  ;;  %v566_v53 = vld [vmem:[%s1023_s0 + $0xa8] sm:$0xff]  }
  0x1c   :  { %369 = vst [vmem:[%s1026_s3 + $0xa8] sm:$0xff] %v305_v48  ;;  %370 = vst [vmem:[%s1026_s3 + $0xb0] sm:$0xff] %v306_v50  ;;  %v480_v60 = vunpack.c.l.bf16 %v560_v49  ;;  %v481_v61 = vunpack.c.h.bf16 %v560_v49  ;;  %v175_v62 = vmul.f32 %v472_v54, %v603_v1  ;;  %v176_v63 = vmul.f32 %v473_v55, %v603_v1  ;;  %v565_v48 = vld [vmem:[%s1023_s0 + $0xa0] sm:$0xff]   ;;  %v567_v54 = vld [vmem:[%s1023_s0 + $0xb0] sm:$0xff]  }
  0x1d   :  { %371 = vst [vmem:[%s1026_s3 + $0xb8] sm:$0xff] %v307_v51  ;;  %v177_v0 = vmul.f32 %v476_v56, %v603_v1  ;;  %v178_v2 = vmul.f32 %v477_v57, %v603_v1  ;;  %v244_v3 = vadd.f32 %v617_v7, %v173_v58  ;;  %v245_v4 = vadd.f32 %v617_v7, %v174_v59  ;;  %v568_v59 = vld [vmem:[%s1023_s0 + $0xb8] sm:$0xff]  }
  0x1e   :  { %v179_v5 = vmul.f32 %v480_v60, %v603_v1  ;;  %v180_v6 = vmul.f32 %v481_v61, %v603_v1  ;;  %v246_v8 = vadd.f32 %v617_v7, %v175_v62  ;;  %v247_v9 = vadd.f32 %v617_v7, %v176_v63 }
  0x1f   :  { %v248_v10 = vadd.f32 %v617_v7, %v177_v0  ;;  %v249_v11 = vadd.f32 %v617_v7, %v178_v2  ;;  %v308_v13 = vmax.f32 %v244_v3, 0.0  ;;  %v309_v14 = vmax.f32 %v245_v4, 0.0 }
  0x20   :  { %v250_v15 = vadd.f32 %v617_v7, %v179_v5  ;;  %v251_v16 = vadd.f32 %v617_v7, %v180_v6  ;;  %v310_v19 = vmax.f32 %v246_v8, 0.0  ;;  %v311_v20 = vmax.f32 %v247_v9, 0.0 }
  0x21   :  { %v312_v21 = vmax.f32 %v248_v10, 0.0  ;;  %v313_v22 = vmax.f32 %v249_v11, 0.0  ;;  %372 = vst [vmem:[%s1026_s3 + $0xc0] sm:$0xff] %v308_v13  ;;  %373 = vst [vmem:[%s1026_s3 + $0xc8] sm:$0xff] %v309_v14  ;;  %v484_v26 = vunpack.c.l.bf16 %v561_v12  ;;  %v485_v27 = vunpack.c.h.bf16 %v561_v12 }
  0x22   :  { %v314_v24 = vmax.f32 %v250_v15, 0.0  ;;  %v315_v25 = vmax.f32 %v251_v16, 0.0  ;;  %374 = vst [vmem:[%s1026_s3 + $0xd0] sm:$0xff] %v310_v19  ;;  %375 = vst [vmem:[%s1026_s3 + $0xd8] sm:$0xff] %v311_v20  ;;  %v488_v28 = vunpack.c.l.bf16 %v562_v17  ;;  %v489_v29 = vunpack.c.h.bf16 %v562_v17 }
  0x23   :  { %376 = vst [vmem:[%s1026_s3 + $0xe0] sm:$0xff] %v312_v21  ;;  %377 = vst [vmem:[%s1026_s3 + $0xe8] sm:$0xff] %v313_v22  ;;  %v492_v30 = vunpack.c.l.bf16 %v563_v18  ;;  %v493_v31 = vunpack.c.h.bf16 %v563_v18  ;;  %v181_v32 = vmul.f32 %v484_v26, %v603_v1  ;;  %v182_v33 = vmul.f32 %v485_v27, %v603_v1  ;;  %v569_v22 = vld [vmem:[%s1023_s0 + $0xc0] sm:$0xff]   ;;  %v570_v27 = vld [vmem:[%s1023_s0 + $0xc8] sm:$0xff]  }
  0x24   :  { %378 = vst [vmem:[%s1026_s3 + $0xf0] sm:$0xff] %v314_v24  ;;  %379 = vst [vmem:[%s1026_s3 + $0xf8] sm:$0xff] %v315_v25  ;;  %v496_v34 = vunpack.c.l.bf16 %v564_v23  ;;  %v497_v35 = vunpack.c.h.bf16 %v564_v23  ;;  %v183_v36 = vmul.f32 %v488_v28, %v603_v1  ;;  %v184_v37 = vmul.f32 %v489_v29, %v603_v1  ;;  %v571_v28 = vld [vmem:[%s1023_s0 + $0xd0] sm:$0xff]  }
  0x25   :  { %v185_v38 = vmul.f32 %v492_v30, %v603_v1  ;;  %v186_v39 = vmul.f32 %v493_v31, %v603_v1  ;;  %v252_v40 = vadd.f32 %v617_v7, %v181_v32  ;;  %v253_v41 = vadd.f32 %v617_v7, %v182_v33  ;;  %v572_v33 = vld [vmem:[%s1023_s0 + $0xd8] sm:$0xff]  }
  0x26   :  { %v187_v42 = vmul.f32 %v496_v34, %v603_v1  ;;  %v188_v43 = vmul.f32 %v497_v35, %v603_v1  ;;  %v254_v44 = vadd.f32 %v617_v7, %v183_v36  ;;  %v255_v45 = vadd.f32 %v617_v7, %v184_v37 }
  0x27   :  { %v256_v46 = vadd.f32 %v617_v7, %v185_v38  ;;  %v257_v47 = vadd.f32 %v617_v7, %v186_v39  ;;  %v316_v49 = vmax.f32 %v252_v40, 0.0  ;;  %v317_v50 = vmax.f32 %v253_v41, 0.0 }
  0x28   :  { %v258_v51 = vadd.f32 %v617_v7, %v187_v42  ;;  %v259_v52 = vadd.f32 %v617_v7, %v188_v43  ;;  %v318_v55 = vmax.f32 %v254_v44, 0.0  ;;  %v319_v56 = vmax.f32 %v255_v45, 0.0 }
  0x29   :  { %v320_v57 = vmax.f32 %v256_v46, 0.0  ;;  %v321_v58 = vmax.f32 %v257_v47, 0.0  ;;  %380 = vst [vmem:[%s1026_s3 + $0x100] sm:$0xff] %v316_v49  ;;  %381 = vst [vmem:[%s1026_s3 + $0x108] sm:$0xff] %v317_v50  ;;  %v500_v62 = vunpack.c.l.bf16 %v565_v48  ;;  %v501_v63 = vunpack.c.h.bf16 %v565_v48 }
  0x2a   :  { %v322_v60 = vmax.f32 %v258_v51, 0.0  ;;  %v323_v61 = vmax.f32 %v259_v52, 0.0  ;;  %382 = vst [vmem:[%s1026_s3 + $0x110] sm:$0xff] %v318_v55  ;;  %383 = vst [vmem:[%s1026_s3 + $0x118] sm:$0xff] %v319_v56  ;;  %v504_v0 = vunpack.c.l.bf16 %v566_v53  ;;  %v505_v2 = vunpack.c.h.bf16 %v566_v53 }
  0x2b   :  { %384 = vst [vmem:[%s1026_s3 + $0x120] sm:$0xff] %v320_v57  ;;  %385 = vst [vmem:[%s1026_s3 + $0x128] sm:$0xff] %v321_v58  ;;  %v508_v3 = vunpack.c.l.bf16 %v567_v54  ;;  %v509_v4 = vunpack.c.h.bf16 %v567_v54  ;;  %v189_v5 = vmul.f32 %v500_v62, %v603_v1  ;;  %v190_v6 = vmul.f32 %v501_v63, %v603_v1  ;;  %v573_v58 = vld [vmem:[%s1023_s0 + $0xe0] sm:$0xff]   ;;  %v574_v63 = vld [vmem:[%s1023_s0 + $0xe8] sm:$0xff]  }
  0x2c   :  { %386 = vst [vmem:[%s1026_s3 + $0x130] sm:$0xff] %v322_v60  ;;  %387 = vst [vmem:[%s1026_s3 + $0x138] sm:$0xff] %v323_v61  ;;  %v512_v8 = vunpack.c.l.bf16 %v568_v59  ;;  %v513_v9 = vunpack.c.h.bf16 %v568_v59  ;;  %v191_v10 = vmul.f32 %v504_v0, %v603_v1  ;;  %v192_v11 = vmul.f32 %v505_v2, %v603_v1  ;;  %v575_v0 = vld [vmem:[%s1023_s0 + $0xf0] sm:$0xff]  }
  0x2d   :  { %v193_v12 = vmul.f32 %v508_v3, %v603_v1  ;;  %v194_v13 = vmul.f32 %v509_v4, %v603_v1  ;;  %v260_v14 = vadd.f32 %v617_v7, %v189_v5  ;;  %v261_v15 = vadd.f32 %v617_v7, %v190_v6  ;;  %v576_v6 = vld [vmem:[%s1023_s0 + $0xf8] sm:$0xff]  }
  0x2e   :  { %v195_v16 = vmul.f32 %v512_v8, %v603_v1  ;;  %v196_v17 = vmul.f32 %v513_v9, %v603_v1  ;;  %v262_v18 = vadd.f32 %v617_v7, %v191_v10  ;;  %v263_v19 = vadd.f32 %v617_v7, %v192_v11 }
  0x2f   :  { %v264_v20 = vadd.f32 %v617_v7, %v193_v12  ;;  %v265_v21 = vadd.f32 %v617_v7, %v194_v13  ;;  %v324_v23 = vmax.f32 %v260_v14, 0.0  ;;  %v325_v24 = vmax.f32 %v261_v15, 0.0 }
  0x30   :  { %v266_v25 = vadd.f32 %v617_v7, %v195_v16  ;;  %v267_v26 = vadd.f32 %v617_v7, %v196_v17  ;;  %v326_v29 = vmax.f32 %v262_v18, 0.0  ;;  %v327_v30 = vmax.f32 %v263_v19, 0.0 }
  0x31   :  { %v328_v31 = vmax.f32 %v264_v20, 0.0  ;;  %v329_v32 = vmax.f32 %v265_v21, 0.0  ;;  %388 = vst [vmem:[%s1026_s3 + $0x140] sm:$0xff] %v324_v23  ;;  %389 = vst [vmem:[%s1026_s3 + $0x148] sm:$0xff] %v325_v24  ;;  %v516_v36 = vunpack.c.l.bf16 %v569_v22  ;;  %v517_v37 = vunpack.c.h.bf16 %v569_v22 }
  0x32   :  { %v330_v34 = vmax.f32 %v266_v25, 0.0  ;;  %v331_v35 = vmax.f32 %v267_v26, 0.0  ;;  %390 = vst [vmem:[%s1026_s3 + $0x150] sm:$0xff] %v326_v29  ;;  %391 = vst [vmem:[%s1026_s3 + $0x158] sm:$0xff] %v327_v30  ;;  %v520_v38 = vunpack.c.l.bf16 %v570_v27  ;;  %v521_v39 = vunpack.c.h.bf16 %v570_v27 }
  0x33   :  { %392 = vst [vmem:[%s1026_s3 + $0x160] sm:$0xff] %v328_v31  ;;  %393 = vst [vmem:[%s1026_s3 + $0x168] sm:$0xff] %v329_v32  ;;  %v524_v40 = vunpack.c.l.bf16 %v571_v28  ;;  %v525_v41 = vunpack.c.h.bf16 %v571_v28  ;;  %v197_v42 = vmul.f32 %v516_v36, %v603_v1  ;;  %v198_v43 = vmul.f32 %v517_v37, %v603_v1 }
  0x34   :  { %394 = vst [vmem:[%s1026_s3 + $0x170] sm:$0xff] %v330_v34  ;;  %395 = vst [vmem:[%s1026_s3 + $0x178] sm:$0xff] %v331_v35  ;;  %v528_v44 = vunpack.c.l.bf16 %v572_v33  ;;  %v529_v45 = vunpack.c.h.bf16 %v572_v33  ;;  %v199_v46 = vmul.f32 %v520_v38, %v603_v1  ;;  %v200_v47 = vmul.f32 %v521_v39, %v603_v1 }
  0x35   :  { %v201_v48 = vmul.f32 %v524_v40, %v603_v1  ;;  %v202_v49 = vmul.f32 %v525_v41, %v603_v1  ;;  %v268_v50 = vadd.f32 %v617_v7, %v197_v42  ;;  %v269_v51 = vadd.f32 %v617_v7, %v198_v43 }
  0x36   :  { %v203_v52 = vmul.f32 %v528_v44, %v603_v1  ;;  %v204_v53 = vmul.f32 %v529_v45, %v603_v1  ;;  %v270_v54 = vadd.f32 %v617_v7, %v199_v46  ;;  %v271_v55 = vadd.f32 %v617_v7, %v200_v47 }
  0x37   :  { %v272_v56 = vadd.f32 %v617_v7, %v201_v48  ;;  %v273_v57 = vadd.f32 %v617_v7, %v202_v49  ;;  %v332_v59 = vmax.f32 %v268_v50, 0.0  ;;  %v333_v60 = vmax.f32 %v269_v51, 0.0 }
  0x38   :  { %v274_v61 = vadd.f32 %v617_v7, %v203_v52  ;;  %v275_v62 = vadd.f32 %v617_v7, %v204_v53  ;;  %v334_v2 = vmax.f32 %v270_v54, 0.0  ;;  %v335_v3 = vmax.f32 %v271_v55, 0.0 }
  0x39   :  { %v336_v4 = vmax.f32 %v272_v56, 0.0  ;;  %v337_v5 = vmax.f32 %v273_v57, 0.0  ;;  %396 = vst [vmem:[%s1026_s3 + $0x180] sm:$0xff] %v332_v59  ;;  %397 = vst [vmem:[%s1026_s3 + $0x188] sm:$0xff] %v333_v60  ;;  %v532_v10 = vunpack.c.l.bf16 %v573_v58  ;;  %v533_v11 = vunpack.c.h.bf16 %v573_v58 }
  0x3a   :  { %v338_v8 = vmax.f32 %v274_v61, 0.0  ;;  %v339_v9 = vmax.f32 %v275_v62, 0.0  ;;  %398 = vst [vmem:[%s1026_s3 + $0x190] sm:$0xff] %v334_v2  ;;  %399 = vst [vmem:[%s1026_s3 + $0x198] sm:$0xff] %v335_v3  ;;  %v536_v12 = vunpack.c.l.bf16 %v574_v63  ;;  %v537_v13 = vunpack.c.h.bf16 %v574_v63 }
  0x3b   :  { %400 = vst [vmem:[%s1026_s3 + $0x1a0] sm:$0xff] %v336_v4  ;;  %401 = vst [vmem:[%s1026_s3 + $0x1a8] sm:$0xff] %v337_v5  ;;  %v540_v14 = vunpack.c.l.bf16 %v575_v0  ;;  %v541_v15 = vunpack.c.h.bf16 %v575_v0  ;;  %v205_v16 = vmul.f32 %v532_v10, %v603_v1  ;;  %v206_v17 = vmul.f32 %v533_v11, %v603_v1 }
  0x3c   :  { %402 = vst [vmem:[%s1026_s3 + $0x1b0] sm:$0xff] %v338_v8  ;;  %403 = vst [vmem:[%s1026_s3 + $0x1b8] sm:$0xff] %v339_v9  ;;  %v544_v18 = vunpack.c.l.bf16 %v576_v6  ;;  %v545_v19 = vunpack.c.h.bf16 %v576_v6  ;;  %v207_v20 = vmul.f32 %v536_v12, %v603_v1  ;;  %v208_v21 = vmul.f32 %v537_v13, %v603_v1 }
  0x3d   :  { %v209_v22 = vmul.f32 %v540_v14, %v603_v1  ;;  %v210_v23 = vmul.f32 %v541_v15, %v603_v1  ;;  %v276_v24 = vadd.f32 %v617_v7, %v205_v16  ;;  %v277_v25 = vadd.f32 %v617_v7, %v206_v17 }
  0x3e   :  { %v211_v26 = vmul.f32 %v544_v18, %v603_v1  ;;  %v212_v27 = vmul.f32 %v545_v19, %v603_v1  ;;  %v278_v28 = vadd.f32 %v617_v7, %v207_v20  ;;  %v279_v29 = vadd.f32 %v617_v7, %v208_v21 }
  0x3f   :  { %v280_v30 = vadd.f32 %v617_v7, %v209_v22  ;;  %v281_v31 = vadd.f32 %v617_v7, %v210_v23  ;;  %v340_v32 = vmax.f32 %v276_v24, 0.0  ;;  %v341_v33 = vmax.f32 %v277_v25, 0.0 }
  0x40   :  { %v282_v34 = vadd.f32 %v617_v7, %v211_v26  ;;  %v283_v35 = vadd.f32 %v617_v7, %v212_v27  ;;  %v342_v36 = vmax.f32 %v278_v28, 0.0  ;;  %v343_v37 = vmax.f32 %v279_v29, 0.0 }
  0x41   :  { %v344_v38 = vmax.f32 %v280_v30, 0.0  ;;  %v345_v39 = vmax.f32 %v281_v31, 0.0  ;;  %404 = vst [vmem:[%s1026_s3 + $0x1c0] sm:$0xff] %v340_v32  ;;  %405 = vst [vmem:[%s1026_s3 + $0x1c8] sm:$0xff] %v341_v33 }
  0x42   :  { %v346_v1 = vmax.f32 %v282_v34, 0.0  ;;  %v347_v40 = vmax.f32 %v283_v35, 0.0  ;;  %406 = vst [vmem:[%s1026_s3 + $0x1d0] sm:$0xff] %v342_v36  ;;  %407 = vst [vmem:[%s1026_s3 + $0x1d8] sm:$0xff] %v343_v37 }
  0x43   :  { %408 = vst [vmem:[%s1026_s3 + $0x1e0] sm:$0xff] %v344_v38  ;;  %409 = vst [vmem:[%s1026_s3 + $0x1e8] sm:$0xff] %v345_v39 }
  0x44   :  { %410 = vst [vmem:[%s1026_s3 + $0x1f0] sm:$0xff] %v346_v1  ;;  %411 = vst [vmem:[%s1026_s3 + $0x1f8] sm:$0xff] %v347_v40 }

// kernel: stack_decoder_forward.3
= control target key start
LH: loop header
LB: loop body
LE: loop exit
PB: predicated region body
PF: predicated region fallthrough
CT: control target
= control target key end

     0   :  { %s3375_s15 = smov 0   ;;  %s4648_s0 = inlined_call_operand.vmem [shape: bf16[2,16,16,8], index: 0, kind: input, shape index: {}]   ;;  %s4649_s1 = inlined_call_operand.vmem [shape: bf16[72,128], index: 1, kind: input, shape index: {}]   ;;  %s4650_s2 = inlined_call_operand.vmem [shape: bf16[2,16,16,128], index: 2, kind: output, shape index: {0}]   ;;  %s4651_s3 = inlined_call_operand.vmem [shape: f32[2,1,128], index: 3, kind: output, shape index: {1}]   ;;  %s4652_s4 = inlined_call_operand.vmem [shape: f32[2,1,128], index: 4, kind: output, shape index: {2}]  }
   0x1 LB: > { %s2324_s16 = sadd.s32 4294967295, %s3339_s15   ;;  %p2328_p0 = scmp.ge.s32.totalorder %s3339_s15, 1  ;;  %s3339_s15 = sphi %s3375_s15, %s15_s15  }
   0x2   : > { %p167_p1 = scmp.lt.s32.totalorder %s3339_s15, 3 }
   0x4   : > { %p168_p2 = pnand %p2328_p0, %p167_p1 }
   0x6   : > { %171 = sbr.rel (%p168_p2) target bundleno = 652 (0x28c), region = 28 }
   0xd   : > { %vm313_vm0 = vcmask 1040384   ;;  %p199_p3 = scmp.lt.s32.totalorder %s2324_s16, 1  ;;  %v3341_v0 = vmov 0.0   ;;  %vm479_vm1 = vcmask 1046528   ;;  %vm560_vm2 = vcmask 1045504   ;;  %s3342_s21 = smov 8  }
   0xe   : > { %v3383_v1 = vrot.slane %v3341_v0, 7  ;;  %s3343_s22 = smov 16   ;;  %s3344_s23 = smov 24   ;;  %vm1786_vm3 = vcmask 1043456   ;;  %vm1421_vm4 = vcmask 64512   ;;  %vm1454_vm5 = vcmask 130048  }
   0xf   : > { %s4776_s16 = smov (!%p199_p3, %s2324_s16), 1  ;;  %s3345_s30 = smov 32   ;;  %vm1487_vm6 = vcmask 195584   ;;  %vm1520_vm7 = vcmask 261120   ;;  %vm1553_vm8 = vcmask 326656   ;;  %vm1586_vm9 = vcmask 392192  }
  0x10   : > { %4696 = vst [vmem:[#allocation2_spill] sm:$0xff] %v3383_v1  ;;  %v3389_v2 = vsel %vm313_vm0, 0.0, %v3383_v1  ;;  %v430_v3 = vsel %vm313_vm0, %v3383_v1, 0.0  ;;  %v481_v4 = vrot.slane %v3383_v1, 1  ;;  %v562_v5 = vrot.slane %v3383_v1, 2  ;;  %s2388_s17 = sshll.u32 %s4776_s16, 7 }
  0x11   : > { %4697 = vst [vmem:[#allocation3_spill] sm:$0xff] %v3389_v2  ;;  %v480_v6 = vrot.slane %v3389_v2, 1  ;;  %v483_v7 = vrot.slane %v430_v3, 1  ;;  %v564_v8 = vrot.slane %v430_v3, 2  ;;  %v561_v9 = vrot.slane %v3389_v2, 2  ;;  %s3403_s20 = scalar_lea.vmem %s4648_s0, %s2388_s17  ;;  %s3346_s7 = smov 40  }
  0x12   : > { %v2566_v12 = vld [vmem:[%s3403_s20 + $0x8] sm:$0xff]   ;;  %v2423_v13 = vld [vmem:[%s3403_s20] sm:$0xff]   ;;  %v2567_v14 = vld [vmem:[%s3403_s20 + $0x10] sm:$0xff]   ;;  %s3347_s10 = smov 48   ;;  %s3348_s11 = smov 56   ;;  %vm1619_vm10 = vcmask 457728  }
  0x13   : > { %v482_v10 = vsel %vm479_vm1, %v480_v6, %v481_v4  ;;  %v484_v11 = vsel %vm479_vm1, %v481_v4, %v483_v7  ;;  %v3411_v15 = vsel %vm560_vm2, %v561_v9, %v562_v5  ;;  %v3414_v16 = vsel %vm560_vm2, %v562_v5, %v564_v8  ;;  %v2568_v20 = vld [vmem:[%s3403_s20 + $0x18] sm:$0xff]   ;;  %v2569_v49 = vld [vmem:[%s3403_s20 + $0x20] sm:$0xff]   ;;  %v2570_v62 = vld [vmem:[%s3403_s20 + $0x28] sm:$0xff]   ;;  %s3349_s12 = smov 64   ;;  %s4619_s18 = scalar_lea.vmem %s4650_s2, %s2388_s17 }
  0x14   : > { %v3416_v17 = vpack.i.bf16 %v484_v11, %v482_v10  ;;  %v2428_v18 = vunpack.c.l.bf16 %v2566_v12  ;;  %v2429_v19 = vunpack.c.h.bf16 %v2566_v12  ;;  %v2424_v21 = vunpack.c.l.bf16 %v2423_v13  ;;  %v2571_v5 = vld [vmem:[%s3403_s20 + $0x30] sm:$0xff]  }
  0x15   : > { %v2425_v22 = vunpack.c.h.bf16 %v2423_v13  ;;  %v2432_v23 = vunpack.c.l.bf16 %v2567_v14  ;;  %v2433_v24 = vunpack.c.h.bf16 %v2567_v14  ;;  %v2436_v27 = vunpack.c.l.bf16 %v2568_v20 }
  0x16   : > { %4698 = vst [vmem:[#allocation4_spill] sm:$0xff] %v3416_v17  ;;  %2689 = vrot.lane.b32.xlu0 %v3416_v17, %s3342_s21  ;;  %v319_v25 = vrot.slane %v2428_v18, 7  ;;  %v320_v26 = vrot.slane %v2429_v19, 7  ;;  %v2437_v28 = vunpack.c.h.bf16 %v2568_v20  ;;  %v316_v29 = vrot.slane %v2424_v21, 7 }
  0x17   : > { %v317_v30 = vrot.slane %v2425_v22, 7  ;;  %v322_v31 = vrot.slane %v2432_v23, 7  ;;  %v323_v32 = vrot.slane %v2433_v24, 7  ;;  %v325_v36 = vrot.slane %v2436_v27, 7 }
  0x18   : > { %v3422_v33 = vsel %vm313_vm0, %v319_v25, %v320_v26  ;;  %v3425_v34 = vsel %vm313_vm0, 0.0, %v319_v25  ;;  %v3428_v35 = vsel %vm313_vm0, %v320_v26, 0.0  ;;  %v3438_v42 = vsel %vm313_vm0, 0.0, %v316_v29  ;;  %v2572_v25 = vld [vmem:[%s3403_s20 + $0x38] sm:$0xff]  }
  0x19   : > { %v490_v37 = vrot.slane %v3425_v34, 1  ;;  %v491_v38 = vrot.slane %v3422_v33, 1  ;;  %v493_v39 = vrot.slane %v3428_v35, 1  ;;  %v3435_v41 = vsel %vm313_vm0, %v316_v29, %v317_v30 }
  0x1a   : > { %v3441_v43 = vsel %vm313_vm0, %v317_v30, 0.0  ;;  %v3444_v44 = vsel %vm313_vm0, %v322_v31, %v323_v32  ;;  %v485_v47 = vrot.slane %v3438_v42, 1  ;;  %v486_v48 = vrot.slane %v3435_v41, 1 }
  0x1b   : > { %v492_v45 = vsel %vm479_vm1, %v490_v37, %v491_v38  ;;  %v494_v46 = vsel %vm479_vm1, %v491_v38, %v493_v39  ;;  %v488_v51 = vrot.slane %v3441_v43, 1  ;;  %v3455_v52 = vsel %vm313_vm0, 0.0, %v322_v31 }
  0x1c   : > { %v3451_v50 = vpack.i.bf16 %v494_v46, %v492_v45  ;;  %v3458_v53 = vsel %vm313_vm0, %v323_v32, 0.0  ;;  %v487_v54 = vsel %vm479_vm1, %v485_v47, %v486_v48  ;;  %v495_v55 = vrot.slane %v3455_v52, 1 }
  0x1d   : > { %v496_v56 = vrot.slane %v3444_v44, 1  ;;  %v498_v57 = vrot.slane %v3458_v53, 1  ;;  %v489_v58 = vsel %vm479_vm1, %v486_v48, %v488_v51  ;;  %v326_v59 = vrot.slane %v2437_v28, 7 }
  0x1e   : > { %2699 = vrot.lane.b32.xlu1 %v3451_v50, %s3342_s21  ;;  %v3468_v60 = vsel %vm313_vm0, 0.0, %v325_v36  ;;  %v2440_v61 = vunpack.c.l.bf16 %v2569_v49  ;;  %v3471_v63 = vpack.i.bf16 %v489_v58, %v487_v54  ;;  %v2441_v9 = vunpack.c.h.bf16 %v2569_v49 }
  0x1f   : > { %4699 = vst [vmem:[#allocation5_spill] sm:$0xff] %v3468_v60  ;;  %v497_v0 = vsel %vm479_vm1, %v495_v55, %v496_v56  ;;  %v499_v3 = vsel %vm479_vm1, %v496_v56, %v498_v57  ;;  %v500_v4 = vrot.slane %v3468_v60, 1  ;;  %v3480_v7 = vsel %vm313_vm0, %v325_v36, %v326_v59  ;;  %v2573_v57 = vld [vmem:[%s3403_s20 + $0x40] sm:$0xff]  }
  0x20   : > { %v3477_v6 = vpack.i.bf16 %v499_v3, %v497_v0  ;;  %4700 = vst [vmem:[#allocation6_spill] sm:$0xff] %v3480_v7  ;;  %v3483_v8 = vsel %vm313_vm0, %v326_v59, 0.0  ;;  %2694 = vrot.lane.b32.xlu0 %v3471_v63, %s3342_s21  ;;  %v501_v10 = vrot.slane %v3480_v7, 1  ;;  %v328_v12 = vrot.slane %v2440_v61, 7  ;;  %v2574_v0 = vld [vmem:[%s3403_s20 + $0x48] sm:$0xff]  }
  0x21   : > { %v503_v11 = vrot.slane %v3483_v8, 1  ;;  %v2444_v13 = vunpack.c.l.bf16 %v2570_v62  ;;  %v329_v14 = vrot.slane %v2441_v9, 7  ;;  %v2445_v18 = vunpack.c.h.bf16 %v2570_v62 }
  0x22   : > { %2704 = vrot.lane.b32.xlu1 %v3477_v6, %s3342_s21  ;;  %v2448_v19 = vunpack.c.l.bf16 %v2571_v5  ;;  %v2449_v20 = vunpack.c.h.bf16 %v2571_v5  ;;  %v502_v21 = vsel %vm479_vm1, %v500_v4, %v501_v10  ;;  %v3494_v23 = vsel %vm313_vm0, 0.0, %v328_v12 }
  0x23   : > { %v504_v22 = vsel %vm479_vm1, %v501_v10, %v503_v11  ;;  %4701 = vst [vmem:[#allocation7_spill] sm:$0xff] %v3494_v23  ;;  %v331_v24 = vrot.slane %v2444_v13, 7  ;;  %v3500_v27 = vsel %vm313_vm0, %v328_v12, %v329_v14  ;;  %v3503_v28 = vsel %vm313_vm0, %v329_v14, 0.0 }
  0x24   : > { %v3497_v26 = vpack.i.bf16 %v504_v22, %v502_v21  ;;  %4703 = vst [vmem:[#allocation9_spill] sm:$0xff] %v3500_v27  ;;  %v505_v29 = vrot.slane %v3494_v23, 1  ;;  %v506_v30 = vrot.slane %v3500_v27, 1  ;;  %v508_v31 = vrot.slane %v3503_v28, 1  ;;  %v2575_v21 = vld [vmem:[%s3403_s20 + $0x50] sm:$0xff]  }
  0x25   : > { %v332_v32 = vrot.slane %v2445_v18, 7  ;;  %v3509_v36 = vsel %vm313_vm0, 0.0, %v331_v24  ;;  %v334_v38 = vrot.slane %v2448_v19, 7  ;;  %v335_v39 = vrot.slane %v2449_v20, 7 }
  0x26   : > { %4702 = vst [vmem:[#allocation8_spill] sm:$0xff] %v3497_v26  ;;  %4704 = vst [vmem:[#allocation10_spill] sm:$0xff] %v3509_v36  ;;  %2709 = vrot.lane.b32.xlu0 %v3497_v26, %s3342_s21  ;;  %v510_v37 = vrot.slane %v3509_v36, 1  ;;  %v2452_v45 = vunpack.c.l.bf16 %v2572_v25  ;;  %v507_v46 = vsel %vm479_vm1, %v505_v29, %v506_v30  ;;  %v509_v47 = vsel %vm479_vm1, %v506_v30, %v508_v31 }
  0x27   : > { %v3517_v48 = vsel %vm313_vm0, %v331_v24, %v332_v32  ;;  %v3520_v49 = vsel %vm313_vm0, %v332_v32, 0.0  ;;  %v3522_v51 = vpack.i.bf16 %v509_v47, %v507_v46  ;;  %v3527_v56 = vsel %vm313_vm0, %v334_v38, %v335_v39 }
  0x28   : > { %4705 = vst [vmem:[#allocation11_spill] sm:$0xff] %v3517_v48  ;;  %v511_v54 = vrot.slane %v3517_v48, 1  ;;  %v513_v55 = vrot.slane %v3520_v49, 1  ;;  %v3531_v58 = vsel %vm313_vm0, 0.0, %v334_v38  ;;  %v3534_v59 = vsel %vm313_vm0, %v335_v39, 0.0 }
  0x29   : > { %4706 = vst [vmem:[#allocation12_spill] sm:$0xff] %v3522_v51  ;;  %v516_v61 = vrot.slane %v3527_v56, 1  ;;  %v2453_v62 = vunpack.c.h.bf16 %v2572_v25  ;;  %2714 = vrot.lane.b32.xlu1 %v3522_v51, %s3342_s21  ;;  %v515_v5 = vrot.slane %v3531_v58, 1  ;;  %v518_v9 = vrot.slane %v3534_v59, 1 }
  0x2a   : > { %v512_v3 = vsel %vm479_vm1, %v510_v37, %v511_v54  ;;  %v514_v4 = vsel %vm479_vm1, %v511_v54, %v513_v55  ;;  %v337_v11 = vrot.slane %v2452_v45, 7  ;;  %v2456_v13 = vunpack.c.l.bf16 %v2573_v57 }
  0x2b   : > { %v3544_v10 = vpack.i.bf16 %v514_v4, %v512_v3  ;;  %v338_v12 = vrot.slane %v2453_v62, 7  ;;  %v517_v14 = vsel %vm479_vm1, %v515_v5, %v516_v61  ;;  %v519_v18 = vsel %vm479_vm1, %v516_v61, %v518_v9  ;;  %v2576_v61 = vld [vmem:[%s3403_s20 + $0x58] sm:$0xff]  }
  0x2c   : > { %v2457_v19 = vunpack.c.h.bf16 %v2573_v57  ;;  %v2460_v20 = vunpack.c.l.bf16 %v2574_v0  ;;  %v3551_v22 = vpack.i.bf16 %v519_v18, %v517_v14  ;;  %v3557_v25 = vsel %vm313_vm0, 0.0, %v337_v11 }
  0x2d   : > { %4707 = vst [vmem:[#allocation13_spill] sm:$0xff] %v3544_v10  ;;  %2719 = vrot.lane.b32.xlu0 %v3544_v10, %s3342_s21  ;;  %v3554_v24 = vsel %vm313_vm0, %v337_v11, %v338_v12  ;;  %v3560_v29 = vsel %vm313_vm0, %v338_v12, 0.0  ;;  %v520_v30 = vrot.slane %v3557_v25, 1  ;;  %v340_v37 = vrot.slane %v2456_v13, 7 }
  0x2e   : > { %4708 = vst [vmem:[#allocation14_spill] sm:$0xff] %v3551_v22  ;;  %v521_v31 = vrot.slane %v3554_v24, 1  ;;  %v523_v32 = vrot.slane %v3560_v29, 1  ;;  %2724 = vrot.lane.b32.xlu1 %v3551_v22, %s3342_s21  ;;  %v341_v38 = vrot.slane %v2457_v19, 7  ;;  %v2461_v39 = vunpack.c.h.bf16 %v2574_v0 }
  0x2f   : > { %v343_v45 = vrot.slane %v2460_v20, 7  ;;  %v2464_v46 = vunpack.c.l.bf16 %v2575_v21  ;;  %v3570_v55 = vsel %vm313_vm0, 0.0, %v340_v37  ;;  %v2465_v57 = vunpack.c.h.bf16 %v2575_v21 }
  0x30   : > { %v522_v47 = vsel %vm479_vm1, %v520_v30, %v521_v31  ;;  %v524_v54 = vsel %vm479_vm1, %v521_v31, %v523_v32  ;;  %v3576_v3 = vsel %vm313_vm0, %v340_v37, %v341_v38  ;;  %v3579_v4 = vsel %vm313_vm0, %v341_v38, 0.0 }
  0x31   : > { %v3573_v62 = vpack.i.bf16 %v524_v54, %v522_v47  ;;  %v525_v0 = vrot.slane %v3570_v55, 1  ;;  %v526_v5 = vrot.slane %v3576_v3, 1  ;;  %v528_v9 = vrot.slane %v3579_v4, 1 }
  0x32   : > { %v344_v11 = vrot.slane %v2461_v39, 7  ;;  %v3585_v12 = vsel %vm313_vm0, 0.0, %v343_v45  ;;  %v346_v14 = vrot.slane %v2464_v46, 7  ;;  %v347_v18 = vrot.slane %v2465_v57, 7  ;;  %v2577_v46 = vld [vmem:[%s3403_s20 + $0x60] sm:$0xff]  }
  0x33   : > { %4709 = vst [vmem:[#allocation15_spill] sm:$0xff] %v3573_v62  ;;  %2729 = vrot.lane.b32.xlu0 %v3573_v62, %s3342_s21  ;;  %v530_v13 = vrot.slane %v3585_v12, 1  ;;  %v2468_v19 = vunpack.c.l.bf16 %v2576_v61  ;;  %v527_v20 = vsel %vm479_vm1, %v525_v0, %v526_v5  ;;  %v529_v21 = vsel %vm479_vm1, %v526_v5, %v528_v9  ;;  %v2578_v0 = vld [vmem:[%s3403_s20 + $0x68] sm:$0xff]  }
  0x34   : > { %v3593_v30 = vsel %vm313_vm0, %v343_v45, %v344_v11  ;;  %v3596_v31 = vsel %vm313_vm0, %v344_v11, 0.0  ;;  %v3598_v32 = vpack.i.bf16 %v529_v21, %v527_v20  ;;  %v3603_v39 = vsel %vm313_vm0, %v346_v14, %v347_v18 }
  0x35   : > { %v531_v37 = vrot.slane %v3593_v30, 1  ;;  %v533_v38 = vrot.slane %v3596_v31, 1  ;;  %v3607_v47 = vsel %vm313_vm0, 0.0, %v346_v14  ;;  %v3610_v54 = vsel %vm313_vm0, %v347_v18, 0.0 }
  0x36   : > { %4710 = vst [vmem:[#allocation16_spill] sm:$0xff] %v3598_v32  ;;  %v536_v45 = vrot.slane %v3603_v39, 1  ;;  %v2469_v57 = vunpack.c.h.bf16 %v2576_v61  ;;  %2734 = vrot.lane.b32.xlu1 %v3598_v32, %s3342_s21  ;;  %v535_v11 = vrot.slane %v3607_v47, 1  ;;  %v538_v14 = vrot.slane %v3610_v54, 1  ;;  %v2579_v32 = vld [vmem:[%s3403_s20 + $0x70] sm:$0xff]  }
  0x37   : > { %v532_v5 = vsel %vm479_vm1, %v530_v13, %v531_v37  ;;  %v534_v9 = vsel %vm479_vm1, %v531_v37, %v533_v38  ;;  %v349_v18 = vrot.slane %v2468_v19, 7  ;;  %v2472_v40 = vunpack.c.l.bf16 %v2577_v46 }
  0x38   : > { %v3620_v20 = vpack.i.bf16 %v534_v9, %v532_v5  ;;  %v350_v21 = vrot.slane %v2469_v57, 7  ;;  %v537_v17 = vsel %vm479_vm1, %v535_v11, %v536_v45  ;;  %v539_v61 = vsel %vm479_vm1, %v536_v45, %v538_v14 }
  0x39   : > { %v2473_v2 = vunpack.c.h.bf16 %v2577_v46  ;;  %v2476_v1 = vunpack.c.l.bf16 %v2578_v0  ;;  %v3627_v13 = vpack.i.bf16 %v539_v61, %v537_v17  ;;  %v3633_v38 = vsel %vm313_vm0, 0.0, %v349_v18 }
  0x3a   : > { %4711 = vst [vmem:[#allocation17_spill] sm:$0xff] %v3620_v20  ;;  %2739 = vrot.lane.b32.xlu0 %v3620_v20, %s3342_s21  ;;  %v3630_v37 = vsel %vm313_vm0, %v349_v18, %v350_v21  ;;  %v3636_v19 = vsel %vm313_vm0, %v350_v21, 0.0  ;;  %v540_v57 = vrot.slane %v3633_v38, 1  ;;  %v352_v5 = vrot.slane %v2472_v40, 7 }
  0x3b   : > { %4712 = vst [vmem:[#allocation18_spill] sm:$0xff] %v3627_v13  ;;  %v541_v46 = vrot.slane %v3630_v37, 1  ;;  %v543_v45 = vrot.slane %v3636_v19, 1  ;;  %2744 = vrot.lane.b32.xlu1 %v3627_v13, %s3342_s21  ;;  %v353_v17 = vrot.slane %v2473_v2, 7  ;;  %v2477_v9 = vunpack.c.h.bf16 %v2578_v0 }
  0x3c   : > { %v355_v11 = vrot.slane %v2476_v1, 7  ;;  %v2480_v14 = vunpack.c.l.bf16 %v2579_v32  ;;  %v3646_v21 = vsel %vm313_vm0, 0.0, %v352_v5  ;;  %v2481_v20 = vunpack.c.h.bf16 %v2579_v32 }
  0x3d   : > { %v542_v18 = vsel %vm479_vm1, %v540_v57, %v541_v46  ;;  %v544_v61 = vsel %vm479_vm1, %v541_v46, %v543_v45  ;;  %4713 = vst [vmem:[#allocation19_spill] sm:$0xff] %v3646_v21  ;;  %v3651_v22 = vsel %vm313_vm0, %v352_v5, %v353_v17  ;;  %v3654_v40 = vsel %vm313_vm0, %v353_v17, 0.0 }
  0x3e   : > { %v3648_v62 = vpack.i.bf16 %v544_v61, %v542_v18  ;;  %v545_v2 = vrot.slane %v3646_v21, 1  ;;  %v546_v1 = vrot.slane %v3651_v22, 1  ;;  %v548_v0 = vrot.slane %v3654_v40, 1 }
  0x3f   : > { %v356_v57 = vrot.slane %v2477_v9, 7  ;;  %v3660_v46 = vsel %vm313_vm0, 0.0, %v355_v11  ;;  %v358_v45 = vrot.slane %v2480_v14, 7  ;;  %v359_v5 = vrot.slane %v2481_v20, 7 }
  0x40   : > { %4714 = vst [vmem:[#allocation20_spill] sm:$0xff] %v3648_v62  ;;  %2749 = vrot.lane.b32.xlu0 %v3648_v62, %s3342_s21  ;;  %v550_v32 = vrot.slane %v3660_v46, 1  ;;  %v3667_v17 = vpack.i.bf16 %v3414_v16, %v3411_v15  ;;  %v547_v18 = vsel %vm479_vm1, %v545_v2, %v546_v1  ;;  %v549_v61 = vsel %vm479_vm1, %v546_v1, %v548_v0 }
  0x41   : > { %v3672_v9 = vsel %vm313_vm0, %v355_v11, %v356_v57  ;;  %v3675_v13 = vsel %vm313_vm0, %v356_v57, 0.0  ;;  %v3677_v10 = vpack.i.bf16 %v549_v61, %v547_v18  ;;  %v3682_v14 = vsel %vm313_vm0, %v358_v45, %v359_v5 }
  0x42   : > { %4715 = vst [vmem:[#allocation21_spill] sm:$0xff] %v3667_v17  ;;  %v551_v62 = vrot.slane %v3672_v9, 1  ;;  %v553_v20 = vrot.slane %v3675_v13, 1  ;;  %v3685_v15 = vsel %vm313_vm0, 0.0, %v358_v45  ;;  %v3688_v16 = vsel %vm313_vm0, %v359_v5, 0.0 }
  0x43   : > { %4716 = vst [vmem:[#allocation22_spill] sm:$0xff] %v3677_v10  ;;  %v556_v11 = vrot.slane %v3682_v14, 1  ;;  %2754 = vrot.lane.b32.xlu1 %v3677_v10, %s3342_s21  ;;  %v555_v0 = vrot.slane %v3685_v15, 1  ;;  %v558_v57 = vrot.slane %v3688_v16, 1  ;;  %v566_v45 = vrot.slane %v3438_v42, 2 }
  0x44   : > { %v552_v2 = vsel %vm479_vm1, %v550_v32, %v551_v62  ;;  %v554_v1 = vsel %vm479_vm1, %v551_v62, %v553_v20  ;;  %v567_v5 = vrot.slane %v3435_v41, 2  ;;  %v569_v61 = vrot.slane %v3441_v43, 2 }
  0x45   : > { %v3697_v18 = vpack.i.bf16 %v554_v1, %v552_v2  ;;  %v557_v51 = vsel %vm479_vm1, %v555_v0, %v556_v11  ;;  %v559_v10 = vsel %vm479_vm1, %v556_v11, %v558_v57  ;;  %v571_v32 = vrot.slane %v3425_v34, 2 }
  0x46   : > { %v572_v62 = vrot.slane %v3422_v33, 2  ;;  %v3708_v20 = vpack.i.bf16 %v559_v10, %v557_v51  ;;  %v568_v2 = vsel %vm560_vm2, %v566_v45, %v567_v5  ;;  %v570_v1 = vsel %vm560_vm2, %v567_v5, %v569_v61 }
  0x47   : > { %4717 = vst [vmem:[#allocation23_spill] sm:$0xff] %v3697_v18  ;;  %2759 = vrot.lane.b32.xlu0 %v3697_v18, %s3342_s21  ;;  %v576_v26 = vrot.slane %v3455_v52, 2  ;;  %v4719_v0 = vrot.slane %v3428_v35, 2  ;;  %v577_v57 = vrot.slane %v3444_v44, 2  ;;  %v3720_v18 = vpack.i.bf16 %v570_v1, %v568_v2 }
  0x48   : > { %4718 = vst [vmem:[#allocation24_spill] sm:$0xff] %v3708_v20  ;;  %v573_v43 = vsel %vm560_vm2, %v571_v32, %v572_v62  ;;  %2764 = vrot.lane.b32.xlu1 %v3708_v20, %s3342_s21  ;;  %v579_v51 = vrot.slane %v3458_v53, 2  ;;  %v581_v10 = vrot.slane %v3468_v60, 2  ;;  %v582_v45 = vrot.slane %v3480_v7, 2 }
  0x49   : > { %v575_v11 = vsel %vm560_vm2, %v572_v62, %v4719_v0  ;;  %v578_v5 = vsel %vm560_vm2, %v576_v26, %v577_v57  ;;  %v584_v61 = vrot.slane %v3483_v8, 2  ;;  %v586_v35 = vrot.slane %v3494_v23, 2 }
  0x4a   : > { %v587_v32 = vrot.slane %v3500_v27, 2  ;;  %v3731_v62 = vpack.i.bf16 %v575_v11, %v573_v43  ;;  %v580_v53 = vsel %vm560_vm2, %v577_v57, %v579_v51  ;;  %v589_v2 = vrot.slane %v3503_v28, 2 }
  0x4b   : > { %2769 = vrot.lane.b32.xlu0 %v3667_v17, %s3343_s22  ;;  %v591_v1 = vrot.slane %v3509_v36, 2  ;;  %v583_v26 = vsel %vm560_vm2, %v581_v10, %v582_v45  ;;  %v585_v8 = vsel %vm560_vm2, %v582_v45, %v584_v61  ;;  %v592_v0 = vrot.slane %v3517_v48, 2 }
  0x4c   : > { %2774 = vrot.lane.b32.xlu1 %v3720_v18, %s3343_s22  ;;  %v3741_v20 = vpack.i.bf16 %v580_v53, %v578_v5  ;;  %v594_v43 = vrot.slane %v3520_v49, 2  ;;  %v596_v11 = vrot.slane %v3531_v58, 2  ;;  %v588_v57 = vsel %vm560_vm2, %v586_v35, %v587_v32 }
  0x4d   : > { %v590_v28 = vsel %vm560_vm2, %v587_v32, %v589_v2  ;;  %v597_v51 = vrot.slane %v3527_v56, 2  ;;  %v599_v10 = vrot.slane %v3534_v59, 2  ;;  %v3751_v45 = vpack.i.bf16 %v585_v8, %v583_v26 }
  0x4e   : > { %v593_v5 = vsel %vm560_vm2, %v591_v1, %v592_v0  ;;  %v595_v61 = vsel %vm560_vm2, %v592_v0, %v594_v43  ;;  %v601_v49 = vrot.slane %v3557_v25, 2  ;;  %v602_v53 = vrot.slane %v3554_v24, 2 }
  0x4f   : > { %2779 = vrot.lane.b32.xlu0 %v3731_v62, %s3343_s22  ;;  %v604_v35 = vrot.slane %v3560_v29, 2  ;;  %v3760_v32 = vpack.i.bf16 %v590_v28, %v588_v57  ;;  %v598_v59 = vsel %vm560_vm2, %v596_v11, %v597_v51  ;;  %v600_v2 = vsel %vm560_vm2, %v597_v51, %v599_v10 }
  0x50   : > { %2784 = vrot.lane.b32.xlu1 %v3741_v20, %s3343_s22  ;;  %v606_v26 = vrot.slane %v3570_v55, 2  ;;  %v607_v1 = vrot.slane %v3576_v3, 2  ;;  %v609_v8 = vrot.slane %v3579_v4, 2  ;;  %v3769_v0 = vpack.i.bf16 %v595_v61, %v593_v5 }
  0x51   : > { %v611_v29 = vrot.slane %v3585_v12, 2  ;;  %v612_v43 = vrot.slane %v3593_v30, 2  ;;  %v614_v57 = vrot.slane %v3596_v31, 2  ;;  %v603_v11 = vsel %vm560_vm2, %v601_v49, %v602_v53 }
  0x52   : > { %v605_v28 = vsel %vm560_vm2, %v602_v53, %v604_v35  ;;  %v3778_v51 = vpack.i.bf16 %v600_v2, %v598_v59  ;;  %v616_v4 = vrot.slane %v3607_v47, 2  ;;  %v617_v10 = vrot.slane %v3603_v39, 2 }
  0x53   : > { %2789 = vrot.lane.b32.xlu0 %v3751_v45, %s3343_s22  ;;  %v619_v5 = vrot.slane %v3610_v54, 2  ;;  %v608_v61 = vsel %vm560_vm2, %v606_v26, %v607_v1  ;;  %v610_v17 = vsel %vm560_vm2, %v607_v1, %v609_v8  ;;  %v3787_v31 = vpack.i.bf16 %v605_v28, %v603_v11 }
  0x54   : > { %2794 = vrot.lane.b32.xlu1 %v3760_v32, %s3343_s22  ;;  %v613_v49 = vsel %vm560_vm2, %v611_v29, %v612_v43  ;;  %v615_v53 = vsel %vm560_vm2, %v612_v43, %v614_v57  ;;  %v621_v35 = vrot.slane %v3633_v38, 2  ;;  %v622_v59 = vrot.slane %v3630_v37, 2 }
  0x55   : > { %v624_v2 = vrot.slane %v3636_v19, 2  ;;  %v626_v54 = vrot.slane %v3646_v21, 2  ;;  %v627_v26 = vrot.slane %v3651_v22, 2  ;;  %v3798_v1 = vpack.i.bf16 %v610_v17, %v608_v61 }
  0x56   : > { %v618_v8 = vsel %vm560_vm2, %v616_v4, %v617_v10  ;;  %v620_v29 = vsel %vm560_vm2, %v617_v10, %v619_v5  ;;  %v629_v43 = vrot.slane %v3654_v40, 2  ;;  %v631_v57 = vrot.slane %v3660_v46, 2 }
  0x57   : > { %2799 = vrot.lane.b32.xlu0 %v3769_v0, %s3343_s22  ;;  %v632_v11 = vrot.slane %v3672_v9, 2  ;;  %v634_v19 = vrot.slane %v3675_v13, 2  ;;  %v3808_v28 = vpack.i.bf16 %v615_v53, %v613_v49  ;;  %v3810_v21 = vpack.i.bf16 %v620_v29, %v618_v8 }
  0x58   : > { %2804 = vrot.lane.b32.xlu1 %v3778_v51, %s3343_s22  ;;  %v623_v17 = vsel %vm560_vm2, %v621_v35, %v622_v59  ;;  %v625_v4 = vsel %vm560_vm2, %v622_v59, %v624_v2  ;;  %v628_v10 = vsel %vm560_vm2, %v626_v54, %v627_v26  ;;  %v630_v40 = vsel %vm560_vm2, %v627_v26, %v629_v43 }
  0x59   : > { %v636_v13 = vrot.slane %v3685_v15, 2  ;;  %v637_v5 = vrot.slane %v3682_v14, 2  ;;  %v633_v61 = vsel %vm560_vm2, %v631_v57, %v632_v11  ;;  %v635_v49 = vsel %vm560_vm2, %v632_v11, %v634_v19  ;;  %v3328_v11 = vld [vmem:[%s4649_s1] sm:$0xff]  }
  0x5a   : > { %v639_v53 = vrot.slane %v3688_v16, 2  ;;  %v3825_v35 = vpack.i.bf16 %v625_v4, %v623_v17  ;;  %v3827_v59 = vpack.i.bf16 %v630_v40, %v628_v10  ;;  %v3831_v2 = vpack.i.bf16 %v635_v49, %v633_v61  ;;  %2617 = vmatprep.subr.bf16.mxu0 %v3328_v11  ;;  %2659 = vmatprep.subr.bf16.mxu1 %v3328_v11  ;;  %v3329_v4 = vld [vmem:[%s4649_s1 + $0x8] sm:$0xff]   ;;  %v3330_v40 = vld [vmem:[%s4649_s1 + $0x10] sm:$0xff]  }
  0x5b   : > { %2809 = vrot.lane.b32.xlu0 %v3787_v31, %s3343_s22  ;;  %v638_v54 = vsel %vm560_vm2, %v636_v13, %v637_v5  ;;  %v2848_v8 = vpack.i.bf16 %v3435_v41, %v3438_v42  ;;  %v2853_v29 = vpack.i.bf16 %v3422_v33, %v3425_v34  ;;  %v2858_v43 = vpack.i.bf16 %v3444_v44, %v3455_v52  ;;  %v3331_v13 = vld [vmem:[%s4649_s1 + $0x18] sm:$0xff]   ;;  %v4721_v49 = vld [vmem:[#allocation12_spill] sm:$0xff] }
  0x5c   : > { %2814 = vrot.lane.b32.xlu1 %v3798_v1, %s3343_s22  ;;  %v640_v26 = vsel %vm560_vm2, %v637_v5, %v639_v53  ;;  %v2863_v57 = vpack.i.bf16 %v3480_v7, %v3468_v60  ;;  %v2868_v19 = vpack.i.bf16 %v3500_v27, %v3494_v23  ;;  %v3864_v17 = vpack.i.bf16 %v3517_v48, %v3509_v36 }
  0x5d   : > { %v3839_v16 = vpack.i.bf16 %v640_v26, %v638_v54  ;;  %2618 = vmatpush3.bf16.msra.mxu0 %v3328_v11  ;;  %2664 = vmatpush3.bf16.msra.mxu1 %v3328_v11  ;;  %v3872_v10 = vpack.i.bf16 %v3527_v56, %v3531_v58  ;;  %v4724_v26 = vld [vmem:[#allocation13_spill] sm:$0xff]  ;;  %v3033_v11 = vpack.i.bf16 %v3554_v24, %v3557_v25  ;;  %vm1652_vm11 = vcmask 523264  }
  0x5e   : > { %2619 = vmatprep.subr.bf16.mxu0 %v3329_v4  ;;  %2660 = vmatprep.subr.bf16.mxu1 %v3329_v4  ;;  %vm1737_vm12 = vcmask 588800  }
  0x5f   : > { %2819 = vrot.lane.b32.xlu0 %v3808_v28, %s3343_s22 }
  0x60   : > { %2824 = vrot.lane.b32.xlu1 %v3810_v21, %s3343_s22 }
  0x61   : > { %2620 = vmatpush3.bf16.msra.mxu0 %v3329_v4  ;;  %2665 = vmatpush3.bf16.msra.mxu1 %v3329_v4 }
  0x62   : > { %2621 = vmatprep.subr.bf16.mxu0 %v3330_v40  ;;  %2661 = vmatprep.subr.bf16.mxu1 %v3330_v40 }
  0x63   : > { %2829 = vrot.lane.b32.xlu0 %v3825_v35, %s3343_s22 }
  0x64   : > { %2834 = vrot.lane.b32.xlu1 %v3827_v59, %s3343_s22 }
  0x65   : > { %2622 = vmatpush3.bf16.msra.mxu0 %v3330_v40  ;;  %2666 = vmatpush3.bf16.msra.mxu1 %v3330_v40 }
  0x66   : > { %2623 = vmatprep.subr.bf16.mxu0 %v3331_v13  ;;  %2662 = vmatprep.subr.bf16.mxu1 %v3331_v13 }
  0x67   : > { %2839 = vrot.lane.b32.xlu0 %v3831_v2, %s3343_s22 }
  0x68   : > { %2844 = vrot.lane.b32.xlu1 %v3839_v16, %s3343_s22 }
  0x69   : > { %2624 = vmatpush3.bf16.msra.mxu0 %v3331_v13  ;;  %2667 = vmatpush3.bf16.msra.mxu1 %v3331_v13  ;;  %v3063_v13 = vpack.i.bf16 %v3576_v3, %v3570_v55 }
  0x6b   : > { %2849 = vrot.lane.b32.xlu0 %v2848_v8, %s3344_s23 }
  0x6c   : > { %2854 = vrot.lane.b32.xlu1 %v2853_v29, %s3344_s23 }
  0x6f   : > { %2859 = vrot.lane.b32.xlu0 %v2858_v43, %s3344_s23 }
  0x70   : > { %2864 = vrot.lane.b32.xlu1 %v2863_v57, %s3344_s23 }
  0x73   : > { %2869 = vrot.lane.b32.xlu0 %v2868_v19, %s3344_s23 }
  0x74   : > { %2874 = vrot.lane.b32.xlu1 %v3864_v17, %s3344_s23 }
  0x77   : > { %2879 = vrot.lane.b32.xlu0 %v3872_v10, %s3344_s23 }
  0x78   : > { %2884 = vrot.lane.b32.xlu1 %v3471_v63, %s3345_s30  ;;  %v3332_v63 = vld [vmem:[%s4649_s1 + $0x20] ss:$0 sps:$4 sm:$0xff]  }
  0x79   : > { %2669 = vmatprep.subr.msk.bf16.mxu0 %vm1786_vm3, %v3332_v63  ;;  %v1788_v5 = vsel %vm1786_vm3, %v3332_v63, 0  ;;  %2670 = vmatprep.subr.msk.bf16.mxu1 %vm1786_vm3, %v3332_v63 }
  0x7a   : > { %2626 = vmatpush3.bf16.msra.mxu0 %v1788_v5  ;;  %2668 = vmatpush3.bf16.msra.mxu1 %v1788_v5 }
  0x7b   : > { %2889 = vrot.lane.b32.xlu0 %v3451_v50, %s3345_s30 }
  0x7c   : > { %2894 = vrot.lane.b32.xlu1 %v3720_v18, %s3346_s7  ;;  %v4720_v18 = vld [vmem:[#allocation8_spill] sm:$0xff] }
  0x7f   : > { %2899 = vrot.lane.b32.xlu0 %v3731_v62, %s3346_s7 }
  0x80   : > { %2904 = vrot.lane.b32.xlu1 %v2853_v29, %s3347_s10 }
  0x83   : > { %2909 = vrot.lane.b32.xlu0 %v2858_v43, %s3347_s10 }
  0x84   : > { %2914 = vrot.lane.b32.xlu1 %v3451_v50, %s3348_s11 }
  0x87   : > { %2919 = vrot.lane.b32.xlu0 %v3477_v6, %s3348_s11 }
  0x88   : > { %2924 = vrot.lane.b32.xlu1 %v3731_v62, %s3349_s12  ;;  %v3909_v61 = vpop.permute.xlu0 %2689 }
  0x8b   : > { %2929 = vrot.lane.b32.xlu0 %v3741_v20, %s3349_s12 }
  0x8c   : > { %2934 = vrot.lane.b32.xlu1 %v3477_v6, %s3345_s30 }
  0x8f   : > { %2939 = vrot.lane.b32.xlu0 %v4720_v18, %s3345_s30 }
  0x90   : > { %2944 = vrot.lane.b32.xlu1 %v3741_v20, %s3346_s7  ;;  %v3913_v50 = vpop.permute.xlu1 %2699 }
  0x92   : > { %v3918_v62 = vpop.permute.xlu0 %2694 }
  0x93   : > { %2949 = vrot.lane.b32.xlu0 %v3751_v45, %s3346_s7 }
  0x94   : > { %2954 = vrot.lane.b32.xlu1 %v2863_v57, %s3347_s10  ;;  %v3921_v6 = vpop.permute.xlu1 %2704  ;;  %v4725_v57 = vld [vmem:[#allocation14_spill] sm:$0xff] }
  0x97   : > { %2959 = vrot.lane.b32.xlu0 %v2868_v19, %s3347_s10 }
  0x98   : > { %2964 = vrot.lane.b32.xlu1 %v4720_v18, %s3348_s11  ;;  %v3927_v20 = vpop.permute.xlu0 %2709 }
  0x9b   : > { %2969 = vrot.lane.b32.xlu0 %v4721_v49, %s3348_s11  ;;  %v3931_v53 = vpop.permute.xlu1 %2714 }
  0x9c   : > { %2974 = vrot.lane.b32.xlu1 %v3751_v45, %s3349_s12  ;;  %4722 = vst [vmem:[#allocation8_spill] sm:$0xff] %v3931_v53 }
  0x9f   : > { %2979 = vrot.lane.b32.xlu0 %v3760_v32, %s3349_s12  ;;  %v3937_v54 = vpop.permute.xlu0 %2719 }
  0xa0   : > { %2984 = vrot.lane.b32.xlu1 %v4721_v49, %s3345_s30  ;;  %4723 = vst [vmem:[#allocation12_spill] sm:$0xff] %v3937_v54  ;;  %v2725_v8 = vpop.permute.xlu1 %2724  ;;  %v4728_v49 = vld [vmem:[#allocation16_spill] sm:$0xff] }
  0xa3   : > { %2989 = vrot.lane.b32.xlu0 %v4724_v26, %s3345_s30 }
  0xa4   : > { %2994 = vrot.lane.b32.xlu1 %v3760_v32, %s3346_s7 }
  0xa5   : > { %v2730_v45 = vpop.permute.xlu0 %2729 }
  0xa6   : > { %v2732_v48 = vunpack.i.h.bf16 %v2730_v45  ;;  %v2731_v54 = vunpack.i.l.bf16 %v2730_v45 }
  0xa7   : > { %2999 = vrot.lane.b32.xlu0 %v3769_v0, %s3346_s7 }
  0xa8   : > { %3004 = vrot.lane.b32.xlu1 %v3864_v17, %s3347_s10  ;;  %v3947_v29 = vpop.permute.xlu1 %2734 }
  0xa9   : > { %v2736_v45 = vunpack.i.l.bf16 %v3947_v29 }
  0xab   : > { %3009 = vrot.lane.b32.xlu0 %v3872_v10, %s3347_s10  ;;  %v4726_v10 = vld [vmem:[#allocation15_spill] sm:$0xff] }
  0xac   : > { %3014 = vrot.lane.b32.xlu1 %v4724_v26, %s3348_s11  ;;  %v3953_v43 = vpop.permute.xlu0 %2739 }
  0xad   : > { %v3957_v32 = vpop.permute.xlu1 %2744 }
  0xaf   : > { %3019 = vrot.lane.b32.xlu0 %v4725_v57, %s3348_s11 }
  0xb0   : > { %3024 = vrot.lane.b32.xlu1 %v3769_v0, %s3349_s12 }
  0xb2   : > { %v3965_v19 = vpop.permute.xlu0 %2749 }
  0xb3   : > { %3029 = vrot.lane.b32.xlu0 %v3778_v51, %s3349_s12 }
  0xb4   : > { %3034 = vrot.lane.b32.xlu1 %v3033_v11, %s3344_s23 }
  0xb5   : > { %v3968_v17 = vpop.permute.xlu1 %2754 }
  0xb7   : > { %3039 = vrot.lane.b32.xlu0 %v4725_v57, %s3345_s30  ;;  %v2727_v57 = vunpack.i.h.bf16 %v2725_v8 }
  0xb8   : > { %3044 = vrot.lane.b32.xlu1 %v4726_v10, %s3345_s30 }
  0xb9   : > { %v3972_v4 = vpop.permute.xlu0 %2759 }
  0xba   : > { %v3978_v0 = vpop.permute.xlu1 %2764 }
  0xbb   : > { %3049 = vrot.lane.b32.xlu0 %v3778_v51, %s3346_s7 }
  0xbc   : > { %3054 = vrot.lane.b32.xlu1 %v3787_v31, %s3346_s7 }
  0xbd   : > { %v3980_v40 = vpop.permute.xlu0 %2769 }
  0xbe   : > { %v3987_v63 = vpop.permute.xlu1 %2774 }
  0xbf   : > { %3059 = vrot.lane.b32.xlu0 %v3033_v11, %s3347_s10  ;;  %v2726_v11 = vunpack.i.l.bf16 %v2725_v8  ;;  %v4015_v8 = vpack.i.bf16 %v3603_v39, %v3607_v47 }
  0xc0   : > { %3064 = vrot.lane.b32.xlu1 %v3063_v13, %s3347_s10 }
  0xc1   : > { %v3989_v5 = vpop.permute.xlu0 %2779 }
  0xc2   : > { %v3994_v51 = vpop.permute.xlu1 %2784 }
  0xc3   : > { %3069 = vrot.lane.b32.xlu0 %v4726_v10, %s3348_s11  ;;  %v4010_v10 = vpack.i.bf16 %v3593_v30, %v3585_v12 }
  0xc4   : > { %3074 = vrot.lane.b32.xlu1 %v4728_v49, %s3348_s11 }
  0xc5   : > { %v3996_v18 = vpop.permute.xlu0 %2789 }
  0xc6   : > { %4727 = vst [vmem:[#allocation13_spill] sm:$0xff] %v3996_v18  ;;  %v4002_v26 = vpop.permute.xlu1 %2794  ;;  %v2737_v18 = vunpack.i.h.bf16 %v3947_v29  ;;  %v2742_v29 = vunpack.i.h.bf16 %v3953_v43 }
  0xc7   : > { %3079 = vrot.lane.b32.xlu0 %v3787_v31, %s3349_s12  ;;  %4729 = vst [vmem:[#allocation14_spill] sm:$0xff] %v4002_v26  ;;  %v1436_v26 = vsel %vm1421_vm4, %v3531_v58, %v2726_v11  ;;  %v1438_v58 = vsel %vm1421_vm4, %v3557_v25, %v2731_v54  ;;  %v2747_v25 = vunpack.i.h.bf16 %v3957_v32  ;;  %v2746_v54 = vunpack.i.l.bf16 %v3957_v32 }
  0xc8   : > { %3084 = vrot.lane.b32.xlu1 %v3798_v1, %s3349_s12  ;;  %v2752_v32 = vunpack.i.h.bf16 %v3965_v19 }
  0xc9   : > { %v4004_v36 = vpop.permute.xlu0 %2799 }
  0xca   : > { %4730 = vst [vmem:[#allocation15_spill] sm:$0xff] %v4004_v36  ;;  %v2805_v31 = vpop.permute.xlu1 %2804  ;;  %v1437_v36 = vsel %vm1421_vm4, %v3527_v56, %v2727_v57  ;;  %v1439_v56 = vsel %vm1421_vm4, %v3554_v24, %v2732_v48  ;;  %v2741_v57 = vunpack.i.l.bf16 %v3953_v43  ;;  %v1441_v48 = vsel %vm1421_vm4, %v3576_v3, %v2737_v18 }
  0xcb   : > { %3089 = vrot.lane.b32.xlu0 %v3063_v13, %s3344_s23  ;;  %v2807_v23 = vunpack.i.h.bf16 %v2805_v31  ;;  %v2806_v27 = vunpack.i.l.bf16 %v2805_v31  ;;  %v1440_v24 = vsel %vm1421_vm4, %v3570_v55, %v2736_v45  ;;  %v1443_v3 = vsel %vm1421_vm4, %v3593_v30, %v2742_v29 }
  0xcc   : > { %3094 = vrot.lane.b32.xlu1 %v4010_v10, %s3344_s23  ;;  %v1442_v55 = vsel %vm1421_vm4, %v3585_v12, %v2741_v57  ;;  %v2751_v18 = vunpack.i.l.bf16 %v3965_v19  ;;  %v1445_v30 = vsel %vm1421_vm4, %v3603_v39, %v2747_v25  ;;  %v1444_v12 = vsel %vm1421_vm4, %v3607_v47, %v2746_v54 }
  0xcd   : > { %v2810_v60 = vpop.permute.xlu0 %2809  ;;  %v4026_v13 = vsel %vm1454_vm5, %v1437_v36, %v2807_v23  ;;  %v4029_v31 = vsel %vm1454_vm5, %v1436_v26, %v2806_v27  ;;  %v2757_v19 = vunpack.i.h.bf16 %v3968_v17  ;;  %v2756_v29 = vunpack.i.l.bf16 %v3968_v17 }
  0xce   : > { %v2812_v7 = vunpack.i.h.bf16 %v2810_v60  ;;  %v2811_v53 = vunpack.i.l.bf16 %v2810_v60  ;;  %v2815_v23 = vpop.permute.xlu1 %2814  ;;  %v1447_v39 = vsel %vm1421_vm4, %v3630_v37, %v2752_v32  ;;  %v1446_v47 = vsel %vm1421_vm4, %v3633_v38, %v2751_v18  ;;  %v4736_v18 = vld [vmem:[#allocation19_spill] sm:$0xff] }
  0xcf   : > { %3099 = vrot.lane.b32.xlu0 %v4728_v49, %s3345_s30  ;;  %v2817_v60 = vunpack.i.h.bf16 %v2815_v23  ;;  %v2816_v26 = vunpack.i.l.bf16 %v2815_v23  ;;  %v4731_v49 = vld [vmem:[#allocation17_spill] sm:$0xff]  ;;  %v2762_v17 = vunpack.i.h.bf16 %v3972_v4  ;;  %v2761_v25 = vunpack.i.l.bf16 %v3972_v4 }
  0xd0   : > { %v4040_v36 = vsel %vm1454_vm5, %v1438_v58, %v2811_v53  ;;  %v4043_v27 = vsel %vm1454_vm5, %v1439_v56, %v2812_v7  ;;  %3104 = vrot.lane.b32.xlu1 %v4731_v49, %s3345_s30  ;;  %v1449_v32 = vsel %vm1421_vm4, %v3651_v22, %v2757_v19  ;;  %v2767_v4 = vunpack.i.h.bf16 %v3978_v0 }
  0xd1   : > { %v2820_v43 = vpop.permute.xlu0 %2819  ;;  %v4054_v53 = vsel %vm1454_vm5, %v1441_v48, %v2817_v60  ;;  %v4057_v7 = vsel %vm1454_vm5, %v1440_v24, %v2816_v26  ;;  %v1451_v19 = vsel %vm1421_vm4, %v3672_v9, %v2762_v17 }
  0xd2   : > { %v2822_v11 = vunpack.i.h.bf16 %v2820_v43  ;;  %v2821_v56 = vunpack.i.l.bf16 %v2820_v43  ;;  %v2825_v45 = vpop.permute.xlu1 %2824 }
  0xd3   : > { %3109 = vrot.lane.b32.xlu0 %v3798_v1, %s3346_s7  ;;  %v2827_v60 = vunpack.i.h.bf16 %v2825_v45  ;;  %v2826_v26 = vunpack.i.l.bf16 %v2825_v45  ;;  %v1448_v45 = vsel %vm1421_vm4, %v4736_v18, %v2756_v29  ;;  %v1450_v29 = vsel %vm1421_vm4, %v3660_v46, %v2761_v25 }
  0xd4   : > { %v4068_v58 = vsel %vm1454_vm5, %v1442_v55, %v2821_v56  ;;  %v4071_v23 = vsel %vm1454_vm5, %v1443_v3, %v2822_v11  ;;  %3114 = vrot.lane.b32.xlu1 %v3808_v28, %s3346_s7 }
  0xd5   : > { %v2830_v1 = vpop.permute.xlu0 %2829  ;;  %v4082_v57 = vsel %vm1454_vm5, %v1445_v30, %v2827_v60  ;;  %v4085_v48 = vsel %vm1454_vm5, %v1444_v12, %v2826_v26  ;;  %v2766_v60 = vunpack.i.l.bf16 %v3978_v0 }
  0xd6   : > { %4732 = vst [vmem:[#allocation16_spill] sm:$0xff] %v4082_v57  ;;  %4733 = vst [vmem:[#allocation17_spill] sm:$0xff] %v4085_v48  ;;  %v2832_v24 = vunpack.i.h.bf16 %v2830_v1  ;;  %v2831_v43 = vunpack.i.l.bf16 %v2830_v1  ;;  %v2835_v54 = vpop.permute.xlu1 %2834 }
  0xd7   : > { %3119 = vrot.lane.b32.xlu0 %v4010_v10, %s3347_s10  ;;  %v2837_v3 = vunpack.i.h.bf16 %v2835_v54  ;;  %v2836_v55 = vunpack.i.l.bf16 %v2835_v54  ;;  %v1453_v54 = vsel %vm1421_vm4, %v3682_v14, %v2767_v4  ;;  %v1452_v17 = vsel %vm1421_vm4, %v3685_v15, %v2766_v60 }
  0xd8   : > { %v4096_v11 = vsel %vm1454_vm5, %v1446_v47, %v2831_v43  ;;  %v4099_v56 = vsel %vm1454_vm5, %v1447_v39, %v2832_v24  ;;  %3124 = vrot.lane.b32.xlu1 %v4015_v8, %s3347_s10  ;;  %v3153_v4 = vpack.i.bf16 %v3630_v37, %v3633_v38 }
  0xd9   : > { %4734 = vst [vmem:[#allocation25_spill] sm:$0xff] %v4096_v11  ;;  %4735 = vst [vmem:[#allocation26_spill] sm:$0xff] %v4099_v56  ;;  %v2840_v10 = vpop.permute.xlu0 %2839  ;;  %v4110_v26 = vsel %vm1454_vm5, %v1449_v32, %v2837_v3  ;;  %v4113_v30 = vsel %vm1454_vm5, %v1448_v45, %v2836_v55 }
  0xda   : > { %4737 = vst [vmem:[#allocation19_spill] sm:$0xff] %v4110_v26  ;;  %4738 = vst [vmem:[#allocation27_spill] sm:$0xff] %v4113_v30  ;;  %v2842_v12 = vunpack.i.h.bf16 %v2840_v10  ;;  %v2841_v1 = vunpack.i.l.bf16 %v2840_v10  ;;  %v2845_v0 = vpop.permute.xlu1 %2844 }
  0xdb   : > { %3129 = vrot.lane.b32.xlu0 %v4731_v49, %s3348_s11  ;;  %v2847_v39 = vunpack.i.h.bf16 %v2845_v0  ;;  %v2846_v47 = vunpack.i.l.bf16 %v2845_v0  ;;  %v4741_v49 = vld [vmem:[#allocation18_spill] sm:$0xff]  ;;  %v2691_v0 = vunpack.i.l.bf16 %v3909_v61 }
  0xdc   : > { %v4122_v24 = vsel %vm1454_vm5, %v1450_v29, %v2841_v1  ;;  %v4125_v43 = vsel %vm1454_vm5, %v1451_v19, %v2842_v12  ;;  %3134 = vrot.lane.b32.xlu1 %v4741_v49, %s3348_s11  ;;  %v2580_v12 = vld [vmem:[%s3403_s20 + $0x78] sm:$0xff]   ;;  %v4744_v19 = vld [vmem:[#allocation20_spill] sm:$0xff]  ;;  %v2692_v29 = vunpack.i.h.bf16 %v3909_v61  ;;  %v2697_v61 = vunpack.i.h.bf16 %v3918_v62  ;;  %s211_s20 = scalar_lea.vmem %s4651_s3, %s4776_s16 }
  0xdd   : > { %4739 = vst [vmem:[#allocation28_spill] sm:$0xff] %v4122_v24  ;;  %4740 = vst [vmem:[#allocation29_spill] sm:$0xff] %v4125_v43  ;;  %v4131_v25 = vpop.permute.xlu0 %2849  ;;  %v4136_v3 = vsel %vm1454_vm5, %v1453_v54, %v2847_v39  ;;  %v4139_v55 = vsel %vm1454_vm5, %v1452_v17, %v2846_v47  ;;  %v2484_v37 = vunpack.c.l.bf16 %v2580_v12  ;;  %v2485_v38 = vunpack.c.h.bf16 %v2580_v12 }
  0xde   : > { %4742 = vst [vmem:[#allocation18_spill] sm:$0xff] %v4136_v3  ;;  %4743 = vst [vmem:[#allocation30_spill] sm:$0xff] %v4139_v55  ;;  %v4143_v32 = vpop.permute.xlu1 %2854  ;;  %v4179_v47 = vpack.i.bf16 %v3651_v22, %v4736_v18  ;;  %v4192_v55 = vpack.i.bf16 %v3682_v14, %v3685_v15  ;;  %v4745_v22 = vld [vmem:[#allocation2_spill] sm:$0xff]  ;;  %v2852_v3 = vunpack.i.h.bf16 %v4131_v25  ;;  %v2851_v43 = vunpack.i.l.bf16 %v4131_v25 }
  0xdf   : > { %3139 = vrot.lane.b32.xlu0 %v3808_v28, %s3349_s12  ;;  %v361_v54 = vrot.slane %v2484_v37, 7  ;;  %v4185_v17 = vrot.slane %v2485_v38, 7  ;;  %v1423_v18 = vsel %vm1421_vm4, %v4745_v22, %v2692_v29  ;;  %v2772_v37 = vunpack.i.h.bf16 %v3980_v40 }
  0xe0   : > { %3144 = vrot.lane.b32.xlu1 %v3810_v21, %s3349_s12  ;;  %v2771_v38 = vunpack.i.l.bf16 %v3980_v40  ;;  %v1425_v25 = vsel %vm1421_vm4, %v3435_v41, %v2697_v61  ;;  %v2857_v24 = vunpack.i.h.bf16 %v4143_v32  ;;  %v2856_v15 = vunpack.i.l.bf16 %v4143_v32 }
  0xe1   : > { %v4145_v45 = vpop.permute.xlu0 %2859  ;;  %v4210_v40 = vsel %vm313_vm0, %v361_v54, %v4185_v17  ;;  %v1456_v30 = vsel %vm1454_vm5, %v1423_v18, %v2772_v37 }
  0xe2   : > { %v4153_v60 = vpop.permute.xlu1 %2864  ;;  %v1489_v32 = vsel %vm1487_vm6, %v1456_v30, %v2852_v3 }
  0xe3   : > { %3149 = vrot.lane.b32.xlu0 %v4015_v8, %s3344_s23 }
  0xe4   : > { %3154 = vrot.lane.b32.xlu1 %v3153_v4, %s3344_s23 }
  0xe5   : > { %v4155_v10 = vpop.permute.xlu0 %2869 }
  0xe6   : > { %v4160_v28 = vpop.permute.xlu1 %2874 }
  0xe7   : > { %3159 = vrot.lane.b32.xlu0 %v4741_v49, %s3345_s30  ;;  %v2696_v49 = vunpack.i.l.bf16 %v3918_v62  ;;  %v2777_v62 = vunpack.i.h.bf16 %v3987_v63 }
  0xe8   : > { %3164 = vrot.lane.b32.xlu1 %v4744_v19, %s3345_s30 }
  0xe9   : > { %v4163_v1 = vpop.permute.xlu0 %2879 }
  0xea   : > { %v4169_v8 = vpop.permute.xlu1 %2884 }
  0xeb   : > { %3169 = vrot.lane.b32.xlu0 %v3810_v21, %s3346_s7  ;;  %v4183_v21 = vpack.i.bf16 %v3672_v9, %v3660_v46  ;;  %v4746_v46 = vld [vmem:[#allocation3_spill] sm:$0xff]  ;;  %v2887_v26 = vunpack.i.h.bf16 %v4169_v8  ;;  %v2886_v41 = vunpack.i.l.bf16 %v4169_v8 }
  0xec   : > { %3174 = vrot.lane.b32.xlu1 %v3825_v35, %s3346_s7  ;;  %v1422_v9 = vsel %vm1421_vm4, %v4746_v46, %v2691_v0  ;;  %v1424_v0 = vsel %vm1421_vm4, %v3438_v42, %v2696_v49  ;;  %v1458_v42 = vsel %vm1454_vm5, %v1425_v25, %v2777_v62 }
  0xed   : > { %v4173_v39 = vpop.permute.xlu0 %2889  ;;  %v1522_v3 = vsel %vm1520_vm7, %v1489_v32, %v2887_v26 }
  0xee   : > { %v2895_v12 = vpop.permute.xlu1 %2894  ;;  %v2892_v18 = vunpack.i.h.bf16 %v4173_v39 }
  0xef   : > { %3179 = vrot.lane.b32.xlu0 %v3153_v4, %s3347_s10  ;;  %v2776_v4 = vunpack.i.l.bf16 %v3987_v63  ;;  %v4213_v63 = vsel %vm313_vm0, 0.0, %v361_v54  ;;  %v1455_v54 = vsel %vm1454_vm5, %v1422_v9, %v2771_v38  ;;  %v2891_v9 = vunpack.i.l.bf16 %v4173_v39 }
  0xf0   : > { %3184 = vrot.lane.b32.xlu1 %v4179_v47, %s3347_s10  ;;  %v1488_v49 = vsel %vm1487_vm6, %v1455_v54, %v2851_v43  ;;  %v2897_v37 = vunpack.i.h.bf16 %v2895_v12  ;;  %v2896_v38 = vunpack.i.l.bf16 %v2895_v12 }
  0xf1   : > { %v2900_v14 = vpop.permute.xlu0 %2899  ;;  %v1457_v61 = vsel %vm1454_vm5, %v1424_v0, %v2776_v4  ;;  %v1491_v4 = vsel %vm1487_vm6, %v1458_v42, %v2857_v24  ;;  %v1521_v43 = vsel %vm1520_vm7, %v1488_v49, %v2886_v41 }
  0xf2   : > { %v2905_v29 = vpop.permute.xlu1 %2904  ;;  %v1490_v8 = vsel %vm1487_vm6, %v1457_v61, %v2856_v15  ;;  %v2902_v62 = vunpack.i.h.bf16 %v2900_v14  ;;  %v2901_v25 = vunpack.i.l.bf16 %v2900_v14  ;;  %v1524_v14 = vsel %vm1520_vm7, %v1491_v4, %v2892_v18 }
  0xf3   : > { %3189 = vrot.lane.b32.xlu0 %v4744_v19, %s3348_s11  ;;  %v4747_v19 = vld [vmem:[#allocation22_spill] sm:$0xff]  ;;  %v2907_v0 = vunpack.i.h.bf16 %v2905_v29  ;;  %v2906_v54 = vunpack.i.l.bf16 %v2905_v29  ;;  %v1523_v24 = vsel %vm1520_vm7, %v1490_v8, %v2891_v9  ;;  %v1555_v15 = vsel %vm1553_vm8, %v1522_v3, %v2897_v37 }
  0xf4   : > { %3194 = vrot.lane.b32.xlu1 %v4747_v19, %s3348_s11  ;;  %v1556_v26 = vsel %vm1553_vm8, %v1523_v24, %v2901_v25  ;;  %v1557_v29 = vsel %vm1553_vm8, %v1524_v14, %v2902_v62  ;;  %v4748_v14 = vld [vmem:[#allocation23_spill] sm:$0xff] }
  0xf5   : > { %v2910_v56 = vpop.permute.xlu0 %2909  ;;  %v1588_v49 = vsel %vm1586_vm9, %v1555_v15, %v2907_v0  ;;  %v2707_v0 = vunpack.i.h.bf16 %v3921_v6 }
  0xf6   : > { %v2915_v30 = vpop.permute.xlu1 %2914  ;;  %v2912_v39 = vunpack.i.h.bf16 %v2910_v56  ;;  %v2911_v11 = vunpack.i.l.bf16 %v2910_v56 }
  0xf7   : > { %3199 = vrot.lane.b32.xlu0 %v3825_v35, %s3349_s12  ;;  %v2917_v12 = vunpack.i.h.bf16 %v2915_v30  ;;  %v2916_v48 = vunpack.i.l.bf16 %v2915_v30  ;;  %v1554_v35 = vsel %vm1553_vm8, %v1521_v43, %v2896_v38 }
  0xf8   : > { %3204 = vrot.lane.b32.xlu1 %v3827_v59, %s3349_s12  ;;  %v1587_v42 = vsel %vm1586_vm9, %v1554_v35, %v2906_v54  ;;  %v1589_v9 = vsel %vm1586_vm9, %v1556_v26, %v2911_v11  ;;  %v1590_v37 = vsel %vm1586_vm9, %v1557_v29, %v2912_v39  ;;  %v643_v35 = vrot.slane %v4213_v63, 1 }
  0xf9   : > { %v2920_v57 = vpop.permute.xlu0 %2919  ;;  %v1621_v8 = vsel %vm1619_vm10, %v1588_v49, %v2917_v12  ;;  %v4749_v26 = vunpack.i.h.bf16 %v3913_v50  ;;  %v2787_v49 = vunpack.i.h.bf16 %v3994_v51 }
  0xfa   : > { %v2922_v41 = vunpack.i.h.bf16 %v2920_v57  ;;  %v2921_v56 = vunpack.i.l.bf16 %v2920_v57  ;;  %v2925_v61 = vpop.permute.xlu1 %2924  ;;  %v1620_v57 = vsel %vm1619_vm10, %v1587_v42, %v2916_v48  ;;  %v4267_v48 = vsel %vm313_vm0, %v4185_v17, 0.0 }
  0xfb   : > { %3209 = vrot.lane.b32.xlu0 %v4179_v47, %s3344_s23  ;;  %v2927_v32 = vunpack.i.h.bf16 %v2925_v61  ;;  %v2926_v18 = vunpack.i.l.bf16 %v2925_v61  ;;  %v644_v17 = vrot.slane %v4210_v40, 1  ;;  %v646_v15 = vrot.slane %v4267_v48, 1 }
  0xfc   : > { %3214 = vrot.lane.b32.xlu1 %v4183_v21, %s3344_s23  ;;  %v1622_v30 = vsel %vm1619_vm10, %v1589_v9, %v2921_v56  ;;  %v1623_v11 = vsel %vm1619_vm10, %v1590_v37, %v2922_v41  ;;  %v1427_v29 = vsel %vm1421_vm4, %v3422_v33, %v4749_v26  ;;  %v4750_v41 = vunpack.i.l.bf16 %v3913_v50 }
  0xfd   : > { %v2930_v38 = vpop.permute.xlu0 %2929  ;;  %v1653_v62 = vsel %vm1652_vm11, %v1620_v57, %v2926_v18  ;;  %v1654_v25 = vsel %vm1652_vm11, %v1621_v8, %v2927_v32  ;;  %v4294_v61 = vpack.i.bf16 %v4210_v40, %v4213_v63  ;;  %v1429_v42 = vsel %vm1421_vm4, %v3444_v44, %v2707_v0 }
  0xfe   : > { %v2932_v47 = vunpack.i.h.bf16 %v2930_v38  ;;  %v2931_v4 = vunpack.i.l.bf16 %v2930_v38  ;;  %v2935_v43 = vpop.permute.xlu1 %2934  ;;  %v1685_v3 = vpack.c.bf16 %v1654_v25, %v1653_v62  ;;  %v1426_v56 = vsel %vm1421_vm4, %v3425_v34, %v4750_v41 }
  0xff   : > { %3219 = vrot.lane.b32.xlu0 %v4747_v19, %s3345_s30  ;;  %v2706_v19 = vunpack.i.l.bf16 %v3921_v6  ;;  %v2782_v33 = vunpack.i.h.bf16 %v3989_v5  ;;  %v2781_v50 = vunpack.i.l.bf16 %v3989_v5  ;;  %v2786_v34 = vunpack.i.l.bf16 %v3994_v51 }
 0x100   : > { %v1655_v54 = vsel %vm1652_vm11, %v1622_v30, %v2931_v4  ;;  %v1656_v39 = vsel %vm1652_vm11, %v1623_v11, %v2932_v47  ;;  %3224 = vrot.lane.b32.xlu1 %v4748_v14, %s3345_s30  ;;  %2627 = vmatprep.mubr.msk.bf16.mxu0 %vm1737_vm12, %v1685_v3  ;;  %v2861_v32 = vunpack.i.l.bf16 %v4145_v45  ;;  %v4309_v44 = vsel %vm479_vm1, %v643_v35, %v644_v17 }
 0x101   : > { %v1686_v12 = vpack.c.bf16 %v1656_v39, %v1655_v54  ;;  %v4272_v24 = vpop.permute.xlu0 %2939  ;;  %v1428_v9 = vsel %vm1421_vm4, %v3455_v52, %v2706_v19  ;;  %v4312_v5 = vsel %vm479_vm1, %v644_v17, %v646_v15  ;;  %v648_v37 = vrot.slane %v4213_v63, 2 }
 0x102   : > { %v2945_v6 = vpop.permute.xlu1 %2944  ;;  %v2867_v51 = vunpack.i.h.bf16 %v4153_v60  ;;  %v2866_v38 = vunpack.i.l.bf16 %v4153_v60  ;;  %v649_v57 = vrot.slane %v4210_v40, 2  ;;  %v651_v52 = vrot.slane %v4267_v48, 2 }
 0x103   : > { %3229 = vrot.lane.b32.xlu0 %v3827_v59, %s3346_s7  ;;  %2628 = vmatmul.mubr.msk.bf16.vlgmr.msra.gmra.mrb[0].mxu0 %vm1737_vm12, %v1686_v12  ;;  %v2862_v59 = vunpack.i.h.bf16 %v4145_v45  ;;  %v1460_v8 = vsel %vm1454_vm5, %v1427_v29, %v2782_v33  ;;  %v1459_v47 = vsel %vm1454_vm5, %v1426_v56, %v2781_v50  ;;  %v2937_v4 = vunpack.i.h.bf16 %v2935_v43  ;;  %v4751_v50 = vld [vmem:[#allocation24_spill] sm:$0xff] }
 0x104   : > { %3234 = vrot.lane.b32.xlu1 %v3831_v2, %s3346_s7  ;;  %v2936_v62 = vunpack.i.l.bf16 %v2935_v43  ;;  %v1462_v25 = vsel %vm1454_vm5, %v1429_v42, %v2787_v49  ;;  %v1461_v30 = vsel %vm1454_vm5, %v1428_v9, %v2786_v34  ;;  %v1492_v60 = vsel %vm1487_vm6, %v1459_v47, %v2861_v32 }
 0x105   : > { %v2950_v18 = vpop.permute.xlu0 %2949  ;;  %v1493_v11 = vsel %vm1487_vm6, %v1460_v8, %v2862_v59  ;;  %v2942_v3 = vunpack.i.h.bf16 %v4272_v24  ;;  %v2941_v0 = vunpack.i.l.bf16 %v4272_v24  ;;  %v2947_v54 = vunpack.i.h.bf16 %v2945_v6 }
 0x106   : > { %v2955_v45 = vpop.permute.xlu1 %2954  ;;  %v2946_v39 = vunpack.i.l.bf16 %v2945_v6  ;;  %v1494_v43 = vsel %vm1487_vm6, %v1461_v30, %v2866_v38  ;;  %v1495_v12 = vsel %vm1487_vm6, %v1462_v25, %v2867_v51  ;;  %v2952_v19 = vunpack.i.h.bf16 %v2950_v18 }
 0x107   : > { %3239 = vrot.lane.b32.xlu0 %v4183_v21, %s3347_s10  ;;  %v2951_v35 = vunpack.i.l.bf16 %v2950_v18  ;;  %v1525_v15 = vsel %vm1520_vm7, %v1492_v60, %v2936_v62  ;;  %v1526_v26 = vsel %vm1520_vm7, %v1493_v11, %v2937_v4  ;;  %v2957_v29 = vunpack.i.h.bf16 %v2955_v45 }
 0x108   : > { %3244 = vrot.lane.b32.xlu1 %v4192_v55, %s3347_s10  ;;  %v2956_v41 = vunpack.i.l.bf16 %v2955_v45  ;;  %v1528_v49 = vsel %vm1520_vm7, %v1495_v12, %v2942_v3  ;;  %v1527_v34 = vsel %vm1520_vm7, %v1494_v43, %v2941_v0  ;;  %v1559_v59 = vsel %vm1553_vm8, %v1526_v26, %v2947_v54 }
 0x109   : > { %v2960_v21 = vpop.permute.xlu0 %2959  ;;  %v1560_v32 = vsel %vm1553_vm8, %v1527_v34, %v2951_v35  ;;  %v1561_v18 = vsel %vm1553_vm8, %v1528_v49, %v2952_v19  ;;  %v1592_v8 = vsel %vm1586_vm9, %v1559_v59, %v2957_v29  ;;  %v2712_v54 = vunpack.i.h.bf16 %v3927_v20 }
 0x10a   : > { %v2965_v17 = vpop.permute.xlu1 %2964  ;;  %v2962_v56 = vunpack.i.h.bf16 %v2960_v21  ;;  %v2961_v24 = vunpack.i.l.bf16 %v2960_v21  ;;  %v2711_v35 = vunpack.i.l.bf16 %v3927_v20  ;;  %v4367_v26 = vpack.i.bf16 %v4312_v5, %v4309_v44  ;;  %v4752_v44 = vld [vmem:[#allocation8_spill] sm:$0xff] }
 0x10b   : > { %3249 = vrot.lane.b32.xlu0 %v4748_v14, %s3348_s11  ;;  %v2967_v42 = vunpack.i.h.bf16 %v2965_v17  ;;  %v2966_v6 = vunpack.i.l.bf16 %v2965_v17  ;;  %v1558_v14 = vsel %vm1553_vm8, %v1525_v15, %v2946_v39  ;;  %v650_v20 = vsel %vm560_vm2, %v648_v37, %v649_v57  ;;  %v4754_v37 = vld [vmem:[#allocation5_spill] sm:$0xff] }
 0x10c   : > { %3254 = vrot.lane.b32.xlu1 %v4751_v50, %s3348_s11  ;;  %v1591_v45 = vsel %vm1586_vm9, %v1558_v14, %v2956_v41  ;;  %v1593_v62 = vsel %vm1586_vm9, %v1560_v32, %v2961_v24  ;;  %v1594_v25 = vsel %vm1586_vm9, %v1561_v18, %v2962_v56  ;;  %v2717_v5 = vunpack.i.h.bf16 %v4752_v44  ;;  %v4753_v24 = vld [vmem:[#allocation6_spill] sm:$0xff]  ;;  %v4757_v32 = vld [vmem:[#allocation9_spill] sm:$0xff] }
 0x10d   : > { %v2970_v33 = vpop.permute.xlu0 %2969  ;;  %v1624_v30 = vsel %vm1619_vm10, %v1591_v45, %v2966_v6  ;;  %v1625_v60 = vsel %vm1619_vm10, %v1592_v8, %v2967_v42  ;;  %v2716_v56 = vunpack.i.l.bf16 %v4752_v44  ;;  %v1431_v42 = vsel %vm1421_vm4, %v4753_v24, %v2712_v54  ;;  %v4755_v6 = vld [vmem:[#allocation13_spill] sm:$0xff] }
 0x10e   : > { %v2972_v9 = vunpack.i.h.bf16 %v2970_v33  ;;  %v2971_v51 = vunpack.i.l.bf16 %v2970_v33  ;;  %v2975_v38 = vpop.permute.xlu1 %2974  ;;  %v1430_v48 = vsel %vm1421_vm4, %v4754_v37, %v2711_v35  ;;  %v2792_v40 = vunpack.i.h.bf16 %v4755_v6  ;;  %v4756_v33 = vld [vmem:[#allocation14_spill] sm:$0xff] }
 0x10f   : > { %3259 = vrot.lane.b32.xlu0 %v3831_v2, %s3349_s12  ;;  %v2977_v47 = vunpack.i.h.bf16 %v2975_v38  ;;  %v2976_v4 = vunpack.i.l.bf16 %v2975_v38  ;;  %v2797_v49 = vunpack.i.h.bf16 %v4756_v33  ;;  %v2796_v34 = vunpack.i.l.bf16 %v4756_v33 }
 0x110   : > { %3264 = vrot.lane.b32.xlu1 %v3839_v16, %s3349_s12  ;;  %v1626_v39 = vsel %vm1619_vm10, %v1593_v62, %v2971_v51  ;;  %v1627_v43 = vsel %vm1619_vm10, %v1594_v25, %v2972_v9  ;;  %v2872_v14 = vunpack.i.h.bf16 %v4155_v10  ;;  %v1433_v18 = vsel %vm1421_vm4, %v4757_v32, %v2717_v5  ;;  %v4758_v9 = vld [vmem:[#allocation7_spill] sm:$0xff]  ;;  %v4759_v32 = vld [vmem:[#allocation4_spill] sm:$0xff] }
 0x111   : > { %v2980_v11 = vpop.permute.xlu0 %2979  ;;  %v1657_v2 = vsel %vm1652_vm11, %v1624_v30, %v2976_v4  ;;  %v1658_v21 = vsel %vm1652_vm11, %v1625_v60, %v2977_v47  ;;  %v1432_v51 = vsel %vm1421_vm4, %v4758_v9, %v2716_v56  ;;  %v3303_v38 = vpack.i.bf16 %v4745_v22, %v4746_v46 }
 0x112   : > { %v2982_v3 = vunpack.i.h.bf16 %v2980_v11  ;;  %v2981_v0 = vunpack.i.l.bf16 %v2980_v11  ;;  %v1687_v12 = vpack.c.bf16 %v1658_v21, %v1657_v2  ;;  %v2985_v19 = vpop.permute.xlu1 %2984  ;;  %v2877_v45 = vunpack.i.h.bf16 %v4160_v28 }
 0x113   : > { %3269 = vrot.lane.b32.xlu0 %v4192_v55, %s3344_s23  ;;  %v652_v55 = vsel %vm560_vm2, %v649_v57, %v651_v52  ;;  %v2791_v57 = vunpack.i.l.bf16 %v4755_v6  ;;  %v2876_v8 = vunpack.i.l.bf16 %v4160_v28  ;;  %v1464_v4 = vsel %vm1454_vm5, %v1431_v42, %v2792_v40 }
 0x114   : > { %v1659_v17 = vsel %vm1652_vm11, %v1626_v39, %v2981_v0  ;;  %v1660_v15 = vsel %vm1652_vm11, %v1627_v43, %v2982_v3  ;;  %3274 = vrot.lane.b32.xlu1 %v4294_v61, %s3344_s23  ;;  %2631 = vmatprep.mubr.msk.bf16.mxu0 %vm1737_vm12, %v1687_v12  ;;  %v4393_v52 = vpack.i.bf16 %v652_v55, %v650_v20  ;;  %v2987_v62 = vunpack.i.h.bf16 %v2985_v19  ;;  %s214_s23 = scalar_lea.vmem %s4652_s4, %s4776_s16 }
 0x115   : > { %v1688_v29 = vpack.c.bf16 %v1660_v15, %v1659_v17  ;;  %v2990_v41 = vpop.permute.xlu0 %2989  ;;  %v1463_v47 = vsel %vm1454_vm5, %v1430_v48, %v2791_v57  ;;  %v2986_v25 = vunpack.i.l.bf16 %v2985_v19  ;;  %v1466_v30 = vsel %vm1454_vm5, %v1433_v18, %v2797_v49 }
 0x116   : > { %v2995_v63 = vpop.permute.xlu1 %2994  ;;  %v1465_v60 = vsel %vm1454_vm5, %v1432_v51, %v2796_v34  ;;  %v1497_v46 = vsel %vm1487_vm6, %v1464_v4, %v2872_v14  ;;  %v2991_v28 = vunpack.i.l.bf16 %v2990_v41  ;;  %v1499_v0 = vsel %vm1487_vm6, %v1466_v30, %v2877_v45  ;;  %v4760_v30 = vld [vmem:[#allocation21_spill] sm:$0xff] }
 0x117   : > { %3279 = vrot.lane.b32.xlu0 %v4751_v50, %s3345_s30  ;;  %2632 = vmatmul.mubr.msk.bf16.gmra.mrb[4].mxu0 %vm1737_vm12, %v1688_v29  ;;  %v2871_v50 = vunpack.i.l.bf16 %v4155_v10  ;;  %v2997_v2 = vunpack.i.h.bf16 %v2995_v63  ;;  %v2996_v21 = vunpack.i.l.bf16 %v2995_v63  ;;  %v1498_v3 = vsel %vm1487_vm6, %v1465_v60, %v2876_v8 }
 0x118   : > { %3284 = vrot.lane.b32.xlu1 %v4367_v26, %s3345_s30  ;;  %v1530_v19 = vsel %vm1520_vm7, %v1497_v46, %v2987_v62  ;;  %v1531_v5 = vsel %vm1520_vm7, %v1498_v3, %v2991_v28  ;;  %v2881_v3 = vunpack.i.l.bf16 %v4163_v1 }
 0x119   : > { %v3000_v59 = vpop.permute.xlu0 %2999  ;;  %v1496_v22 = vsel %vm1487_vm6, %v1463_v47, %v2871_v50  ;;  %v1563_v56 = vsel %vm1553_vm8, %v1530_v19, %v2997_v2 }
 0x11a   : > { %v3005_v10 = vpop.permute.xlu1 %3004  ;;  %v3002_v54 = vunpack.i.h.bf16 %v3000_v59  ;;  %v3001_v39 = vunpack.i.l.bf16 %v3000_v59  ;;  %v1529_v12 = vsel %vm1520_vm7, %v1496_v22, %v2986_v25  ;;  %v4761_v22 = vld [vmem:[#allocation12_spill] sm:$0xff] }
 0x11b   : > { %3289 = vrot.lane.b32.xlu0 %v3839_v16, %s3346_s7  ;;  %v2992_v16 = vunpack.i.h.bf16 %v2990_v41  ;;  %v3007_v35 = vunpack.i.h.bf16 %v3005_v10  ;;  %v3006_v17 = vunpack.i.l.bf16 %v3005_v10  ;;  %v2722_v46 = vunpack.i.h.bf16 %v4761_v22 }
 0x11c   : > { %3294 = vrot.lane.b32.xlu1 %v4393_v52, %s3346_s7  ;;  %v1564_v24 = vsel %vm1553_vm8, %v1531_v5, %v3001_v39 }
 0x11d   : > { %v3010_v11 = vpop.permute.xlu0 %3009  ;;  %v1532_v44 = vsel %vm1520_vm7, %v1499_v0, %v2992_v16  ;;  %v1596_v40 = vsel %vm1586_vm9, %v1563_v56, %v3007_v35  ;;  %v4762_v16 = vld [vmem:[#allocation15_spill] sm:$0xff] }
 0x11e   : > { %v3015_v43 = vpop.permute.xlu1 %3014  ;;  %v3012_v15 = vunpack.i.h.bf16 %v3010_v11  ;;  %v3011_v29 = vunpack.i.l.bf16 %v3010_v11  ;;  %v1565_v42 = vsel %vm1553_vm8, %v1532_v44, %v3002_v54  ;;  %v2721_v11 = vunpack.i.l.bf16 %v4761_v22  ;;  %v4763_v54 = vld [vmem:[#allocation11_spill] sm:$0xff] }
 0x11f   : > { %3299 = vrot.lane.b32.xlu0 %v4294_v61, %s3347_s10  ;;  %v3017_v41 = vunpack.i.h.bf16 %v3015_v43  ;;  %v3016_v20 = vunpack.i.l.bf16 %v3015_v43  ;;  %v1562_v61 = vsel %vm1553_vm8, %v1529_v12, %v2996_v21  ;;  %v2802_v28 = vunpack.i.h.bf16 %v4762_v16  ;;  %v4764_v43 = vld [vmem:[#allocation10_spill] sm:$0xff] }
 0x120   : > { %3304 = vrot.lane.b32.xlu1 %v3303_v38, %s3347_s10  ;;  %v1595_v6 = vsel %vm1586_vm9, %v1562_v61, %v3006_v17  ;;  %v1597_v49 = vsel %vm1586_vm9, %v1564_v24, %v3011_v29  ;;  %v1598_v34 = vsel %vm1586_vm9, %v1565_v42, %v3012_v15  ;;  %v2801_v2 = vunpack.i.l.bf16 %v4762_v16 }
 0x121   : > { %v3020_v55 = vpop.permute.xlu0 %3019  ;;  %v1628_v14 = vsel %vm1619_vm10, %v1595_v6, %v3016_v20  ;;  %v1629_v50 = vsel %vm1619_vm10, %v1596_v40, %v3017_v41  ;;  %v2882_v21 = vunpack.i.h.bf16 %v4163_v1  ;;  %v1435_v39 = vsel %vm1421_vm4, %v4763_v54, %v2722_v46 }
 0x122   : > { %v3022_v63 = vunpack.i.h.bf16 %v3020_v55  ;;  %v3021_v37 = vunpack.i.l.bf16 %v3020_v55  ;;  %v3025_v48 = vpop.permute.xlu1 %3024  ;;  %v1434_v12 = vsel %vm1421_vm4, %v4764_v43, %v2721_v11  ;;  %v1468_v29 = vsel %vm1454_vm5, %v1435_v39, %v2802_v28 }
 0x123   : > { %3309 = vrot.lane.b32.xlu0 %v4367_v26, %s3348_s11  ;;  %v3027_v57 = vunpack.i.h.bf16 %v3025_v48  ;;  %v3026_v33 = vunpack.i.l.bf16 %v3025_v48  ;;  %v1467_v15 = vsel %vm1454_vm5, %v1434_v12, %v2801_v2  ;;  %v1501_v1 = vsel %vm1487_vm6, %v1468_v29, %v2882_v21 }
 0x124   : > { %3314 = vrot.lane.b32.xlu1 %v4759_v32, %s3348_s11  ;;  %v1630_v38 = vsel %vm1619_vm10, %v1597_v49, %v3021_v37  ;;  %v1631_v45 = vsel %vm1619_vm10, %v1598_v34, %v3022_v63  ;;  %v1500_v55 = vsel %vm1487_vm6, %v1467_v15, %v2881_v3 }
 0x125   : > { %v3030_v59 = vpop.permute.xlu0 %3029  ;;  %v1661_v26 = vsel %vm1652_vm11, %v1628_v14, %v3026_v33  ;;  %v1662_v18 = vsel %vm1652_vm11, %v1629_v50, %v3027_v57 }
 0x126   : > { %v3032_v9 = vunpack.i.h.bf16 %v3030_v59  ;;  %v3031_v51 = vunpack.i.l.bf16 %v3030_v59  ;;  %v1689_v8 = vpack.c.bf16 %v1662_v18, %v1661_v26  ;;  %v3035_v10 = vpop.permute.xlu1 %3034 }
 0x127   : > { %3319 = vrot.lane.b32.xlu0 %v4393_v52, %s3349_s12  ;;  %v3037_v19 = vunpack.i.h.bf16 %v3035_v10  ;;  %v3036_v35 = vunpack.i.l.bf16 %v3035_v10 }
 0x128   : > { %v1663_v47 = vsel %vm1652_vm11, %v1630_v38, %v3031_v51  ;;  %v1664_v4 = vsel %vm1652_vm11, %v1631_v45, %v3032_v9  ;;  %3324 = vrot.lane.b32.xlu1 %v4760_v30, %s3349_s12  ;;  %2635 = vmatprep.mubr.msk.bf16.mxu0 %vm1737_vm12, %v1689_v8 }
 0x129   : > { %v1690_v62 = vpack.c.bf16 %v1664_v4, %v1663_v47  ;;  %v3040_v25 = vpop.permute.xlu0 %3039  ;;  %v1503_v42 = vsel %vm1487_vm6, %v4026_v13, %v3037_v19  ;;  %v1502_v63 = vsel %vm1487_vm6, %v4029_v31, %v3036_v35 }
 0x12a   : > { %v3045_v60 = vpop.permute.xlu1 %3044  ;;  %v3042_v41 = vunpack.i.h.bf16 %v3040_v25  ;;  %v3041_v20 = vunpack.i.l.bf16 %v3040_v25 }
 0x12b   : > { %2636 = vmatmul.mubr.msk.bf16.gmra.mrb[8].mxu0 %vm1737_vm12, %v1690_v62  ;;  %v3047_v5 = vunpack.i.h.bf16 %v3045_v60  ;;  %v3046_v61 = vunpack.i.l.bf16 %v3045_v60 }
 0x12c   : > { %v1533_v40 = vsel %vm1520_vm7, %v1500_v55, %v3041_v20  ;;  %v1534_v57 = vsel %vm1520_vm7, %v1501_v1, %v3042_v41 }
 0x12d   : > { %v3050_v52 = vpop.permute.xlu0 %3049  ;;  %v1535_v26 = vsel %vm1520_vm7, %v1502_v63, %v3046_v61  ;;  %v1536_v13 = vsel %vm1520_vm7, %v1503_v42, %v3047_v5 }
 0x12e   : > { %v3055_v0 = vpop.permute.xlu1 %3054  ;;  %v3052_v56 = vunpack.i.h.bf16 %v3050_v52  ;;  %v3051_v24 = vunpack.i.l.bf16 %v3050_v52 }
 0x12f   : > { %v3057_v37 = vunpack.i.h.bf16 %v3055_v0  ;;  %v3056_v48 = vunpack.i.l.bf16 %v3055_v0 }
 0x130   : > { %v1566_v31 = vsel %vm1553_vm8, %v1533_v40, %v3051_v24  ;;  %v1567_v18 = vsel %vm1553_vm8, %v1534_v57, %v3052_v56 }
 0x131   : > { %v3060_v17 = vpop.permute.xlu0 %3059  ;;  %v1568_v9 = vsel %vm1553_vm8, %v1535_v26, %v3056_v48  ;;  %v1569_v51 = vsel %vm1553_vm8, %v1536_v13, %v3057_v37 }
 0x132   : > { %v3065_v44 = vpop.permute.xlu1 %3064  ;;  %v3062_v33 = vunpack.i.h.bf16 %v3060_v17  ;;  %v3061_v49 = vunpack.i.l.bf16 %v3060_v17 }
 0x133   : > { %v3067_v34 = vunpack.i.h.bf16 %v3065_v44  ;;  %v3066_v14 = vunpack.i.l.bf16 %v3065_v44 }
 0x134   : > { %v1599_v10 = vsel %vm1586_vm9, %v1566_v31, %v3061_v49  ;;  %v1600_v47 = vsel %vm1586_vm9, %v1567_v18, %v3062_v33 }
 0x135   : > { %v3070_v6 = vpop.permute.xlu0 %3069  ;;  %v1601_v25 = vsel %vm1586_vm9, %v1568_v9, %v3066_v14  ;;  %v1602_v30 = vsel %vm1586_vm9, %v1569_v51, %v3067_v34 }
 0x136   : > { %v3072_v50 = vunpack.i.h.bf16 %v3070_v6  ;;  %v3071_v59 = vunpack.i.l.bf16 %v3070_v6  ;;  %v3075_v32 = vpop.permute.xlu1 %3074 }
 0x137   : > { %v3077_v38 = vunpack.i.h.bf16 %v3075_v32  ;;  %v3076_v45 = vunpack.i.l.bf16 %v3075_v32 }
 0x138   : > { %v1632_v60 = vsel %vm1619_vm10, %v1599_v10, %v3071_v59  ;;  %v1633_v22 = vsel %vm1619_vm10, %v1600_v47, %v3072_v50 }
 0x139   : > { %v3080_v8 = vpop.permute.xlu0 %3079  ;;  %v1634_v2 = vsel %vm1619_vm10, %v1601_v25, %v3076_v45  ;;  %v1635_v21 = vsel %vm1619_vm10, %v1602_v30, %v3077_v38 }
 0x13a   : > { %v3082_v4 = vunpack.i.h.bf16 %v3080_v8  ;;  %v3081_v62 = vunpack.i.l.bf16 %v3080_v8  ;;  %v3085_v46 = vpop.permute.xlu1 %3084 }
 0x13b   : > { %v3087_v16 = vunpack.i.h.bf16 %v3085_v46  ;;  %v3086_v28 = vunpack.i.l.bf16 %v3085_v46 }
 0x13c   : > { %v1665_v11 = vsel %vm1652_vm11, %v1632_v60, %v3081_v62  ;;  %v1666_v52 = vsel %vm1652_vm11, %v1633_v22, %v3082_v4 }
 0x13d   : > { %v1691_v3 = vpack.c.bf16 %v1666_v52, %v1665_v11  ;;  %v3090_v0 = vpop.permute.xlu0 %3089  ;;  %v1667_v54 = vsel %vm1652_vm11, %v1634_v2, %v3086_v28  ;;  %v1668_v39 = vsel %vm1652_vm11, %v1635_v21, %v3087_v16 }
 0x13e   : > { %v1692_v43 = vpack.c.bf16 %v1668_v39, %v1667_v54  ;;  %v3095_v12 = vpop.permute.xlu1 %3094  ;;  %v3092_v15 = vunpack.i.h.bf16 %v3090_v0  ;;  %v3091_v29 = vunpack.i.l.bf16 %v3090_v0 }
 0x13f   : > { %2639 = vmatprep.mubr.msk.bf16.mxu0 %vm1737_vm12, %v1691_v3  ;;  %v3097_v20 = vunpack.i.h.bf16 %v3095_v12  ;;  %v3096_v55 = vunpack.i.l.bf16 %v3095_v12 }
 0x140   : > { %2640 = vmatmul.mubr.msk.bf16.gmra.mrb[12].mxu0 %vm1737_vm12, %v1692_v43  ;;  %v1504_v61 = vsel %vm1487_vm6, %v4040_v36, %v3091_v29  ;;  %v1505_v56 = vsel %vm1487_vm6, %v4043_v27, %v3092_v15 }
 0x141   : > { %v3100_v19 = vpop.permute.xlu0 %3099  ;;  %v1507_v6 = vsel %vm1487_vm6, %v4054_v53, %v3097_v20  ;;  %v1506_v40 = vsel %vm1487_vm6, %v4057_v7, %v3096_v55 }
 0x142   : > { %v3105_v35 = vpop.permute.xlu1 %3104  ;;  %v3102_v44 = vunpack.i.h.bf16 %v3100_v19  ;;  %v3101_v5 = vunpack.i.l.bf16 %v3100_v19 }
 0x143   : > { %v3107_v42 = vunpack.i.h.bf16 %v3105_v35  ;;  %v3106_v63 = vunpack.i.l.bf16 %v3105_v35 }
 0x144   : > { %v1537_v34 = vsel %vm1520_vm7, %v1504_v61, %v3101_v5  ;;  %v1538_v36 = vsel %vm1520_vm7, %v1505_v56, %v3102_v44 }
 0x145   : > { %v3110_v17 = vpop.permute.xlu0 %3109  ;;  %v1539_v31 = vsel %vm1520_vm7, %v1506_v40, %v3106_v63  ;;  %v1540_v53 = vsel %vm1520_vm7, %v1507_v6, %v3107_v42  ;;  %v4765_v6 = vld [vmem:[#allocation16_spill] sm:$0xff] }
 0x146   : > { %v3115_v41 = vpop.permute.xlu1 %3114  ;;  %v3112_v37 = vunpack.i.h.bf16 %v3110_v17  ;;  %v3111_v48 = vunpack.i.l.bf16 %v3110_v17 }
 0x147   : > { %v3117_v57 = vunpack.i.h.bf16 %v3115_v41  ;;  %v3116_v33 = vunpack.i.l.bf16 %v3115_v41 }
 0x148   : > { %v1570_v7 = vsel %vm1553_vm8, %v1537_v34, %v3111_v48  ;;  %v1571_v18 = vsel %vm1553_vm8, %v1538_v36, %v3112_v37 }
 0x149   : > { %v3120_v1 = vpop.permute.xlu0 %3119  ;;  %v1572_v9 = vsel %vm1553_vm8, %v1539_v31, %v3116_v33  ;;  %v1573_v51 = vsel %vm1553_vm8, %v1540_v53, %v3117_v57  ;;  %v4766_v57 = vld [vmem:[#allocation17_spill] sm:$0xff] }
 0x14a   : > { %v3125_v24 = vpop.permute.xlu1 %3124  ;;  %v3122_v14 = vunpack.i.h.bf16 %v3120_v1  ;;  %v3121_v27 = vunpack.i.l.bf16 %v3120_v1 }
 0x14b   : > { %v3127_v50 = vunpack.i.h.bf16 %v3125_v24  ;;  %v3126_v59 = vunpack.i.l.bf16 %v3125_v24 }
 0x14c   : > { %v1603_v10 = vsel %vm1586_vm9, %v1570_v7, %v3121_v27  ;;  %v1604_v47 = vsel %vm1586_vm9, %v1571_v18, %v3122_v14 }
 0x14d   : > { %v3130_v49 = vpop.permute.xlu0 %3129  ;;  %v1605_v25 = vsel %vm1586_vm9, %v1572_v9, %v3126_v59  ;;  %v1606_v30 = vsel %vm1586_vm9, %v1573_v51, %v3127_v50 }
 0x14e   : > { %v3132_v32 = vunpack.i.h.bf16 %v3130_v49  ;;  %v3131_v26 = vunpack.i.l.bf16 %v3130_v49  ;;  %v3135_v13 = vpop.permute.xlu1 %3134 }
 0x14f   : > { %v3137_v38 = vunpack.i.h.bf16 %v3135_v13  ;;  %v3136_v45 = vunpack.i.l.bf16 %v3135_v13 }
 0x150   : > { %v1636_v22 = vsel %vm1619_vm10, %v1603_v10, %v3131_v26  ;;  %v1637_v46 = vsel %vm1619_vm10, %v1604_v47, %v3132_v32 }
 0x151   : > { %v3140_v8 = vpop.permute.xlu0 %3139  ;;  %v1638_v2 = vsel %vm1619_vm10, %v1605_v25, %v3136_v45  ;;  %v1639_v21 = vsel %vm1619_vm10, %v1606_v30, %v3137_v38 }
 0x152   : > { %v3142_v4 = vunpack.i.h.bf16 %v3140_v8  ;;  %v3141_v62 = vunpack.i.l.bf16 %v3140_v8  ;;  %v3145_v60 = vpop.permute.xlu1 %3144 }
 0x153   : > { %v3147_v11 = vunpack.i.h.bf16 %v3145_v60  ;;  %v3146_v52 = vunpack.i.l.bf16 %v3145_v60 }
 0x154   : > { %v1669_v16 = vsel %vm1652_vm11, %v1636_v22, %v3141_v62  ;;  %v1670_v28 = vsel %vm1652_vm11, %v1637_v46, %v3142_v4 }
 0x155   : > { %v3150_v3 = vpop.permute.xlu0 %3149  ;;  %v1693_v0 = vpack.c.bf16 %v1670_v28, %v1669_v16  ;;  %v1671_v54 = vsel %vm1652_vm11, %v1638_v2, %v3146_v52  ;;  %v1672_v39 = vsel %vm1652_vm11, %v1639_v21, %v3147_v11 }
 0x156   : > { %v1694_v43 = vpack.c.bf16 %v1672_v39, %v1671_v54  ;;  %v3155_v12 = vpop.permute.xlu1 %3154  ;;  %v3152_v15 = vunpack.i.h.bf16 %v3150_v3  ;;  %v3151_v29 = vunpack.i.l.bf16 %v3150_v3 }
 0x157   : > { %2643 = vmatprep.mubr.msk.bf16.mxu1 %vm1737_vm12, %v1693_v0  ;;  %v3157_v20 = vunpack.i.h.bf16 %v3155_v12  ;;  %v3156_v55 = vunpack.i.l.bf16 %v3155_v12 }
 0x158   : > { %2644 = vmatmul.mubr.msk.bf16.vlgmr.msra.gmra.mrb[0].mxu1 %vm1737_vm12, %v1694_v43  ;;  %v1508_v61 = vsel %vm1487_vm6, %v4068_v58, %v3151_v29  ;;  %v1509_v56 = vsel %vm1487_vm6, %v4071_v23, %v3152_v15 }
 0x159   : > { %v3160_v19 = vpop.permute.xlu0 %3159  ;;  %v1511_v40 = vsel %vm1487_vm6, %v4765_v6, %v3157_v20  ;;  %v1510_v33 = vsel %vm1487_vm6, %v4766_v57, %v3156_v55  ;;  %v4769_v57 = vld [vmem:[#allocation19_spill] sm:$0xff] }
 0x15a   : > { %v3165_v35 = vpop.permute.xlu1 %3164  ;;  %v3162_v44 = vunpack.i.h.bf16 %v3160_v19  ;;  %v3161_v5 = vunpack.i.l.bf16 %v3160_v19 }
 0x15b   : > { %v3167_v42 = vunpack.i.h.bf16 %v3165_v35  ;;  %v3166_v63 = vunpack.i.l.bf16 %v3165_v35 }
 0x15c   : > { %v1541_v14 = vsel %vm1520_vm7, %v1508_v61, %v3161_v5  ;;  %v1542_v58 = vsel %vm1520_vm7, %v1509_v56, %v3162_v44  ;;  %v4767_v61 = vld [vmem:[#allocation25_spill] sm:$0xff] }
 0x15d   : > { %v3170_v17 = vpop.permute.xlu0 %3169  ;;  %v1543_v31 = vsel %vm1520_vm7, %v1510_v33, %v3166_v63  ;;  %v1544_v53 = vsel %vm1520_vm7, %v1511_v40, %v3167_v42 }
 0x15e   : > { %v3175_v41 = vpop.permute.xlu1 %3174  ;;  %v3172_v37 = vunpack.i.h.bf16 %v3170_v17  ;;  %v3171_v48 = vunpack.i.l.bf16 %v3170_v17 }
 0x15f   : > { %v3177_v49 = vunpack.i.h.bf16 %v3175_v41  ;;  %v3176_v34 = vunpack.i.l.bf16 %v3175_v41 }
 0x160   : > { %v1574_v7 = vsel %vm1553_vm8, %v1541_v14, %v3171_v48  ;;  %v1575_v18 = vsel %vm1553_vm8, %v1542_v58, %v3172_v37 }
 0x161   : > { %v3180_v1 = vpop.permute.xlu0 %3179  ;;  %v1576_v9 = vsel %vm1553_vm8, %v1543_v31, %v3176_v34  ;;  %v1577_v51 = vsel %vm1553_vm8, %v1544_v53, %v3177_v49  ;;  %v4770_v49 = vld [vmem:[#allocation27_spill] sm:$0xff] }
 0x162   : > { %v3185_v24 = vpop.permute.xlu1 %3184  ;;  %v3182_v27 = vunpack.i.h.bf16 %v3180_v1  ;;  %v3181_v23 = vunpack.i.l.bf16 %v3180_v1 }
 0x163   : > { %v3187_v50 = vunpack.i.h.bf16 %v3185_v24  ;;  %v3186_v59 = vunpack.i.l.bf16 %v3185_v24  ;;  %v4768_v24 = vld [vmem:[#allocation26_spill] sm:$0xff] }
 0x164   : > { %v1607_v10 = vsel %vm1586_vm9, %v1574_v7, %v3181_v23  ;;  %v1608_v47 = vsel %vm1586_vm9, %v1575_v18, %v3182_v27 }
 0x165   : > { %v3190_v36 = vpop.permute.xlu0 %3189  ;;  %v1609_v25 = vsel %vm1586_vm9, %v1576_v9, %v3186_v59  ;;  %v1610_v30 = vsel %vm1586_vm9, %v1577_v51, %v3187_v50 }
 0x166   : > { %v3192_v32 = vunpack.i.h.bf16 %v3190_v36  ;;  %v3191_v26 = vunpack.i.l.bf16 %v3190_v36  ;;  %v3195_v13 = vpop.permute.xlu1 %3194 }
 0x167   : > { %v3197_v38 = vunpack.i.h.bf16 %v3195_v13  ;;  %v3196_v45 = vunpack.i.l.bf16 %v3195_v13 }
 0x168   : > { %v1640_v60 = vsel %vm1619_vm10, %v1607_v10, %v3191_v26  ;;  %v1641_v22 = vsel %vm1619_vm10, %v1608_v47, %v3192_v32 }
 0x169   : > { %v3200_v8 = vpop.permute.xlu0 %3199  ;;  %v1642_v2 = vsel %vm1619_vm10, %v1609_v25, %v3196_v45  ;;  %v1643_v21 = vsel %vm1619_vm10, %v1610_v30, %v3197_v38 }
 0x16a   : > { %v3202_v4 = vunpack.i.h.bf16 %v3200_v8  ;;  %v3201_v62 = vunpack.i.l.bf16 %v3200_v8  ;;  %v3205_v46 = vpop.permute.xlu1 %3204 }
 0x16b   : > { %v3207_v16 = vunpack.i.h.bf16 %v3205_v46  ;;  %v3206_v28 = vunpack.i.l.bf16 %v3205_v46 }
 0x16c   : > { %v1673_v11 = vsel %vm1652_vm11, %v1640_v60, %v3201_v62  ;;  %v1674_v52 = vsel %vm1652_vm11, %v1641_v22, %v3202_v4 }
 0x16d   : > { %v1695_v3 = vpack.c.bf16 %v1674_v52, %v1673_v11  ;;  %v3210_v0 = vpop.permute.xlu0 %3209  ;;  %v1675_v54 = vsel %vm1652_vm11, %v1642_v2, %v3206_v28  ;;  %v1676_v39 = vsel %vm1652_vm11, %v1643_v21, %v3207_v16 }
 0x16e   : > { %v1696_v43 = vpack.c.bf16 %v1676_v39, %v1675_v54  ;;  %v3215_v12 = vpop.permute.xlu1 %3214  ;;  %v3212_v15 = vunpack.i.h.bf16 %v3210_v0  ;;  %v3211_v29 = vunpack.i.l.bf16 %v3210_v0 }
 0x16f   : > { %2647 = vmatprep.mubr.msk.bf16.mxu1 %vm1737_vm12, %v1695_v3  ;;  %v3217_v20 = vunpack.i.h.bf16 %v3215_v12  ;;  %v3216_v55 = vunpack.i.l.bf16 %v3215_v12 }
 0x170   : > { %2648 = vmatmul.mubr.msk.bf16.gmra.mrb[4].mxu1 %vm1737_vm12, %v1696_v43  ;;  %v1512_v56 = vsel %vm1487_vm6, %v4767_v61, %v3211_v29  ;;  %v1513_v42 = vsel %vm1487_vm6, %v4768_v24, %v3212_v15  ;;  %v4771_v24 = vld [vmem:[#allocation28_spill] sm:$0xff] }
 0x171   : > { %v3220_v19 = vpop.permute.xlu0 %3219  ;;  %v1515_v33 = vsel %vm1487_vm6, %v4769_v57, %v3217_v20  ;;  %v1514_v34 = vsel %vm1487_vm6, %v4770_v49, %v3216_v55  ;;  %v4773_v49 = vld [vmem:[#allocation18_spill] sm:$0xff] }
 0x172   : > { %v3225_v35 = vpop.permute.xlu1 %3224  ;;  %v3222_v44 = vunpack.i.h.bf16 %v3220_v19  ;;  %v3221_v5 = vunpack.i.l.bf16 %v3220_v19 }
 0x173   : > { %v3227_v37 = vunpack.i.h.bf16 %v3225_v35  ;;  %v3226_v48 = vunpack.i.l.bf16 %v3225_v35 }
 0x174   : > { %v1545_v27 = vsel %vm1520_vm7, %v1512_v56, %v3221_v5  ;;  %v1546_v23 = vsel %vm1520_vm7, %v1513_v42, %v3222_v44 }
 0x175   : > { %v3230_v17 = vpop.permute.xlu0 %3229  ;;  %v1547_v7 = vsel %vm1520_vm7, %v1514_v34, %v3226_v48  ;;  %v1548_v18 = vsel %vm1520_vm7, %v1515_v33, %v3227_v37 }
 0x176   : > { %v3235_v41 = vpop.permute.xlu1 %3234  ;;  %v3232_v6 = vunpack.i.h.bf16 %v3230_v17  ;;  %v3231_v40 = vunpack.i.l.bf16 %v3230_v17 }
 0x177   : > { %v3237_v36 = vunpack.i.h.bf16 %v3235_v41  ;;  %v3236_v14 = vunpack.i.l.bf16 %v3235_v41 }
 0x178   : > { %v1578_v9 = vsel %vm1553_vm8, %v1545_v27, %v3231_v40  ;;  %v1579_v51 = vsel %vm1553_vm8, %v1546_v23, %v3232_v6 }
 0x179   : > { %v3240_v1 = vpop.permute.xlu0 %3239  ;;  %v1580_v38 = vsel %vm1553_vm8, %v1547_v7, %v3236_v14  ;;  %v1581_v45 = vsel %vm1553_vm8, %v1548_v18, %v3237_v36  ;;  %v4774_v36 = vld [vmem:[#allocation30_spill] sm:$0xff] }
 0x17a   : > { %v3245_v63 = vpop.permute.xlu1 %3244  ;;  %v3242_v50 = vunpack.i.h.bf16 %v3240_v1  ;;  %v3241_v59 = vunpack.i.l.bf16 %v3240_v1 }
 0x17b   : > { %v3247_v32 = vunpack.i.h.bf16 %v3245_v63  ;;  %v3246_v26 = vunpack.i.l.bf16 %v3245_v63  ;;  %v4772_v63 = vld [vmem:[#allocation29_spill] sm:$0xff] }
 0x17c   : > { %v1611_v4 = vsel %vm1586_vm9, %v1578_v9, %v3241_v59  ;;  %v1612_v62 = vsel %vm1586_vm9, %v1579_v51, %v3242_v50 }
 0x17d   : > { %v3250_v58 = vpop.permute.xlu0 %3249  ;;  %v1613_v60 = vsel %vm1586_vm9, %v1580_v38, %v3246_v26  ;;  %v1614_v22 = vsel %vm1586_vm9, %v1581_v45, %v3247_v32 }
 0x17e   : > { %v3252_v13 = vunpack.i.h.bf16 %v3250_v58  ;;  %v3251_v31 = vunpack.i.l.bf16 %v3250_v58  ;;  %v3255_v53 = vpop.permute.xlu1 %3254 }
 0x17f   : > { %v3257_v8 = vunpack.i.h.bf16 %v3255_v53  ;;  %v3256_v10 = vunpack.i.l.bf16 %v3255_v53 }
 0x180   : > { %v1644_v46 = vsel %vm1619_vm10, %v1611_v4, %v3251_v31  ;;  %v1645_v11 = vsel %vm1619_vm10, %v1612_v62, %v3252_v13 }
 0x181   : > { %v3260_v47 = vpop.permute.xlu0 %3259  ;;  %v1646_v3 = vsel %vm1619_vm10, %v1613_v60, %v3256_v10  ;;  %v1647_v0 = vsel %vm1619_vm10, %v1614_v22, %v3257_v8 }
 0x182   : > { %v3262_v25 = vunpack.i.h.bf16 %v3260_v47  ;;  %v3261_v30 = vunpack.i.l.bf16 %v3260_v47  ;;  %v3265_v52 = vpop.permute.xlu1 %3264 }
 0x183   : > { %v3267_v2 = vunpack.i.h.bf16 %v3265_v52  ;;  %v3266_v21 = vunpack.i.l.bf16 %v3265_v52 }
 0x184   : > { %v1677_v16 = vsel %vm1652_vm11, %v1644_v46, %v3261_v30  ;;  %v1678_v28 = vsel %vm1652_vm11, %v1645_v11, %v3262_v25 }
 0x185   : > { %v1697_v54 = vpack.c.bf16 %v1678_v28, %v1677_v16  ;;  %v3270_v39 = vpop.permute.xlu0 %3269  ;;  %v1679_v43 = vsel %vm1652_vm11, %v1646_v3, %v3266_v21  ;;  %v1680_v12 = vsel %vm1652_vm11, %v1647_v0, %v3267_v2 }
 0x186   : > { %v1698_v19 = vpack.c.bf16 %v1680_v12, %v1679_v43  ;;  %v3275_v35 = vpop.permute.xlu1 %3274  ;;  %v3272_v41 = vunpack.i.h.bf16 %v3270_v39  ;;  %v3271_v20 = vunpack.i.l.bf16 %v3270_v39 }
 0x187   : > { %2651 = vmatprep.mubr.msk.bf16.mxu1 %vm1737_vm12, %v1697_v54  ;;  %v3277_v1 = vunpack.i.h.bf16 %v3275_v35  ;;  %v3276_v44 = vunpack.i.l.bf16 %v3275_v35 }
 0x188   : > { %2652 = vmatmul.mubr.msk.bf16.gmra.mrb[8].mxu1 %vm1737_vm12, %v1698_v19  ;;  %v1516_v42 = vsel %vm1487_vm6, %v4771_v24, %v3271_v20  ;;  %v1517_v37 = vsel %vm1487_vm6, %v4772_v63, %v3272_v41 }
 0x189   : > { %v3280_v17 = vpop.permute.xlu0 %3279  ;;  %v1519_v34 = vsel %vm1487_vm6, %v4773_v49, %v3277_v1  ;;  %v1518_v14 = vsel %vm1487_vm6, %v4774_v36, %v3276_v44 }
 0x18a   : > { %v3285_v15 = vpop.permute.xlu1 %3284  ;;  %v3282_v61 = vunpack.i.h.bf16 %v3280_v17  ;;  %v3281_v56 = vunpack.i.l.bf16 %v3280_v17 }
 0x18b   : > { %v3287_v6 = vunpack.i.h.bf16 %v3285_v15  ;;  %v3286_v40 = vunpack.i.l.bf16 %v3285_v15 }
 0x18c   : > { %v1549_v50 = vsel %vm1520_vm7, %v1516_v42, %v3281_v56  ;;  %v1550_v59 = vsel %vm1520_vm7, %v1517_v37, %v3282_v61 }
 0x18d   : > { %v3290_v29 = vpop.permute.xlu0 %3289  ;;  %v1551_v9 = vsel %vm1520_vm7, %v1518_v14, %v3286_v40  ;;  %v1552_v51 = vsel %vm1520_vm7, %v1519_v34, %v3287_v6 }
 0x18e   : > { %v3295_v55 = vpop.permute.xlu1 %3294  ;;  %v3292_v57 = vunpack.i.h.bf16 %v3290_v29  ;;  %v3291_v33 = vunpack.i.l.bf16 %v3290_v29 }
 0x18f   : > { %v3297_v58 = vunpack.i.h.bf16 %v3295_v55  ;;  %v3296_v27 = vunpack.i.l.bf16 %v3295_v55 }
 0x190   : > { %v1582_v38 = vsel %vm1553_vm8, %v1549_v50, %v3291_v33  ;;  %v1583_v45 = vsel %vm1553_vm8, %v1550_v59, %v3292_v57 }
 0x191   : > { %v3300_v5 = vpop.permute.xlu0 %3299  ;;  %v1584_v8 = vsel %vm1553_vm8, %v1551_v9, %v3296_v27  ;;  %v1585_v10 = vsel %vm1553_vm8, %v1552_v51, %v3297_v58 }
 0x192   : > { %v3305_v48 = vpop.permute.xlu1 %3304  ;;  %v3302_v32 = vunpack.i.h.bf16 %v3300_v5  ;;  %v3301_v26 = vunpack.i.l.bf16 %v3300_v5 }
 0x193   : > { %v3307_v13 = vunpack.i.h.bf16 %v3305_v48  ;;  %v3306_v31 = vunpack.i.l.bf16 %v3305_v48 }
 0x194   : > { %v1615_v25 = vsel %vm1586_vm9, %v1582_v38, %v3301_v26  ;;  %v1616_v30 = vsel %vm1586_vm9, %v1583_v45, %v3302_v32 }
 0x195   : > { %v3310_v23 = vpop.permute.xlu0 %3309  ;;  %v1617_v46 = vsel %vm1586_vm9, %v1584_v8, %v3306_v31  ;;  %v1618_v11 = vsel %vm1586_vm9, %v1585_v10, %v3307_v13 }
 0x196   : > { %v3312_v53 = vunpack.i.h.bf16 %v3310_v23  ;;  %v3311_v7 = vunpack.i.l.bf16 %v3310_v23  ;;  %v3315_v18 = vpop.permute.xlu1 %3314 }
 0x197   : > { %v3317_v47 = vunpack.i.h.bf16 %v3315_v18  ;;  %v3316_v4 = vunpack.i.l.bf16 %v3315_v18 }
 0x198   : > { %v1648_v52 = vsel %vm1619_vm10, %v1615_v25, %v3311_v7  ;;  %v1649_v16 = vsel %vm1619_vm10, %v1616_v30, %v3312_v53 }
 0x199   : > { %v3320_v62 = vpop.permute.xlu0 %3319  ;;  %v1650_v54 = vsel %vm1619_vm10, %v1617_v46, %v3316_v4  ;;  %v1651_v39 = vsel %vm1619_vm10, %v1618_v11, %v3317_v47 }
 0x19a   : > { %v3322_v60 = vunpack.i.h.bf16 %v3320_v62  ;;  %v3321_v22 = vunpack.i.l.bf16 %v3320_v62  ;;  %v3325_v28 = vpop.permute.xlu1 %3324 }
 0x19b   : > { %v3327_v3 = vunpack.i.h.bf16 %v3325_v28  ;;  %v3326_v0 = vunpack.i.l.bf16 %v3325_v28 }
 0x19c   : > { %v1681_v2 = vsel %vm1652_vm11, %v1648_v52, %v3321_v22  ;;  %v1682_v21 = vsel %vm1652_vm11, %v1649_v16, %v3322_v60 }
 0x19d   : > { %v1699_v43 = vpack.c.bf16 %v1682_v21, %v1681_v2  ;;  %v1683_v12 = vsel %vm1652_vm11, %v1650_v54, %v3326_v0  ;;  %v1684_v19 = vsel %vm1652_vm11, %v1651_v39, %v3327_v3 }
 0x19e   : > { %v1700_v35 = vpack.c.bf16 %v1684_v19, %v1683_v12 }
 0x19f   : > { %2655 = vmatprep.mubr.msk.bf16.mxu1 %vm1737_vm12, %v1699_v43 }
 0x1a0   : > { %2656 = vmatmul.mubr.msk.bf16.gmra.mrb[12].mxu1 %vm1737_vm12, %v1700_v35 }
 0x1d6   : > { %v2629_v17 = vpop.f32.mrb[0].mxu0 }
 0x1d7   : > { %v1824_v15 = vpop.f32.mrb[1].mxu0  ;;  %v1991_v61 = vmul.f32 %v2629_v17, %v2629_v17 }
 0x1d8   : > { %v2630_v29 = vpop.f32.mrb[2].mxu0  ;;  %v1989_v55 = vmul.f32 %v1824_v15, %v1824_v15 }
 0x1d9   : > { %v2494_v41 = vpack.c.bf16 %v2630_v29, %v2629_v17  ;;  %v1827_v20 = vpop.f32.mrb[3].mxu0  ;;  %v1992_v42 = vmul.f32 %v2630_v29, %v2630_v29 }
 0x1da   : > { %v1951_v1 = vadd.f32 %v1827_v20, %v1824_v15  ;;  %v1990_v44 = vmul.f32 %v1827_v20, %v1827_v20  ;;  %v2489_v5 = vpack.c.bf16 %v1827_v20, %v1824_v15 }
 0x1db   : > { %2581 = vst [vmem:[%s4619_s18 + $0x8] sm:$0xff] %v2494_v41  }
 0x1dc   : > { %v1952_v56 = vadd.f32 %v2629_v17, %v1951_v1  ;;  %v2021_v24 = vadd.f32 %v1990_v44, %v1989_v55  ;;  %2490 = vst [vmem:[%s4619_s18] sm:$0xff] %v2489_v5  }
 0x1de   : > { %v2022_v63 = vadd.f32 %v2021_v24, %v1991_v61  ;;  %v1953_v37 = vadd.f32 %v2630_v29, %v1952_v56 }
 0x1e0   : > { %v2023_v48 = vadd.f32 %v2022_v63, %v1992_v42 }
 0x1ea   : > { %v2633_v6 = vpop.f32.mrb[4].mxu0 }
 0x1eb   : > { %v1840_v40 = vpop.f32.mrb[5].mxu0  ;;  %v1995_v50 = vmul.f32 %v2633_v6, %v2633_v6 }
 0x1ec   : > { %v1954_v57 = vadd.f32 %v1953_v37, %v1840_v40  ;;  %v1993_v33 = vmul.f32 %v1840_v40, %v1840_v40  ;;  %v2634_v49 = vpop.f32.mrb[6].mxu0 }
 0x1ed   : > { %v2504_v34 = vpack.c.bf16 %v2634_v49, %v2633_v6  ;;  %v1843_v36 = vpop.f32.mrb[7].mxu0  ;;  %v1996_v26 = vmul.f32 %v2634_v49, %v2634_v49 }
 0x1ee   : > { %v2024_v14 = vadd.f32 %v2023_v48, %v1993_v33  ;;  %v1955_v58 = vadd.f32 %v1954_v57, %v1843_v36  ;;  %v1994_v27 = vmul.f32 %v1843_v36, %v1843_v36  ;;  %v2499_v23 = vpack.c.bf16 %v1843_v36, %v1840_v40 }
 0x1ef   : > { %2583 = vst [vmem:[%s4619_s18 + $0x18] sm:$0xff] %v2504_v34  }
 0x1f0   : > { %v1956_v59 = vadd.f32 %v2633_v6, %v1955_v58  ;;  %v2025_v32 = vadd.f32 %v2024_v14, %v1994_v27  ;;  %2582 = vst [vmem:[%s4619_s18 + $0x10] sm:$0xff] %v2499_v23  }
 0x1f2   : > { %v2026_v13 = vadd.f32 %v2025_v32, %v1995_v50  ;;  %v1957_v31 = vadd.f32 %v2634_v49, %v1956_v59 }
 0x1f4   : > { %v2027_v53 = vadd.f32 %v2026_v13, %v1996_v26 }
 0x1fe   : > { %v2637_v7 = vpop.f32.mrb[8].mxu0 }
 0x1ff   : > { %v1856_v18 = vpop.f32.mrb[9].mxu0  ;;  %v1999_v25 = vmul.f32 %v2637_v7, %v2637_v7 }
 0x200   : > { %v1958_v9 = vadd.f32 %v1957_v31, %v1856_v18  ;;  %v1997_v51 = vmul.f32 %v1856_v18, %v1856_v18  ;;  %v2638_v38 = vpop.f32.mrb[10].mxu0 }
 0x201   : > { %v2514_v45 = vpack.c.bf16 %v2638_v38, %v2637_v7  ;;  %v1859_v8 = vpop.f32.mrb[11].mxu0  ;;  %v2000_v22 = vmul.f32 %v2638_v38, %v2638_v38 }
 0x202   : > { %v2028_v10 = vadd.f32 %v2027_v53, %v1997_v51  ;;  %v1959_v47 = vadd.f32 %v1958_v9, %v1859_v8  ;;  %v1998_v4 = vmul.f32 %v1859_v8, %v1859_v8  ;;  %v2509_v62 = vpack.c.bf16 %v1859_v8, %v1856_v18 }
 0x203   : > { %2585 = vst [vmem:[%s4619_s18 + $0x28] sm:$0xff] %v2514_v45  }
 0x204   : > { %v1960_v30 = vadd.f32 %v2637_v7, %v1959_v47  ;;  %v2029_v60 = vadd.f32 %v2028_v10, %v1998_v4  ;;  %2584 = vst [vmem:[%s4619_s18 + $0x20] sm:$0xff] %v2509_v62  }
 0x206   : > { %v2030_v46 = vadd.f32 %v2029_v60, %v1999_v25  ;;  %v1961_v11 = vadd.f32 %v2638_v38, %v1960_v30 }
 0x208   : > { %v2031_v52 = vadd.f32 %v2030_v46, %v2000_v22 }
 0x213   : > { %v2641_v16 = vpop.f32.mrb[12].mxu0 }
 0x214   : > { %v1872_v28 = vpop.f32.mrb[13].mxu0  ;;  %v2003_v35 = vmul.f32 %v2641_v16, %v2641_v16 }
 0x215   : > { %v1962_v2 = vadd.f32 %v1961_v11, %v1872_v28  ;;  %v2001_v21 = vmul.f32 %v1872_v28, %v1872_v28  ;;  %v2642_v3 = vpop.f32.mrb[14].mxu0 }
 0x216   : > { %v2524_v0 = vpack.c.bf16 %v2642_v3, %v2641_v16  ;;  %v1875_v54 = vpop.f32.mrb[15].mxu0  ;;  %v2004_v29 = vmul.f32 %v2642_v3, %v2642_v3 }
 0x217   : > { %v2032_v39 = vadd.f32 %v2031_v52, %v2001_v21  ;;  %v1963_v43 = vadd.f32 %v1962_v2, %v1875_v54  ;;  %v2002_v12 = vmul.f32 %v1875_v54, %v1875_v54  ;;  %v2519_v19 = vpack.c.bf16 %v1875_v54, %v1872_v28 }
 0x218   : > { %2587 = vst [vmem:[%s4619_s18 + $0x38] sm:$0xff] %v2524_v0  }
 0x219   : > { %v1964_v17 = vadd.f32 %v2641_v16, %v1963_v43  ;;  %v2033_v15 = vadd.f32 %v2032_v39, %v2002_v12  ;;  %2586 = vst [vmem:[%s4619_s18 + $0x30] sm:$0xff] %v2519_v19  }
 0x21b   : > { %v2034_v41 = vadd.f32 %v2033_v15, %v2003_v35  ;;  %v1965_v20 = vadd.f32 %v2642_v3, %v1964_v17 }
 0x21d   : > { %v2035_v55 = vadd.f32 %v2034_v41, %v2004_v29 }
 0x22b   : > { %v2645_v1 = vpop.f32.mrb[0].mxu1 }
 0x22c   : > { %v1888_v44 = vpop.f32.mrb[1].mxu1  ;;  %v2007_v40 = vmul.f32 %v2645_v1, %v2645_v1 }
 0x22d   : > { %v1966_v5 = vadd.f32 %v1965_v20, %v1888_v44  ;;  %v2005_v61 = vmul.f32 %v1888_v44, %v1888_v44  ;;  %v2646_v56 = vpop.f32.mrb[2].mxu1 }
 0x22e   : > { %v2534_v24 = vpack.c.bf16 %v2646_v56, %v2645_v1  ;;  %v1891_v42 = vpop.f32.mrb[3].mxu1  ;;  %v2008_v49 = vmul.f32 %v2646_v56, %v2646_v56 }
 0x22f   : > { %v2036_v63 = vadd.f32 %v2035_v55, %v2005_v61  ;;  %v1967_v37 = vadd.f32 %v1966_v5, %v1891_v42  ;;  %v2006_v48 = vmul.f32 %v1891_v42, %v1891_v42  ;;  %v2529_v6 = vpack.c.bf16 %v1891_v42, %v1888_v44 }
 0x230   : > { %2589 = vst [vmem:[%s4619_s18 + $0x48] sm:$0xff] %v2534_v24  }
 0x231   : > { %v1968_v57 = vadd.f32 %v2645_v1, %v1967_v37  ;;  %v2037_v33 = vadd.f32 %v2036_v63, %v2006_v48  ;;  %2588 = vst [vmem:[%s4619_s18 + $0x40] sm:$0xff] %v2529_v6  }
 0x233   : > { %v2038_v34 = vadd.f32 %v2037_v33, %v2007_v40  ;;  %v1969_v36 = vadd.f32 %v2646_v56, %v1968_v57 }
 0x235   : > { %v2039_v14 = vadd.f32 %v2038_v34, %v2008_v49 }
 0x243   : > { %v2649_v58 = vpop.f32.mrb[4].mxu1 }
 0x244   : > { %v1904_v27 = vpop.f32.mrb[5].mxu1  ;;  %v2011_v18 = vmul.f32 %v2649_v58, %v2649_v58 }
 0x245   : > { %v1970_v23 = vadd.f32 %v1969_v36, %v1904_v27  ;;  %v2009_v50 = vmul.f32 %v1904_v27, %v1904_v27  ;;  %v2650_v59 = vpop.f32.mrb[6].mxu1 }
 0x246   : > { %v2544_v32 = vpack.c.bf16 %v2650_v59, %v2649_v58  ;;  %v1907_v26 = vpop.f32.mrb[7].mxu1  ;;  %v2012_v38 = vmul.f32 %v2650_v59, %v2650_v59 }
 0x247   : > { %v2040_v13 = vadd.f32 %v2039_v14, %v2009_v50  ;;  %v1971_v31 = vadd.f32 %v1970_v23, %v1907_v26  ;;  %v2010_v53 = vmul.f32 %v1907_v26, %v1907_v26  ;;  %v2539_v7 = vpack.c.bf16 %v1907_v26, %v1904_v27 }
 0x248   : > { %2591 = vst [vmem:[%s4619_s18 + $0x58] sm:$0xff] %v2544_v32  }
 0x249   : > { %v1972_v9 = vadd.f32 %v2649_v58, %v1971_v31  ;;  %v2041_v51 = vadd.f32 %v2040_v13, %v2010_v53  ;;  %2590 = vst [vmem:[%s4619_s18 + $0x50] sm:$0xff] %v2539_v7  }
 0x24b   : > { %v2042_v45 = vadd.f32 %v2041_v51, %v2011_v18  ;;  %v1973_v8 = vadd.f32 %v2650_v59, %v1972_v9 }
 0x24d   : > { %v2043_v10 = vadd.f32 %v2042_v45, %v2012_v38 }
 0x25b   : > { %v2653_v47 = vpop.f32.mrb[8].mxu1 }
 0x25c   : > { %v1920_v4 = vpop.f32.mrb[9].mxu1  ;;  %v2015_v28 = vmul.f32 %v2653_v47, %v2653_v47 }
 0x25d   : > { %v1974_v62 = vadd.f32 %v1973_v8, %v1920_v4  ;;  %v2013_v25 = vmul.f32 %v1920_v4, %v1920_v4  ;;  %v2654_v30 = vpop.f32.mrb[10].mxu1 }
 0x25e   : > { %v2554_v60 = vpack.c.bf16 %v2654_v30, %v2653_v47  ;;  %v1923_v22 = vpop.f32.mrb[11].mxu1  ;;  %v2016_v3 = vmul.f32 %v2654_v30, %v2654_v30 }
 0x25f   : > { %v2044_v46 = vadd.f32 %v2043_v10, %v2013_v25  ;;  %v1975_v11 = vadd.f32 %v1974_v62, %v1923_v22  ;;  %v2014_v52 = vmul.f32 %v1923_v22, %v1923_v22  ;;  %v2549_v16 = vpack.c.bf16 %v1923_v22, %v1920_v4 }
 0x260   : > { %2593 = vst [vmem:[%s4619_s18 + $0x68] sm:$0xff] %v2554_v60  }
 0x261   : > { %v1976_v2 = vadd.f32 %v2653_v47, %v1975_v11  ;;  %v2045_v21 = vadd.f32 %v2044_v46, %v2014_v52  ;;  %2592 = vst [vmem:[%s4619_s18 + $0x60] sm:$0xff] %v2549_v16  }
 0x263   : > { %v2046_v0 = vadd.f32 %v2045_v21, %v2015_v28  ;;  %v1977_v54 = vadd.f32 %v2654_v30, %v1976_v2 }
 0x265   : > { %v2047_v39 = vadd.f32 %v2046_v0, %v2016_v3 }
 0x273   : > { %v2657_v43 = vpop.f32.mrb[12].mxu1 }
 0x274   : > { %v1936_v12 = vpop.f32.mrb[13].mxu1  ;;  %v2019_v44 = vmul.f32 %v2657_v43, %v2657_v43 }
 0x275   : > { %v1978_v19 = vadd.f32 %v1977_v54, %v1936_v12  ;;  %v2017_v35 = vmul.f32 %v1936_v12, %v1936_v12  ;;  %v2658_v17 = vpop.f32.mrb[14].mxu1 }
 0x276   : > { %v2564_v15 = vpack.c.bf16 %v2658_v17, %v2657_v43  ;;  %v1939_v29 = vpop.f32.mrb[15].mxu1  ;;  %v2020_v56 = vmul.f32 %v2658_v17, %v2658_v17 }
 0x277   : > { %v2048_v41 = vadd.f32 %v2047_v39, %v2017_v35  ;;  %v1979_v20 = vadd.f32 %v1978_v19, %v1939_v29  ;;  %v2018_v55 = vmul.f32 %v1939_v29, %v1939_v29  ;;  %v2559_v1 = vpack.c.bf16 %v1939_v29, %v1936_v12 }
 0x278   : > { %2595 = vst [vmem:[%s4619_s18 + $0x78] sm:$0xff] %v2564_v15  }
 0x279   : > { %v1980_v5 = vadd.f32 %v2657_v43, %v1979_v20  ;;  %v2049_v61 = vadd.f32 %v2048_v41, %v2018_v55  ;;  %2594 = vst [vmem:[%s4619_s18 + $0x70] sm:$0xff] %v2559_v1  }
 0x27b   : > { %v1981_v24 = vadd.f32 %v2658_v17, %v1980_v5  ;;  %v2050_v42 = vadd.f32 %v2049_v61, %v2019_v44 }
 0x27d   : > { %v1982_v63 = vrot.slane %v1981_v24, 4  ;;  %v2051_v37 = vadd.f32 %v2050_v42, %v2020_v56 }
 0x27f   : > { %v1983_v48 = vadd.f32 %v1982_v63, %v1981_v24  ;;  %v2052_v6 = vrot.slane %v2051_v37, 4 }
 0x281   : > { %v1984_v40 = vrot.slane %v1983_v48, 2  ;;  %v2053_v57 = vadd.f32 %v2052_v6, %v2051_v37 }
 0x283   : > { %v1985_v33 = vadd.f32 %v1984_v40, %v1983_v48  ;;  %v2054_v49 = vrot.slane %v2053_v57, 2 }
 0x285   : > { %v1986_v34 = vrot.slane %v1985_v33, 1  ;;  %v2055_v36 = vadd.f32 %v2054_v49, %v2053_v57 }
 0x287   : > { %v1987_v14 = vadd.f32 %v1986_v34, %v1985_v33  ;;  %v2056_v58 = vrot.slane %v2055_v36, 1 }
 0x289   : > { %1988 = vst [vmem:[%s211_s20] sm:$0x1] %v1987_v14  ;;  %v2057_v27 = vadd.f32 %v2056_v58, %v2055_v36 }
 0x28b   : > { %2058 = vst [vmem:[%s214_s23] sm:$0x1] %v2057_v27 }
 0x28c PF: > { %s15_s15 = sadd.s32 1, %s3339_s15  }
 0x28d   : > { %p12_p4 = scmp.ge.s32.totalorder %s15_s15, 4  }
 0x28f   :  { %14 = sbr.rel (!%p12_p4) target bundleno = 1 (0x1), region = 82 }

// kernel: stack_decoder_forward.4
= control target key start
LH: loop header
LB: loop body
LE: loop exit
PB: predicated region body
PF: predicated region fallthrough
CT: control target
= control target key end

     0   :  { %s9071_s27 = smov 0   ;;  %s10702_s0 = inlined_call_operand.vmem [shape: bf16[2,16,16,128], index: 0, kind: input, shape index: {}]   ;;  %s10703_s1 = inlined_call_operand.vmem [shape: bf16[2,16,16,128], index: 1, kind: input, shape index: {}]   ;;  %s10704_s2 = inlined_call_operand.vmem [shape: f32[1,128], index: 2, kind: input, shape index: {}]   ;;  %s10705_s3 = inlined_call_operand.vmem [shape: f32[1,128], index: 3, kind: input, shape index: {}]   ;;  %s10706_s4 = inlined_call_operand.vmem [shape: bf16[1152,128], index: 4, kind: input, shape index: {}]   ;;  %s10707_s5 = inlined_call_operand.vmem [shape: bf16[1152,128], index: 5, kind: input, shape index: {}]   ;;  %s10708_s6 = inlined_call_operand.vmem [shape: bf16[2,16,16,128], index: 6, kind: output, shape index: {0}]   ;;  %s10709_s7 = inlined_call_operand.vmem [shape: f32[2,1,128], index: 7, kind: output, shape index: {1}]   ;;  %s10710_s8 = inlined_call_operand.vmem [shape: f32[2,1,128], index: 8, kind: output, shape index: {2}]  }
   0x1 LB: > { %s6588_s28 = sadd.s32 4294967295, %s9023_s27   ;;  %p6592_p0 = scmp.ge.s32.totalorder %s9023_s27, 1  ;;  %s9023_s27 = sphi %s9071_s27, %s19_s27  }
   0x2   : > { %p277_p1 = scmp.lt.s32.totalorder %s9023_s27, 3 }
   0x4   : > { %p278_p2 = pnand %p6592_p0, %p277_p1 }
   0x6   : > { %281 = sbr.rel (%p278_p2) target bundleno = 891 (0x37b), region = 44 }
   0xd   : > { %v8853_v0 = vld [vmem:[%s10706_s4 + $0x40] sm:$0xff]   ;;  %v8855_v2 = vld [vmem:[%s10706_s4 + $0x48] sm:$0xff]   ;;  %p322_p3 = scmp.lt.s32.totalorder %s6588_s28, 1  ;;  %v8857_v4 = vld [vmem:[%s10706_s4 + $0x50] sm:$0xff]   ;;  %v9025_v10 = vmov 0   ;;  %vm687_vm0 = vcmask 1040384  }
   0xe   : > { %v8854_v1 = vld [vmem:[%s10707_s5] sm:$0xff]   ;;  %7436 = vmatprep.subr.bf16.mxu1 %v8853_v0  ;;  %v8856_v3 = vld [vmem:[%s10707_s5 + $0x8] sm:$0xff]   ;;  %v8858_v5 = vld [vmem:[%s10707_s5 + $0x10] sm:$0xff]   ;;  %v537_v11 = vrot.slane %v9025_v10, 7  ;;  %vm688_vm1 = vsmask.f32 256 }
   0xf   : > { %7868 = vmatprep.subr.bf16.mxu0 %v8854_v1  ;;  %7437 = vmatpush3.bf16.msra.mxu1 %v8853_v0  ;;  %s10995_s28 = smov (!%p322_p3, %s6588_s28), 1  ;;  %v8859_v6 = vld [vmem:[%s10706_s4 + $0x58] sm:$0xff]   ;;  %v8861_v8 = vld [vmem:[%s10706_s4 + $0x60] sm:$0xff]   ;;  %v8863_v12 = vld [vmem:[%s10706_s4 + $0x68] sm:$0xff]   ;;  %v10826_v15 = vmov 0  ;;  %vm1415_vm4 = vcmask 1046528  }
  0x10   : > { %7869 = vmatpush3.bf16.msra.mxu0 %v8854_v1  ;;  %7438 = vmatprep.subr.bf16.mxu1 %v8855_v2  ;;  %v8860_v7 = vld [vmem:[%s10707_s5 + $0x18] sm:$0xff]   ;;  %s9106_s23 = sshll.u32 %s10995_s28, 7  ;;  %v8862_v9 = vld [vmem:[%s10707_s5 + $0x20] sm:$0xff]   ;;  %v8864_v13 = vld [vmem:[%s10707_s5 + $0x28] sm:$0xff]   ;;  %vm740_vm3 = vsmask.f32 7424  ;;  %s339_s11 = scalar_lea.vmem %s10709_s7, %s10995_s28 }
  0x11   : > { %7870 = vmatprep.subr.bf16.mxu0 %v8856_v3  ;;  %s9118_s10 = scalar_lea.vmem %s10702_s0, %s9106_s23  ;;  %s9130_s17 = scalar_lea.vmem %s10703_s1, %s9106_s23  ;;  %vm9133_vm2 = vmand %vm687_vm0, %vm688_vm1  ;;  %v9140_v18 = vld [vmem:[%s10704_s2] ss:$0 sm:$0xff]  ;;  %v8865_v20 = vld [vmem:[%s10706_s4 + $0x70] sm:$0xff]  }
  0x12   : > { %v6831_v14 = vld [vmem:[%s9118_s10] sm:$0xff]   ;;  %v10827_v15 = vsel %vm9133_vm2, 4294967295, %v10826_v15  ;;  %v9152_v21 = vsel %vm9133_vm2, 0, %v537_v11  ;;  %v9156_v22 = vsel %vm9133_vm2, %v537_v11, 0  ;;  %v8866_v29 = vld [vmem:[%s10707_s5 + $0x30] sm:$0xff]   ;;  %v6974_v34 = vld [vmem:[%s9118_s10 + $0x8] sm:$0xff]   ;;  %s10673_s30 = scalar_lea.vmem %s10708_s6, %s9106_s23 }
  0x13   : > { %7439 = vmatpush3.bf16.msra.mxu1 %v8855_v2  ;;  %10828 = vst [vmem:[#allocation2_spill] sm:$0xff] %v10827_v15  ;;  %v6832_v16 = vunpack.c.l.bf16 %v6831_v14  ;;  %v6833_v17 = vunpack.c.h.bf16 %v6831_v14  ;;  %v9145_v19 = vld [vmem:[%s10705_s3] ss:$0 sm:$0xff]  ;;  %10829 = vst [vmem:[#allocation3_spill] sm:$0xff] %v9152_v21  ;;  %v742_v23 = vshrl.u32 %v9152_v21, 16  ;;  %v744_v24 = vshll.u32 %v9152_v21, 16  ;;  %7884 = vmatprep.mubr.bf16.mxu0 %v9152_v21 }
  0x14   : > { %7871 = vmatpush3.bf16.msra.mxu0 %v8856_v3  ;;  %7440 = vmatprep.subr.bf16.mxu1 %v8857_v4  ;;  %10830 = vst [vmem:[#allocation4_spill] sm:$0xff] %v9156_v22  ;;  %v749_v25 = vshll.u32 %v9156_v22, 16  ;;  %v8870_v27 = vld [vmem:[%s9130_s17] sm:$0xff]   ;;  %v8872_v35 = vld [vmem:[%s9130_s17 + $0x8] sm:$0xff]   ;;  %v8867_v36 = vld [vmem:[%s10706_s4 + $0x78] sm:$0xff]   ;;  %v6836_v39 = vunpack.c.l.bf16 %v6974_v34  ;;  %v6837_v40 = vunpack.c.h.bf16 %v6974_v34 }
  0x15   : > { %7872 = vmatprep.subr.bf16.mxu0 %v8858_v5  ;;  %v415_v26 = vmul.f32 %v6832_v16, %v9140_v18  ;;  %v416_v28 = vmul.f32 %v6833_v17, %v9140_v18  ;;  %v746_v30 = vrot.slane %v744_v24, 1  ;;  %v3411_v33 = vshrl.u32 %v8870_v27, 16  ;;  %v6975_v41 = vld [vmem:[%s9118_s10 + $0x10] sm:$0xff]   ;;  %v8868_v42 = vld [vmem:[%s10707_s5 + $0x38] sm:$0xff]   ;;  %v9201_v1 = vld [vmem:[%s10706_s4] sm:$0xff]  }
  0x16   : > { %v751_v31 = vrot.slane %v749_v25, 1  ;;  %v3414_v38 = vshll.u32 %v8870_v27, 16  ;;  %v3418_v46 = vshrl.u32 %v8872_v35, 16  ;;  %v417_v48 = vmul.f32 %v6836_v39, %v9140_v18  ;;  %v8874_v55 = vld [vmem:[%s9130_s17 + $0x10] sm:$0xff]   ;;  %v8875_v27 = vld [vmem:[%s10707_s5 + $0x48] sm:$0xff]  }
  0x17   : > { %7441 = vmatpush3.bf16.msra.mxu1 %v8857_v4  ;;  %v454_v32 = vadd.f32 %v9145_v19, %v415_v26  ;;  %v455_v37 = vadd.f32 %v9145_v19, %v416_v28  ;;  %v747_v43 = vor.u32 %v746_v30, %v742_v23  ;;  %v9179_v45 = vrot.slane %v3411_v33, 7  ;;  %v6976_v4 = vld [vmem:[%s9118_s10 + $0x18] sm:$0xff]  }
  0x18   : > { %7873 = vmatpush3.bf16.msra.mxu0 %v8858_v5  ;;  %7442 = vmatprep.subr.bf16.mxu1 %v8859_v6  ;;  %v418_v49 = vmul.f32 %v6837_v40, %v9140_v18  ;;  %v3421_v50 = vshll.u32 %v8872_v35, 16  ;;  %v9187_v53 = vrot.slane %v3418_v46, 7  ;;  %v6840_v54 = vunpack.c.l.bf16 %v6975_v41  ;;  %v8876_v28 = vld [vmem:[%s9130_s17 + $0x18] sm:$0xff]  }
  0x19   : > { %7874 = vmatprep.subr.bf16.mxu0 %v8860_v7  ;;  %v486_v44 = vmax.f32 %v454_v32, 0.0  ;;  %v487_v47 = vmax.f32 %v455_v37, 0.0  ;;  %v9184_v51 = vsel %vm740_vm3, %v747_v43, %v751_v31  ;;  %v3416_v52 = vor.u32 %v3414_v38, %v9179_v45 }
  0x1a   : > { %10831 = vst [vmem:[#allocation5_spill] sm:$0xff] %v9184_v51  ;;  %7452 = vmatprep.mubr.bf16.mxu1 %v9184_v51  ;;  %v456_v57 = vadd.f32 %v9145_v19, %v417_v48  ;;  %v457_v58 = vadd.f32 %v9145_v19, %v418_v49  ;;  %v6841_v59 = vunpack.c.h.bf16 %v6975_v41  ;;  %v419_v61 = vmul.f32 %v6840_v54, %v9140_v18 }
  0x1b   : > { %7443 = vmatpush3.bf16.msra.mxu1 %v8859_v6  ;;  %v518_v56 = vpack.c.bf16 %v487_v47, %v486_v44  ;;  %v9195_v60 = vsel %vm9133_vm2, 0, %v3416_v52  ;;  %v3425_v62 = vshrl.u32 %v8874_v55, 16  ;;  %v3423_v3 = vor.u32 %v3421_v50, %v9187_v53  ;;  %v8871_v6 = vld [vmem:[%s10707_s5 + $0x40] sm:$0xff]   ;;  %v8879_v50 = vld [vmem:[%s10707_s5 + $0x50] sm:$0xff]  }
  0x1c   : > { %7875 = vmatpush3.bf16.msra.mxu0 %v8860_v7  ;;  %7444 = vmatprep.subr.bf16.mxu1 %v8861_v8  ;;  %v488_v7 = vmax.f32 %v456_v57, 0.0  ;;  %v458_v11 = vadd.f32 %v9145_v19, %v419_v61  ;;  %v6844_v17 = vunpack.c.l.bf16 %v6976_v4  ;;  %v3432_v44 = vshrl.u32 %v8876_v28, 16 }
  0x1d   : > { %7876 = vmatprep.subr.bf16.mxu0 %v8862_v9  ;;  %v542_v63 = vshrl.u32 %v518_v56, 16  ;;  %v545_v0 = vshll.u32 %v518_v56, 16  ;;  %v9228_v32 = vsel %vm9133_vm2, 0, %v3423_v3  ;;  %v3435_v49 = vshll.u32 %v8876_v28, 16  ;;  %v8873_v56 = vld [vmem:[%s10706_s4 + $0x8] sm:$0xff]   ;;  %v8877_v28 = vld [vmem:[%s10706_s4 + $0x10] sm:$0xff]  }
  0x1e   : > { %v490_v25 = vmax.f32 %v458_v11, 0.0 }
  0x1f   : > { %7445 = vmatpush3.bf16.msra.mxu1 %v8861_v8  ;;  %v489_v8 = vmax.f32 %v457_v58, 0.0  ;;  %v544_v10 = vrot.slane %v542_v63, 7  ;;  %v6977_v58 = vld [vmem:[%s9118_s10 + $0x20] sm:$0xff]   ;;  %v9262_v63 = vrot.slane %v3432_v44, 7  ;;  %v8880_v44 = vld [vmem:[%s9130_s17 + $0x28] sm:$0xff]  }
  0x20   : > { %7877 = vmatpush3.bf16.msra.mxu0 %v8862_v9  ;;  %7446 = vmatprep.subr.bf16.mxu1 %v8863_v12  ;;  %v420_v9 = vmul.f32 %v6841_v59, %v9140_v18  ;;  %v6848_v11 = vunpack.c.l.bf16 %v6977_v58 }
  0x21   : > { %7878 = vmatprep.subr.bf16.mxu0 %v8864_v13  ;;  %v519_v14 = vpack.c.bf16 %v489_v8, %v488_v7  ;;  %v547_v23 = vor.u32 %v545_v0, %v544_v10  ;;  %v9217_v24 = vsel %vm9133_vm2, %v544_v10, 0  ;;  %v8878_v0 = vld [vmem:[%s9130_s17 + $0x20] sm:$0xff]   ;;  %v3437_v10 = vor.u32 %v3435_v49, %v9262_v63 }
  0x22   : > { %v459_v16 = vadd.f32 %v9145_v19, %v420_v9  ;;  %10832 = vst [vmem:[#allocation6_spill] sm:$0xff] %v9217_v24 }
  0x23   : > { %7447 = vmatpush3.bf16.msra.mxu1 %v8863_v12  ;;  %v9212_v12 = vrot.slane %v3425_v62, 7  ;;  %v549_v30 = vshrl.u32 %v519_v14, 16  ;;  %v552_v31 = vshll.u32 %v519_v14, 16  ;;  %v9232_v33 = vsel %vm9133_vm2, 0, %v547_v23 }
  0x24   : > { %7879 = vmatpush3.bf16.msra.mxu0 %v8864_v13  ;;  %7448 = vmatprep.subr.bf16.mxu1 %v8865_v20  ;;  %v3428_v13 = vshll.u32 %v8874_v55, 16  ;;  %v491_v34 = vmax.f32 %v459_v16, 0.0  ;;  %v754_v37 = vshrl.u32 %v9232_v33, 16  ;;  %v756_v38 = vshll.u32 %v9232_v33, 16 }
  0x25   : > { %7880 = vmatprep.subr.bf16.mxu0 %v8866_v29  ;;  %v551_v40 = vrot.slane %v549_v30, 7 }
  0x26   : > { %v3430_v26 = vor.u32 %v3428_v13, %v9212_v12  ;;  %v520_v41 = vpack.c.bf16 %v491_v34, %v490_v25  ;;  %v758_v46 = vrot.slane %v756_v38, 1  ;;  %v8883_v13 = vld [vmem:[%s10707_s5 + $0x58] sm:$0xff]   ;;  %v3439_v34 = vshrl.u32 %v8878_v0, 16 }
  0x27   : > { %7449 = vmatpush3.bf16.msra.mxu1 %v8865_v20  ;;  %v6845_v20 = vunpack.c.h.bf16 %v6976_v4  ;;  %v554_v47 = vor.u32 %v552_v31, %v551_v40  ;;  %v9247_v48 = vsel %vm9133_vm2, %v551_v40, 0 }
  0x28   : > { %7881 = vmatpush3.bf16.msra.mxu0 %v8866_v29  ;;  %7450 = vmatprep.subr.bf16.mxu1 %v8867_v36  ;;  %v761_v29 = vshll.u32 %v9217_v24, 16  ;;  %v9236_v35 = vsel %vm9133_vm2, 0, %v3430_v26  ;;  %10833 = vst [vmem:[#allocation7_spill] sm:$0xff] %v9247_v48  ;;  %v773_v52 = vshll.u32 %v9247_v48, 16  ;;  %v556_v54 = vshrl.u32 %v520_v41, 16 }
  0x29   : > { %7882 = vmatprep.subr.bf16.mxu0 %v8868_v42  ;;  %v559_v55 = vshll.u32 %v520_v41, 16  ;;  %v759_v59 = vor.u32 %v758_v46, %v754_v37  ;;  %v9260_v61 = vsel %vm9133_vm2, 0, %v554_v47  ;;  %v9284_v26 = vsel %vm9133_vm2, 0, %v3437_v10  ;;  %v8887_v46 = vld [vmem:[%s10707_s5 + $0x60] sm:$0xff]  }
  0x2a   : > { %v763_v39 = vrot.slane %v761_v29, 1  ;;  %v766_v3 = vshrl.u32 %v9260_v61, 16  ;;  %v768_v4 = vshll.u32 %v9260_v61, 16  ;;  %v558_v7 = vrot.slane %v556_v54, 7  ;;  %v6978_v29 = vld [vmem:[%s9118_s10 + $0x28] sm:$0xff]  }
  0x2b   : > { %7451 = vmatpush3.bf16.msra.mxu1 %v8867_v36  ;;  %v421_v36 = vmul.f32 %v6844_v17, %v9140_v18 }
  0x2c   : > { %7883 = vmatpush3.bf16.msra.mxu0 %v8868_v42  ;;  %7484 = vmatprep.subr.bf16.mxu1 %v9201_v1  ;;  %v422_v42 = vmul.f32 %v6845_v20, %v9140_v18  ;;  %v9268_v8 = vsel %vm740_vm3, %v759_v59, %v763_v39  ;;  %v770_v14 = vrot.slane %v768_v4, 1  ;;  %v561_v16 = vor.u32 %v559_v55, %v558_v7 }
  0x2d   : > { %7916 = vmatprep.subr.bf16.mxu0 %v8871_v6  ;;  %v460_v43 = vadd.f32 %v9145_v19, %v421_v36  ;;  %10834 = vst [vmem:[#allocation8_spill] sm:$0xff] %v9268_v8  ;;  %v9277_v17 = vsel %vm9133_vm2, %v558_v7, 0  ;;  %v6849_v20 = vunpack.c.h.bf16 %v6977_v58  ;;  %v6853_v58 = vunpack.c.h.bf16 %v6978_v29 }
  0x2e   : > { %v461_v57 = vadd.f32 %v9145_v19, %v422_v42  ;;  %7453 = vmatmul.mubr.bf16.vlgmr.msra.gmra.mrb[0].mxu1 %v9268_v8  ;;  %10835 = vst [vmem:[#allocation9_spill] sm:$0xff] %v9277_v17  ;;  %v785_v23 = vshll.u32 %v9277_v17, 16  ;;  %v771_v30 = vor.u32 %v770_v14, %v766_v3 }
  0x2f   : > { %7885 = vmatmul.mubr.bf16.vlgmr.msra.gmra.mrb[0].mxu0 %v9195_v60  ;;  %v492_v62 = vmax.f32 %v460_v43, 0.0  ;;  %7485 = vmatpush3.bf16.msra.mxu1 %v9201_v1  ;;  %v9293_v1 = vsel %vm9133_vm2, 0, %v561_v16  ;;  %v424_v31 = vmul.f32 %v6849_v20, %v9140_v18  ;;  %v426_v10 = vmul.f32 %v6853_v58, %v9140_v18  ;;  %v6980_v58 = vld [vmem:[%s9118_s10 + $0x38] sm:$0xff]  }
  0x30   : > { %7917 = vmatpush3.bf16.msra.mxu0 %v8871_v6  ;;  %7888 = vmatprep.mubr.bf16.mxu0 %v9228_v32  ;;  %v775_v6 = vrot.slane %v773_v52, 1  ;;  %v493_v9 = vmax.f32 %v461_v57, 0.0  ;;  %v778_v36 = vshrl.u32 %v9293_v1, 16  ;;  %v780_v37 = vshll.u32 %v9293_v1, 16 }
  0x31   : > { %7918 = vmatprep.subr.bf16.mxu0 %v8875_v27  ;;  %7486 = vmatprep.subr.bf16.mxu1 %v8873_v56  ;;  %v787_v38 = vrot.slane %v785_v23, 1  ;;  %v463_v43 = vadd.f32 %v9145_v19, %v424_v31  ;;  %v3442_v52 = vshll.u32 %v8878_v0, 16  ;;  %v6852_v57 = vunpack.c.l.bf16 %v6978_v29  ;;  %v8891_v23 = vld [vmem:[%s10707_s5 + $0x68] sm:$0xff]   ;;  %v8885_v31 = vld [vmem:[%s10706_s4 + $0x20] sm:$0xff]  }
  0x32   : > { %v521_v25 = vpack.c.bf16 %v493_v9, %v492_v62  ;;  %v9300_v40 = vsel %vm740_vm3, %v771_v30, %v775_v6  ;;  %v782_v47 = vrot.slane %v780_v37, 1  ;;  %v6979_v6 = vld [vmem:[%s9118_s10 + $0x30] sm:$0xff]   ;;  %v3446_v20 = vshrl.u32 %v8880_v44, 16 }
  0x33   : > { %10836 = vst [vmem:[#allocation10_spill] sm:$0xff] %v9300_v40  ;;  %7456 = vmatprep.mubr.bf16.mxu1 %v9300_v40  ;;  %7487 = vmatpush3.bf16.msra.mxu1 %v8873_v56  ;;  %v495_v55 = vmax.f32 %v463_v43, 0.0  ;;  %v8881_v56 = vld [vmem:[%s10706_s4 + $0x18] sm:$0xff]   ;;  %v425_v9 = vmul.f32 %v6852_v57, %v9140_v18 }
  0x34   : > { %7919 = vmatpush3.bf16.msra.mxu0 %v8875_v27  ;;  %v423_v27 = vmul.f32 %v6848_v11, %v9140_v18  ;;  %v563_v39 = vshrl.u32 %v521_v25, 16  ;;  %v566_v41 = vshll.u32 %v521_v25, 16  ;;  %7488 = vmatprep.subr.bf16.mxu1 %v8877_v28  ;;  %v783_v59 = vor.u32 %v782_v47, %v778_v36  ;;  %v9324_v11 = vld [vmem:[%s9130_s17 + $0x30] sm:$0xff]  }
  0x35   : > { %7920 = vmatprep.subr.bf16.mxu0 %v8879_v50  ;;  %v465_v36 = vadd.f32 %v9145_v19, %v426_v10  ;;  %v9349_v37 = vrot.slane %v3446_v20, 7  ;;  %v8884_v20 = vld [vmem:[%s9130_s17 + $0x38] sm:$0xff]  }
  0x36   : > { %v462_v42 = vadd.f32 %v9145_v19, %v423_v27  ;;  %v565_v49 = vrot.slane %v563_v39, 7  ;;  %v9327_v14 = vsel %vm740_vm3, %v783_v59, %v787_v38 }
  0x37   : > { %7889 = vmatmul.mubr.bf16.gmra.mrb[4].mxu0 %v9236_v35  ;;  %10838 = vst [vmem:[#allocation12_spill] sm:$0xff] %v9327_v14  ;;  %7489 = vmatpush3.bf16.msra.mxu1 %v8877_v28  ;;  %v497_v47 = vmax.f32 %v465_v36, 0.0  ;;  %v3456_v36 = vshll.u32 %v9324_v11, 16 }
  0x38   : > { %7892 = vmatprep.mubr.bf16.mxu0 %v9284_v26  ;;  %7921 = vmatpush3.bf16.msra.mxu0 %v8879_v50  ;;  %v9309_v50 = vrot.slane %v3439_v34, 7  ;;  %v494_v54 = vmax.f32 %v462_v42, 0.0  ;;  %v568_v62 = vor.u32 %v566_v41, %v565_v49  ;;  %v9313_v3 = vsel %vm9133_vm2, %v565_v49, 0 }
  0x39   : > { %7922 = vmatprep.subr.bf16.mxu0 %v8883_v13  ;;  %10837 = vst [vmem:[#allocation11_spill] sm:$0xff] %v9313_v3  ;;  %v797_v0 = vshll.u32 %v9313_v3, 16  ;;  %7457 = vmatmul.mubr.bf16.gmra.mrb[4].mxu1 %v9327_v14  ;;  %v464_v34 = vadd.f32 %v9145_v19, %v425_v9  ;;  %v3449_v41 = vshll.u32 %v8880_v44, 16  ;;  %v6856_v42 = vunpack.c.l.bf16 %v6979_v6  ;;  %v8889_v44 = vld [vmem:[%s10706_s4 + $0x28] sm:$0xff]  }
  0x3a   : > { %v3444_v4 = vor.u32 %v3442_v52, %v9309_v50  ;;  %v522_v7 = vpack.c.bf16 %v495_v55, %v494_v54  ;;  %v9331_v16 = vsel %vm9133_vm2, 0, %v568_v62  ;;  %7490 = vmatprep.subr.bf16.mxu1 %v8881_v56  ;;  %v6857_v49 = vunpack.c.h.bf16 %v6979_v6 }
  0x3b   : > { %v790_v25 = vshrl.u32 %v9331_v16, 16  ;;  %v792_v27 = vshll.u32 %v9331_v16, 16  ;;  %v799_v29 = vrot.slane %v797_v0, 1  ;;  %v496_v43 = vmax.f32 %v464_v34, 0.0  ;;  %7491 = vmatpush3.bf16.msra.mxu1 %v8881_v56  ;;  %v8895_v56 = vld [vmem:[%s10707_s5 + $0x70] sm:$0xff]  }
  0x3c   : > { %7923 = vmatpush3.bf16.msra.mxu0 %v8883_v13  ;;  %v9335_v13 = vsel %vm9133_vm2, 0, %v3444_v4  ;;  %v570_v30 = vshrl.u32 %v522_v7, 16  ;;  %v573_v28 = vshll.u32 %v522_v7, 16  ;;  %v3453_v52 = vshrl.u32 %v9324_v11, 16  ;;  %7492 = vmatprep.subr.bf16.mxu1 %v8885_v31  ;;  %v8899_v11 = vld [vmem:[%s10707_s5 + $0x78] sm:$0xff]  }
  0x3d   : > { %7924 = vmatprep.subr.bf16.mxu0 %v8887_v46  ;;  %v794_v38 = vrot.slane %v792_v27, 1  ;;  %v523_v62 = vpack.c.bf16 %v497_v47, %v496_v43  ;;  %v427_v4 = vmul.f32 %v6856_v42, %v9140_v18  ;;  %v428_v6 = vmul.f32 %v6857_v49, %v9140_v18  ;;  %v8893_v43 = vld [vmem:[%s10706_s4 + $0x30] sm:$0xff]  }
  0x3e   : > { %v572_v39 = vrot.slane %v570_v30, 7  ;;  %v9378_v10 = vrot.slane %v3453_v52, 7  ;;  %v6861_v42 = vunpack.c.h.bf16 %v6980_v58 }
  0x3f   : > { %7893 = vmatmul.mubr.bf16.gmra.mrb[8].mxu0 %v9335_v13  ;;  %v795_v54 = vor.u32 %v794_v38, %v790_v25  ;;  %v580_v30 = vshll.u32 %v523_v62, 16  ;;  %v467_v34 = vadd.f32 %v9145_v19, %v428_v6  ;;  %7493 = vmatpush3.bf16.msra.mxu1 %v8885_v31 }
  0x40   : > { %7925 = vmatpush3.bf16.msra.mxu0 %v8887_v46  ;;  %v575_v55 = vor.u32 %v573_v28, %v572_v39  ;;  %v9354_v57 = vsel %vm9133_vm2, %v572_v39, 0  ;;  %v3451_v46 = vor.u32 %v3449_v41, %v9349_v37  ;;  %v466_v28 = vadd.f32 %v9145_v19, %v427_v4  ;;  %7494 = vmatprep.subr.bf16.mxu1 %v8889_v44  ;;  %v8897_v4 = vld [vmem:[%s10706_s4 + $0x38] sm:$0xff]  }
  0x41   : > { %7926 = vmatprep.subr.bf16.mxu0 %v8891_v23  ;;  %10839 = vst [vmem:[#allocation13_spill] sm:$0xff] %v9354_v57  ;;  %v809_v59 = vshll.u32 %v9354_v57, 16  ;;  %v9368_v0 = vsel %vm740_vm3, %v795_v54, %v799_v29  ;;  %v577_v29 = vshrl.u32 %v523_v62, 16  ;;  %v6860_v41 = vunpack.c.l.bf16 %v6980_v58  ;;  %v9402_v62 = vld [vmem:[%s9130_s17 + $0x40] sm:$0xff]  }
  0x42   : > { %10840 = vst [vmem:[#allocation14_spill] sm:$0xff] %v9368_v0  ;;  %v9372_v7 = vsel %vm9133_vm2, 0, %v575_v55  ;;  %v9376_v9 = vsel %vm9133_vm2, 0, %v3451_v46  ;;  %7460 = vmatprep.mubr.bf16.mxu1 %v9368_v0  ;;  %v498_v47 = vmax.f32 %v466_v28, 0.0  ;;  %v499_v49 = vmax.f32 %v467_v34, 0.0 }
  0x43   : > { %v804_v25 = vshll.u32 %v9372_v7, 16  ;;  %v811_v27 = vrot.slane %v809_v59, 1  ;;  %7896 = vmatprep.mubr.bf16.mxu0 %v9376_v9  ;;  %v579_v39 = vrot.slane %v577_v29, 7  ;;  %v3458_v52 = vor.u32 %v3456_v36, %v9378_v10  ;;  %v6981_v59 = vld [vmem:[%s9118_s10 + $0x40] sm:$0xff]   ;;  %7495 = vmatpush3.bf16.msra.mxu1 %v8889_v44 }
  0x44   : > { %7927 = vmatpush3.bf16.msra.mxu0 %v8891_v23  ;;  %v802_v23 = vshrl.u32 %v9372_v7, 16  ;;  %v3460_v54 = vshrl.u32 %v8884_v20, 16  ;;  %v429_v58 = vmul.f32 %v6860_v41, %v9140_v18  ;;  %7496 = vmatprep.subr.bf16.mxu1 %v8893_v43 }
  0x45   : > { %7928 = vmatprep.subr.bf16.mxu0 %v8895_v56  ;;  %v806_v38 = vrot.slane %v804_v25, 1  ;;  %v582_v55 = vor.u32 %v580_v30, %v579_v39  ;;  %v9397_v46 = vsel %vm9133_vm2, %v579_v39, 0  ;;  %v430_v25 = vmul.f32 %v6861_v42, %v9140_v18 }
  0x46   : > { %10841 = vst [vmem:[#allocation15_spill] sm:$0xff] %v9397_v46  ;;  %v821_v6 = vshll.u32 %v9397_v46, 16  ;;  %v468_v28 = vadd.f32 %v9145_v19, %v429_v58  ;;  %v9422_v34 = vrot.slane %v3460_v54, 7 }
  0x47   : > { %v807_v31 = vor.u32 %v806_v38, %v802_v23  ;;  %v9410_v23 = vsel %vm9133_vm2, 0, %v3458_v52  ;;  %v9418_v30 = vsel %vm9133_vm2, 0, %v582_v55  ;;  %v469_v41 = vadd.f32 %v9145_v19, %v430_v25  ;;  %7497 = vmatpush3.bf16.msra.mxu1 %v8893_v43 }
  0x48   : > { %7929 = vmatpush3.bf16.msra.mxu0 %v8895_v56  ;;  %v524_v56 = vpack.c.bf16 %v499_v49, %v498_v47  ;;  %v814_v36 = vshrl.u32 %v9418_v30, 16  ;;  %v816_v44 = vshll.u32 %v9418_v30, 16  ;;  %v823_v38 = vrot.slane %v821_v6, 1  ;;  %v9431_v49 = vld [vmem:[%s10707_s5 + $0x80] sm:$0xff]   ;;  %7498 = vmatprep.subr.bf16.mxu1 %v8897_v4 }
  0x49   : > { %7930 = vmatprep.subr.bf16.mxu0 %v8899_v11  ;;  %v9414_v29 = vsel %vm740_vm3, %v807_v31, %v811_v27  ;;  %7897 = vmatmul.mubr.bf16.gmra.mrb[12].mxu0 %v9410_v23  ;;  %v500_v42 = vmax.f32 %v468_v28, 0.0  ;;  %v3463_v47 = vshll.u32 %v8884_v20, 16  ;;  %v6864_v31 = vunpack.c.l.bf16 %v6981_v59  ;;  %v9439_v20 = vld [vmem:[%s10706_s4 + $0x80] sm:$0xff]  }
  0x4a   : > { %10842 = vst [vmem:[#allocation16_spill] sm:$0xff] %v9414_v29  ;;  %7461 = vmatmul.mubr.bf16.gmra.mrb[8].mxu1 %v9414_v29  ;;  %v584_v27 = vshrl.u32 %v524_v56, 16  ;;  %v587_v39 = vshll.u32 %v524_v56, 16  ;;  %v818_v52 = vrot.slane %v816_v44, 1  ;;  %v6865_v55 = vunpack.c.h.bf16 %v6981_v59  ;;  %v6982_v44 = vld [vmem:[%s9118_s10 + $0x48] sm:$0xff]  }
  0x4b   : > { %v501_v58 = vmax.f32 %v469_v41, 0.0  ;;  %v3467_v6 = vshrl.u32 %v9402_v62, 16  ;;  %v3470_v56 = vshll.u32 %v9402_v62, 16  ;;  %v431_v59 = vmul.f32 %v6864_v31, %v9140_v18  ;;  %7499 = vmatpush3.bf16.msra.mxu1 %v8897_v4 }
  0x4c   : > { %7931 = vmatpush3.bf16.msra.mxu0 %v8899_v11  ;;  %v586_v54 = vrot.slane %v584_v27, 7  ;;  %v3465_v11 = vor.u32 %v3463_v47, %v9422_v34  ;;  %v819_v25 = vor.u32 %v818_v52, %v814_v36  ;;  %v8888_v27 = vld [vmem:[%s9130_s17 + $0x48] sm:$0xff]   ;;  %v432_v2 = vmul.f32 %v6865_v55, %v9140_v18  ;;  %7532 = vmatprep.subr.bf16.mxu1 %v9439_v20 }
  0x4d   : > { %7964 = vmatprep.subr.bf16.mxu0 %v9431_v49  ;;  %v525_v41 = vpack.c.bf16 %v501_v58, %v500_v42  ;;  %v470_v52 = vadd.f32 %v9145_v19, %v431_v59  ;;  %v6983_v59 = vld [vmem:[%s9118_s10 + $0x50] sm:$0xff]   ;;  %v6868_v4 = vunpack.c.l.bf16 %v6982_v44  ;;  %v6869_v29 = vunpack.c.h.bf16 %v6982_v44 }
  0x4e   : > { %v589_v28 = vor.u32 %v587_v39, %v586_v54  ;;  %v9444_v43 = vsel %vm9133_vm2, %v586_v54, 0  ;;  %v9452_v47 = vsel %vm9133_vm2, 0, %v3465_v11  ;;  %v9456_v36 = vsel %vm740_vm3, %v819_v25, %v823_v38 }
  0x4f   : > { %10843 = vst [vmem:[#allocation17_spill] sm:$0xff] %v9444_v43  ;;  %v833_v62 = vshll.u32 %v9444_v43, 16  ;;  %10844 = vst [vmem:[#allocation18_spill] sm:$0xff] %v9456_v36  ;;  %7900 = vmatprep.mubr.bf16.mxu0 %v9452_v47  ;;  %v9464_v54 = vrot.slane %v3467_v6, 7  ;;  %7464 = vmatprep.mubr.bf16.mxu1 %v9456_v36  ;;  %v591_v55 = vshrl.u32 %v525_v41, 16  ;;  %v594_v58 = vshll.u32 %v525_v41, 16 }
  0x50   : > { %v9460_v39 = vsel %vm9133_vm2, 0, %v589_v28  ;;  %v471_v11 = vadd.f32 %v9145_v19, %v432_v2  ;;  %v502_v25 = vmax.f32 %v470_v52, 0.0  ;;  %v3477_v14 = vshll.u32 %v8888_v27, 16 }
  0x51   : > { %10845 = vst [vmem:[#allocation19_spill] sm:$0xff] %v9460_v39  ;;  %v826_v42 = vshrl.u32 %v9460_v39, 16  ;;  %v828_v31 = vshll.u32 %v9460_v39, 16  ;;  %v835_v38 = vrot.slane %v833_v62, 1  ;;  %v3472_v28 = vor.u32 %v3470_v56, %v9464_v54 }
  0x52   : > { %v593_v5 = vrot.slane %v591_v55, 7  ;;  %v503_v36 = vmax.f32 %v471_v11, 0.0  ;;  %v3474_v62 = vshrl.u32 %v8888_v27, 16  ;;  %v433_v56 = vmul.f32 %v6868_v4, %v9140_v18 }
  0x53   : > { %v830_v6 = vrot.slane %v828_v31, 1  ;;  %v9475_v0 = vsel %vm9133_vm2, 0, %v3472_v28  ;;  %v434_v31 = vmul.f32 %v6869_v29, %v9140_v18 }
  0x54   : > { %v596_v41 = vor.u32 %v594_v58, %v593_v5  ;;  %v9479_v2 = vsel %vm9133_vm2, %v593_v5, 0  ;;  %7901 = vmatmul.mubr.bf16.gmra.mrb[16].mxu0 %v9475_v0  ;;  %v526_v52 = vpack.c.bf16 %v503_v36, %v502_v25  ;;  %v9485_v55 = vrot.slane %v3474_v62, 7  ;;  %v8890_v58 = vld [vmem:[%s9130_s17 + $0x50] sm:$0xff]  }
  0x55   : > { %v831_v40 = vor.u32 %v830_v6, %v826_v42  ;;  %10846 = vst [vmem:[#allocation20_spill] sm:$0xff] %v9479_v2  ;;  %v845_v44 = vshll.u32 %v9479_v2, 16  ;;  %v472_v5 = vadd.f32 %v9145_v19, %v433_v56  ;;  %v6872_v42 = vunpack.c.l.bf16 %v6983_v59  ;;  %v6984_v2 = vld [vmem:[%s9118_s10 + $0x58] sm:$0xff]  }
  0x56   : > { %v9492_v27 = vsel %vm9133_vm2, 0, %v596_v41  ;;  %v598_v28 = vshrl.u32 %v526_v52, 16  ;;  %v601_v6 = vshll.u32 %v526_v52, 16  ;;  %v3479_v4 = vor.u32 %v3477_v14, %v9485_v55 }
  0x57   : > { %v9488_v11 = vsel %vm740_vm3, %v831_v40, %v835_v38  ;;  %10848 = vst [vmem:[#allocation22_spill] sm:$0xff] %v9492_v27  ;;  %v838_v36 = vshrl.u32 %v9492_v27, 16  ;;  %v840_v29 = vshll.u32 %v9492_v27, 16  ;;  %v847_v25 = vrot.slane %v845_v44, 1 }
  0x58   : > { %10847 = vst [vmem:[#allocation21_spill] sm:$0xff] %v9488_v11  ;;  %7465 = vmatmul.mubr.bf16.gmra.mrb[12].mxu1 %v9488_v11  ;;  %v473_v40 = vadd.f32 %v9145_v19, %v434_v31  ;;  %v504_v38 = vmax.f32 %v472_v5, 0.0  ;;  %v600_v41 = vrot.slane %v598_v28, 7  ;;  %v6873_v56 = vunpack.c.h.bf16 %v6983_v59 }
  0x59   : > { %v842_v62 = vrot.slane %v840_v29, 1  ;;  %v435_v8 = vmul.f32 %v6872_v42, %v9140_v18  ;;  %v9505_v11 = vsel %vm9133_vm2, 0, %v3479_v4  ;;  %v3481_v44 = vshrl.u32 %v8890_v58, 16 }
  0x5a   : > { %v505_v43 = vmax.f32 %v473_v40, 0.0  ;;  %v3484_v46 = vshll.u32 %v8890_v58, 16  ;;  %v603_v57 = vor.u32 %v601_v6, %v600_v41  ;;  %v9509_v31 = vsel %vm9133_vm2, %v600_v41, 0  ;;  %7904 = vmatprep.mubr.bf16.mxu0 %v9505_v11  ;;  %v8892_v40 = vld [vmem:[%s9130_s17 + $0x58] sm:$0xff]  }
  0x5b   : > { %v843_v52 = vor.u32 %v842_v62, %v838_v36  ;;  %10849 = vst [vmem:[#allocation23_spill] sm:$0xff] %v9509_v31  ;;  %v436_v14 = vmul.f32 %v6873_v56, %v9140_v18  ;;  %v857_v59 = vshll.u32 %v9509_v31, 16  ;;  %v474_v42 = vadd.f32 %v9145_v19, %v435_v8 }
  0x5c   : > { %v527_v5 = vpack.c.bf16 %v505_v43, %v504_v38  ;;  %v9515_v29 = vrot.slane %v3481_v44, 7  ;;  %v9522_v58 = vsel %vm9133_vm2, 0, %v603_v57  ;;  %v6876_v6 = vunpack.c.l.bf16 %v6984_v2 }
  0x5d   : > { %v9518_v28 = vsel %vm740_vm3, %v843_v52, %v847_v25  ;;  %10851 = vst [vmem:[#allocation25_spill] sm:$0xff] %v9522_v58  ;;  %v475_v36 = vadd.f32 %v9145_v19, %v436_v14  ;;  %v850_v4 = vshrl.u32 %v9522_v58, 16  ;;  %v852_v43 = vshll.u32 %v9522_v58, 16 }
  0x5e   : > { %10850 = vst [vmem:[#allocation24_spill] sm:$0xff] %v9518_v28  ;;  %7468 = vmatprep.mubr.bf16.mxu1 %v9518_v28  ;;  %v859_v8 = vrot.slane %v857_v59, 1  ;;  %v605_v38 = vshrl.u32 %v527_v5, 16  ;;  %v608_v62 = vshll.u32 %v527_v5, 16  ;;  %v506_v41 = vmax.f32 %v474_v42, 0.0 }
  0x5f   : > { %v507_v25 = vmax.f32 %v475_v36, 0.0  ;;  %v3486_v56 = vor.u32 %v3484_v46, %v9515_v29  ;;  %v854_v44 = vrot.slane %v852_v43, 1  ;;  %v6877_v52 = vunpack.c.h.bf16 %v6984_v2  ;;  %v6985_v43 = vld [vmem:[%s9118_s10 + $0x60] sm:$0xff]  }
  0x60   : > { %v607_v57 = vrot.slane %v605_v38, 7  ;;  %v437_v14 = vmul.f32 %v6876_v6, %v9140_v18  ;;  %v3488_v3 = vshrl.u32 %v8892_v40, 16  ;;  %v3491_v17 = vshll.u32 %v8892_v40, 16  ;;  %v9554_v38 = vld [vmem:[%s10705_s3] ss:$0 sm:$0xff] }
  0x61   : > { %v528_v31 = vpack.c.bf16 %v507_v25, %v506_v41  ;;  %v9533_v28 = vsel %vm9133_vm2, 0, %v3486_v56  ;;  %v855_v59 = vor.u32 %v854_v44, %v850_v4  ;;  %v438_v46 = vmul.f32 %v6877_v52, %v9140_v18 }
  0x62   : > { %v610_v48 = vor.u32 %v608_v62, %v607_v57  ;;  %v9537_v5 = vsel %vm9133_vm2, %v607_v57, 0  ;;  %7905 = vmatmul.mubr.bf16.gmra.mrb[20].mxu0 %v9533_v28  ;;  %v476_v6 = vadd.f32 %v9145_v19, %v437_v14  ;;  %v9557_v62 = vrot.slane %v3488_v3, 7 }
  0x63   : > { %10852 = vst [vmem:[#allocation26_spill] sm:$0xff] %v9537_v5  ;;  %v869_v2 = vshll.u32 %v9537_v5, 16  ;;  %v612_v42 = vshrl.u32 %v528_v31, 16  ;;  %v615_v36 = vshll.u32 %v528_v31, 16  ;;  %v9545_v40 = vsel %vm740_vm3, %v855_v59, %v859_v8 }
  0x64   : > { %10853 = vst [vmem:[#allocation27_spill] sm:$0xff] %v9545_v40  ;;  %v9549_v4 = vsel %vm9133_vm2, 0, %v610_v48  ;;  %v477_v18 = vadd.f32 %v9554_v38, %v438_v46  ;;  %7469 = vmatmul.mubr.bf16.gmra.mrb[16].mxu1 %v9545_v40  ;;  %v8894_v48 = vld [vmem:[%s9130_s17 + $0x60] sm:$0xff]   ;;  %v508_v25 = vmax.f32 %v476_v6, 0.0  ;;  %v3493_v44 = vor.u32 %v3491_v17, %v9557_v62  ;;  %v10889_v15 = vld [vmem:[#allocation25_spill] sm:$0xff] }
  0x65   : > { %10854 = vst [vmem:[#allocation28_spill] sm:$0xff] %v9549_v4  ;;  %v862_v19 = vshrl.u32 %v9549_v4, 16  ;;  %v864_v31 = vshll.u32 %v9549_v4, 16  ;;  %v871_v8 = vrot.slane %v869_v2, 1  ;;  %v614_v41 = vrot.slane %v612_v42, 7 }
  0x66   : > { %v509_v56 = vmax.f32 %v477_v18, 0.0  ;;  %v6880_v57 = vunpack.c.l.bf16 %v6985_v43  ;;  %v6881_v59 = vunpack.c.h.bf16 %v6985_v43  ;;  %v9571_v2 = vsel %vm9133_vm2, 0, %v3493_v44  ;;  %v9576_v42 = vld [vmem:[%s10704_s2] ss:$0 sm:$0xff] }
  0x67   : > { %v866_v52 = vrot.slane %v864_v31, 1  ;;  %v617_v14 = vor.u32 %v615_v36, %v614_v41  ;;  %v9566_v3 = vsel %vm9133_vm2, %v614_v41, 0  ;;  %10856 = vst [vmem:[#allocation30_spill] sm:$0xff] %v9571_v2  ;;  %v6986_v36 = vld [vmem:[%s9118_s10 + $0x68] sm:$0xff]   ;;  %7908 = vmatprep.mubr.bf16.mxu0 %v9571_v2  ;;  %v3495_v31 = vshrl.u32 %v8894_v48, 16 }
  0x68   : > { %10855 = vst [vmem:[#allocation29_spill] sm:$0xff] %v9566_v3  ;;  %v881_v46 = vshll.u32 %v9566_v3, 16  ;;  %v529_v40 = vpack.c.bf16 %v509_v56, %v508_v25  ;;  %v439_v17 = vmul.f32 %v9576_v42, %v6880_v57  ;;  %v440_v18 = vmul.f32 %v9576_v42, %v6881_v59 }
  0x69   : > { %v867_v6 = vor.u32 %v866_v52, %v862_v19  ;;  %v9582_v43 = vsel %vm9133_vm2, 0, %v617_v14  ;;  %v8896_v14 = vld [vmem:[%s9130_s17 + $0x68] sm:$0xff]   ;;  %v9595_v24 = vrot.slane %v3495_v31, 7  ;;  %v3498_v4 = vshll.u32 %v8894_v48, 16 }
  0x6a   : > { %10857 = vst [vmem:[#allocation31_spill] sm:$0xff] %v9582_v43  ;;  %v874_v41 = vshrl.u32 %v9582_v43, 16  ;;  %v876_v25 = vshll.u32 %v9582_v43, 16  ;;  %v883_v56 = vrot.slane %v881_v46, 1  ;;  %v619_v44 = vshrl.u32 %v529_v40, 16 }
  0x6b   : > { %v9589_v3 = vsel %vm740_vm3, %v867_v6, %v871_v8  ;;  %v622_v57 = vshll.u32 %v529_v40, 16  ;;  %v478_v19 = vadd.f32 %v9554_v38, %v439_v17  ;;  %v479_v52 = vadd.f32 %v9554_v38, %v440_v18  ;;  %10859 = vst [vmem:[#allocation33_spill] sm:$0xff] %v9595_v24 }
  0x6c   : > { %10858 = vst [vmem:[#allocation32_spill] sm:$0xff] %v9589_v3  ;;  %7472 = vmatprep.mubr.bf16.mxu1 %v9589_v3  ;;  %v878_v5 = vrot.slane %v876_v25, 1  ;;  %v621_v59 = vrot.slane %v619_v44, 7  ;;  %v6884_v22 = vunpack.c.l.bf16 %v6986_v36  ;;  %v6885_v8 = vunpack.c.h.bf16 %v6986_v36  ;;  %v6987_v44 = vld [vmem:[%s9118_s10 + $0x70] sm:$0xff]  }
  0x6d   : > { %v510_v43 = vmax.f32 %v478_v19, 0.0  ;;  %v511_v46 = vmax.f32 %v479_v52, 0.0  ;;  %v3500_v18 = vor.u32 %v3498_v4, %v9595_v24  ;;  %v3502_v4 = vshrl.u32 %v8896_v14, 16 }
  0x6e   : > { %v879_v6 = vor.u32 %v878_v5, %v874_v41  ;;  %v624_v40 = vor.u32 %v622_v57, %v621_v59  ;;  %v9599_v17 = vsel %vm9133_vm2, %v621_v59, 0  ;;  %v441_v31 = vmul.f32 %v9576_v42, %v6884_v22  ;;  %v8898_v41 = vld [vmem:[%s9130_s17 + $0x70] sm:$0xff]  }
  0x6f   : > { %10860 = vst [vmem:[#allocation34_spill] sm:$0xff] %v9599_v17  ;;  %v893_v25 = vshll.u32 %v9599_v17, 16  ;;  %v530_v3 = vpack.c.bf16 %v511_v46, %v510_v43  ;;  %v442_v48 = vmul.f32 %v9576_v42, %v6885_v8  ;;  %v9615_v36 = vsel %vm9133_vm2, 0, %v3500_v18 }
  0x70   : > { %v9607_v19 = vsel %vm740_vm3, %v879_v6, %v883_v56  ;;  %v9611_v5 = vsel %vm9133_vm2, 0, %v624_v40  ;;  %10863 = vst [vmem:[#allocation37_spill] sm:$0xff] %v9615_v36  ;;  %7909 = vmatmul.mubr.bf16.gmra.mrb[24].mxu0 %v9615_v36  ;;  %v480_v59 = vadd.f32 %v9554_v38, %v441_v31  ;;  %v9624_v8 = vrot.slane %v3502_v4, 7 }
  0x71   : > { %10861 = vst [vmem:[#allocation35_spill] sm:$0xff] %v9607_v19  ;;  %10862 = vst [vmem:[#allocation36_spill] sm:$0xff] %v9611_v5  ;;  %7473 = vmatmul.mubr.bf16.gmra.mrb[20].mxu1 %v9607_v19  ;;  %v886_v22 = vshrl.u32 %v9611_v5, 16  ;;  %v888_v43 = vshll.u32 %v9611_v5, 16  ;;  %v895_v57 = vrot.slane %v893_v25, 1  ;;  %v626_v52 = vshrl.u32 %v530_v3, 16 }
  0x72   : > { %v629_v56 = vshll.u32 %v530_v3, 16  ;;  %v481_v46 = vadd.f32 %v9554_v38, %v442_v48  ;;  %v3505_v18 = vshll.u32 %v8896_v14, 16  ;;  %v6888_v17 = vunpack.c.l.bf16 %v6987_v44 }
  0x73   : > { %v890_v6 = vrot.slane %v888_v43, 1  ;;  %v628_v40 = vrot.slane %v626_v52, 7  ;;  %v512_v19 = vmax.f32 %v480_v59, 0.0  ;;  %v6889_v27 = vunpack.c.h.bf16 %v6987_v44 }
  0x74   : > { %v513_v58 = vmax.f32 %v481_v46, 0.0  ;;  %v3509_v39 = vshrl.u32 %v8898_v41, 16  ;;  %v3507_v3 = vor.u32 %v3505_v18, %v9624_v8  ;;  %v443_v4 = vmul.f32 %v9576_v42, %v6888_v17 }
  0x75   : > { %v891_v5 = vor.u32 %v890_v6, %v886_v22  ;;  %v631_v25 = vor.u32 %v629_v56, %v628_v40  ;;  %v9628_v24 = vsel %vm9133_vm2, %v628_v40, 0  ;;  %v444_v14 = vmul.f32 %v9576_v42, %v6889_v27 }
  0x76   : > { %v905_v31 = vshll.u32 %v9628_v24, 16  ;;  %v531_v48 = vpack.c.bf16 %v513_v58, %v512_v19  ;;  %v9643_v22 = vsel %vm9133_vm2, 0, %v3507_v3  ;;  %v9645_v52 = vrot.slane %v3509_v39, 7 }
  0x77   : > { %v9635_v43 = vsel %vm740_vm3, %v891_v5, %v895_v57  ;;  %v9639_v44 = vsel %vm9133_vm2, 0, %v631_v25  ;;  %7912 = vmatprep.mubr.bf16.mxu0 %v9643_v22  ;;  %v482_v5 = vadd.f32 %v9554_v38, %v443_v4  ;;  %v483_v57 = vadd.f32 %v9554_v38, %v444_v14 }
  0x78   : > { %10864 = vst [vmem:[#allocation38_spill] sm:$0xff] %v9635_v43  ;;  %7476 = vmatprep.mubr.bf16.mxu1 %v9635_v43  ;;  %v898_v58 = vshrl.u32 %v9639_v44, 16  ;;  %v900_v17 = vshll.u32 %v9639_v44, 16  ;;  %v907_v27 = vrot.slane %v905_v31, 1  ;;  %v633_v42 = vshrl.u32 %v531_v48, 16 }
  0x79   : > { %v636_v19 = vshll.u32 %v531_v48, 16  ;;  %v3512_v56 = vshll.u32 %v8898_v41, 16  ;;  %v9656_v39 = vsel %vm9133_vm2, %v9179_v45, 0  ;;  %v10865_v6 = vshll.u32 %v9195_v60, 16 }
  0x7a   : > { %v902_v59 = vrot.slane %v900_v17, 1  ;;  %v635_v46 = vrot.slane %v633_v42, 7  ;;  %v514_v18 = vmax.f32 %v482_v5, 0.0  ;;  %v515_v25 = vmax.f32 %v483_v57, 0.0 }
  0x7b   : > { %v3848_v40 = vrot.slane %v10865_v6, 1  ;;  %v3514_v3 = vor.u32 %v3512_v56, %v9645_v52  ;;  %v3851_v31 = vshll.u32 %v9656_v39, 16  ;;  %v10866_v41 = vshrl.u32 %v9195_v60, 16 }
  0x7c   : > { %v903_v48 = vor.u32 %v902_v59, %v898_v58  ;;  %v638_v4 = vor.u32 %v636_v19, %v635_v46  ;;  %v9664_v38 = vsel %vm9133_vm2, %v635_v46, 0  ;;  %v532_v17 = vpack.c.bf16 %v515_v25, %v514_v18 }
  0x7d   : > { %v3849_v14 = vor.u32 %v3848_v40, %v10866_v41  ;;  %v917_v45 = vshll.u32 %v9664_v38, 16  ;;  %v9671_v42 = vsel %vm9133_vm2, 0, %v3514_v3  ;;  %v3853_v5 = vrot.slane %v3851_v31, 1 }
  0x7e   : > { %v9674_v57 = vsel %vm740_vm3, %v903_v48, %v907_v27  ;;  %v9678_v58 = vsel %vm9133_vm2, 0, %v638_v4  ;;  %7913 = vmatmul.mubr.bf16.gmra.mrb[28].mxu0 %v9671_v42  ;;  %v9684_v19 = vsel %vm9133_vm2, %v9187_v53, 0  ;;  %v640_v46 = vshrl.u32 %v532_v17, 16 }
  0x7f   : > { %10867 = vst [vmem:[#allocation39_spill] sm:$0xff] %v9674_v57  ;;  %10868 = vst [vmem:[#allocation40_spill] sm:$0xff] %v9678_v58  ;;  %7477 = vmatmul.mubr.bf16.gmra.mrb[24].mxu1 %v9674_v57  ;;  %v910_v56 = vshrl.u32 %v9678_v58, 16  ;;  %v912_v59 = vshll.u32 %v9678_v58, 16  ;;  %7932 = vmatprep.mubr.bf16.mxu0 %v9184_v51  ;;  %v3856_v27 = vshrl.u32 %v9228_v32, 16  ;;  %v919_v6 = vrot.slane %v917_v45, 1 }
  0x80   : > { %v643_v40 = vshll.u32 %v532_v17, 16  ;;  %v3858_v18 = vshll.u32 %v9228_v32, 16  ;;  %v3863_v25 = vshll.u32 %v9684_v19, 16  ;;  %v642_v53 = vrot.slane %v640_v46, 7 }
  0x81   : > { %v914_v3 = vrot.slane %v912_v59, 1  ;;  %v9694_v31 = vsel %vm740_vm3, %v3849_v14, %v3853_v5  ;;  %v9699_v48 = vsel %vm9133_vm2, %v9212_v12, 0  ;;  %v3868_v51 = vshrl.u32 %v9236_v35, 16  ;;  %v8903_v12 = vld [vmem:[%s10707_s5 + $0x88] sm:$0xff]  }
  0x82   : > { %10869 = vst [vmem:[#allocation41_spill] sm:$0xff] %v9694_v31  ;;  %v3860_v4 = vrot.slane %v3858_v18, 1  ;;  %v3865_v41 = vrot.slane %v3863_v25, 1  ;;  %v3870_v45 = vshll.u32 %v9236_v35, 16  ;;  %v645_v57 = vor.u32 %v643_v40, %v642_v53 }
  0x83   : > { %v915_v17 = vor.u32 %v914_v3, %v910_v56  ;;  %v9705_v59 = vsel %vm9133_vm2, %v642_v53, 0  ;;  %v3875_v14 = vshll.u32 %v9699_v48, 16  ;;  %v9715_v18 = vsel %vm9133_vm2, %v9262_v63, 0 }
  0x84   : > { %10870 = vst [vmem:[#allocation42_spill] sm:$0xff] %v9705_v59  ;;  %v929_v5 = vshll.u32 %v9705_v59, 16  ;;  %v3861_v46 = vor.u32 %v3860_v4, %v3856_v27  ;;  %v3872_v43 = vrot.slane %v3870_v45, 1  ;;  %v9722_v40 = vsel %vm9133_vm2, 0, %v645_v57 }
  0x85   : > { %v9718_v56 = vsel %vm740_vm3, %v915_v17, %v919_v6  ;;  %10872 = vst [vmem:[#allocation44_spill] sm:$0xff] %v9722_v40  ;;  %v3880_v25 = vshrl.u32 %v9284_v26, 16  ;;  %v3882_v27 = vshll.u32 %v9284_v26, 16  ;;  %v922_v3 = vshrl.u32 %v9722_v40, 16 }
  0x86   : > { %10871 = vst [vmem:[#allocation43_spill] sm:$0xff] %v9718_v56  ;;  %7480 = vmatprep.mubr.bf16.mxu1 %v9718_v56  ;;  %v924_v53 = vshll.u32 %v9722_v40, 16  ;;  %7933 = vmatmul.mubr.bf16.vlgmr.msra.gmra.mrb[0].mxu0 %v9694_v31  ;;  %v9731_v63 = vsel %vm740_vm3, %v3861_v46, %v3865_v41  ;;  %v3873_v57 = vor.u32 %v3872_v43, %v3868_v51  ;;  %v3877_v6 = vrot.slane %v3875_v14, 1  ;;  %v8905_v31 = vld [vmem:[%s10707_s5 + $0x90] sm:$0xff]  }
  0x87   : > { %10873 = vst [vmem:[#allocation45_spill] sm:$0xff] %v9731_v63  ;;  %7965 = vmatpush3.bf16.msra.mxu0 %v9431_v49  ;;  %7936 = vmatprep.mubr.bf16.mxu0 %v9731_v63  ;;  %v3884_v4 = vrot.slane %v3882_v27, 1  ;;  %v3887_v45 = vshll.u32 %v9715_v18, 16  ;;  %v931_v56 = vrot.slane %v929_v5, 1  ;;  %v3894_v59 = vshll.u32 %v9335_v13, 16  ;;  %v8907_v27 = vld [vmem:[%s10707_s5 + $0x98] sm:$0xff]  }
  0x88   : > { %v926_v17 = vrot.slane %v924_v53, 1  ;;  %7966 = vmatprep.subr.bf16.mxu0 %v8903_v12  ;;  %v9743_v49 = vsel %vm9133_vm2, %v9309_v50, 0  ;;  %v9748_v43 = vsel %vm9133_vm2, %v9349_v37, 0  ;;  %v9751_v14 = vsel %vm740_vm3, %v3873_v57, %v3877_v6 }
  0x89   : > { %v3885_v41 = vor.u32 %v3884_v4, %v3880_v25  ;;  %v3889_v46 = vrot.slane %v3887_v45, 1  ;;  %10874 = vst [vmem:[#allocation46_spill] sm:$0xff] %v9751_v14  ;;  %v3892_v5 = vshrl.u32 %v9335_v13, 16  ;;  %v3906_v25 = vshll.u32 %v9376_v9, 16  ;;  %v8909_v45 = vld [vmem:[%s10707_s5 + $0xa0] sm:$0xff]  }
  0x8a   : > { %v927_v51 = vor.u32 %v926_v17, %v922_v3  ;;  %v3896_v37 = vrot.slane %v3894_v59, 1  ;;  %v3899_v53 = vshll.u32 %v9743_v49, 16  ;;  %v3911_v6 = vshll.u32 %v9748_v43, 16 }
  0x8b   : > { %7967 = vmatpush3.bf16.msra.mxu0 %v8903_v12  ;;  %v9762_v3 = vsel %vm740_vm3, %v3885_v41, %v3889_v46  ;;  %v3904_v12 = vshrl.u32 %v9376_v9, 16  ;;  %v3908_v57 = vrot.slane %v3906_v25, 1  ;;  %v3918_v59 = vshll.u32 %v9410_v23, 16 }
  0x8c   : > { %v9759_v50 = vsel %vm740_vm3, %v927_v51, %v931_v56  ;;  %10876 = vst [vmem:[#allocation48_spill] sm:$0xff] %v9762_v3  ;;  %7968 = vmatprep.subr.bf16.mxu0 %v8905_v31  ;;  %v3897_v56 = vor.u32 %v3896_v37, %v3892_v5  ;;  %v3901_v4 = vrot.slane %v3899_v53, 1  ;;  %v3913_v41 = vrot.slane %v3911_v6, 1  ;;  %v8902_v5 = vld [vmem:[%s10706_s4 + $0x88] sm:$0xff]  }
  0x8d   : > { %10875 = vst [vmem:[#allocation47_spill] sm:$0xff] %v9759_v50  ;;  %7481 = vmatmul.mubr.bf16.gmra.mrb[28].mxu1 %v9759_v50  ;;  %v3909_v17 = vor.u32 %v3908_v57, %v3904_v12  ;;  %v9778_v46 = vsel %vm9133_vm2, %v9378_v10, 0  ;;  %v3930_v51 = vshll.u32 %v9452_v47, 16  ;;  %v3916_v25 = vshrl.u32 %v9410_v23, 16 }
  0x8e   : > { %7500 = vmatprep.mubr.bf16.mxu1 %v9152_v21  ;;  %7937 = vmatmul.mubr.bf16.gmra.mrb[4].mxu0 %v9751_v14  ;;  %v9791_v37 = vsel %vm740_vm3, %v3897_v56, %v3901_v4  ;;  %v3920_v53 = vrot.slane %v3918_v59, 1  ;;  %v3923_v10 = vshll.u32 %v9778_v46, 16  ;;  %v8904_v56 = vld [vmem:[%s10706_s4 + $0x90] sm:$0xff]   ;;  %v3954_v50 = vshll.u32 %v9505_v11, 16 }
  0x8f   : > { %7940 = vmatprep.mubr.bf16.mxu0 %v9762_v3  ;;  %7969 = vmatpush3.bf16.msra.mxu0 %v8905_v31  ;;  %v9784_v31 = vsel %vm9133_vm2, %v9422_v34, 0  ;;  %10877 = vst [vmem:[#allocation49_spill] sm:$0xff] %v9791_v37  ;;  %v9796_v12 = vsel %vm740_vm3, %v3909_v17, %v3913_v41  ;;  %v3928_v34 = vshrl.u32 %v9452_v47, 16  ;;  %v3932_v57 = vrot.slane %v3930_v51, 1  ;;  %v10887_v3 = vld [vmem:[#allocation22_spill] sm:$0xff] }
  0x90   : > { %7970 = vmatprep.subr.bf16.mxu0 %v8907_v27  ;;  %10878 = vst [vmem:[#allocation50_spill] sm:$0xff] %v9796_v12  ;;  %v3935_v6 = vshll.u32 %v9784_v31, 16  ;;  %v3921_v4 = vor.u32 %v3920_v53, %v3916_v25  ;;  %v3925_v59 = vrot.slane %v3923_v10, 1  ;;  %v9813_v17 = vsel %vm9133_vm2, %v9464_v54, 0  ;;  %v8906_v54 = vld [vmem:[%s10706_s4 + $0x98] sm:$0xff]  }
  0x91   : > { %v3933_v41 = vor.u32 %v3932_v57, %v3928_v34  ;;  %v9823_v25 = vsel %vm9133_vm2, %v9485_v55, 0  ;;  %v3940_v10 = vshrl.u32 %v9475_v0, 16  ;;  %v3952_v55 = vshrl.u32 %v9505_v11, 16 }
  0x92   : > { %v3937_v51 = vrot.slane %v3935_v6, 1  ;;  %v9830_v53 = vsel %vm740_vm3, %v3921_v4, %v3925_v59  ;;  %v3956_v57 = vrot.slane %v3954_v50, 1  ;;  %v3959_v6 = vshll.u32 %v9823_v25, 16  ;;  %v8915_v4 = vld [vmem:[%s10707_s5 + $0xb8] sm:$0xff]   ;;  %v9850_v50 = vld [vmem:[%s10707_s5 + $0xc0] sm:$0xff]  }
  0x93   : > { %7971 = vmatpush3.bf16.msra.mxu0 %v8907_v27  ;;  %v8911_v27 = vld [vmem:[%s10707_s5 + $0xa8] sm:$0xff]   ;;  %10879 = vst [vmem:[#allocation51_spill] sm:$0xff] %v9830_v53 }
  0x94   : > { %7972 = vmatprep.subr.bf16.mxu0 %v8909_v45 }
  0x95   : > { %7501 = vmatmul.mubr.bf16.vlgmr.msra.gmra.mrb[0].mxu1 %v9232_v33 }
  0x96   : > { %7533 = vmatpush3.bf16.msra.mxu1 %v9439_v20  ;;  %7504 = vmatprep.mubr.bf16.mxu1 %v9260_v61  ;;  %v3942_v20 = vshll.u32 %v9475_v0, 16 }
  0x97   : > { %7534 = vmatprep.subr.bf16.mxu1 %v8902_v5  ;;  %7941 = vmatmul.mubr.bf16.gmra.mrb[8].mxu0 %v9791_v37  ;;  %v8913_v37 = vld [vmem:[%s10707_s5 + $0xb0] sm:$0xff]  }
  0x98   : > { %7944 = vmatprep.mubr.bf16.mxu0 %v9796_v12  ;;  %7973 = vmatpush3.bf16.msra.mxu0 %v8909_v45  ;;  %v3947_v45 = vshll.u32 %v9813_v17, 16  ;;  %v3944_v34 = vrot.slane %v3942_v20, 1  ;;  %v9863_v12 = vsel %vm9133_vm2, %v9557_v62, 0  ;;  %v3976_v62 = vshrl.u32 %v9571_v2, 16 }
  0x99   : > { %7974 = vmatprep.subr.bf16.mxu0 %v8911_v27 }
  0x9a   : > { %7535 = vmatpush3.bf16.msra.mxu1 %v8902_v5  ;;  %v9835_v5 = vsel %vm740_vm3, %v3933_v41, %v3937_v51  ;;  %v3949_v59 = vrot.slane %v3947_v45, 1  ;;  %v3945_v20 = vor.u32 %v3944_v34, %v3940_v10  ;;  %v3966_v41 = vshll.u32 %v9533_v28, 16 }
  0x9b   : > { %7536 = vmatprep.subr.bf16.mxu1 %v8904_v56  ;;  %10880 = vst [vmem:[#allocation52_spill] sm:$0xff] %v9835_v5  ;;  %v3957_v51 = vor.u32 %v3956_v57, %v3952_v55  ;;  %v3978_v45 = vshll.u32 %v9571_v2, 16 }
  0x9c   : > { %7975 = vmatpush3.bf16.msra.mxu0 %v8911_v27  ;;  %v8908_v27 = vld [vmem:[%s10706_s4 + $0xa0] sm:$0xff]   ;;  %v9869_v10 = vsel %vm740_vm3, %v3945_v20, %v3949_v59  ;;  %v3968_v34 = vrot.slane %v3966_v41, 1  ;;  %v3990_v20 = vshll.u32 %v9615_v36, 16 }
  0x9d   : > { %7505 = vmatmul.mubr.bf16.gmra.mrb[4].mxu1 %v9293_v1  ;;  %7976 = vmatprep.subr.bf16.mxu0 %v8913_v37  ;;  %10881 = vst [vmem:[#allocation53_spill] sm:$0xff] %v9869_v10  ;;  %v3980_v57 = vrot.slane %v3978_v45, 1  ;;  %v10883_v45 = vld [vmem:[#allocation33_spill] sm:$0xff] }
  0x9e   : > { %7508 = vmatprep.mubr.bf16.mxu1 %v9331_v16  ;;  %7537 = vmatpush3.bf16.msra.mxu1 %v8904_v56  ;;  %v9856_v56 = vsel %vm9133_vm2, %v9515_v29, 0  ;;  %v8910_v29 = vld [vmem:[%s10706_s4 + $0xa8] sm:$0xff]  }
  0x9f   : > { %7538 = vmatprep.subr.bf16.mxu1 %v8906_v54  ;;  %7945 = vmatmul.mubr.bf16.gmra.mrb[12].mxu0 %v9830_v53  ;;  %v3961_v53 = vrot.slane %v3959_v6, 1  ;;  %v3971_v55 = vshll.u32 %v9856_v56, 16  ;;  %v3983_v6 = vshll.u32 %v9863_v12, 16  ;;  %v3981_v41 = vor.u32 %v3980_v57, %v3976_v62 }
  0xa0   : > { %7948 = vmatprep.mubr.bf16.mxu0 %v9835_v5  ;;  %7977 = vmatpush3.bf16.msra.mxu0 %v8913_v37  ;;  %v3964_v37 = vshrl.u32 %v9533_v28, 16  ;;  %v9890_v5 = vsel %vm9133_vm2, %v10883_v45, 0  ;;  %v3992_v62 = vrot.slane %v3990_v20, 1 }
  0xa1   : > { %7978 = vmatprep.subr.bf16.mxu0 %v8915_v4  ;;  %v3973_v59 = vrot.slane %v3971_v55, 1  ;;  %v3988_v55 = vshrl.u32 %v9615_v36, 16  ;;  %v3995_v57 = vshll.u32 %v9890_v5, 16 }
  0xa2   : > { %7539 = vmatpush3.bf16.msra.mxu1 %v8906_v54  ;;  %v9875_v54 = vsel %vm740_vm3, %v3957_v51, %v3961_v53  ;;  %v3969_v53 = vor.u32 %v3968_v34, %v3964_v37  ;;  %v3985_v51 = vrot.slane %v3983_v6, 1  ;;  %v8914_v37 = vld [vmem:[%s10706_s4 + $0xb8] sm:$0xff]   ;;  %v10885_v6 = vld [vmem:[#allocation19_spill] sm:$0xff] }
  0xa3   : > { %7540 = vmatprep.subr.bf16.mxu1 %v8908_v27  ;;  %10882 = vst [vmem:[#allocation54_spill] sm:$0xff] %v9875_v54  ;;  %v3993_v20 = vor.u32 %v3992_v62, %v3988_v55 }
  0xa4   : > { %7979 = vmatpush3.bf16.msra.mxu0 %v8915_v4  ;;  %v8912_v4 = vld [vmem:[%s10706_s4 + $0xb0] sm:$0xff]   ;;  %v9902_v34 = vsel %vm740_vm3, %v3969_v53, %v3973_v59  ;;  %v9916_v53 = vsel %vm9133_vm2, %v9645_v52, 0  ;;  %v9922_v59 = vld [vmem:[%s10706_s4 + $0xc0] sm:$0xff]   ;;  %v4012_v52 = vshrl.u32 %v9671_v42, 16 }
  0xa5   : > { %7509 = vmatmul.mubr.bf16.gmra.mrb[8].mxu1 %v9372_v7  ;;  %8012 = vmatprep.subr.bf16.mxu0 %v9850_v50  ;;  %10884 = vst [vmem:[#allocation33_spill] sm:$0xff] %v9902_v34  ;;  %v4019_v14 = vshll.u32 %v9916_v53, 16 }
  0xa6   : > { %7512 = vmatprep.mubr.bf16.mxu1 %v9418_v30  ;;  %7541 = vmatpush3.bf16.msra.mxu1 %v8908_v27  ;;  %v4002_v27 = vshll.u32 %v9643_v22, 16 }
  0xa7   : > { %7949 = vmatmul.mubr.bf16.gmra.mrb[16].mxu0 %v9869_v10  ;;  %7542 = vmatprep.subr.bf16.mxu1 %v8910_v29  ;;  %v9896_v10 = vsel %vm9133_vm2, %v9624_v8, 0  ;;  %v4000_v8 = vshrl.u32 %v9643_v22, 16  ;;  %v4021_v62 = vrot.slane %v4019_v14, 1 }
  0xa8   : > { %7952 = vmatprep.mubr.bf16.mxu0 %v9875_v54  ;;  %v4004_v45 = vrot.slane %v4002_v27, 1  ;;  %v4007_v54 = vshll.u32 %v9896_v10, 16 }
  0xaa   : > { %7543 = vmatpush3.bf16.msra.mxu1 %v8910_v29  ;;  %v9908_v29 = vsel %vm740_vm3, %v3981_v41, %v3985_v51  ;;  %v3997_v41 = vrot.slane %v3995_v57, 1  ;;  %v4014_v51 = vshll.u32 %v9671_v42, 16  ;;  %v4009_v27 = vrot.slane %v4007_v54, 1  ;;  %v10891_v57 = vld [vmem:[#allocation4_spill] sm:$0xff] }
  0xab   : > { %7544 = vmatprep.subr.bf16.mxu1 %v8912_v4  ;;  %10886 = vst [vmem:[#allocation19_spill] sm:$0xff] %v9908_v29  ;;  %v1416_v54 = vrot.slane %v9152_v21, 1  ;;  %v10896_v21 = vld [vmem:[#allocation36_spill] sm:$0xff] }
  0xac   : > { %v4016_v63 = vrot.slane %v4014_v51, 1  ;;  %v10894_v51 = vld [vmem:[#allocation31_spill] sm:$0xff] }
  0xad   : > { %7513 = vmatmul.mubr.bf16.gmra.mrb[12].mxu1 %v10885_v6 }
  0xae   : > { %7516 = vmatprep.mubr.bf16.mxu1 %v10887_v3  ;;  %7545 = vmatpush3.bf16.msra.mxu1 %v8912_v4  ;;  %v4005_v4 = vor.u32 %v4004_v45, %v4000_v8  ;;  %v1417_v8 = vrot.slane %v10891_v57, 1  ;;  %v4017_v45 = vor.u32 %v4016_v63, %v4012_v52  ;;  %v4329_v57 = vrot.slane %v9684_v19, 1 }
  0xaf   : > { %7953 = vmatmul.mubr.bf16.gmra.mrb[20].mxu0 %v9902_v34  ;;  %7546 = vmatprep.subr.bf16.mxu1 %v8914_v37  ;;  %v9930_v34 = vsel %vm740_vm3, %v3993_v20, %v3997_v41  ;;  %v4325_v20 = vrot.slane %v9195_v60, 1 }
  0xb0   : > { %7956 = vmatprep.mubr.bf16.mxu0 %v9908_v29  ;;  %10888 = vst [vmem:[#allocation22_spill] sm:$0xff] %v9930_v34  ;;  %v9934_v55 = vsel %vm740_vm3, %v4005_v4, %v4009_v27  ;;  %v9943_v41 = vsel %vm740_vm3, %v4017_v45, %v4021_v62  ;;  %v9947_v14 = vsel %vm1415_vm4, %v1416_v54, %v1417_v8  ;;  %v4326_v4 = vrot.slane %v9656_v39, 1  ;;  %v8919_v39 = vld [vmem:[%s10707_s5 + $0xc8] sm:$0xff]   ;;  %v10899_v62 = vld [vmem:[#allocation6_spill] sm:$0xff]  ;;  %v8921_v45 = vld [vmem:[%s10707_s5 + $0xd0] sm:$0xff]  }
  0xb1   : > { %10890 = vst [vmem:[#allocation55_spill] sm:$0xff] %v9934_v55  ;;  %10893 = vst [vmem:[#allocation4_spill] sm:$0xff] %v9943_v41  ;;  %v4328_v27 = vrot.slane %v9228_v32, 1  ;;  %v1420_v19 = vrot.slane %v10899_v62, 1  ;;  %v1419_v54 = vrot.slane %v9232_v33, 1  ;;  %v1422_v8 = vrot.slane %v9260_v61, 1 }
  0xb2   : > { %7547 = vmatpush3.bf16.msra.mxu1 %v8914_v37  ;;  %v10892_v37 = vld [vmem:[#allocation28_spill] sm:$0xff]  ;;  %v9956_v63 = vsel %vm1415_vm4, %v4325_v20, %v4326_v4  ;;  %v4331_v20 = vrot.slane %v9236_v35, 1  ;;  %v4332_v4 = vrot.slane %v9699_v48, 1  ;;  %v10900_v62 = vld [vmem:[#allocation7_spill] sm:$0xff]  ;;  %v4338_v48 = vrot.slane %v9743_v49, 1 }
  0xb3   : > { %7580 = vmatprep.subr.bf16.mxu1 %v9922_v59  ;;  %10895 = vst [vmem:[#allocation28_spill] sm:$0xff] %v9947_v14  ;;  %10897 = vst [vmem:[#allocation31_spill] sm:$0xff] %v9956_v63  ;;  %v9960_v52 = vsel %vm1415_vm4, %v4328_v27, %v4329_v57  ;;  %v4334_v27 = vrot.slane %v9284_v26, 1  ;;  %v4335_v57 = vrot.slane %v9715_v18, 1  ;;  %v4341_v18 = vrot.slane %v9748_v43, 1  ;;  %v8918_v49 = vld [vmem:[%s10706_s4 + $0xc8] sm:$0xff]  }
  0xb4   : > { %10898 = vst [vmem:[#allocation36_spill] sm:$0xff] %v9960_v52  ;;  %v10004_v43 = vsel %vm1415_vm4, %v1419_v54, %v1420_v19  ;;  %v8927_v19 = vld [vmem:[%s10707_s5 + $0xe8] sm:$0xff]  }
  0xb5   : > { %7517 = vmatmul.mubr.bf16.gmra.mrb[16].mxu1 %v10889_v15 }
  0xb6   : > { %7520 = vmatprep.mubr.bf16.mxu1 %v10892_v37 }
  0xb7   : > { %7957 = vmatmul.mubr.bf16.gmra.mrb[24].mxu0 %v9930_v34 }
  0xb8   : > { %7960 = vmatprep.mubr.bf16.mxu0 %v9934_v55  ;;  %v4337_v55 = vrot.slane %v9335_v13, 1 }
  0xbd   : > { %7521 = vmatmul.mubr.bf16.gmra.mrb[20].mxu1 %v10894_v51 }
  0xbe   : > { %7524 = vmatprep.mubr.bf16.mxu1 %v10896_v21 }
  0xbf   : > { %7961 = vmatmul.mubr.bf16.gmra.mrb[28].mxu0 %v9943_v41  ;;  %v1423_v41 = vrot.slane %v10900_v62, 1 }
  0xc0   : > { %7980 = vmatprep.mubr.bf16.mxu0 %v9947_v14 }
  0xc5   : > { %7525 = vmatmul.mubr.bf16.gmra.mrb[24].mxu1 %v9639_v44 }
  0xc6   : > { %7528 = vmatprep.mubr.bf16.mxu1 %v9678_v58 }
  0xc7   : > { %7981 = vmatmul.mubr.bf16.vlgmr.msra.gmra.mrb[0].mxu0 %v9956_v63  ;;  %v9981_v63 = vsel %vm1415_vm4, %v4331_v20, %v4332_v4  ;;  %v8923_v20 = vld [vmem:[%s10707_s5 + $0xd8] sm:$0xff]   ;;  %v10007_v4 = vsel %vm1415_vm4, %v1422_v8, %v1423_v41  ;;  %v10902_v41 = vld [vmem:[#allocation11_spill] sm:$0xff]  ;;  %v8920_v8 = vld [vmem:[%s10706_s4 + $0xd0] sm:$0xff]  }
  0xc8   : > { %8013 = vmatpush3.bf16.msra.mxu0 %v9850_v50  ;;  %7984 = vmatprep.mubr.bf16.mxu0 %v9960_v52  ;;  %v9986_v50 = vsel %vm1415_vm4, %v4334_v27, %v4335_v57  ;;  %v4340_v52 = vrot.slane %v9376_v9, 1  ;;  %v10010_v27 = vsel %vm1415_vm4, %v4337_v55, %v4338_v48  ;;  %v1425_v57 = vrot.slane %v9293_v1, 1 }
  0xc9   : > { %8014 = vmatprep.subr.bf16.mxu0 %v8919_v39  ;;  %v1428_v55 = vrot.slane %v9331_v16, 1  ;;  %v1429_v54 = vrot.slane %v10902_v41, 1  ;;  %v4344_v48 = vrot.slane %v9778_v46, 1  ;;  %v8922_v46 = vld [vmem:[%s10706_s4 + $0xd8] sm:$0xff]  }
  0xcb   : > { %v10041_v41 = vsel %vm1415_vm4, %v1428_v55, %v1429_v54  ;;  %v1434_v54 = vrot.slane %v9418_v30, 1 }
  0xcc   : > { %8015 = vmatpush3.bf16.msra.mxu0 %v8919_v39  ;;  %v8925_v39 = vld [vmem:[%s10707_s5 + $0xe0] sm:$0xff]   ;;  %10903 = vst [vmem:[#allocation6_spill] sm:$0xff] %v10041_v41 }
  0xcd   : > { %7529 = vmatmul.mubr.bf16.gmra.mrb[28].mxu1 %v9722_v40  ;;  %8016 = vmatprep.subr.bf16.mxu0 %v8921_v45 }
  0xce   : > { %7548 = vmatprep.mubr.bf16.mxu1 %v9947_v14  ;;  %v10016_v14 = vsel %vm1415_vm4, %v4340_v52, %v4341_v18  ;;  %v4343_v52 = vrot.slane %v9410_v23, 1  ;;  %v4347_v18 = vrot.slane %v9784_v31, 1 }
  0xcf   : > { %7985 = vmatmul.mubr.bf16.gmra.mrb[4].mxu0 %v9981_v63 }
  0xd0   : > { %7988 = vmatprep.mubr.bf16.mxu0 %v9986_v50  ;;  %8017 = vmatpush3.bf16.msra.mxu0 %v8921_v45  ;;  %v10901_v45 = vld [vmem:[#allocation9_spill] sm:$0xff] }
  0xd1   : > { %8018 = vmatprep.subr.bf16.mxu0 %v8923_v20  ;;  %v1426_v62 = vrot.slane %v10901_v45, 1 }
  0xd3   : > { %v10038_v45 = vsel %vm1415_vm4, %v1425_v57, %v1426_v62  ;;  %v1431_v57 = vrot.slane %v9372_v7, 1  ;;  %v10905_v62 = vld [vmem:[#allocation13_spill] sm:$0xff] }
  0xd4   : > { %8019 = vmatpush3.bf16.msra.mxu0 %v8923_v20  ;;  %v8929_v20 = vld [vmem:[%s10707_s5 + $0xf0] sm:$0xff]   ;;  %v1432_v55 = vrot.slane %v10905_v62, 1  ;;  %v4353_v62 = vrot.slane %v9823_v25, 1 }
  0xd5   : > { %7549 = vmatmul.mubr.bf16.vlgmr.msra.gmra.mrb[0].mxu1 %v10004_v43  ;;  %8020 = vmatprep.subr.bf16.mxu0 %v8925_v39 }
  0xd6   : > { %7581 = vmatpush3.bf16.msra.mxu1 %v9922_v59  ;;  %7552 = vmatprep.mubr.bf16.mxu1 %v10007_v4  ;;  %v4346_v59 = vrot.slane %v9452_v47, 1 }
  0xd7   : > { %7582 = vmatprep.subr.bf16.mxu1 %v8918_v49  ;;  %7989 = vmatmul.mubr.bf16.gmra.mrb[8].mxu0 %v10010_v27 }
  0xd8   : > { %7992 = vmatprep.mubr.bf16.mxu0 %v10016_v14  ;;  %8021 = vmatpush3.bf16.msra.mxu0 %v8925_v39  ;;  %v10047_v39 = vsel %vm1415_vm4, %v4343_v52, %v4344_v48  ;;  %v10051_v31 = vsel %vm1415_vm4, %v4346_v59, %v4347_v18  ;;  %v8924_v48 = vld [vmem:[%s10706_s4 + $0xe0] sm:$0xff]   ;;  %v4349_v59 = vrot.slane %v9475_v0, 1  ;;  %v4350_v18 = vrot.slane %v9813_v17, 1  ;;  %v8926_v17 = vld [vmem:[%s10706_s4 + $0xe8] sm:$0xff]  }
  0xd9   : > { %8022 = vmatprep.subr.bf16.mxu0 %v8927_v19  ;;  %10904 = vst [vmem:[#allocation7_spill] sm:$0xff] %v10051_v31 }
  0xda   : > { %7583 = vmatpush3.bf16.msra.mxu1 %v8918_v49  ;;  %v8931_v49 = vld [vmem:[%s10707_s5 + $0xf8] sm:$0xff]   ;;  %v10085_v25 = vsel %vm1415_vm4, %v4349_v59, %v4350_v18  ;;  %v4355_v18 = vrot.slane %v9533_v28, 1 }
  0xdb   : > { %7584 = vmatprep.subr.bf16.mxu1 %v8920_v8 }
  0xdc   : > { %8023 = vmatpush3.bf16.msra.mxu0 %v8927_v19  ;;  %v10906_v19 = vld [vmem:[#allocation15_spill] sm:$0xff] }
  0xdd   : > { %7553 = vmatmul.mubr.bf16.gmra.mrb[4].mxu1 %v10038_v45  ;;  %8024 = vmatprep.subr.bf16.mxu0 %v8929_v20  ;;  %v1435_v52 = vrot.slane %v10906_v19, 1  ;;  %v10073_v19 = vld [vmem:[%s10707_s5 + $0x100] sm:$0xff]  }
  0xde   : > { %7556 = vmatprep.mubr.bf16.mxu1 %v10041_v41  ;;  %7585 = vmatpush3.bf16.msra.mxu1 %v8920_v8  ;;  %v4352_v8 = vrot.slane %v9505_v11, 1  ;;  %v10076_v41 = vsel %vm1415_vm4, %v1431_v57, %v1432_v55  ;;  %v10909_v57 = vld [vmem:[#allocation17_spill] sm:$0xff] }
  0xdf   : > { %7586 = vmatprep.subr.bf16.mxu1 %v8922_v46  ;;  %7993 = vmatmul.mubr.bf16.gmra.mrb[12].mxu0 %v10047_v39  ;;  %v1438_v55 = vrot.slane %v10909_v57, 1 }
  0xe0   : > { %7996 = vmatprep.mubr.bf16.mxu0 %v10051_v31  ;;  %8025 = vmatpush3.bf16.msra.mxu0 %v8929_v20  ;;  %v10079_v31 = vsel %vm1415_vm4, %v1434_v54, %v1435_v52  ;;  %v10089_v20 = vsel %vm1415_vm4, %v4352_v8, %v4353_v62  ;;  %v1440_v54 = vrot.slane %v10887_v3, 1  ;;  %v10910_v52 = vld [vmem:[#allocation20_spill] sm:$0xff]  ;;  %v4356_v8 = vrot.slane %v9856_v56, 1 }
  0xe1   : > { %8026 = vmatprep.subr.bf16.mxu0 %v8931_v49  ;;  %10907 = vst [vmem:[#allocation9_spill] sm:$0xff] %v10079_v31  ;;  %10908 = vst [vmem:[#allocation11_spill] sm:$0xff] %v10089_v20  ;;  %v1441_v59 = vrot.slane %v10910_v52, 1  ;;  %v4358_v62 = vrot.slane %v9571_v2, 1 }
  0xe2   : > { %7587 = vmatpush3.bf16.msra.mxu1 %v8922_v46  ;;  %v1437_v46 = vrot.slane %v10885_v6, 1 }
  0xe3   : > { %7588 = vmatprep.subr.bf16.mxu1 %v8924_v48  ;;  %v10110_v52 = vsel %vm1415_vm4, %v1440_v54, %v1441_v59  ;;  %v10915_v54 = vld [vmem:[#allocation26_spill] sm:$0xff] }
  0xe4   : > { %8027 = vmatpush3.bf16.msra.mxu0 %v8931_v49  ;;  %v8928_v49 = vld [vmem:[%s10706_s4 + $0xf0] sm:$0xff]   ;;  %v10107_v57 = vsel %vm1415_vm4, %v1437_v46, %v1438_v55  ;;  %10912 = vst [vmem:[#allocation15_spill] sm:$0xff] %v10110_v52  ;;  %v1446_v55 = vrot.slane %v10892_v37, 1  ;;  %v1447_v59 = vrot.slane %v10915_v54, 1 }
  0xe5   : > { %7557 = vmatmul.mubr.bf16.gmra.mrb[8].mxu1 %v10076_v41  ;;  %8060 = vmatprep.subr.bf16.mxu0 %v10073_v19  ;;  %10911 = vst [vmem:[#allocation13_spill] sm:$0xff] %v10107_v57 }
  0xe6   : > { %7560 = vmatprep.mubr.bf16.mxu1 %v10079_v31  ;;  %7589 = vmatpush3.bf16.msra.mxu1 %v8924_v48  ;;  %v4359_v48 = vrot.slane %v9863_v12, 1  ;;  %v10116_v31 = vsel %vm1415_vm4, %v4355_v18, %v4356_v8  ;;  %v1443_v12 = vrot.slane %v10889_v15, 1  ;;  %v8932_v18 = vld [vmem:[%s10706_s4 + $0x100] sm:$0xff]   ;;  %v4361_v8 = vrot.slane %v9615_v36, 1 }
  0xe7   : > { %7997 = vmatmul.mubr.bf16.gmra.mrb[16].mxu0 %v10085_v25  ;;  %7590 = vmatprep.subr.bf16.mxu1 %v8926_v17  ;;  %v10140_v54 = vsel %vm1415_vm4, %v1446_v55, %v1447_v59  ;;  %v4367_v59 = vrot.slane %v9671_v42, 1 }
  0xe8   : > { %8000 = vmatprep.mubr.bf16.mxu0 %v10089_v20  ;;  %v8930_v20 = vld [vmem:[%s10706_s4 + $0xf8] sm:$0xff]   ;;  %v10120_v56 = vsel %vm1415_vm4, %v4358_v62, %v4359_v48  ;;  %v4362_v62 = vrot.slane %v9890_v5, 1  ;;  %v4364_v48 = vrot.slane %v9643_v22, 1  ;;  %v1449_v5 = vrot.slane %v10894_v51, 1 }
  0xe9   : > { %10913 = vst [vmem:[#allocation17_spill] sm:$0xff] %v10120_v56 }
  0xea   : > { %7591 = vmatpush3.bf16.msra.mxu1 %v8926_v17  ;;  %v10914_v17 = vld [vmem:[#allocation23_spill] sm:$0xff] }
  0xeb   : > { %7592 = vmatprep.subr.bf16.mxu1 %v8928_v49  ;;  %v1444_v46 = vrot.slane %v10914_v17, 1 }
  0xed   : > { %7561 = vmatmul.mubr.bf16.gmra.mrb[12].mxu1 %v10107_v57  ;;  %v10137_v17 = vsel %vm1415_vm4, %v1443_v12, %v1444_v46  ;;  %v10919_v46 = vld [vmem:[#allocation34_spill] sm:$0xff] }
  0xee   : > { %7564 = vmatprep.mubr.bf16.mxu1 %v10110_v52  ;;  %7593 = vmatpush3.bf16.msra.mxu1 %v8928_v49  ;;  %v4365_v49 = vrot.slane %v9896_v10, 1  ;;  %10916 = vst [vmem:[#allocation20_spill] sm:$0xff] %v10137_v17  ;;  %v10143_v52 = vsel %vm1415_vm4, %v4361_v8, %v4362_v62  ;;  %v10918_v10 = vld [vmem:[#allocation29_spill] sm:$0xff]  ;;  %v1453_v55 = vrot.slane %v10919_v46, 1  ;;  %v4368_v8 = vrot.slane %v9916_v53, 1 }
  0xef   : > { %8001 = vmatmul.mubr.bf16.gmra.mrb[20].mxu0 %v10116_v31  ;;  %7594 = vmatprep.subr.bf16.mxu1 %v8930_v20  ;;  %v1450_v12 = vrot.slane %v10918_v10, 1  ;;  %v1455_v10 = vrot.slane %v9639_v44, 1  ;;  %v1456_v46 = vrot.slane %v9628_v24, 1  ;;  %v1459_v53 = vrot.slane %v9664_v38, 1  ;;  %v8935_v24 = vld [vmem:[%s10707_s5 + $0x108] sm:$0xff]  }
  0xf0   : > { %8004 = vmatprep.mubr.bf16.mxu0 %v10120_v56  ;;  %v10147_v56 = vsel %vm1415_vm4, %v4364_v48, %v4365_v49  ;;  %v10165_v49 = vsel %vm1415_vm4, %v4367_v59, %v4368_v8  ;;  %v1461_v38 = vrot.slane %v9722_v40, 1  ;;  %v8939_v59 = vld [vmem:[%s10707_s5 + $0x118] sm:$0xff]   ;;  %v8934_v8 = vld [vmem:[%s10706_s4 + $0x108] sm:$0xff]  }
  0xf1   : > { %10917 = vst [vmem:[#allocation23_spill] sm:$0xff] %v10147_v56  ;;  %v10159_v62 = vsel %vm1415_vm4, %v1449_v5, %v1450_v12  ;;  %v10176_v5 = vsel %vm1415_vm4, %v1455_v10, %v1456_v46  ;;  %v8936_v10 = vld [vmem:[%s10706_s4 + $0x110] sm:$0xff]  }
  0xf2   : > { %7595 = vmatpush3.bf16.msra.mxu1 %v8930_v20  ;;  %v1452_v20 = vrot.slane %v10896_v21, 1  ;;  %v8945_v46 = vld [vmem:[%s10707_s5 + $0x130] sm:$0xff]  }
  0xf3   : > { %7628 = vmatprep.subr.bf16.mxu1 %v8932_v18 }
  0xf4   : > { %v10162_v48 = vsel %vm1415_vm4, %v1452_v20, %v1453_v55  ;;  %v10920_v20 = vld [vmem:[#allocation42_spill] sm:$0xff] }
  0xf5   : > { %7565 = vmatmul.mubr.bf16.gmra.mrb[16].mxu1 %v10137_v17  ;;  %v1462_v55 = vrot.slane %v10920_v20, 1  ;;  %v8942_v20 = vld [vmem:[%s10706_s4 + $0x128] sm:$0xff]  }
  0xf6   : > { %7568 = vmatprep.mubr.bf16.mxu1 %v10140_v54 }
  0xf7   : > { %8005 = vmatmul.mubr.bf16.gmra.mrb[24].mxu0 %v10143_v52 }
  0xf8   : > { %8008 = vmatprep.mubr.bf16.mxu0 %v10147_v56  ;;  %v1458_v56 = vrot.slane %v9678_v58, 1 }
  0xfa   : > { %v10179_v12 = vsel %vm1415_vm4, %v1458_v56, %v1459_v53  ;;  %v10195_v56 = vsel %vm1415_vm4, %v1461_v38, %v1462_v55  ;;  %v8948_v53 = vld [vmem:[%s10707_s5 + $0x138] sm:$0xff]   ;;  %v8950_v38 = vld [vmem:[%s10707_s5 + $0x140] sm:$0xff]   ;;  %v8944_v55 = vld [vmem:[%s10706_s4 + $0x130] sm:$0xff]  }
  0xfd   : > { %7569 = vmatmul.mubr.bf16.gmra.mrb[20].mxu1 %v10159_v62 }
  0xfe   : > { %7572 = vmatprep.mubr.bf16.mxu1 %v10162_v48 }
  0xff   : > { %8009 = vmatmul.mubr.bf16.gmra.mrb[28].mxu0 %v10165_v49 }
 0x100   : > { %8028 = vmatprep.mubr.bf16.mxu0 %v9195_v60  ;;  %v8937_v60 = vld [vmem:[%s10707_s5 + $0x110] sm:$0xff]  }
 0x105   : > { %7573 = vmatmul.mubr.bf16.gmra.mrb[24].mxu1 %v10176_v5 }
 0x106   : > { %7576 = vmatprep.mubr.bf16.mxu1 %v10179_v12 }
 0x107   : > { %8029 = vmatmul.mubr.bf16.vlgmr.msra.gmra.mrb[0].mxu0 %v9228_v32 }
 0x108   : > { %8061 = vmatpush3.bf16.msra.mxu0 %v10073_v19  ;;  %8032 = vmatprep.mubr.bf16.mxu0 %v9236_v35  ;;  %v8941_v19 = vld [vmem:[%s10707_s5 + $0x120] sm:$0xff]  }
 0x109   : > { %8062 = vmatprep.subr.bf16.mxu0 %v8935_v24 }
 0x10c   : > { %8063 = vmatpush3.bf16.msra.mxu0 %v8935_v24  ;;  %v8940_v24 = vld [vmem:[%s10706_s4 + $0x120] sm:$0xff]  }
 0x10d   : > { %7577 = vmatmul.mubr.bf16.gmra.mrb[28].mxu1 %v10195_v56  ;;  %8064 = vmatprep.subr.bf16.mxu0 %v8937_v60 }
 0x10e   : > { %7596 = vmatprep.mubr.bf16.mxu1 %v9232_v33  ;;  %v8943_v33 = vld [vmem:[%s10707_s5 + $0x128] sm:$0xff]  }
 0x10f   : > { %8033 = vmatmul.mubr.bf16.gmra.mrb[4].mxu0 %v9284_v26 }
 0x110   : > { %8036 = vmatprep.mubr.bf16.mxu0 %v9335_v13  ;;  %8065 = vmatpush3.bf16.msra.mxu0 %v8937_v60  ;;  %v6988_v60 = vld [vmem:[%s9118_s10 + $0x78] sm:$0xff]  }
 0x111   : > { %8066 = vmatprep.subr.bf16.mxu0 %v8939_v59 }
 0x114   : > { %8067 = vmatpush3.bf16.msra.mxu0 %v8939_v59  ;;  %v6892_v59 = vunpack.c.l.bf16 %v6988_v60 }
 0x115   : > { %7597 = vmatmul.mubr.bf16.vlgmr.msra.gmra.mrb[0].mxu1 %v9260_v61  ;;  %8068 = vmatprep.subr.bf16.mxu0 %v8941_v19 }
 0x116   : > { %7629 = vmatpush3.bf16.msra.mxu1 %v8932_v18  ;;  %7600 = vmatprep.mubr.bf16.mxu1 %v9293_v1  ;;  %v8938_v18 = vld [vmem:[%s10706_s4 + $0x118] sm:$0xff]  }
 0x117   : > { %7630 = vmatprep.subr.bf16.mxu1 %v8934_v8  ;;  %8037 = vmatmul.mubr.bf16.gmra.mrb[8].mxu0 %v9376_v9 }
 0x118   : > { %8040 = vmatprep.mubr.bf16.mxu0 %v9410_v23  ;;  %8069 = vmatpush3.bf16.msra.mxu0 %v8941_v19  ;;  %v6893_v19 = vunpack.c.h.bf16 %v6988_v60 }
 0x119   : > { %8070 = vmatprep.subr.bf16.mxu0 %v8943_v33 }
 0x11a   : > { %7631 = vmatpush3.bf16.msra.mxu1 %v8934_v8  ;;  %v8946_v8 = vld [vmem:[%s10706_s4 + $0x138] sm:$0xff]  }
 0x11b   : > { %7632 = vmatprep.subr.bf16.mxu1 %v8936_v10 }
 0x11c   : > { %8071 = vmatpush3.bf16.msra.mxu0 %v8943_v33  ;;  %v8947_v33 = vld [vmem:[%s9130_s17 + $0x78] sm:$0xff]   ;;  %s342_s17 = scalar_lea.vmem %s10710_s8, %s10995_s28 }
 0x11d   : > { %7601 = vmatmul.mubr.bf16.gmra.mrb[4].mxu1 %v9331_v16  ;;  %8072 = vmatprep.subr.bf16.mxu0 %v8945_v46 }
 0x11e   : > { %7604 = vmatprep.mubr.bf16.mxu1 %v9372_v7  ;;  %7633 = vmatpush3.bf16.msra.mxu1 %v8936_v10  ;;  %v9015_v10 = vld [vmem:[%s10704_s2] ss:$0 sm:$0xff] }
 0x11f   : > { %7634 = vmatprep.subr.bf16.mxu1 %v8938_v18  ;;  %8041 = vmatmul.mubr.bf16.gmra.mrb[12].mxu0 %v9452_v47 }
 0x120   : > { %8044 = vmatprep.mubr.bf16.mxu0 %v9475_v0  ;;  %8073 = vmatpush3.bf16.msra.mxu0 %v8945_v46  ;;  %v445_v46 = vmul.f32 %v9015_v10, %v6892_v59 }
 0x121   : > { %8074 = vmatprep.subr.bf16.mxu0 %v8948_v53 }
 0x122   : > { %7635 = vmatpush3.bf16.msra.mxu1 %v8938_v18  ;;  %v446_v18 = vmul.f32 %v9015_v10, %v6893_v19  ;;  %v3519_v19 = vshll.u32 %v8947_v33, 16 }
 0x123   : > { %7636 = vmatprep.subr.bf16.mxu1 %v8940_v24 }
 0x124   : > { %8075 = vmatpush3.bf16.msra.mxu0 %v8948_v53  ;;  %v8949_v53 = vld [vmem:[%s10706_s4 + $0x140] sm:$0xff]  }
 0x125   : > { %7605 = vmatmul.mubr.bf16.gmra.mrb[8].mxu1 %v9418_v30  ;;  %8108 = vmatprep.subr.bf16.mxu0 %v8950_v38 }
 0x126   : > { %7608 = vmatprep.mubr.bf16.mxu1 %v10885_v6  ;;  %7637 = vmatpush3.bf16.msra.mxu1 %v8940_v24  ;;  %v3516_v24 = vshrl.u32 %v8947_v33, 16 }
 0x127   : > { %8045 = vmatmul.mubr.bf16.gmra.mrb[16].mxu0 %v9505_v11  ;;  %7638 = vmatprep.subr.bf16.mxu1 %v8942_v20 }
 0x128   : > { %8048 = vmatprep.mubr.bf16.mxu0 %v9533_v28  ;;  %v10267_v59 = vrot.slane %v3516_v24, 7 }
 0x12a   : > { %7639 = vmatpush3.bf16.msra.mxu1 %v8942_v20  ;;  %v9016_v20 = vld [vmem:[%s10705_s3] ss:$0 sm:$0xff] }
 0x12b   : > { %7640 = vmatprep.subr.bf16.mxu1 %v8944_v55  ;;  %v485_v60 = vadd.f32 %v9016_v20, %v446_v18  ;;  %v10922_v18 = vld [vmem:[#allocation41_spill] sm:$0xff] }
 0x12d   : > { %7609 = vmatmul.mubr.bf16.gmra.mrb[12].mxu1 %v10887_v3 }
 0x12e   : > { %7612 = vmatprep.mubr.bf16.mxu1 %v10889_v15  ;;  %7641 = vmatpush3.bf16.msra.mxu1 %v8944_v55  ;;  %v484_v55 = vadd.f32 %v9016_v20, %v445_v46  ;;  %v517_v15 = vmax.f32 %v485_v60, 0.0  ;;  %v10924_v60 = vld [vmem:[#allocation46_spill] sm:$0xff] }
 0x12f   : > { %8049 = vmatmul.mubr.bf16.gmra.mrb[20].mxu0 %v9571_v2  ;;  %7642 = vmatprep.subr.bf16.mxu1 %v8946_v8 }
 0x130   : > { %8052 = vmatprep.mubr.bf16.mxu0 %v9615_v36  ;;  %v516_v10 = vmax.f32 %v484_v55, 0.0  ;;  %v3521_v36 = vor.u32 %v3519_v19, %v10267_v59  ;;  %v10923_v55 = vld [vmem:[#allocation45_spill] sm:$0xff] }
 0x132   : > { %7643 = vmatpush3.bf16.msra.mxu1 %v8946_v8  ;;  %v533_v2 = vpack.c.bf16 %v517_v15, %v516_v10  ;;  %v10276_v8 = vsel %vm9133_vm2, 0, %v3521_v36  ;;  %v8952_v15 = vld [vmem:[%s10707_s5 + $0x148] sm:$0xff]   ;;  %v8956_v10 = vld [vmem:[%s10707_s5 + $0x158] sm:$0xff]  }
 0x133   : > { %7676 = vmatprep.subr.bf16.mxu1 %v8949_v53 }
 0x134   : > { %v647_v33 = vshrl.u32 %v533_v2, 16  ;;  %v650_v20 = vshll.u32 %v533_v2, 16  ;;  %v8954_v2 = vld [vmem:[%s10707_s5 + $0x150] sm:$0xff]  }
 0x135   : > { %7613 = vmatmul.mubr.bf16.gmra.mrb[16].mxu1 %v10892_v37 }
 0x136   : > { %7616 = vmatprep.mubr.bf16.mxu1 %v10894_v51  ;;  %v10282_v24 = vrot.slane %v647_v33, 7  ;;  %v10926_v33 = vld [vmem:[#allocation48_spill] sm:$0xff] }
 0x137   : > { %8053 = vmatmul.mubr.bf16.gmra.mrb[24].mxu0 %v9643_v22 }
 0x138   : > { %8056 = vmatprep.mubr.bf16.mxu0 %v9671_v42  ;;  %v652_v36 = vor.u32 %v650_v20, %v10282_v24  ;;  %v8958_v20 = vld [vmem:[%s10707_s5 + $0x160] sm:$0xff]  }
 0x13a   : > { %v10297_v19 = vsel %vm9133_vm2, 0, %v652_v36  ;;  %v10928_v36 = vld [vmem:[#allocation10_spill] sm:$0xff] }
 0x13d   : > { %7617 = vmatmul.mubr.bf16.gmra.mrb[20].mxu1 %v10896_v21 }
 0x13e   : > { %7620 = vmatprep.mubr.bf16.mxu1 %v9639_v44 }
 0x13f   : > { %8057 = vmatmul.mubr.bf16.gmra.mrb[28].mxu0 %v10276_v8 }
 0x140   : > { %8076 = vmatprep.mubr.bf16.mxu0 %v10922_v18  ;;  %v10927_v18 = vld [vmem:[#allocation49_spill] sm:$0xff] }
 0x145   : > { %7621 = vmatmul.mubr.bf16.gmra.mrb[24].mxu1 %v9678_v58  ;;  %v10947_v58 = vld [vmem:[#allocation39_spill] sm:$0xff] }
 0x146   : > { %7624 = vmatprep.mubr.bf16.mxu1 %v9722_v40 }
 0x147   : > { %8077 = vmatmul.mubr.bf16.vlgmr.msra.gmra.mrb[0].mxu0 %v10923_v55 }
 0x148   : > { %8109 = vmatpush3.bf16.msra.mxu0 %v8950_v38  ;;  %8080 = vmatprep.mubr.bf16.mxu0 %v10924_v60  ;;  %v10925_v38 = vld [vmem:[#allocation8_spill] sm:$0xff]  ;;  %v10931_v60 = vld [vmem:[#allocation51_spill] sm:$0xff] }
 0x149   : > { %8110 = vmatprep.subr.bf16.mxu0 %v8952_v15 }
 0x14c   : > { %8111 = vmatpush3.bf16.msra.mxu0 %v8952_v15  ;;  %v8951_v15 = vld [vmem:[%s10706_s4 + $0x148] sm:$0xff]  }
 0x14d   : > { %7625 = vmatmul.mubr.bf16.gmra.mrb[28].mxu1 %v10297_v19  ;;  %8112 = vmatprep.subr.bf16.mxu0 %v8954_v2 }
 0x14e   : > { %7644 = vmatprep.mubr.bf16.mxu1 %v10925_v38  ;;  %v8960_v38 = vld [vmem:[%s10707_s5 + $0x168] sm:$0xff]  }
 0x14f   : > { %8081 = vmatmul.mubr.bf16.gmra.mrb[4].mxu0 %v10926_v33  ;;  %v10930_v33 = vld [vmem:[#allocation50_spill] sm:$0xff] }
 0x150   : > { %8084 = vmatprep.mubr.bf16.mxu0 %v10927_v18  ;;  %8113 = vmatpush3.bf16.msra.mxu0 %v8954_v2  ;;  %v10929_v18 = vld [vmem:[#allocation12_spill] sm:$0xff] }
 0x151   : > { %8114 = vmatprep.subr.bf16.mxu0 %v8956_v10  ;;  %v8953_v2 = vld [vmem:[%s10706_s4 + $0x150] sm:$0xff]  }
 0x154   : > { %8115 = vmatpush3.bf16.msra.mxu0 %v8956_v10  ;;  %v8962_v10 = vld [vmem:[%s10707_s5 + $0x170] sm:$0xff]  }
 0x155   : > { %7645 = vmatmul.mubr.bf16.vlgmr.msra.gmra.mrb[0].mxu1 %v10928_v36  ;;  %8116 = vmatprep.subr.bf16.mxu0 %v8958_v20  ;;  %v10935_v36 = vld [vmem:[#allocation53_spill] sm:$0xff] }
 0x156   : > { %7677 = vmatpush3.bf16.msra.mxu1 %v8949_v53  ;;  %7648 = vmatprep.mubr.bf16.mxu1 %v10929_v18  ;;  %v8955_v53 = vld [vmem:[%s10706_s4 + $0x158] sm:$0xff]   ;;  %v10932_v18 = vld [vmem:[#allocation14_spill] sm:$0xff] }
 0x157   : > { %7678 = vmatprep.subr.bf16.mxu1 %v8951_v15  ;;  %8085 = vmatmul.mubr.bf16.gmra.mrb[8].mxu0 %v10930_v33  ;;  %v10934_v33 = vld [vmem:[#allocation52_spill] sm:$0xff] }
 0x158   : > { %8088 = vmatprep.mubr.bf16.mxu0 %v10931_v60  ;;  %8117 = vmatpush3.bf16.msra.mxu0 %v8958_v20  ;;  %v8964_v60 = vld [vmem:[%s10707_s5 + $0x178] sm:$0xff]   ;;  %v10933_v20 = vld [vmem:[#allocation16_spill] sm:$0xff] }
 0x159   : > { %8118 = vmatprep.subr.bf16.mxu0 %v8960_v38 }
 0x15a   : > { %7679 = vmatpush3.bf16.msra.mxu1 %v8951_v15  ;;  %v8957_v15 = vld [vmem:[%s10706_s4 + $0x160] sm:$0xff]  }
 0x15b   : > { %7680 = vmatprep.subr.bf16.mxu1 %v8953_v2 }
 0x15c   : > { %8119 = vmatpush3.bf16.msra.mxu0 %v8960_v38  ;;  %v8966_v38 = vld [vmem:[%s10707_s5 + $0x180] sm:$0xff]  }
 0x15d   : > { %7649 = vmatmul.mubr.bf16.gmra.mrb[4].mxu1 %v10932_v18  ;;  %8120 = vmatprep.subr.bf16.mxu0 %v8962_v10  ;;  %v10941_v18 = vld [vmem:[#allocation27_spill] sm:$0xff] }
 0x15e   : > { %7652 = vmatprep.mubr.bf16.mxu1 %v10933_v20  ;;  %7681 = vmatpush3.bf16.msra.mxu1 %v8953_v2  ;;  %v8959_v2 = vld [vmem:[%s10706_s4 + $0x168] sm:$0xff]   ;;  %v10936_v20 = vld [vmem:[#allocation18_spill] sm:$0xff] }
 0x15f   : > { %7682 = vmatprep.subr.bf16.mxu1 %v8955_v53  ;;  %8089 = vmatmul.mubr.bf16.gmra.mrb[12].mxu0 %v10934_v33  ;;  %v10937_v33 = vld [vmem:[#allocation21_spill] sm:$0xff] }
 0x160   : > { %8092 = vmatprep.mubr.bf16.mxu0 %v10935_v36  ;;  %8121 = vmatpush3.bf16.msra.mxu0 %v8962_v10  ;;  %v10938_v36 = vld [vmem:[#allocation54_spill] sm:$0xff]  ;;  %v8961_v10 = vld [vmem:[%s10706_s4 + $0x170] sm:$0xff]  }
 0x161   : > { %8122 = vmatprep.subr.bf16.mxu0 %v8964_v60 }
 0x162   : > { %7683 = vmatpush3.bf16.msra.mxu1 %v8955_v53  ;;  %v10939_v53 = vld [vmem:[#allocation33_spill] sm:$0xff] }
 0x163   : > { %7684 = vmatprep.subr.bf16.mxu1 %v8957_v15 }
 0x164   : > { %8123 = vmatpush3.bf16.msra.mxu0 %v8964_v60  ;;  %v8963_v60 = vld [vmem:[%s10706_s4 + $0x178] sm:$0xff]  }
 0x165   : > { %7653 = vmatmul.mubr.bf16.gmra.mrb[8].mxu1 %v10936_v20  ;;  %8156 = vmatprep.subr.bf16.mxu0 %v8966_v38  ;;  %v10940_v20 = vld [vmem:[#allocation24_spill] sm:$0xff] }
 0x166   : > { %7656 = vmatprep.mubr.bf16.mxu1 %v10937_v33  ;;  %7685 = vmatpush3.bf16.msra.mxu1 %v8957_v15  ;;  %v8965_v15 = vld [vmem:[%s10706_s4 + $0x180] sm:$0xff]   ;;  %v10943_v33 = vld [vmem:[#allocation35_spill] sm:$0xff] }
 0x167   : > { %8093 = vmatmul.mubr.bf16.gmra.mrb[16].mxu0 %v10938_v36  ;;  %7686 = vmatprep.subr.bf16.mxu1 %v8959_v2  ;;  %v10944_v36 = vld [vmem:[#allocation55_spill] sm:$0xff] }
 0x168   : > { %8096 = vmatprep.mubr.bf16.mxu0 %v10939_v53  ;;  %v10365_v53 = vsel %vm9133_vm2, %v10267_v59, 0 }
 0x16a   : > { %7687 = vmatpush3.bf16.msra.mxu1 %v8959_v2  ;;  %v4902_v2 = vshll.u32 %v10276_v8, 16 }
 0x16b   : > { %7688 = vmatprep.subr.bf16.mxu1 %v8961_v10 }
 0x16d   : > { %7657 = vmatmul.mubr.bf16.gmra.mrb[12].mxu1 %v10940_v20  ;;  %v10942_v20 = vld [vmem:[#allocation32_spill] sm:$0xff] }
 0x16e   : > { %7660 = vmatprep.mubr.bf16.mxu1 %v10941_v18  ;;  %7689 = vmatpush3.bf16.msra.mxu1 %v8961_v10  ;;  %v4900_v10 = vshrl.u32 %v10276_v8, 16  ;;  %v4904_v18 = vrot.slane %v4902_v2, 1  ;;  %v1997_v2 = vshll.u32 %v10297_v19, 16 }
 0x16f   : > { %8097 = vmatmul.mubr.bf16.gmra.mrb[20].mxu0 %v9908_v29  ;;  %7690 = vmatprep.subr.bf16.mxu1 %v8963_v60  ;;  %v4907_v29 = vshll.u32 %v10365_v53, 16 }
 0x170   : > { %8100 = vmatprep.mubr.bf16.mxu0 %v9930_v34  ;;  %v10945_v34 = vld [vmem:[#allocation4_spill] sm:$0xff]  ;;  %v4905_v40 = vor.u32 %v4904_v18, %v4900_v10  ;;  %v1999_v18 = vrot.slane %v1997_v2, 1  ;;  %v8968_v10 = vld [vmem:[%s10707_s5 + $0x188] sm:$0xff]  }
 0x171   : > { %v4909_v55 = vrot.slane %v4907_v29, 1  ;;  %v1995_v29 = vshrl.u32 %v10297_v19, 16 }
 0x172   : > { %7691 = vmatpush3.bf16.msra.mxu1 %v8963_v60  ;;  %v10946_v60 = vld [vmem:[#allocation38_spill] sm:$0xff] }
 0x173   : > { %7724 = vmatprep.subr.bf16.mxu1 %v8965_v15  ;;  %v10374_v59 = vsel %vm740_vm3, %v4905_v40, %v4909_v55  ;;  %v10949_v55 = vld [vmem:[#allocation43_spill] sm:$0xff]  ;;  %v2000_v46 = vor.u32 %v1999_v18, %v1995_v29  ;;  %v8972_v29 = vld [vmem:[%s10707_s5 + $0x198] sm:$0xff]  }
 0x174   : > { %v8967_v18 = vld [vmem:[%s10706_s4 + $0x188] sm:$0xff]  }
 0x175   : > { %7661 = vmatmul.mubr.bf16.gmra.mrb[16].mxu1 %v10942_v20  ;;  %v10382_v20 = vsel %vm9133_vm2, %v10282_v24, 0 }
 0x176   : > { %7664 = vmatprep.mubr.bf16.mxu1 %v10943_v33  ;;  %v10948_v33 = vld [vmem:[#allocation31_spill] sm:$0xff]  ;;  %v2002_v40 = vshll.u32 %v10382_v20, 16 }
 0x177   : > { %8101 = vmatmul.mubr.bf16.gmra.mrb[24].mxu0 %v10944_v36 }
 0x178   : > { %8104 = vmatprep.mubr.bf16.mxu0 %v10945_v34  ;;  %v2004_v24 = vrot.slane %v2002_v40, 1  ;;  %v10951_v34 = vld [vmem:[#allocation36_spill] sm:$0xff] }
 0x179   : > { %v8969_v40 = vld [vmem:[%s10706_s4 + $0x190] sm:$0xff]  }
 0x17a   : > { %v10399_v2 = vsel %vm740_vm3, %v2000_v46, %v2004_v24  ;;  %v10952_v46 = vld [vmem:[#allocation6_spill] sm:$0xff]  ;;  %v8980_v24 = vld [vmem:[%s10707_s5 + $0x1b8] sm:$0xff]  }
 0x17d   : > { %7665 = vmatmul.mubr.bf16.gmra.mrb[20].mxu1 %v10946_v60 }
 0x17e   : > { %7668 = vmatprep.mubr.bf16.mxu1 %v10947_v58  ;;  %v10950_v58 = vld [vmem:[#allocation47_spill] sm:$0xff] }
 0x17f   : > { %8105 = vmatmul.mubr.bf16.gmra.mrb[28].mxu0 %v10374_v59 }
 0x180   : > { %8124 = vmatprep.mubr.bf16.mxu0 %v10948_v33  ;;  %v8970_v33 = vld [vmem:[%s10707_s5 + $0x190] sm:$0xff]  }
 0x185   : > { %7669 = vmatmul.mubr.bf16.gmra.mrb[24].mxu1 %v10949_v55 }
 0x186   : > { %7672 = vmatprep.mubr.bf16.mxu1 %v10950_v58 }
 0x187   : > { %8125 = vmatmul.mubr.bf16.vlgmr.msra.gmra.mrb[0].mxu0 %v10951_v34 }
 0x188   : > { %8157 = vmatpush3.bf16.msra.mxu0 %v8966_v38  ;;  %8128 = vmatprep.mubr.bf16.mxu0 %v9981_v63  ;;  %v8974_v38 = vld [vmem:[%s10707_s5 + $0x1a0] sm:$0xff]  }
 0x189   : > { %8158 = vmatprep.subr.bf16.mxu0 %v8968_v10 }
 0x18c   : > { %8159 = vmatpush3.bf16.msra.mxu0 %v8968_v10  ;;  %v8978_v10 = vld [vmem:[%s10707_s5 + $0x1b0] sm:$0xff]  }
 0x18d   : > { %7673 = vmatmul.mubr.bf16.gmra.mrb[28].mxu1 %v10399_v2  ;;  %8160 = vmatprep.subr.bf16.mxu0 %v8970_v33 }
 0x18e   : > { %7692 = vmatprep.mubr.bf16.mxu1 %v10004_v43  ;;  %v8976_v43 = vld [vmem:[%s10707_s5 + $0x1a8] sm:$0xff]  }
 0x18f   : > { %8129 = vmatmul.mubr.bf16.gmra.mrb[4].mxu0 %v9986_v50 }
 0x190   : > { %8132 = vmatprep.mubr.bf16.mxu0 %v10010_v27  ;;  %8161 = vmatpush3.bf16.msra.mxu0 %v8970_v33  ;;  %v10953_v33 = vld [vmem:[#allocation7_spill] sm:$0xff] }
 0x191   : > { %8162 = vmatprep.subr.bf16.mxu0 %v8972_v29 }
 0x194   : > { %8163 = vmatpush3.bf16.msra.mxu0 %v8972_v29  ;;  %v8973_v29 = vld [vmem:[%s10706_s4 + $0x1a0] sm:$0xff]  }
 0x195   : > { %7693 = vmatmul.mubr.bf16.vlgmr.msra.gmra.mrb[0].mxu1 %v10007_v4  ;;  %8164 = vmatprep.subr.bf16.mxu0 %v8974_v38 }
 0x196   : > { %7725 = vmatpush3.bf16.msra.mxu1 %v8965_v15  ;;  %7696 = vmatprep.mubr.bf16.mxu1 %v10038_v45  ;;  %v8971_v15 = vld [vmem:[%s10706_s4 + $0x198] sm:$0xff]  }
 0x197   : > { %7726 = vmatprep.subr.bf16.mxu1 %v8967_v18  ;;  %8133 = vmatmul.mubr.bf16.gmra.mrb[8].mxu0 %v10016_v14 }
 0x198   : > { %8136 = vmatprep.mubr.bf16.mxu0 %v10047_v39  ;;  %8165 = vmatpush3.bf16.msra.mxu0 %v8974_v38  ;;  %v8982_v38 = vld [vmem:[%s10707_s5 + $0x1c0] sm:$0xff]  }
 0x199   : > { %8166 = vmatprep.subr.bf16.mxu0 %v8976_v43 }
 0x19a   : > { %7727 = vmatpush3.bf16.msra.mxu1 %v8967_v18  ;;  %v8975_v18 = vld [vmem:[%s10706_s4 + $0x1a8] sm:$0xff]  }
 0x19b   : > { %7728 = vmatprep.subr.bf16.mxu1 %v8969_v40 }
 0x19c   : > { %8167 = vmatpush3.bf16.msra.mxu0 %v8976_v43  ;;  %v10954_v43 = vld [vmem:[#allocation9_spill] sm:$0xff] }
 0x19d   : > { %7697 = vmatmul.mubr.bf16.gmra.mrb[4].mxu1 %v10952_v46  ;;  %8168 = vmatprep.subr.bf16.mxu0 %v8978_v10 }
 0x19e   : > { %7700 = vmatprep.mubr.bf16.mxu1 %v10076_v41  ;;  %7729 = vmatpush3.bf16.msra.mxu1 %v8969_v40  ;;  %v10955_v40 = vld [vmem:[#allocation11_spill] sm:$0xff] }
 0x19f   : > { %7730 = vmatprep.subr.bf16.mxu1 %v8971_v15  ;;  %8137 = vmatmul.mubr.bf16.gmra.mrb[12].mxu0 %v10953_v33 }
 0x1a0   : > { %8140 = vmatprep.mubr.bf16.mxu0 %v10085_v25  ;;  %8169 = vmatpush3.bf16.msra.mxu0 %v8978_v10  ;;  %v8977_v10 = vld [vmem:[%s10706_s4 + $0x1b0] sm:$0xff]  }
 0x1a1   : > { %8170 = vmatprep.subr.bf16.mxu0 %v8980_v24 }
 0x1a2   : > { %7731 = vmatpush3.bf16.msra.mxu1 %v8971_v15  ;;  %v8979_v15 = vld [vmem:[%s10706_s4 + $0x1b8] sm:$0xff]  }
 0x1a3   : > { %7732 = vmatprep.subr.bf16.mxu1 %v8973_v29 }
 0x1a4   : > { %8171 = vmatpush3.bf16.msra.mxu0 %v8980_v24  ;;  %v10956_v24 = vld [vmem:[#allocation15_spill] sm:$0xff] }
 0x1a5   : > { %7701 = vmatmul.mubr.bf16.gmra.mrb[8].mxu1 %v10954_v43  ;;  %8204 = vmatprep.subr.bf16.mxu0 %v8982_v38 }
 0x1a6   : > { %7704 = vmatprep.mubr.bf16.mxu1 %v10107_v57  ;;  %7733 = vmatpush3.bf16.msra.mxu1 %v8973_v29  ;;  %v10957_v29 = vld [vmem:[#allocation17_spill] sm:$0xff]  ;;  %v8981_v57 = vld [vmem:[%s10706_s4 + $0x1c0] sm:$0xff]  }
 0x1a7   : > { %8141 = vmatmul.mubr.bf16.gmra.mrb[16].mxu0 %v10955_v40  ;;  %7734 = vmatprep.subr.bf16.mxu1 %v8975_v18 }
 0x1a8   : > { %8144 = vmatprep.mubr.bf16.mxu0 %v10116_v31 }
 0x1aa   : > { %7735 = vmatpush3.bf16.msra.mxu1 %v8975_v18  ;;  %v10958_v18 = vld [vmem:[#allocation23_spill] sm:$0xff] }
 0x1ab   : > { %7736 = vmatprep.subr.bf16.mxu1 %v8977_v10 }
 0x1ad   : > { %7705 = vmatmul.mubr.bf16.gmra.mrb[12].mxu1 %v10956_v24 }
 0x1ae   : > { %7708 = vmatprep.mubr.bf16.mxu1 %v10137_v17  ;;  %7737 = vmatpush3.bf16.msra.mxu1 %v8977_v10  ;;  %v5171_v10 = vrot.slane %v10276_v8, 1  ;;  %v5172_v17 = vrot.slane %v10365_v53, 1  ;;  %v2266_v53 = vrot.slane %v10297_v19, 1 }
 0x1af   : > { %8145 = vmatmul.mubr.bf16.gmra.mrb[20].mxu0 %v10957_v29  ;;  %7738 = vmatprep.subr.bf16.mxu1 %v8979_v15 }
 0x1b0   : > { %8148 = vmatprep.mubr.bf16.mxu0 %v10143_v52  ;;  %v10470_v29 = vsel %vm1415_vm4, %v5171_v10, %v5172_v17  ;;  %v2267_v17 = vrot.slane %v10382_v20, 1  ;;  %v8988_v20 = vld [vmem:[%s10707_s5 + $0x1d8] sm:$0xff]  }
 0x1b2   : > { %7739 = vmatpush3.bf16.msra.mxu1 %v8979_v15  ;;  %v8984_v15 = vld [vmem:[%s10707_s5 + $0x1c8] sm:$0xff]   ;;  %v10489_v10 = vsel %vm1415_vm4, %v2266_v53, %v2267_v17  ;;  %v10970_v53 = vld [vmem:[#allocation50_spill] sm:$0xff] }
 0x1b3   : > { %7772 = vmatprep.subr.bf16.mxu1 %v8981_v57  ;;  %v9006_v17 = vld [vmem:[%s10707_s5 + $0x220] sm:$0xff]  }
 0x1b5   : > { %7709 = vmatmul.mubr.bf16.gmra.mrb[16].mxu1 %v10140_v54 }
 0x1b6   : > { %7712 = vmatprep.mubr.bf16.mxu1 %v10159_v62 }
 0x1b7   : > { %8149 = vmatmul.mubr.bf16.gmra.mrb[24].mxu0 %v10958_v18 }
 0x1b8   : > { %8152 = vmatprep.mubr.bf16.mxu0 %v10165_v49 }
 0x1bd   : > { %7713 = vmatmul.mubr.bf16.gmra.mrb[20].mxu1 %v10162_v48 }
 0x1be   : > { %7716 = vmatprep.mubr.bf16.mxu1 %v10176_v5 }
 0x1bf   : > { %8153 = vmatmul.mubr.bf16.gmra.mrb[28].mxu0 %v10470_v29 }
 0x1c0   : > { %8172 = vmatprep.mubr.bf16.mxu0 %v9228_v32  ;;  %v8986_v32 = vld [vmem:[%s10707_s5 + $0x1d0] sm:$0xff]  }
 0x1c5   : > { %7717 = vmatmul.mubr.bf16.gmra.mrb[24].mxu1 %v10179_v12 }
 0x1c6   : > { %7720 = vmatprep.mubr.bf16.mxu1 %v10195_v56 }
 0x1c7   : > { %8173 = vmatmul.mubr.bf16.vlgmr.msra.gmra.mrb[0].mxu0 %v9236_v35  ;;  %v8990_v35 = vld [vmem:[%s10707_s5 + $0x1e0] sm:$0xff]  }
 0x1c8   : > { %8205 = vmatpush3.bf16.msra.mxu0 %v8982_v38  ;;  %8176 = vmatprep.mubr.bf16.mxu0 %v9284_v26  ;;  %v8983_v26 = vld [vmem:[%s10706_s4 + $0x1c8] sm:$0xff]   ;;  %v10964_v38 = vld [vmem:[#allocation45_spill] sm:$0xff] }
 0x1c9   : > { %8206 = vmatprep.subr.bf16.mxu0 %v8984_v15 }
 0x1cc   : > { %8207 = vmatpush3.bf16.msra.mxu0 %v8984_v15  ;;  %v10965_v15 = vld [vmem:[#allocation44_spill] sm:$0xff] }
 0x1cd   : > { %7721 = vmatmul.mubr.bf16.gmra.mrb[28].mxu1 %v10489_v10  ;;  %8208 = vmatprep.subr.bf16.mxu0 %v8986_v32 }
 0x1ce   : > { %7740 = vmatprep.mubr.bf16.mxu1 %v9260_v61  ;;  %v8992_v61 = vld [vmem:[%s10707_s5 + $0x1e8] sm:$0xff]  }
 0x1cf   : > { %8177 = vmatmul.mubr.bf16.gmra.mrb[4].mxu0 %v9335_v13  ;;  %v8985_v13 = vld [vmem:[%s10706_s4 + $0x1d0] sm:$0xff]  }
 0x1d0   : > { %8180 = vmatprep.mubr.bf16.mxu0 %v9376_v9  ;;  %8209 = vmatpush3.bf16.msra.mxu0 %v8986_v32  ;;  %v8996_v9 = vld [vmem:[%s10707_s5 + $0x1f8] sm:$0xff]   ;;  %v8999_v32 = vld [vmem:[%s10706_s4 + $0x208] sm:$0xff]  }
 0x1d1   : > { %8210 = vmatprep.subr.bf16.mxu0 %v8988_v20 }
 0x1d4   : > { %8211 = vmatpush3.bf16.msra.mxu0 %v8988_v20  ;;  %v10971_v20 = vld [vmem:[#allocation12_spill] sm:$0xff] }
 0x1d5   : > { %7741 = vmatmul.mubr.bf16.vlgmr.msra.gmra.mrb[0].mxu1 %v9293_v1  ;;  %8212 = vmatprep.subr.bf16.mxu0 %v8990_v35  ;;  %v8994_v1 = vld [vmem:[%s10707_s5 + $0x1f0] sm:$0xff]  }
 0x1d6   : > { %7773 = vmatpush3.bf16.msra.mxu1 %v8981_v57  ;;  %7744 = vmatprep.mubr.bf16.mxu1 %v9331_v16  ;;  %v8987_v16 = vld [vmem:[%s10706_s4 + $0x1d8] sm:$0xff]   ;;  %v10963_v57 = vld [vmem:[#allocation3_spill] sm:$0xff] }
 0x1d7   : > { %7774 = vmatprep.subr.bf16.mxu1 %v8983_v26  ;;  %8181 = vmatmul.mubr.bf16.gmra.mrb[8].mxu0 %v9410_v23  ;;  %v8989_v23 = vld [vmem:[%s10706_s4 + $0x1e0] sm:$0xff]  }
 0x1d8   : > { %8184 = vmatprep.mubr.bf16.mxu0 %v9452_v47  ;;  %8213 = vmatpush3.bf16.msra.mxu0 %v8990_v35  ;;  %v10959_v47 = vld [vmem:[#allocation30_spill] sm:$0xff]  ;;  %v9008_v35 = vld [vmem:[%s10707_s5 + $0x228] sm:$0xff]  }
 0x1d9   : > { %8214 = vmatprep.subr.bf16.mxu0 %v8992_v61 }
 0x1da   : > { %7775 = vmatpush3.bf16.msra.mxu1 %v8983_v26  ;;  %v10972_v26 = vld [vmem:[#allocation14_spill] sm:$0xff] }
 0x1db   : > { %7776 = vmatprep.subr.bf16.mxu1 %v8985_v13 }
 0x1dc   : > { %8215 = vmatpush3.bf16.msra.mxu0 %v8992_v61  ;;  %v9001_v61 = vld [vmem:[%s10706_s4 + $0x210] sm:$0xff]  }
 0x1dd   : > { %7745 = vmatmul.mubr.bf16.gmra.mrb[4].mxu1 %v9372_v7  ;;  %8216 = vmatprep.subr.bf16.mxu0 %v8994_v1  ;;  %v8998_v7 = vld [vmem:[%s10707_s5 + $0x200] sm:$0xff]  }
 0x1de   : > { %7748 = vmatprep.mubr.bf16.mxu1 %v9418_v30  ;;  %7777 = vmatpush3.bf16.msra.mxu1 %v8985_v13  ;;  %v8991_v30 = vld [vmem:[%s10706_s4 + $0x1e8] sm:$0xff]  }
 0x1df   : > { %7778 = vmatprep.subr.bf16.mxu1 %v8987_v16  ;;  %8185 = vmatmul.mubr.bf16.gmra.mrb[12].mxu0 %v9475_v0  ;;  %v8993_v0 = vld [vmem:[%s10706_s4 + $0x1f0] sm:$0xff]   ;;  %v10973_v13 = vld [vmem:[#allocation51_spill] sm:$0xff] }
 0x1e0   : > { %8188 = vmatprep.mubr.bf16.mxu0 %v9505_v11  ;;  %8217 = vmatpush3.bf16.msra.mxu0 %v8994_v1  ;;  %v8995_v11 = vld [vmem:[%s10706_s4 + $0x1f8] sm:$0xff]   ;;  %v10974_v1 = vld [vmem:[#allocation52_spill] sm:$0xff] }
 0x1e1   : > { %8218 = vmatprep.subr.bf16.mxu0 %v8996_v9 }
 0x1e2   : > { %7779 = vmatpush3.bf16.msra.mxu1 %v8987_v16  ;;  %v9010_v16 = vld [vmem:[%s10707_s5 + $0x230] sm:$0xff]  }
 0x1e3   : > { %7780 = vmatprep.subr.bf16.mxu1 %v8989_v23 }
 0x1e4   : > { %8219 = vmatpush3.bf16.msra.mxu0 %v8996_v9  ;;  %v9003_v9 = vld [vmem:[%s10706_s4 + $0x218] sm:$0xff]  }
 0x1e5   : > { %7749 = vmatmul.mubr.bf16.gmra.mrb[8].mxu1 %v10885_v6  ;;  %8252 = vmatprep.subr.bf16.mxu0 %v8998_v7  ;;  %v10960_v6 = vld [vmem:[#allocation25_spill] sm:$0xff] }
 0x1e6   : > { %7752 = vmatprep.mubr.bf16.mxu1 %v10887_v3  ;;  %7781 = vmatpush3.bf16.msra.mxu1 %v8989_v23  ;;  %v10961_v3 = vld [vmem:[#allocation37_spill] sm:$0xff]  ;;  %v10975_v23 = vld [vmem:[#allocation16_spill] sm:$0xff] }
 0x1e7   : > { %8189 = vmatmul.mubr.bf16.gmra.mrb[16].mxu0 %v9533_v28  ;;  %7782 = vmatprep.subr.bf16.mxu1 %v8991_v30  ;;  %v8997_v28 = vld [vmem:[%s10706_s4 + $0x200] sm:$0xff]  }
 0x1e8   : > { %8192 = vmatprep.mubr.bf16.mxu0 %v10959_v47  ;;  %v9005_v47 = vld [vmem:[%s10706_s4 + $0x220] sm:$0xff]  }
 0x1ea   : > { %7783 = vmatpush3.bf16.msra.mxu1 %v8991_v30  ;;  %v10976_v30 = vld [vmem:[#allocation18_spill] sm:$0xff] }
 0x1eb   : > { %7784 = vmatprep.subr.bf16.mxu1 %v8993_v0 }
 0x1ed   : > { %7753 = vmatmul.mubr.bf16.gmra.mrb[12].mxu1 %v10960_v6  ;;  %v9007_v6 = vld [vmem:[%s10706_s4 + $0x228] sm:$0xff]  }
 0x1ee   : > { %7756 = vmatprep.mubr.bf16.mxu1 %v10892_v37  ;;  %7785 = vmatpush3.bf16.msra.mxu1 %v8993_v0  ;;  %v10962_v37 = vld [vmem:[#allocation40_spill] sm:$0xff]  ;;  %v10977_v0 = vld [vmem:[#allocation53_spill] sm:$0xff] }
 0x1ef   : > { %8193 = vmatmul.mubr.bf16.gmra.mrb[20].mxu0 %v10961_v3  ;;  %7786 = vmatprep.subr.bf16.mxu1 %v8995_v11  ;;  %v10979_v3 = vld [vmem:[#allocation21_spill] sm:$0xff] }
 0x1f0   : > { %8196 = vmatprep.mubr.bf16.mxu0 %v9643_v22  ;;  %v9000_v22 = vld [vmem:[%s10707_s5 + $0x208] sm:$0xff]  }
 0x1f2   : > { %7787 = vmatpush3.bf16.msra.mxu1 %v8995_v11  ;;  %v10978_v11 = vld [vmem:[#allocation54_spill] sm:$0xff] }
 0x1f3   : > { %7820 = vmatprep.subr.bf16.mxu1 %v8997_v28 }
 0x1f5   : > { %7757 = vmatmul.mubr.bf16.gmra.mrb[16].mxu1 %v10894_v51  ;;  %v9004_v51 = vld [vmem:[%s10707_s5 + $0x218] sm:$0xff]  }
 0x1f6   : > { %7760 = vmatprep.mubr.bf16.mxu1 %v10896_v21  ;;  %v10966_v21 = vld [vmem:[#allocation46_spill] sm:$0xff] }
 0x1f7   : > { %8197 = vmatmul.mubr.bf16.gmra.mrb[24].mxu0 %v9671_v42  ;;  %v10967_v42 = vld [vmem:[#allocation48_spill] sm:$0xff] }
 0x1f8   : > { %8200 = vmatprep.mubr.bf16.mxu0 %v10276_v8  ;;  %v10968_v8 = vld [vmem:[#allocation10_spill] sm:$0xff] }
 0x1fd   : > { %7761 = vmatmul.mubr.bf16.gmra.mrb[20].mxu1 %v9639_v44  ;;  %v9002_v44 = vld [vmem:[%s10707_s5 + $0x210] sm:$0xff]  }
 0x1fe   : > { %7764 = vmatprep.mubr.bf16.mxu1 %v10962_v37  ;;  %v10981_v37 = vld [vmem:[#allocation33_spill] sm:$0xff] }
 0x1ff   : > { %8201 = vmatmul.mubr.bf16.gmra.mrb[28].mxu0 %v10963_v57 }
 0x200   : > { %8220 = vmatprep.mubr.bf16.mxu0 %v10964_v38  ;;  %v10982_v38 = vld [vmem:[#allocation19_spill] sm:$0xff] }
 0x205   : > { %7765 = vmatmul.mubr.bf16.gmra.mrb[24].mxu1 %v10965_v15  ;;  %v9011_v15 = vld [vmem:[%s10706_s4 + $0x238] sm:$0xff]  }
 0x206   : > { %7768 = vmatprep.mubr.bf16.mxu1 %v10297_v19  ;;  %v10969_v19 = vld [vmem:[#allocation49_spill] sm:$0xff] }
 0x207   : > { %8221 = vmatmul.mubr.bf16.vlgmr.msra.gmra.mrb[0].mxu0 %v10966_v21  ;;  %v10984_v21 = vld [vmem:[#allocation32_spill] sm:$0xff] }
 0x208   : > { %8253 = vmatpush3.bf16.msra.mxu0 %v8998_v7  ;;  %8224 = vmatprep.mubr.bf16.mxu0 %v10967_v42  ;;  %v9012_v7 = vld [vmem:[%s10707_s5 + $0x238] sm:$0xff]   ;;  %v10985_v42 = vld [vmem:[#allocation22_spill] sm:$0xff] }
 0x209   : > { %8254 = vmatprep.subr.bf16.mxu0 %v9000_v22 }
 0x20c   : > { %8255 = vmatpush3.bf16.msra.mxu0 %v9000_v22  ;;  %v10983_v22 = vld [vmem:[#allocation27_spill] sm:$0xff] }
 0x20d   : > { %7769 = vmatmul.mubr.bf16.gmra.mrb[28].mxu1 %v10963_v57  ;;  %8256 = vmatprep.subr.bf16.mxu0 %v9002_v44  ;;  %v9009_v57 = vld [vmem:[%s10706_s4 + $0x230] sm:$0xff]  }
 0x20e   : > { %7788 = vmatprep.mubr.bf16.mxu1 %v10968_v8  ;;  %v10988_v8 = vld [vmem:[#allocation39_spill] sm:$0xff] }
 0x20f   : > { %8225 = vmatmul.mubr.bf16.gmra.mrb[4].mxu0 %v10969_v19  ;;  %v10989_v19 = vld [vmem:[#allocation5_spill] sm:$0xff] }
 0x210   : > { %8228 = vmatprep.mubr.bf16.mxu0 %v10970_v53  ;;  %8257 = vmatpush3.bf16.msra.mxu0 %v9002_v44  ;;  %v10986_v44 = vld [vmem:[#allocation35_spill] sm:$0xff] }
 0x211   : > { %8258 = vmatprep.subr.bf16.mxu0 %v9004_v51 }
 0x214   : > { %8259 = vmatpush3.bf16.msra.mxu0 %v9004_v51  ;;  %v10987_v51 = vld [vmem:[#allocation4_spill] sm:$0xff] }
 0x215   : > { %7789 = vmatmul.mubr.bf16.vlgmr.msra.gmra.mrb[0].mxu1 %v10971_v20  ;;  %8260 = vmatprep.subr.bf16.mxu0 %v9006_v17 }
 0x216   : > { %7821 = vmatpush3.bf16.msra.mxu1 %v8997_v28  ;;  %7792 = vmatprep.mubr.bf16.mxu1 %v10972_v26  ;;  %v10980_v28 = vld [vmem:[#allocation24_spill] sm:$0xff] }
 0x217   : > { %7822 = vmatprep.subr.bf16.mxu1 %v8999_v32  ;;  %8229 = vmatmul.mubr.bf16.gmra.mrb[8].mxu0 %v10973_v13 }
 0x218   : > { %8232 = vmatprep.mubr.bf16.mxu0 %v10974_v1  ;;  %8261 = vmatpush3.bf16.msra.mxu0 %v9006_v17 }
 0x219   : > { %8262 = vmatprep.subr.bf16.mxu0 %v9008_v35 }
 0x21a   : > { %7823 = vmatpush3.bf16.msra.mxu1 %v8999_v32 }
 0x21b   : > { %7824 = vmatprep.subr.bf16.mxu1 %v9001_v61 }
 0x21c   : > { %8263 = vmatpush3.bf16.msra.mxu0 %v9008_v35 }
 0x21d   : > { %7793 = vmatmul.mubr.bf16.gmra.mrb[4].mxu1 %v10975_v23  ;;  %8264 = vmatprep.subr.bf16.mxu0 %v9010_v16 }
 0x21e   : > { %7796 = vmatprep.mubr.bf16.mxu1 %v10976_v30  ;;  %7825 = vmatpush3.bf16.msra.mxu1 %v9001_v61 }
 0x21f   : > { %7826 = vmatprep.subr.bf16.mxu1 %v9003_v9  ;;  %8233 = vmatmul.mubr.bf16.gmra.mrb[12].mxu0 %v10977_v0 }
 0x220   : > { %8236 = vmatprep.mubr.bf16.mxu0 %v10978_v11  ;;  %8265 = vmatpush3.bf16.msra.mxu0 %v9010_v16 }
 0x221   : > { %8266 = vmatprep.subr.bf16.mxu0 %v9012_v7 }
 0x222   : > { %7827 = vmatpush3.bf16.msra.mxu1 %v9003_v9 }
 0x223   : > { %7828 = vmatprep.subr.bf16.mxu1 %v9005_v47 }
 0x224   : > { %8267 = vmatpush3.bf16.msra.mxu0 %v9012_v7 }
 0x225   : > { %7797 = vmatmul.mubr.bf16.gmra.mrb[8].mxu1 %v10979_v3 }
 0x226   : > { %7800 = vmatprep.mubr.bf16.mxu1 %v10980_v28  ;;  %7829 = vmatpush3.bf16.msra.mxu1 %v9005_v47 }
 0x227   : > { %8237 = vmatmul.mubr.bf16.gmra.mrb[16].mxu0 %v10981_v37  ;;  %7830 = vmatprep.subr.bf16.mxu1 %v9007_v6 }
 0x228   : > { %8240 = vmatprep.mubr.bf16.mxu0 %v10982_v38 }
 0x22a   : > { %7831 = vmatpush3.bf16.msra.mxu1 %v9007_v6 }
 0x22b   : > { %7832 = vmatprep.subr.bf16.mxu1 %v9009_v57 }
 0x22d   : > { %7801 = vmatmul.mubr.bf16.gmra.mrb[12].mxu1 %v10983_v22 }
 0x22e   : > { %7804 = vmatprep.mubr.bf16.mxu1 %v10984_v21  ;;  %7833 = vmatpush3.bf16.msra.mxu1 %v9009_v57 }
 0x22f   : > { %8241 = vmatmul.mubr.bf16.gmra.mrb[20].mxu0 %v10985_v42  ;;  %7834 = vmatprep.subr.bf16.mxu1 %v9011_v15 }
 0x230   : > { %8244 = vmatprep.mubr.bf16.mxu0 %v10944_v36 }
 0x232   : > { %7835 = vmatpush3.bf16.msra.mxu1 %v9011_v15 }
 0x235   : > { %7805 = vmatmul.mubr.bf16.gmra.mrb[16].mxu1 %v10986_v44 }
 0x236   : > { %7808 = vmatprep.mubr.bf16.mxu1 %v10946_v60 }
 0x237   : > { %8245 = vmatmul.mubr.bf16.gmra.mrb[24].mxu0 %v10987_v51 }
 0x238   : > { %8248 = vmatprep.mubr.bf16.mxu0 %v10374_v59 }
 0x23d   : > { %7809 = vmatmul.mubr.bf16.gmra.mrb[20].mxu1 %v10988_v8 }
 0x23e   : > { %7812 = vmatprep.mubr.bf16.mxu1 %v10949_v55 }
 0x23f   : > { %8249 = vmatmul.mubr.bf16.gmra.mrb[28].mxu0 %v10989_v19 }
 0x240   : > { %8268 = vmatprep.mubr.bf16.mxu0 %v10951_v34  ;;  %v10991_v34 = vld [vmem:[#allocation17_spill] sm:$0xff] }
 0x245   : > { %7813 = vmatmul.mubr.bf16.gmra.mrb[24].mxu1 %v10950_v58  ;;  %v10990_v58 = vld [vmem:[#allocation13_spill] sm:$0xff] }
 0x246   : > { %7816 = vmatprep.mubr.bf16.mxu1 %v10399_v2 }
 0x247   : > { %8269 = vmatmul.mubr.bf16.vlgmr.msra.gmra.mrb[0].mxu0 %v9981_v63  ;;  %v10993_v63 = vld [vmem:[#allocation28_spill] sm:$0xff] }
 0x248   : > { %8272 = vmatprep.mubr.bf16.mxu0 %v9986_v50 }
 0x24d   : > { %7817 = vmatmul.mubr.bf16.gmra.mrb[28].mxu1 %v10989_v19 }
 0x24e   : > { %7836 = vmatprep.mubr.bf16.mxu1 %v10007_v4 }
 0x24f   : > { %8273 = vmatmul.mubr.bf16.gmra.mrb[4].mxu0 %v10010_v27 }
 0x250   : > { %8276 = vmatprep.mubr.bf16.mxu0 %v10016_v14  ;;  %v10992_v14 = vld [vmem:[#allocation20_spill] sm:$0xff] }
 0x255   : > { %7837 = vmatmul.mubr.bf16.vlgmr.msra.gmra.mrb[0].mxu1 %v10038_v45 }
 0x256   : > { %7840 = vmatprep.mubr.bf16.mxu1 %v10952_v46 }
 0x257   : > { %8277 = vmatmul.mubr.bf16.gmra.mrb[8].mxu0 %v10047_v39 }
 0x258   : > { %8280 = vmatprep.mubr.bf16.mxu0 %v10953_v33 }
 0x25d   : > { %7841 = vmatmul.mubr.bf16.gmra.mrb[4].mxu1 %v10076_v41 }
 0x25e   : > { %7844 = vmatprep.mubr.bf16.mxu1 %v10954_v43 }
 0x25f   : > { %8281 = vmatmul.mubr.bf16.gmra.mrb[12].mxu0 %v10085_v25 }
 0x260   : > { %8284 = vmatprep.mubr.bf16.mxu0 %v10955_v40 }
 0x265   : > { %7845 = vmatmul.mubr.bf16.gmra.mrb[8].mxu1 %v10990_v58 }
 0x266   : > { %7848 = vmatprep.mubr.bf16.mxu1 %v10956_v24 }
 0x267   : > { %8285 = vmatmul.mubr.bf16.gmra.mrb[16].mxu0 %v10116_v31 }
 0x268   : > { %8288 = vmatprep.mubr.bf16.mxu0 %v10991_v34 }
 0x26d   : > { %7849 = vmatmul.mubr.bf16.gmra.mrb[12].mxu1 %v10992_v14 }
 0x26e   : > { %7852 = vmatprep.mubr.bf16.mxu1 %v10140_v54 }
 0x26f   : > { %8289 = vmatmul.mubr.bf16.gmra.mrb[20].mxu0 %v10143_v52 }
 0x270   : > { %8292 = vmatprep.mubr.bf16.mxu0 %v10958_v18 }
 0x275   : > { %7853 = vmatmul.mubr.bf16.gmra.mrb[16].mxu1 %v10159_v62 }
 0x276   : > { %7856 = vmatprep.mubr.bf16.mxu1 %v10162_v48 }
 0x277   : > { %8293 = vmatmul.mubr.bf16.gmra.mrb[24].mxu0 %v10165_v49 }
 0x278   : > { %8296 = vmatprep.mubr.bf16.mxu0 %v10470_v29 }
 0x27d   : > { %7857 = vmatmul.mubr.bf16.gmra.mrb[20].mxu1 %v10176_v5 }
 0x27e   : > { %7860 = vmatprep.mubr.bf16.mxu1 %v10179_v12 }
 0x27f   : > { %8297 = vmatmul.mubr.bf16.gmra.mrb[28].mxu0 %v10993_v63 }
 0x285   : > { %7861 = vmatmul.mubr.bf16.gmra.mrb[24].mxu1 %v10195_v56 }
 0x286   : > { %7864 = vmatprep.mubr.bf16.mxu1 %v10489_v10 }
 0x28d   : > { %7865 = vmatmul.mubr.bf16.gmra.mrb[28].mxu1 %v10993_v63 }
 0x31a   : > { %v8270_v50 = vpop.f32.mrb[0].mxu0 }
 0x31b   : > { %v6044_v4 = vpop.f32.mrb[1].mxu0 }
 0x31c   : > { %v8271_v27 = vpop.f32.mrb[2].mxu0 }
 0x31d   : > { %v6047_v45 = vpop.f32.mrb[3].mxu0 }
 0x322   : > { %v8274_v41 = vpop.f32.mrb[4].mxu0 }
 0x323   : > { %v6060_v39 = vpop.f32.mrb[5].mxu0 }
 0x324   : > { %v8275_v31 = vpop.f32.mrb[6].mxu0 }
 0x325   : > { %v6063_v25 = vpop.f32.mrb[7].mxu0 }
 0x328   : > { %v7838_v52 = vpop.f32.mrb[0].mxu1 }
 0x329   : > { %v8300_v54 = vadd.f32 %v8270_v50, %v7838_v52  ;;  %v3139_v62 = vpop.f32.mrb[1].mxu1 }
 0x32a   : > { %v8301_v48 = vadd.f32 %v6044_v4, %v3139_v62  ;;  %v7839_v49 = vpop.f32.mrb[2].mxu1  ;;  %v8278_v5 = vpop.f32.mrb[8].mxu0 }
 0x32b   : > { %v8302_v12 = vadd.f32 %v8271_v27, %v7839_v49  ;;  %v3142_v56 = vpop.f32.mrb[3].mxu1  ;;  %v6076_v36 = vpop.f32.mrb[9].mxu0  ;;  %v6243_v24 = vmul.f32 %v8300_v54, %v8300_v54 }
 0x32c   : > { %v8303_v59 = vadd.f32 %v6047_v45, %v3142_v56  ;;  %v8279_v60 = vpop.f32.mrb[10].mxu0  ;;  %v6241_v46 = vmul.f32 %v8301_v48, %v8301_v48 }
 0x32d   : > { %v6902_v55 = vpack.c.bf16 %v8302_v12, %v8300_v54  ;;  %v6079_v2 = vpop.f32.mrb[11].mxu0  ;;  %v6244_v32 = vmul.f32 %v8302_v12, %v8302_v12 }
 0x32e   : > { %v6203_v33 = vadd.f32 %v8303_v59, %v8301_v48  ;;  %v6242_v43 = vmul.f32 %v8303_v59, %v8303_v59  ;;  %v6897_v40 = vpack.c.bf16 %v8303_v59, %v8301_v48 }
 0x32f   : > { %6989 = vst [vmem:[%s10673_s30 + $0x8] sm:$0xff] %v6902_v55  }
 0x330   : > { %v6204_v29 = vadd.f32 %v8300_v54, %v6203_v33  ;;  %v6273_v18 = vadd.f32 %v6242_v43, %v6241_v46  ;;  %6898 = vst [vmem:[%s10673_s30] sm:$0xff] %v6897_v40   ;;  %v7842_v10 = vpop.f32.mrb[4].mxu1 }
 0x331   : > { %v8304_v53 = vadd.f32 %v8274_v41, %v7842_v10  ;;  %v3155_v17 = vpop.f32.mrb[5].mxu1 }
 0x332   : > { %v6274_v20 = vadd.f32 %v6273_v18, %v6243_v24  ;;  %v8305_v35 = vadd.f32 %v6060_v39, %v3155_v17  ;;  %v6205_v26 = vadd.f32 %v8302_v12, %v6204_v29  ;;  %v7843_v61 = vpop.f32.mrb[6].mxu1  ;;  %v8282_v13 = vpop.f32.mrb[12].mxu0 }
 0x333   : > { %v8306_v1 = vadd.f32 %v8275_v31, %v7843_v61  ;;  %v3158_v16 = vpop.f32.mrb[7].mxu1  ;;  %v6092_v9 = vpop.f32.mrb[13].mxu0  ;;  %v6247_v38 = vmul.f32 %v8304_v53, %v8304_v53 }
 0x334   : > { %v6206_v23 = vadd.f32 %v8305_v35, %v6205_v26  ;;  %v6245_v7 = vmul.f32 %v8305_v35, %v8305_v35  ;;  %v6275_v30 = vadd.f32 %v6274_v20, %v6244_v32  ;;  %v8307_v0 = vadd.f32 %v6063_v25, %v3158_v16  ;;  %v8283_v47 = vpop.f32.mrb[14].mxu0 }
 0x335   : > { %v6912_v11 = vpack.c.bf16 %v8306_v1, %v8304_v53  ;;  %v6095_v6 = vpop.f32.mrb[15].mxu0  ;;  %v6248_v51 = vmul.f32 %v8306_v1, %v8306_v1 }
 0x336   : > { %v6276_v3 = vadd.f32 %v6275_v30, %v6245_v7  ;;  %v6207_v28 = vadd.f32 %v8307_v0, %v6206_v23  ;;  %v6246_v37 = vmul.f32 %v8307_v0, %v8307_v0  ;;  %v6907_v57 = vpack.c.bf16 %v8307_v0, %v8305_v35 }
 0x337   : > { %6991 = vst [vmem:[%s10673_s30 + $0x18] sm:$0xff] %v6912_v11  }
 0x338   : > { %v6208_v15 = vadd.f32 %v8304_v53, %v6207_v28  ;;  %v6277_v22 = vadd.f32 %v6276_v3, %v6246_v37  ;;  %6990 = vst [vmem:[%s10673_s30 + $0x10] sm:$0xff] %v6907_v57   ;;  %v7846_v21 = vpop.f32.mrb[8].mxu1 }
 0x339   : > { %v8308_v42 = vadd.f32 %v8278_v5, %v7846_v21  ;;  %v3171_v44 = vpop.f32.mrb[9].mxu1 }
 0x33a   : > { %v6278_v8 = vadd.f32 %v6277_v22, %v6247_v38  ;;  %v8309_v19 = vadd.f32 %v6076_v36, %v3171_v44  ;;  %v6209_v58 = vadd.f32 %v8306_v1, %v6208_v15  ;;  %v7847_v34 = vpop.f32.mrb[10].mxu1  ;;  %v8286_v14 = vpop.f32.mrb[16].mxu0 }
 0x33b   : > { %v8310_v63 = vadd.f32 %v8279_v60, %v7847_v34  ;;  %v3174_v50 = vpop.f32.mrb[11].mxu1  ;;  %v6108_v4 = vpop.f32.mrb[17].mxu0  ;;  %v6251_v5 = vmul.f32 %v8308_v42, %v8308_v42 }
 0x33c   : > { %v6210_v27 = vadd.f32 %v8309_v19, %v6209_v58  ;;  %v6249_v45 = vmul.f32 %v8309_v19, %v8309_v19  ;;  %v6279_v41 = vadd.f32 %v6278_v8, %v6248_v51  ;;  %v8311_v39 = vadd.f32 %v6079_v2, %v3174_v50  ;;  %v8287_v31 = vpop.f32.mrb[18].mxu0 }
 0x33d   : > { %v6922_v25 = vpack.c.bf16 %v8310_v63, %v8308_v42  ;;  %v6111_v52 = vpop.f32.mrb[19].mxu0  ;;  %v6252_v55 = vmul.f32 %v8310_v63, %v8310_v63 }
 0x33e   : > { %v6280_v54 = vadd.f32 %v6279_v41, %v6249_v45  ;;  %v6211_v62 = vadd.f32 %v8311_v39, %v6210_v27  ;;  %v6250_v48 = vmul.f32 %v8311_v39, %v8311_v39  ;;  %v6917_v49 = vpack.c.bf16 %v8311_v39, %v8309_v19 }
 0x33f   : > { %6993 = vst [vmem:[%s10673_s30 + $0x28] sm:$0xff] %v6922_v25  }
 0x340   : > { %v6212_v12 = vadd.f32 %v8308_v42, %v6211_v62  ;;  %v6281_v56 = vadd.f32 %v6280_v54, %v6250_v48  ;;  %6992 = vst [vmem:[%s10673_s30 + $0x20] sm:$0xff] %v6917_v49   ;;  %v7850_v36 = vpop.f32.mrb[12].mxu1 }
 0x341   : > { %v8312_v59 = vadd.f32 %v8282_v13, %v7850_v36  ;;  %v3187_v60 = vpop.f32.mrb[13].mxu1 }
 0x342   : > { %v6282_v46 = vadd.f32 %v6281_v56, %v6251_v5  ;;  %v8313_v33 = vadd.f32 %v6092_v9, %v3187_v60  ;;  %v6213_v43 = vadd.f32 %v8310_v63, %v6212_v12  ;;  %v7851_v2 = vpop.f32.mrb[14].mxu1  ;;  %v8290_v40 = vpop.f32.mrb[20].mxu0 }
 0x343   : > { %v8314_v24 = vadd.f32 %v8283_v47, %v7851_v2  ;;  %v3190_v29 = vpop.f32.mrb[15].mxu1  ;;  %v6124_v18 = vpop.f32.mrb[21].mxu0  ;;  %v6255_v9 = vmul.f32 %v8312_v59, %v8312_v59 }
 0x344   : > { %v6214_v10 = vadd.f32 %v8313_v33, %v6213_v43  ;;  %v6253_v53 = vmul.f32 %v8313_v33, %v8313_v33  ;;  %v6283_v17 = vadd.f32 %v6282_v46, %v6252_v55  ;;  %v8315_v32 = vadd.f32 %v6095_v6, %v3190_v29  ;;  %v8291_v20 = vpop.f32.mrb[22].mxu0 }
 0x345   : > { %v6932_v35 = vpack.c.bf16 %v8314_v24, %v8312_v59  ;;  %v6127_v26 = vpop.f32.mrb[23].mxu0  ;;  %v6256_v11 = vmul.f32 %v8314_v24, %v8314_v24 }
 0x346   : > { %v6284_v61 = vadd.f32 %v6283_v17, %v6253_v53  ;;  %v6215_v13 = vadd.f32 %v8315_v32, %v6214_v10  ;;  %v6254_v1 = vmul.f32 %v8315_v32, %v8315_v32  ;;  %v6927_v16 = vpack.c.bf16 %v8315_v32, %v8313_v33 }
 0x347   : > { %6995 = vst [vmem:[%s10673_s30 + $0x38] sm:$0xff] %v6932_v35  }
 0x348   : > { %v6216_v23 = vadd.f32 %v8312_v59, %v6215_v13  ;;  %v6285_v7 = vadd.f32 %v6284_v61, %v6254_v1  ;;  %6994 = vst [vmem:[%s10673_s30 + $0x30] sm:$0xff] %v6927_v16   ;;  %v7854_v30 = vpop.f32.mrb[16].mxu1 }
 0x349   : > { %v8316_v0 = vadd.f32 %v8286_v14, %v7854_v30  ;;  %v3203_v47 = vpop.f32.mrb[17].mxu1 }
 0x34a   : > { %v6286_v3 = vadd.f32 %v6285_v7, %v6255_v9  ;;  %v8317_v28 = vadd.f32 %v6108_v4, %v3203_v47  ;;  %v6217_v37 = vadd.f32 %v8314_v24, %v6216_v23  ;;  %v7855_v6 = vpop.f32.mrb[18].mxu1  ;;  %v8294_v57 = vpop.f32.mrb[24].mxu0 }
 0x34b   : > { %v8318_v38 = vadd.f32 %v8287_v31, %v7855_v6  ;;  %v3206_v15 = vpop.f32.mrb[19].mxu1  ;;  %v6140_v22 = vpop.f32.mrb[25].mxu0  ;;  %v6259_v4 = vmul.f32 %v8316_v0, %v8316_v0 }
 0x34c   : > { %v6218_v21 = vadd.f32 %v8317_v28, %v6217_v37  ;;  %v6257_v42 = vmul.f32 %v8317_v28, %v8317_v28  ;;  %v6287_v44 = vadd.f32 %v6286_v3, %v6256_v11  ;;  %v8319_v51 = vadd.f32 %v6111_v52, %v3206_v15  ;;  %v8295_v8 = vpop.f32.mrb[26].mxu0 }
 0x34d   : > { %v6942_v19 = vpack.c.bf16 %v8318_v38, %v8316_v0  ;;  %v6143_v58 = vpop.f32.mrb[27].mxu0  ;;  %v6260_v25 = vmul.f32 %v8318_v38, %v8318_v38 }
 0x34e   : > { %v6288_v34 = vadd.f32 %v6287_v44, %v6257_v42  ;;  %v6219_v14 = vadd.f32 %v8319_v51, %v6218_v21  ;;  %v6258_v63 = vmul.f32 %v8319_v51, %v8319_v51  ;;  %v6937_v50 = vpack.c.bf16 %v8319_v51, %v8317_v28 }
 0x34f   : > { %6997 = vst [vmem:[%s10673_s30 + $0x48] sm:$0xff] %v6942_v19  }
 0x350   : > { %v6220_v27 = vadd.f32 %v8316_v0, %v6219_v14  ;;  %v6289_v45 = vadd.f32 %v6288_v34, %v6258_v63  ;;  %6996 = vst [vmem:[%s10673_s30 + $0x40] sm:$0xff] %v6937_v50   ;;  %v7858_v41 = vpop.f32.mrb[20].mxu1 }
 0x351   : > { %v8320_v39 = vadd.f32 %v8290_v40, %v7858_v41  ;;  %v3219_v31 = vpop.f32.mrb[21].mxu1 }
 0x352   : > { %v6290_v54 = vadd.f32 %v6289_v45, %v6259_v4  ;;  %v8321_v62 = vadd.f32 %v6124_v18, %v3219_v31  ;;  %v6221_v48 = vadd.f32 %v8318_v38, %v6220_v27  ;;  %v7859_v52 = vpop.f32.mrb[22].mxu1  ;;  %v8298_v49 = vpop.f32.mrb[28].mxu0 }
 0x353   : > { %v8322_v5 = vadd.f32 %v8291_v20, %v7859_v52  ;;  %v3222_v12 = vpop.f32.mrb[23].mxu1  ;;  %v6156_v56 = vpop.f32.mrb[29].mxu0  ;;  %v6263_v18 = vmul.f32 %v8320_v39, %v8320_v39 }
 0x354   : > { %v6222_v36 = vadd.f32 %v8321_v62, %v6221_v48  ;;  %v6261_v59 = vmul.f32 %v8321_v62, %v8321_v62  ;;  %v6291_v60 = vadd.f32 %v6290_v54, %v6260_v25  ;;  %v8323_v55 = vadd.f32 %v6127_v26, %v3222_v12  ;;  %v8299_v46 = vpop.f32.mrb[30].mxu0 }
 0x355   : > { %v6952_v33 = vpack.c.bf16 %v8322_v5, %v8320_v39  ;;  %v6159_v43 = vpop.f32.mrb[31].mxu0  ;;  %v6264_v35 = vmul.f32 %v8322_v5, %v8322_v5 }
 0x356   : > { %v6292_v2 = vadd.f32 %v6291_v60, %v6261_v59  ;;  %v6223_v40 = vadd.f32 %v8323_v55, %v6222_v36  ;;  %v6262_v24 = vmul.f32 %v8323_v55, %v8323_v55  ;;  %v6947_v29 = vpack.c.bf16 %v8323_v55, %v8321_v62 }
 0x357   : > { %6999 = vst [vmem:[%s10673_s30 + $0x58] sm:$0xff] %v6952_v33  }
 0x358   : > { %v6224_v10 = vadd.f32 %v8320_v39, %v6223_v40  ;;  %v6293_v53 = vadd.f32 %v6292_v2, %v6262_v24  ;;  %6998 = vst [vmem:[%s10673_s30 + $0x50] sm:$0xff] %v6947_v29   ;;  %v7862_v17 = vpop.f32.mrb[24].mxu1 }
 0x359   : > { %v8324_v32 = vadd.f32 %v8294_v57, %v7862_v17  ;;  %v3235_v20 = vpop.f32.mrb[25].mxu1 }
 0x35a   : > { %v6294_v61 = vadd.f32 %v6293_v53, %v6263_v18  ;;  %v8325_v13 = vadd.f32 %v6140_v22, %v3235_v20  ;;  %v6225_v26 = vadd.f32 %v8322_v5, %v6224_v10  ;;  %v7863_v1 = vpop.f32.mrb[26].mxu1 }
 0x35b   : > { %v8326_v16 = vadd.f32 %v8295_v8, %v7863_v1  ;;  %v3238_v9 = vpop.f32.mrb[27].mxu1  ;;  %v6267_v6 = vmul.f32 %v8324_v32, %v8324_v32 }
 0x35c   : > { %v6226_v23 = vadd.f32 %v8325_v13, %v6225_v26  ;;  %v6265_v7 = vmul.f32 %v8325_v13, %v8325_v13  ;;  %v6295_v30 = vadd.f32 %v6294_v61, %v6264_v35  ;;  %v8327_v0 = vadd.f32 %v6143_v58, %v3238_v9 }
 0x35d   : > { %v6962_v47 = vpack.c.bf16 %v8326_v16, %v8324_v32  ;;  %v6268_v42 = vmul.f32 %v8326_v16, %v8326_v16 }
 0x35e   : > { %v6296_v11 = vadd.f32 %v6295_v30, %v6265_v7  ;;  %v6227_v3 = vadd.f32 %v8327_v0, %v6226_v23  ;;  %v6266_v28 = vmul.f32 %v8327_v0, %v8327_v0  ;;  %v6957_v37 = vpack.c.bf16 %v8327_v0, %v8325_v13 }
 0x35f   : > { %7001 = vst [vmem:[%s10673_s30 + $0x68] sm:$0xff] %v6962_v47  }
 0x360   : > { %v6228_v57 = vadd.f32 %v8324_v32, %v6227_v3  ;;  %v6297_v38 = vadd.f32 %v6296_v11, %v6266_v28  ;;  %7000 = vst [vmem:[%s10673_s30 + $0x60] sm:$0xff] %v6957_v37   ;;  %v7866_v15 = vpop.f32.mrb[28].mxu1 }
 0x361   : > { %v8328_v22 = vadd.f32 %v8298_v49, %v7866_v15  ;;  %v3251_v21 = vpop.f32.mrb[29].mxu1 }
 0x362   : > { %v6298_v44 = vadd.f32 %v6297_v38, %v6267_v6  ;;  %v8329_v51 = vadd.f32 %v6156_v56, %v3251_v21  ;;  %v6229_v8 = vadd.f32 %v8326_v16, %v6228_v57  ;;  %v7867_v19 = vpop.f32.mrb[30].mxu1 }
 0x363   : > { %v8330_v58 = vadd.f32 %v8299_v46, %v7867_v19  ;;  %v3254_v34 = vpop.f32.mrb[31].mxu1  ;;  %v6271_v25 = vmul.f32 %v8328_v22, %v8328_v22 }
 0x364   : > { %v6230_v14 = vadd.f32 %v8329_v51, %v6229_v8  ;;  %v6269_v63 = vmul.f32 %v8329_v51, %v8329_v51  ;;  %v6299_v50 = vadd.f32 %v6298_v44, %v6268_v42  ;;  %v8331_v4 = vadd.f32 %v6159_v43, %v3254_v34 }
 0x365   : > { %v6972_v27 = vpack.c.bf16 %v8330_v58, %v8328_v22  ;;  %v6272_v48 = vmul.f32 %v8330_v58, %v8330_v58 }
 0x366   : > { %v6300_v45 = vadd.f32 %v6299_v50, %v6269_v63  ;;  %v6231_v41 = vadd.f32 %v8331_v4, %v6230_v14  ;;  %v6270_v39 = vmul.f32 %v8331_v4, %v8331_v4  ;;  %v6967_v31 = vpack.c.bf16 %v8331_v4, %v8329_v51 }
 0x367   : > { %7003 = vst [vmem:[%s10673_s30 + $0x78] sm:$0xff] %v6972_v27  }
 0x368   : > { %v6232_v54 = vadd.f32 %v8328_v22, %v6231_v41  ;;  %v6301_v62 = vadd.f32 %v6300_v45, %v6270_v39  ;;  %7002 = vst [vmem:[%s10673_s30 + $0x70] sm:$0xff] %v6967_v31  }
 0x36a   : > { %v6233_v52 = vadd.f32 %v8330_v58, %v6232_v54  ;;  %v6302_v49 = vadd.f32 %v6301_v62, %v6271_v25 }
 0x36c   : > { %v6234_v5 = vrot.slane %v6233_v52, 4  ;;  %v6303_v12 = vadd.f32 %v6302_v49, %v6272_v48 }
 0x36e   : > { %v6235_v56 = vadd.f32 %v6234_v5, %v6233_v52  ;;  %v6304_v36 = vrot.slane %v6303_v12, 4 }
 0x370   : > { %v6236_v59 = vrot.slane %v6235_v56, 2  ;;  %v6305_v60 = vadd.f32 %v6304_v36, %v6303_v12 }
 0x372   : > { %v6237_v55 = vadd.f32 %v6236_v59, %v6235_v56  ;;  %v6306_v46 = vrot.slane %v6305_v60, 2 }
 0x374   : > { %v6238_v33 = vrot.slane %v6237_v55, 1  ;;  %v6307_v43 = vadd.f32 %v6306_v46, %v6305_v60 }
 0x376   : > { %v6239_v2 = vadd.f32 %v6238_v33, %v6237_v55  ;;  %v6308_v40 = vrot.slane %v6307_v43, 1 }
 0x378   : > { %6240 = vst [vmem:[%s339_s11] sm:$0x1] %v6239_v2  ;;  %v6309_v24 = vadd.f32 %v6308_v40, %v6307_v43 }
 0x37a   : > { %6310 = vst [vmem:[%s342_s17] sm:$0x1] %v6309_v24 }
 0x37b PF: > { %s19_s27 = sadd.s32 1, %s9023_s27  }
 0x37c   : > { %p16_p4 = scmp.ge.s32.totalorder %s19_s27, 4  }
 0x37e   :  { %18 = sbr.rel (!%p16_p4) target bundleno = 1 (0x1), region = 101 }

</bundles_post_ra>
